<compile_context>
chip_gen: v6e
topology: v6e:2x2x1
jax: 0.10.0
libtpu: 0.0.40
codegen_flags: <defaults>
</compile_context>

<pallas_src>
import functools
import math

import jax
import jax.numpy as jnp
from jax.experimental import pallas as pl
from jax.experimental.pallas import tpu as pltpu

LANE = 128      # lane width  (last dim)
SUBLANE = 8     # sublane width (second-to-last dim)


def _round_up(x, m):
    return ((x + m - 1) // m) * m


# --------------------------------------------------------------------------
# Fused ConvEncoder kernel: conv3x3+ReLU -> conv3x3+ReLU (one image per step)
#
# The spatially padded image is flattened row-major with padded width
# wp2 = W + 2, so the input row needed by output row o for kernel tap (ky, kx)
# is simply o + (ky * wp2 + kx): each of the 9 taps is ONE contiguous-slice
# matmul over the channel (lane) dim.  Rows with o % wp2 >= W are junk; they
# are masked to zero before re-padding for conv2 and discarded by the wrapper.
# --------------------------------------------------------------------------
def _conv_encoder_kernel(x_ref, mask_ref, w1_ref, b1_ref, w2_ref, b2_ref,
                         o_ref, buf_ref, *, wp2, rows_out):
    cd = w1_ref.dtype
    ep = o_ref.shape[-1]
    shifts = [ky * wp2 + kx for ky in range(3) for kx in range(3)]

    # conv1 + bias + ReLU (bf16 MXU inputs, f32 accumulation)
    acc = jnp.zeros((rows_out, ep), jnp.float32)
    for i, s in enumerate(shifts):
        acc += jnp.dot(x_ref[0, pl.ds(s, rows_out), :].astype(cd), w1_ref[i],
                       preferred_element_type=jnp.float32)
    y1 = jnp.maximum(acc + b1_ref[...], 0.0) * mask_ref[...]

    # re-pad conv1 output for conv2: zero borders, interior at flat row wp2 + 1
    buf_ref[...] = jnp.zeros(buf_ref.shape, buf_ref.dtype)
    buf_ref[pl.ds(wp2 + 1, rows_out), :] = y1

    # conv2 + bias + ReLU
    acc2 = jnp.zeros((rows_out, ep), jnp.float32)
    for i, s in enumerate(shifts):
        acc2 += jnp.dot(buf_ref[pl.ds(s, rows_out), :].astype(cd), w2_ref[i],
                        preferred_element_type=jnp.float32)
    o_ref[0] = jnp.maximum(acc2 + b2_ref[...], 0.0)


# --------------------------------------------------------------------------
# Fully fused TransformerEncoderLayer kernel (one batch element per grid step)
# --------------------------------------------------------------------------
def _layernorm(z, g, b, e_real, eps=1e-5):
    # z has zero padding beyond the real E features, so sums over the full
    # 128-lane tile divided by the real E give exact statistics.
    inv_e = 1.0 / e_real
    mean = jnp.sum(z, axis=-1, keepdims=True) * inv_e
    var = jnp.sum(z * z, axis=-1, keepdims=True) * inv_e - mean * mean
    # gamma/beta are zero in the padded lanes, so the output padding stays 0.
    return (z - mean) * jax.lax.rsqrt(var + eps) * g + b


def _encoder_layer_kernel(x_ref, wqkv_ref, bqkv_ref, wo_ref, bo_ref,
                          g1_ref, be1_ref, w1_ref, b1_ref, w2_ref, b2_ref,
                          g2_ref, be2_ref, o_ref, *, e_real):
    cd = wqkv_ref.dtype
    num_heads = wqkv_ref.shape[1]
    x = x_ref[0]                                    # (S, Ep) f32, zero-padded lanes
    xb = x.astype(cd)

    # --- multi-head self-attention (per-head lane-dense projections) ---
    attn = jnp.zeros(x.shape, jnp.float32)
    for h in range(num_heads):
        q = jnp.dot(xb, wqkv_ref[0, h], preferred_element_type=jnp.float32) + bqkv_ref[0, h]
        k = jnp.dot(xb, wqkv_ref[1, h], preferred_element_type=jnp.float32) + bqkv_ref[1, h]
        v = jnp.dot(xb, wqkv_ref[2, h], preferred_element_type=jnp.float32) + bqkv_ref[2, h]
        # scores: contract the head dim directly (A @ B^T), no transpose materialized
        s = jax.lax.dot_general(q.astype(cd), k.astype(cd),
                                (((1,), (1,)), ((), ())),
                                preferred_element_type=jnp.float32)      # (S, S)
        s = s - jnp.max(s, axis=-1, keepdims=True)
        p = jnp.exp(s)
        p = p * pl.reciprocal(jnp.sum(p, axis=-1, keepdims=True), approx=True)
        ctx = jnp.dot(p.astype(cd), v.astype(cd), preferred_element_type=jnp.float32)
        attn = attn + jnp.dot(ctx.astype(cd), wo_ref[h],
                              preferred_element_type=jnp.float32)
    attn = attn + bo_ref[...]

    # --- residual add + LayerNorm 1 (f32 epilogue) ---
    x1 = _layernorm(x + attn, g1_ref[...], be1_ref[...], e_real)

    # --- FFN: Linear -> ReLU -> Linear (bf16 MXU, f32 accumulation) ---
    hdn = jnp.dot(x1.astype(cd), w1_ref[...], preferred_element_type=jnp.float32) + b1_ref[...]
    hdn = jnp.maximum(hdn, 0.0)
    ff = jnp.dot(hdn.astype(cd), w2_ref[...], preferred_element_type=jnp.float32) + b2_ref[...]

    # --- residual add + LayerNorm 2 (f32 epilogue) ---
    o_ref[0] = _layernorm(x1 + ff, g2_ref[...], be2_ref[...], e_real)


# --------------------------------------------------------------------------
# Fused head kernel: (optional salt decoder) -> sequence mean -> fc
# --------------------------------------------------------------------------
def _head_kernel(x_ref, wsd_ref, bsd_ref, wfc_ref, bfc_ref, o_ref, *, use_salt):
    cd = wfc_ref.dtype
    x = x_ref[0]                                    # (S, Ep) f32
    if use_salt:
        x = jnp.dot(x.astype(cd), wsd_ref[...],
                    preferred_element_type=jnp.float32) + bsd_ref[...]
    pooled = jnp.sum(x, axis=0, keepdims=True) * (1.0 / x.shape[0])     # mean over seq
    o_ref[0] = jnp.dot(pooled.astype(cd), wfc_ref[...],
                       preferred_element_type=jnp.float32) + bfc_ref[...]


# --------------------------------------------------------------------------
# Small generic linear (only used for the rarely exercised salt_layer='input'
# path, which like the PyTorch module requires image width == model_dim).
# --------------------------------------------------------------------------
def _linear_kernel(x_ref, w_ref, b_ref, o_ref):
    o_ref[...] = (jnp.dot(x_ref[...], w_ref[...],
                          preferred_element_type=jnp.float32) + b_ref[...])


def pallas_linear(x, w, b, compute_dtype=jnp.bfloat16):
    """nn.Linear: x (M, K), w (N, K) [PyTorch layout], b (N,) -> (M, N) f32."""
    M, K = x.shape
    N = w.shape[0]
    Mp, Kp, Np = _round_up(M, SUBLANE), _round_up(K, LANE), _round_up(N, LANE)
    xp = jnp.zeros((Mp, Kp), compute_dtype).at[:M, :K].set(x.astype(compute_dtype))
    wp = jnp.zeros((Kp, Np), compute_dtype).at[:K, :N].set(w.T.astype(compute_dtype))
    bp = jnp.zeros((1, Np), jnp.float32).at[0, :N].set(b.astype(jnp.float32))
    out = pl.pallas_call(
        _linear_kernel, out_shape=jax.ShapeDtypeStruct((Mp, Np), jnp.float32),
    )(xp, wp, bp)
    return out[:M, :N]


# --------------------------------------------------------------------------
# Pallas-call wrappers
# --------------------------------------------------------------------------
def _encoder_layer_call(x_seq, lp, *, model_dim):
    B, S, Ep = x_seq.shape
    H = lp["wqkv"].shape[1]
    F = lp["w1"].shape[1]

    def _full(shape):
        return pl.BlockSpec(shape, lambda b: (0,) * len(shape))

    return pl.pallas_call(
        functools.partial(_encoder_layer_kernel, e_real=model_dim),
        out_shape=jax.ShapeDtypeStruct((B, S, Ep), jnp.float32),
        grid_spec=pltpu.PrefetchScalarGridSpec(
            num_scalar_prefetch=0,
            grid=(B,),
            in_specs=[
                pl.BlockSpec((1, S, Ep), lambda b: (b, 0, 0)),
                _full((3, H, Ep, Ep)),            # packed per-head Q/K/V weights
                _full((3, H, 1, Ep)),             # packed per-head Q/K/V biases
                _full((H, Ep, Ep)),               # per-head out-proj weights
                _full((1, Ep)),                   # out-proj bias
                _full((1, Ep)), _full((1, Ep)),   # LayerNorm1 gamma/beta
                _full((Ep, F)), _full((1, F)),    # FFN linear1
                _full((F, Ep)), _full((1, Ep)),   # FFN linear2
                _full((1, Ep)), _full((1, Ep)),   # LayerNorm2 gamma/beta
            ],
            out_specs=pl.BlockSpec((1, S, Ep), lambda b: (b, 0, 0)),
        ),
        # Constant-index weight blocks are re-used across the B grid steps; the
        # pipeline skips the re-copy when the block index is unchanged.
        compiler_params=pltpu.CompilerParams(dimension_semantics=("parallel",)),
    )(x_seq, lp["wqkv"], lp["bqkv"], lp["wo"], lp["bo"],
      lp["ln1_g"], lp["ln1_b"], lp["w1"], lp["b1"], lp["w2"], lp["b2"],
      lp["ln2_g"], lp["ln2_b"])


def _head_call(x_seq, prep, *, use_salt):
    B, S, Ep = x_seq.shape
    Cp = prep["fc_w"].shape[1]
    out = pl.pallas_call(
        functools.partial(_head_kernel, use_salt=use_salt),
        out_shape=jax.ShapeDtypeStruct((B, 1, Cp), jnp.float32),
        grid_spec=pltpu.PrefetchScalarGridSpec(
            num_scalar_prefetch=0,
            grid=(B,),
            in_specs=[
                pl.BlockSpec((1, S, Ep), lambda b: (b, 0, 0)),
                pl.BlockSpec((Ep, Ep), lambda b: (0, 0)),
                pl.BlockSpec((1, Ep), lambda b: (0, 0)),
                pl.BlockSpec((Ep, Cp), lambda b: (0, 0)),
                pl.BlockSpec((1, Cp), lambda b: (0, 0)),
            ],
            out_specs=pl.BlockSpec((1, 1, Cp), lambda b: (b, 0, 0)),
        ),
        compiler_params=pltpu.CompilerParams(dimension_semantics=("parallel",)),
    )(x_seq, prep["salt_dec_w"], prep["salt_dec_b"], prep["fc_w"], prep["fc_b"])
    return out[:, 0, :]


# --------------------------------------------------------------------------
# Full TransformerWithSalt forward (jit-friendly; weights already prepared)
# --------------------------------------------------------------------------
def transformer_with_salt_forward(x, prep, *, model_dim, num_classes,
                                  salt_layer=None):
    if salt_layer == "input":
        # nn.Linear over the trailing dim (requires width == model_dim, as in PyTorch).
        B0, C0, H0, W0 = x.shape
        x = pallas_linear(x.reshape(-1, W0), prep["salt_enc_w"],
                          prep["salt_enc_b"]).reshape(B0, C0, H0, -1)

    B, C, H, W = x.shape
    w1p = prep["conv1_w"]                              # (9, Cp, Ep)
    Cp, Ep = w1p.shape[1], w1p.shape[2]
    wp2 = W + 2
    rows_out = H * wp2
    rows_in = _round_up(rows_out + 2 * wp2 + 2, SUBLANE)

    # NCHW -> spatially padded, channel-last, flattened rows (pure layout work).
    xcl = jnp.transpose(x, (0, 2, 3, 1)).astype(jnp.float32)
    xcl = jnp.pad(xcl, ((0, 0), (1, 1), (1, 1), (0, Cp - C)))
    xflat = xcl.reshape(B, (H + 2) * wp2, Cp)
    xflat = jnp.pad(xflat, ((0, 0), (0, rows_in - (H + 2) * wp2), (0, 0)))

    # Validity mask for the junk rows (w >= W) of the strided row layout.
    col = jax.lax.broadcasted_iota(jnp.int32, (rows_out, Ep), 0) % wp2
    col_mask = (col < W).astype(jnp.float32)

    conv_out = pl.pallas_call(
        functools.partial(_conv_encoder_kernel, wp2=wp2, rows_out=rows_out),
        out_shape=jax.ShapeDtypeStruct((B, rows_out, Ep), jnp.float32),
        grid_spec=pltpu.PrefetchScalarGridSpec(
            num_scalar_prefetch=0,
            grid=(B,),
            in_specs=[
                pl.BlockSpec((1, rows_in, Cp), lambda b: (b, 0, 0)),
                pl.BlockSpec((rows_out, Ep), lambda b: (0, 0)),
                pl.BlockSpec((9, Cp, Ep), lambda b: (0, 0, 0)),
                pl.BlockSpec((1, Ep), lambda b: (0, 0)),
                pl.BlockSpec((9, Ep, Ep), lambda b: (0, 0, 0)),
                pl.BlockSpec((1, Ep), lambda b: (0, 0)),
            ],
            out_specs=pl.BlockSpec((1, rows_out, Ep), lambda b: (b, 0, 0)),
            scratch_shapes=[pltpu.VMEM((rows_in, Ep), jnp.float32)],
        ),
        compiler_params=pltpu.CompilerParams(dimension_semantics=("parallel",)),
    )(xflat, col_mask, w1p, prep["conv1_b"], prep["conv2_w"], prep["conv2_b"])

    # 2x2 max-pool (stride 2): tiny layout/reduction op, stays in the wrapper.
    y = conv_out.reshape(B, H, wp2, Ep)[:, :, :W, :]
    y = y.reshape(B, H // 2, 2, W // 2, 2, Ep).max(axis=(2, 4))
    S = (H // 2) * (W // 2)
    x_seq = y.reshape(B, S, Ep)                        # (B, S, Ep) f32, zero-padded lanes

    for lp in prep["layers"]:
        x_seq = _encoder_layer_call(x_seq, lp, model_dim=model_dim)

    logits = _head_call(x_seq, prep, use_salt=(salt_layer == "output"))
    return logits[:, :num_classes]


# --------------------------------------------------------------------------
# One-time weight preparation OUTSIDE the jitted forward:
#   pad / pre-transpose to lane-dense shapes, split attention heads,
#   fold the 1/sqrt(head_dim) softmax scale into the Q projection, cast the
#   matmul weights to bf16 (biases / LN params stay f32).
# --------------------------------------------------------------------------
def prepare_params(params, *, num_heads, compute_dtype=jnp.bfloat16):
    cd = compute_dtype
    E = params["conv1_w"].shape[0]
    Ep = _round_up(E, LANE)
    Dh = E // num_heads
    scale = 1.0 / math.sqrt(Dh)
    n_cls = params["fc_w"].shape[0]
    Cls_p = _round_up(n_cls, LANE)

    def pad2(w, shape):
        return jnp.zeros(shape, jnp.float32).at[:w.shape[0], :w.shape[1]].set(w)

    def row(v, n):
        return jnp.zeros((1, n), jnp.float32).at[0, :v.shape[0]].set(v)

    def conv_w(w):                                   # (D, Cin, 3, 3) -> (9, Cinp, Ep)
        D, Cin = w.shape[0], w.shape[1]
        Cinp = _round_up(Cin, LANE)
        out = jnp.zeros((9, Cinp, Ep), jnp.float32)
        for ky in range(3):
            for kx in range(3):
                out = out.at[ky * 3 + kx, :Cin, :D].set(w[:, :, ky, kx].T)
        return out.astype(cd)

    prep = {
        "conv1_w": conv_w(params["conv1_w"]),
        "conv1_b": row(params["conv1_b"], Ep),
        "conv2_w": conv_w(params["conv2_w"]),
        "conv2_b": row(params["conv2_b"], Ep),
        "salt_enc_w": params["salt_enc_w"],          # raw; used by pallas_linear path
        "salt_enc_b": params["salt_enc_b"],
        "salt_dec_w": pad2(params["salt_dec_w"].T, (Ep, Ep)).astype(cd),
        "salt_dec_b": row(params["salt_dec_b"], Ep),
        "fc_w": pad2(params["fc_w"].T, (Ep, Cls_p)).astype(cd),
        "fc_b": row(params["fc_b"], Cls_p),
        "layers": [],
    }

    for p in params["layers"]:
        F = p["lin1_w"].shape[0]
        Fp = _round_up(F, LANE)
        wqkv = jnp.zeros((3, num_heads, Ep, Ep), jnp.float32)
        bqkv = jnp.zeros((3, num_heads, 1, Ep), jnp.float32)
        for j in range(3):                           # 0: Q (scaled), 1: K, 2: V
            wj = p["in_proj_w"][j * E:(j + 1) * E]   # (E, E)
            bj = p["in_proj_b"][j * E:(j + 1) * E]   # (E,)
            sc = scale if j == 0 else 1.0
            for h in range(num_heads):
                wqkv = wqkv.at[j, h, :E, :Dh].set(wj[h * Dh:(h + 1) * Dh, :].T * sc)
                bqkv = bqkv.at[j, h, 0, :Dh].set(bj[h * Dh:(h + 1) * Dh] * sc)
        wo = jnp.zeros((num_heads, Ep, Ep), jnp.float32)
        for h in range(num_heads):
            wo = wo.at[h, :Dh, :E].set(p["out_proj_w"][:, h * Dh:(h + 1) * Dh].T)
        prep["layers"].append({
            "wqkv": wqkv.astype(cd),
            "bqkv": bqkv,
            "wo": wo.astype(cd),
            "bo": row(p["out_proj_b"], Ep),
            "ln1_g": row(p["ln1_g"], Ep),
            "ln1_b": row(p["ln1_b"], Ep),
            "w1": pad2(p["lin1_w"].T, (Ep, Fp)).astype(cd),
            "b1": row(p["lin1_b"], Fp),
            "w2": pad2(p["lin2_w"].T, (Fp, Ep)).astype(cd),
            "b2": row(p["lin2_b"], Ep),
            "ln2_g": row(p["ln2_g"], Ep),
            "ln2_b": row(p["ln2_b"], Ep),
        })
    return prep


# --------------------------------------------------------------------------
# Pure-JAX f32 reference (mirrors the PyTorch module, eval mode)
# --------------------------------------------------------------------------
def _ref_linear(x, w, b):
    return x @ w.T + b


def _ref_conv_relu(x, w, b):
    y = jax.lax.conv_general_dilated(
        x, w, window_strides=(1, 1), padding=((1, 1), (1, 1)),
        dimension_numbers=("NCHW", "OIHW", "NCHW"))
    return jax.nn.relu(y + b[None, :, None, None])


def _ref_layernorm(x, g, b, eps=1e-5):
    mean = x.mean(-1, keepdims=True)
    var = ((x - mean) ** 2).mean(-1, keepdims=True)
    return (x - mean) * jax.lax.rsqrt(var + eps) * g + b


def _ref_mha(x, p, num_heads):
    B, S, E = x.shape
    Dh = E // num_heads
    qkv = _ref_linear(x, p["in_proj_w"], p["in_proj_b"])
    q, k, v = jnp.split(qkv, 3, axis=-1)
    heads = lambda t: t.reshape(B, S, num_heads, Dh).transpose(0, 2, 1, 3)
    q, k, v = heads(q), heads(k), heads(v)
    s = jnp.einsum("bhqd,bhkd->bhqk", q, k) / math.sqrt(Dh)
    a = jax.nn.softmax(s, axis=-1)
    o = jnp.einsum("bhqk,bhkd->bhqd", a, v).transpose(0, 2, 1, 3).reshape(B, S, E)
    return _ref_linear(o, p["out_proj_w"], p["out_proj_b"])


def reference_forward(x, params, *, num_heads, salt_layer=None):
    if salt_layer == "input":
        x = _ref_linear(x, params["salt_enc_w"], params["salt_enc_b"])
    x = _ref_conv_relu(x, params["conv1_w"], params["conv1_b"])
    x = _ref_conv_relu(x, params["conv2_w"], params["conv2_b"])
    x = jax.lax.reduce_window(x, -jnp.inf, jax.lax.max,
                              (1, 1, 2, 2), (1, 1, 2, 2), "VALID")
    B, E, Hp, Wp = x.shape
    x = x.reshape(B, E, Hp * Wp).transpose(0, 2, 1)
    for p in params["layers"]:
        a = _ref_mha(x, p, num_heads)
        x = _ref_layernorm(x + a, p["ln1_g"], p["ln1_b"])
        f = _ref_linear(jax.nn.relu(_ref_linear(x, p["lin1_w"], p["lin1_b"])),
                        p["lin2_w"], p["lin2_b"])
        x = _ref_layernorm(x + f, p["ln2_g"], p["ln2_b"])
    if salt_layer == "output":
        x = _ref_linear(x, params["salt_dec_w"], params["salt_dec_b"])
    return _ref_linear(x.mean(axis=1), params["fc_w"], params["fc_b"])


# --------------------------------------------------------------------------
# Deterministic parameter init (PyTorch-style uniform(-1/sqrt(fan_in), ...))
# --------------------------------------------------------------------------
def init_params(key, *, input_channels, model_dim, num_heads, num_layers,
                num_classes, dim_feedforward=2048):
    def uni(k, shape, fan_in):
        bound = 1.0 / math.sqrt(fan_in)
        return jax.random.uniform(k, shape, minval=-bound, maxval=bound,
                                  dtype=jnp.float32)

    keys = iter(jax.random.split(key, 64))
    E = model_dim
    params = {
        "conv1_w": uni(next(keys), (E, input_channels, 3, 3), input_channels * 9),
        "conv1_b": uni(next(keys), (E,), input_channels * 9),
        "conv2_w": uni(next(keys), (E, E, 3, 3), E * 9),
        "conv2_b": uni(next(keys), (E,), E * 9),
        "fc_w": uni(next(keys), (num_classes, E), E),
        "fc_b": uni(next(keys), (num_classes,), E),
        "salt_enc_w": uni(next(keys), (E, E), E),
        "salt_enc_b": uni(next(keys), (E,), E),
        "salt_dec_w": uni(next(keys), (E, E), E),
        "salt_dec_b": uni(next(keys), (E,), E),
        "layers": [],
    }
    for _ in range(num_layers):
        params["layers"].append({
            "in_proj_w": uni(next(keys), (3 * E, E), E),
            "in_proj_b": uni(next(keys), (3 * E,), E),
            "out_proj_w": uni(next(keys), (E, E), E),
            "out_proj_b": uni(next(keys), (E,), E),
            "lin1_w": uni(next(keys), (dim_feedforward, E), E),
            "lin1_b": uni(next(keys), (dim_feedforward,), E),
            "lin2_w": uni(next(keys), (E, dim_feedforward), dim_feedforward),
            "lin2_b": uni(next(keys), (E,), dim_feedforward),
            "ln1_g": jnp.ones((E,), jnp.float32),
            "ln1_b": jnp.zeros((E,), jnp.float32),
            "ln2_g": jnp.ones((E,), jnp.float32),
            "ln2_b": jnp.zeros((E,), jnp.float32),
        })
    return params


if __name__ == "__main__":
    # Small shapes consistent with the module:
    # batch=2, input_channels=4, 16x16 images, model_dim=32, 4 heads, 2 layers.
    batch, input_channels, H, W = 2, 4, 16, 16
    model_dim, num_heads, num_layers, num_classes = 32, 4, 2, 10
    salt_layer = "output"   # exercises SaltDecoder; None / "input" also supported

    key = jax.random.PRNGKey(0)
    kx, kp = jax.random.split(key)
    x = jax.random.normal(kx, (batch, input_channels, H, W), dtype=jnp.float32)
    params = init_params(kp, input_channels=input_channels, model_dim=model_dim,
                         num_heads=num_heads, num_layers=num_layers,
                         num_classes=num_classes)

    # One-time weight prep (pad / transpose / split heads / fold softmax scale),
    # done OUTSIDE the jitted forward.  bf16 MXU inputs on all generations.
    prep = prepare_params(params, num_heads=num_heads,
                          compute_dtype=jnp.bfloat16)

    fwd = jax.jit(functools.partial(transformer_with_salt_forward,
                                    model_dim=model_dim,
                                    num_classes=num_classes,
                                    salt_layer=salt_layer))
    y = fwd(x, prep)
    jax.block_until_ready(y)

    y_ref = reference_forward(x, params, num_heads=num_heads,
                              salt_layer=salt_layer)
    assert y.shape == (batch, num_classes)
    # bf16 MXU inputs with f32 accumulation / f32 epilogues: slightly wider
    # tolerance than a pure-f32 comparison.
    assert jnp.allclose(y, y_ref, atol=3e-2, rtol=3e-2), \
        float(jnp.max(jnp.abs(y - y_ref)))

    print("KERNEL_OK")
</pallas_src>

<mosaic_0001>
module attributes {stable_mosaic.version = 11 : i64} {
  func.func @_conv_encoder_kernel(%arg0: i32, %arg1: memref<1x328x128xf32, #tpu.memory_space<vmem>>, %arg2: memref<288x128xf32, #tpu.memory_space<vmem>>, %arg3: memref<9x128x128xbf16, #tpu.memory_space<vmem>>, %arg4: memref<1x128xf32, #tpu.memory_space<vmem>>, %arg5: memref<9x128x128xbf16, #tpu.memory_space<vmem>>, %arg6: memref<1x128xf32, #tpu.memory_space<vmem>>, %arg7: memref<1x288x128xf32, #tpu.memory_space<vmem>>, %arg8: memref<328x128xf32, #tpu.memory_space<vmem>>) attributes {dimension_semantics = [#tpu.dimension_semantics<parallel>], iteration_bounds = array<i64: 2>, scalar_prefetch = 0 : i64, scratch_operands = 1 : i64, tpu.core_type = #tpu.core_type<tc>, window_params = [{transform_indices = @transform_0, window_bounds = array<i64: 1, 328, 128>}, {pipeline_mode = #tpu.pipeline_mode<synchronous>, transform_indices = @transform_1, window_bounds = array<i64: 288, 128>}, {pipeline_mode = #tpu.pipeline_mode<synchronous>, transform_indices = @transform_2, window_bounds = array<i64: 9, 128, 128>}, {pipeline_mode = #tpu.pipeline_mode<synchronous>, transform_indices = @transform_3, window_bounds = array<i64: 1, 128>}, {pipeline_mode = #tpu.pipeline_mode<synchronous>, transform_indices = @transform_4, window_bounds = array<i64: 9, 128, 128>}, {pipeline_mode = #tpu.pipeline_mode<synchronous>, transform_indices = @transform_5, window_bounds = array<i64: 1, 128>}, {transform_indices = @transform_6, window_bounds = array<i64: 1, 288, 128>}]} {
    %cst = arith.constant 0.000000e+00 : f32
    %0 = vector.broadcast %cst : f32 to vector<288x128xf32>
    %c0 = arith.constant 0 : index
    %c0_0 = arith.constant 0 : index
    %c0_1 = arith.constant 0 : index
    %1 = vector.load %arg1[%c0, %c0_0, %c0_1] : memref<1x328x128xf32, #tpu.memory_space<vmem>>, vector<1x288x128xf32>
    %2 = vector.shape_cast %1 : vector<1x288x128xf32> to vector<288x128xf32>
    %3 = arith.truncf %2 : vector<288x128xf32> to vector<288x128xbf16>
    %c0_2 = arith.constant 0 : index
    %c0_3 = arith.constant 0 : index
    %c0_4 = arith.constant 0 : index
    %4 = vector.load %arg3[%c0_2, %c0_3, %c0_4] : memref<9x128x128xbf16, #tpu.memory_space<vmem>>, vector<1x128x128xbf16>
    %5 = vector.shape_cast %4 : vector<1x128x128xbf16> to vector<128x128xbf16>
    %cst_5 = arith.constant dense<0.000000e+00> : vector<288x128xf32>
    %6 = tpu.matmul %3, %5, %cst_5 {dimension_numbers = #tpu.dot_dimension_numbers<[1], [0], [0], [1], [0, 0, 1, 1], [], []>} : vector<288x128xbf16>, vector<128x128xbf16>, vector<288x128xf32> -> vector<288x128xf32>
    %7 = arith.addf %0, %6 : vector<288x128xf32>
    %c0_6 = arith.constant 0 : index
    %c1 = arith.constant 1 : index
    %c0_7 = arith.constant 0 : index
    %8 = vector.load %arg1[%c0_6, %c1, %c0_7] : memref<1x328x128xf32, #tpu.memory_space<vmem>>, vector<1x288x128xf32>
    %9 = vector.shape_cast %8 : vector<1x288x128xf32> to vector<288x128xf32>
    %10 = arith.truncf %9 : vector<288x128xf32> to vector<288x128xbf16>
    %c1_8 = arith.constant 1 : index
    %c0_9 = arith.constant 0 : index
    %c0_10 = arith.constant 0 : index
    %11 = vector.load %arg3[%c1_8, %c0_9, %c0_10] : memref<9x128x128xbf16, #tpu.memory_space<vmem>>, vector<1x128x128xbf16>
    %12 = vector.shape_cast %11 : vector<1x128x128xbf16> to vector<128x128xbf16>
    %cst_11 = arith.constant dense<0.000000e+00> : vector<288x128xf32>
    %13 = tpu.matmul %10, %12, %cst_11 {dimension_numbers = #tpu.dot_dimension_numbers<[1], [0], [0], [1], [0, 0, 1, 1], [], []>} : vector<288x128xbf16>, vector<128x128xbf16>, vector<288x128xf32> -> vector<288x128xf32>
    %14 = arith.addf %7, %13 : vector<288x128xf32>
    %c0_12 = arith.constant 0 : index
    %c2 = arith.constant 2 : index
    %c0_13 = arith.constant 0 : index
    %15 = vector.load %arg1[%c0_12, %c2, %c0_13] : memref<1x328x128xf32, #tpu.memory_space<vmem>>, vector<1x288x128xf32>
    %16 = vector.shape_cast %15 : vector<1x288x128xf32> to vector<288x128xf32>
    %17 = arith.truncf %16 : vector<288x128xf32> to vector<288x128xbf16>
    %c2_14 = arith.constant 2 : index
    %c0_15 = arith.constant 0 : index
    %c0_16 = arith.constant 0 : index
    %18 = vector.load %arg3[%c2_14, %c0_15, %c0_16] : memref<9x128x128xbf16, #tpu.memory_space<vmem>>, vector<1x128x128xbf16>
    %19 = vector.shape_cast %18 : vector<1x128x128xbf16> to vector<128x128xbf16>
    %cst_17 = arith.constant dense<0.000000e+00> : vector<288x128xf32>
    %20 = tpu.matmul %17, %19, %cst_17 {dimension_numbers = #tpu.dot_dimension_numbers<[1], [0], [0], [1], [0, 0, 1, 1], [], []>} : vector<288x128xbf16>, vector<128x128xbf16>, vector<288x128xf32> -> vector<288x128xf32>
    %21 = arith.addf %14, %20 : vector<288x128xf32>
    %c0_18 = arith.constant 0 : index
    %c18 = arith.constant 18 : index
    %c0_19 = arith.constant 0 : index
    %22 = vector.load %arg1[%c0_18, %c18, %c0_19] : memref<1x328x128xf32, #tpu.memory_space<vmem>>, vector<1x288x128xf32>
    %23 = vector.shape_cast %22 : vector<1x288x128xf32> to vector<288x128xf32>
    %24 = arith.truncf %23 : vector<288x128xf32> to vector<288x128xbf16>
    %c3 = arith.constant 3 : index
    %c0_20 = arith.constant 0 : index
    %c0_21 = arith.constant 0 : index
    %25 = vector.load %arg3[%c3, %c0_20, %c0_21] : memref<9x128x128xbf16, #tpu.memory_space<vmem>>, vector<1x128x128xbf16>
    %26 = vector.shape_cast %25 : vector<1x128x128xbf16> to vector<128x128xbf16>
    %cst_22 = arith.constant dense<0.000000e+00> : vector<288x128xf32>
    %27 = tpu.matmul %24, %26, %cst_22 {dimension_numbers = #tpu.dot_dimension_numbers<[1], [0], [0], [1], [0, 0, 1, 1], [], []>} : vector<288x128xbf16>, vector<128x128xbf16>, vector<288x128xf32> -> vector<288x128xf32>
    %28 = arith.addf %21, %27 : vector<288x128xf32>
    %c0_23 = arith.constant 0 : index
    %c19 = arith.constant 19 : index
    %c0_24 = arith.constant 0 : index
    %29 = vector.load %arg1[%c0_23, %c19, %c0_24] : memref<1x328x128xf32, #tpu.memory_space<vmem>>, vector<1x288x128xf32>
    %30 = vector.shape_cast %29 : vector<1x288x128xf32> to vector<288x128xf32>
    %31 = arith.truncf %30 : vector<288x128xf32> to vector<288x128xbf16>
    %c4 = arith.constant 4 : index
    %c0_25 = arith.constant 0 : index
    %c0_26 = arith.constant 0 : index
    %32 = vector.load %arg3[%c4, %c0_25, %c0_26] : memref<9x128x128xbf16, #tpu.memory_space<vmem>>, vector<1x128x128xbf16>
    %33 = vector.shape_cast %32 : vector<1x128x128xbf16> to vector<128x128xbf16>
    %cst_27 = arith.constant dense<0.000000e+00> : vector<288x128xf32>
    %34 = tpu.matmul %31, %33, %cst_27 {dimension_numbers = #tpu.dot_dimension_numbers<[1], [0], [0], [1], [0, 0, 1, 1], [], []>} : vector<288x128xbf16>, vector<128x128xbf16>, vector<288x128xf32> -> vector<288x128xf32>
    %35 = arith.addf %28, %34 : vector<288x128xf32>
    %c0_28 = arith.constant 0 : index
    %c20 = arith.constant 20 : index
    %c0_29 = arith.constant 0 : index
    %36 = vector.load %arg1[%c0_28, %c20, %c0_29] : memref<1x328x128xf32, #tpu.memory_space<vmem>>, vector<1x288x128xf32>
    %37 = vector.shape_cast %36 : vector<1x288x128xf32> to vector<288x128xf32>
    %38 = arith.truncf %37 : vector<288x128xf32> to vector<288x128xbf16>
    %c5 = arith.constant 5 : index
    %c0_30 = arith.constant 0 : index
    %c0_31 = arith.constant 0 : index
    %39 = vector.load %arg3[%c5, %c0_30, %c0_31] : memref<9x128x128xbf16, #tpu.memory_space<vmem>>, vector<1x128x128xbf16>
    %40 = vector.shape_cast %39 : vector<1x128x128xbf16> to vector<128x128xbf16>
    %cst_32 = arith.constant dense<0.000000e+00> : vector<288x128xf32>
    %41 = tpu.matmul %38, %40, %cst_32 {dimension_numbers = #tpu.dot_dimension_numbers<[1], [0], [0], [1], [0, 0, 1, 1], [], []>} : vector<288x128xbf16>, vector<128x128xbf16>, vector<288x128xf32> -> vector<288x128xf32>
    %42 = arith.addf %35, %41 : vector<288x128xf32>
    %c0_33 = arith.constant 0 : index
    %c36 = arith.constant 36 : index
    %c0_34 = arith.constant 0 : index
    %43 = vector.load %arg1[%c0_33, %c36, %c0_34] : memref<1x328x128xf32, #tpu.memory_space<vmem>>, vector<1x288x128xf32>
    %44 = vector.shape_cast %43 : vector<1x288x128xf32> to vector<288x128xf32>
    %45 = arith.truncf %44 : vector<288x128xf32> to vector<288x128xbf16>
    %c6 = arith.constant 6 : index
    %c0_35 = arith.constant 0 : index
    %c0_36 = arith.constant 0 : index
    %46 = vector.load %arg3[%c6, %c0_35, %c0_36] : memref<9x128x128xbf16, #tpu.memory_space<vmem>>, vector<1x128x128xbf16>
    %47 = vector.shape_cast %46 : vector<1x128x128xbf16> to vector<128x128xbf16>
    %cst_37 = arith.constant dense<0.000000e+00> : vector<288x128xf32>
    %48 = tpu.matmul %45, %47, %cst_37 {dimension_numbers = #tpu.dot_dimension_numbers<[1], [0], [0], [1], [0, 0, 1, 1], [], []>} : vector<288x128xbf16>, vector<128x128xbf16>, vector<288x128xf32> -> vector<288x128xf32>
    %49 = arith.addf %42, %48 : vector<288x128xf32>
    %c0_38 = arith.constant 0 : index
    %c37 = arith.constant 37 : index
    %c0_39 = arith.constant 0 : index
    %50 = vector.load %arg1[%c0_38, %c37, %c0_39] : memref<1x328x128xf32, #tpu.memory_space<vmem>>, vector<1x288x128xf32>
    %51 = vector.shape_cast %50 : vector<1x288x128xf32> to vector<288x128xf32>
    %52 = arith.truncf %51 : vector<288x128xf32> to vector<288x128xbf16>
    %c7 = arith.constant 7 : index
    %c0_40 = arith.constant 0 : index
    %c0_41 = arith.constant 0 : index
    %53 = vector.load %arg3[%c7, %c0_40, %c0_41] : memref<9x128x128xbf16, #tpu.memory_space<vmem>>, vector<1x128x128xbf16>
    %54 = vector.shape_cast %53 : vector<1x128x128xbf16> to vector<128x128xbf16>
    %cst_42 = arith.constant dense<0.000000e+00> : vector<288x128xf32>
    %55 = tpu.matmul %52, %54, %cst_42 {dimension_numbers = #tpu.dot_dimension_numbers<[1], [0], [0], [1], [0, 0, 1, 1], [], []>} : vector<288x128xbf16>, vector<128x128xbf16>, vector<288x128xf32> -> vector<288x128xf32>
    %56 = arith.addf %49, %55 : vector<288x128xf32>
    %c0_43 = arith.constant 0 : index
    %c38 = arith.constant 38 : index
    %c0_44 = arith.constant 0 : index
    %57 = vector.load %arg1[%c0_43, %c38, %c0_44] : memref<1x328x128xf32, #tpu.memory_space<vmem>>, vector<1x288x128xf32>
    %58 = vector.shape_cast %57 : vector<1x288x128xf32> to vector<288x128xf32>
    %59 = arith.truncf %58 : vector<288x128xf32> to vector<288x128xbf16>
    %c8 = arith.constant 8 : index
    %c0_45 = arith.constant 0 : index
    %c0_46 = arith.constant 0 : index
    %60 = vector.load %arg3[%c8, %c0_45, %c0_46] : memref<9x128x128xbf16, #tpu.memory_space<vmem>>, vector<1x128x128xbf16>
    %61 = vector.shape_cast %60 : vector<1x128x128xbf16> to vector<128x128xbf16>
    %cst_47 = arith.constant dense<0.000000e+00> : vector<288x128xf32>
    %62 = tpu.matmul %59, %61, %cst_47 {dimension_numbers = #tpu.dot_dimension_numbers<[1], [0], [0], [1], [0, 0, 1, 1], [], []>} : vector<288x128xbf16>, vector<128x128xbf16>, vector<288x128xf32> -> vector<288x128xf32>
    %63 = arith.addf %56, %62 : vector<288x128xf32>
    %c0_48 = arith.constant 0 : index
    %c0_49 = arith.constant 0 : index
    %64 = vector.load %arg4[%c0_48, %c0_49] : memref<1x128xf32, #tpu.memory_space<vmem>>, vector<1x128xf32>
    %65 = vector.broadcast %64 : vector<1x128xf32> to vector<288x128xf32>
    %66 = arith.addf %63, %65 : vector<288x128xf32>
    %cst_50 = arith.constant 0.000000e+00 : f32
    %67 = vector.broadcast %cst_50 : f32 to vector<288x128xf32>
    %68 = arith.maximumf %66, %67 : vector<288x128xf32>
    %c0_51 = arith.constant 0 : index
    %c0_52 = arith.constant 0 : index
    %69 = vector.load %arg2[%c0_51, %c0_52] : memref<288x128xf32, #tpu.memory_space<vmem>>, vector<288x128xf32>
    %70 = arith.mulf %68, %69 : vector<288x128xf32>
    %cst_53 = arith.constant 0.000000e+00 : f32
    %71 = vector.broadcast %cst_53 : f32 to vector<328x128xf32>
    %c0_54 = arith.constant 0 : index
    %c0_55 = arith.constant 0 : index
    %72 = vector.load %arg8[%c0_54, %c0_55] : memref<328x128xf32, #tpu.memory_space<vmem>>, vector<328x128xf32>
    tpu.vector_store %arg8[%c0_54, %c0_55], %71 {strides = array<i32>} : memref<328x128xf32, #tpu.memory_space<vmem>>, vector<328x128xf32>,
    %c19_56 = arith.constant 19 : index
    %c0_57 = arith.constant 0 : index
    %73 = vector.load %arg8[%c19_56, %c0_57] : memref<328x128xf32, #tpu.memory_space<vmem>>, vector<288x128xf32>
    tpu.vector_store %arg8[%c19_56, %c0_57], %70 {strides = array<i32>} : memref<328x128xf32, #tpu.memory_space<vmem>>, vector<288x128xf32>,
    %cst_58 = arith.constant 0.000000e+00 : f32
    %74 = vector.broadcast %cst_58 : f32 to vector<288x128xf32>
    %c0_59 = arith.constant 0 : index
    %c0_60 = arith.constant 0 : index
    %75 = vector.load %arg8[%c0_59, %c0_60] : memref<328x128xf32, #tpu.memory_space<vmem>>, vector<288x128xf32>
    %76 = arith.truncf %75 : vector<288x128xf32> to vector<288x128xbf16>
    %c0_61 = arith.constant 0 : index
    %c0_62 = arith.constant 0 : index
    %c0_63 = arith.constant 0 : index
    %77 = vector.load %arg5[%c0_61, %c0_62, %c0_63] : memref<9x128x128xbf16, #tpu.memory_space<vmem>>, vector<1x128x128xbf16>
    %78 = vector.shape_cast %77 : vector<1x128x128xbf16> to vector<128x128xbf16>
    %cst_64 = arith.constant dense<0.000000e+00> : vector<288x128xf32>
    %79 = tpu.matmul %76, %78, %cst_64 {dimension_numbers = #tpu.dot_dimension_numbers<[1], [0], [0], [1], [0, 0, 1, 1], [], []>} : vector<288x128xbf16>, vector<128x128xbf16>, vector<288x128xf32> -> vector<288x128xf32>
    %80 = arith.addf %74, %79 : vector<288x128xf32>
    %c1_65 = arith.constant 1 : index
    %c0_66 = arith.constant 0 : index
    %81 = vector.load %arg8[%c1_65, %c0_66] : memref<328x128xf32, #tpu.memory_space<vmem>>, vector<288x128xf32>
    %82 = arith.truncf %81 : vector<288x128xf32> to vector<288x128xbf16>
    %c1_67 = arith.constant 1 : index
    %c0_68 = arith.constant 0 : index
    %c0_69 = arith.constant 0 : index
    %83 = vector.load %arg5[%c1_67, %c0_68, %c0_69] : memref<9x128x128xbf16, #tpu.memory_space<vmem>>, vector<1x128x128xbf16>
    %84 = vector.shape_cast %83 : vector<1x128x128xbf16> to vector<128x128xbf16>
    %cst_70 = arith.constant dense<0.000000e+00> : vector<288x128xf32>
    %85 = tpu.matmul %82, %84, %cst_70 {dimension_numbers = #tpu.dot_dimension_numbers<[1], [0], [0], [1], [0, 0, 1, 1], [], []>} : vector<288x128xbf16>, vector<128x128xbf16>, vector<288x128xf32> -> vector<288x128xf32>
    %86 = arith.addf %80, %85 : vector<288x128xf32>
    %c2_71 = arith.constant 2 : index
    %c0_72 = arith.constant 0 : index
    %87 = vector.load %arg8[%c2_71, %c0_72] : memref<328x128xf32, #tpu.memory_space<vmem>>, vector<288x128xf32>
    %88 = arith.truncf %87 : vector<288x128xf32> to vector<288x128xbf16>
    %c2_73 = arith.constant 2 : index
    %c0_74 = arith.constant 0 : index
    %c0_75 = arith.constant 0 : index
    %89 = vector.load %arg5[%c2_73, %c0_74, %c0_75] : memref<9x128x128xbf16, #tpu.memory_space<vmem>>, vector<1x128x128xbf16>
    %90 = vector.shape_cast %89 : vector<1x128x128xbf16> to vector<128x128xbf16>
    %cst_76 = arith.constant dense<0.000000e+00> : vector<288x128xf32>
    %91 = tpu.matmul %88, %90, %cst_76 {dimension_numbers = #tpu.dot_dimension_numbers<[1], [0], [0], [1], [0, 0, 1, 1], [], []>} : vector<288x128xbf16>, vector<128x128xbf16>, vector<288x128xf32> -> vector<288x128xf32>
    %92 = arith.addf %86, %91 : vector<288x128xf32>
    %c18_77 = arith.constant 18 : index
    %c0_78 = arith.constant 0 : index
    %93 = vector.load %arg8[%c18_77, %c0_78] : memref<328x128xf32, #tpu.memory_space<vmem>>, vector<288x128xf32>
    %94 = arith.truncf %93 : vector<288x128xf32> to vector<288x128xbf16>
    %c3_79 = arith.constant 3 : index
    %c0_80 = arith.constant 0 : index
    %c0_81 = arith.constant 0 : index
    %95 = vector.load %arg5[%c3_79, %c0_80, %c0_81] : memref<9x128x128xbf16, #tpu.memory_space<vmem>>, vector<1x128x128xbf16>
    %96 = vector.shape_cast %95 : vector<1x128x128xbf16> to vector<128x128xbf16>
    %cst_82 = arith.constant dense<0.000000e+00> : vector<288x128xf32>
    %97 = tpu.matmul %94, %96, %cst_82 {dimension_numbers = #tpu.dot_dimension_numbers<[1], [0], [0], [1], [0, 0, 1, 1], [], []>} : vector<288x128xbf16>, vector<128x128xbf16>, vector<288x128xf32> -> vector<288x128xf32>
    %98 = arith.addf %92, %97 : vector<288x128xf32>
    %c19_83 = arith.constant 19 : index
    %c0_84 = arith.constant 0 : index
    %99 = vector.load %arg8[%c19_83, %c0_84] : memref<328x128xf32, #tpu.memory_space<vmem>>, vector<288x128xf32>
    %100 = arith.truncf %99 : vector<288x128xf32> to vector<288x128xbf16>
    %c4_85 = arith.constant 4 : index
    %c0_86 = arith.constant 0 : index
    %c0_87 = arith.constant 0 : index
    %101 = vector.load %arg5[%c4_85, %c0_86, %c0_87] : memref<9x128x128xbf16, #tpu.memory_space<vmem>>, vector<1x128x128xbf16>
    %102 = vector.shape_cast %101 : vector<1x128x128xbf16> to vector<128x128xbf16>
    %cst_88 = arith.constant dense<0.000000e+00> : vector<288x128xf32>
    %103 = tpu.matmul %100, %102, %cst_88 {dimension_numbers = #tpu.dot_dimension_numbers<[1], [0], [0], [1], [0, 0, 1, 1], [], []>} : vector<288x128xbf16>, vector<128x128xbf16>, vector<288x128xf32> -> vector<288x128xf32>
    %104 = arith.addf %98, %103 : vector<288x128xf32>
    %c20_89 = arith.constant 20 : index
    %c0_90 = arith.constant 0 : index
    %105 = vector.load %arg8[%c20_89, %c0_90] : memref<328x128xf32, #tpu.memory_space<vmem>>, vector<288x128xf32>
    %106 = arith.truncf %105 : vector<288x128xf32> to vector<288x128xbf16>
    %c5_91 = arith.constant 5 : index
    %c0_92 = arith.constant 0 : index
    %c0_93 = arith.constant 0 : index
    %107 = vector.load %arg5[%c5_91, %c0_92, %c0_93] : memref<9x128x128xbf16, #tpu.memory_space<vmem>>, vector<1x128x128xbf16>
    %108 = vector.shape_cast %107 : vector<1x128x128xbf16> to vector<128x128xbf16>
    %cst_94 = arith.constant dense<0.000000e+00> : vector<288x128xf32>
    %109 = tpu.matmul %106, %108, %cst_94 {dimension_numbers = #tpu.dot_dimension_numbers<[1], [0], [0], [1], [0, 0, 1, 1], [], []>} : vector<288x128xbf16>, vector<128x128xbf16>, vector<288x128xf32> -> vector<288x128xf32>
    %110 = arith.addf %104, %109 : vector<288x128xf32>
    %c36_95 = arith.constant 36 : index
    %c0_96 = arith.constant 0 : index
    %111 = vector.load %arg8[%c36_95, %c0_96] : memref<328x128xf32, #tpu.memory_space<vmem>>, vector<288x128xf32>
    %112 = arith.truncf %111 : vector<288x128xf32> to vector<288x128xbf16>
    %c6_97 = arith.constant 6 : index
    %c0_98 = arith.constant 0 : index
    %c0_99 = arith.constant 0 : index
    %113 = vector.load %arg5[%c6_97, %c0_98, %c0_99] : memref<9x128x128xbf16, #tpu.memory_space<vmem>>, vector<1x128x128xbf16>
    %114 = vector.shape_cast %113 : vector<1x128x128xbf16> to vector<128x128xbf16>
    %cst_100 = arith.constant dense<0.000000e+00> : vector<288x128xf32>
    %115 = tpu.matmul %112, %114, %cst_100 {dimension_numbers = #tpu.dot_dimension_numbers<[1], [0], [0], [1], [0, 0, 1, 1], [], []>} : vector<288x128xbf16>, vector<128x128xbf16>, vector<288x128xf32> -> vector<288x128xf32>
    %116 = arith.addf %110, %115 : vector<288x128xf32>
    %c37_101 = arith.constant 37 : index
    %c0_102 = arith.constant 0 : index
    %117 = vector.load %arg8[%c37_101, %c0_102] : memref<328x128xf32, #tpu.memory_space<vmem>>, vector<288x128xf32>
    %118 = arith.truncf %117 : vector<288x128xf32> to vector<288x128xbf16>
    %c7_103 = arith.constant 7 : index
    %c0_104 = arith.constant 0 : index
    %c0_105 = arith.constant 0 : index
    %119 = vector.load %arg5[%c7_103, %c0_104, %c0_105] : memref<9x128x128xbf16, #tpu.memory_space<vmem>>, vector<1x128x128xbf16>
    %120 = vector.shape_cast %119 : vector<1x128x128xbf16> to vector<128x128xbf16>
    %cst_106 = arith.constant dense<0.000000e+00> : vector<288x128xf32>
    %121 = tpu.matmul %118, %120, %cst_106 {dimension_numbers = #tpu.dot_dimension_numbers<[1], [0], [0], [1], [0, 0, 1, 1], [], []>} : vector<288x128xbf16>, vector<128x128xbf16>, vector<288x128xf32> -> vector<288x128xf32>
    %122 = arith.addf %116, %121 : vector<288x128xf32>
    %c38_107 = arith.constant 38 : index
    %c0_108 = arith.constant 0 : index
    %123 = vector.load %arg8[%c38_107, %c0_108] : memref<328x128xf32, #tpu.memory_space<vmem>>, vector<288x128xf32>
    %124 = arith.truncf %123 : vector<288x128xf32> to vector<288x128xbf16>
    %c8_109 = arith.constant 8 : index
    %c0_110 = arith.constant 0 : index
    %c0_111 = arith.constant 0 : index
    %125 = vector.load %arg5[%c8_109, %c0_110, %c0_111] : memref<9x128x128xbf16, #tpu.memory_space<vmem>>, vector<1x128x128xbf16>
    %126 = vector.shape_cast %125 : vector<1x128x128xbf16> to vector<128x128xbf16>
    %cst_112 = arith.constant dense<0.000000e+00> : vector<288x128xf32>
    %127 = tpu.matmul %124, %126, %cst_112 {dimension_numbers = #tpu.dot_dimension_numbers<[1], [0], [0], [1], [0, 0, 1, 1], [], []>} : vector<288x128xbf16>, vector<128x128xbf16>, vector<288x128xf32> -> vector<288x128xf32>
    %128 = arith.addf %122, %127 : vector<288x128xf32>
    %c0_113 = arith.constant 0 : index
    %c0_114 = arith.constant 0 : index
    %129 = vector.load %arg6[%c0_113, %c0_114] : memref<1x128xf32, #tpu.memory_space<vmem>>, vector<1x128xf32>
    %130 = vector.broadcast %129 : vector<1x128xf32> to vector<288x128xf32>
    %131 = arith.addf %128, %130 : vector<288x128xf32>
    %cst_115 = arith.constant 0.000000e+00 : f32
    %132 = vector.broadcast %cst_115 : f32 to vector<288x128xf32>
    %133 = arith.maximumf %131, %132 : vector<288x128xf32>
    %c0_116 = arith.constant 0 : index
    %c0_117 = arith.constant 0 : index
    %c0_118 = arith.constant 0 : index
    %134 = vector.load %arg7[%c0_116, %c0_117, %c0_118] : memref<1x288x128xf32, #tpu.memory_space<vmem>>, vector<1x288x128xf32>
    %135 = vector.shape_cast %134 : vector<1x288x128xf32> to vector<288x128xf32>
    %136 = vector.shape_cast %133 : vector<288x128xf32> to vector<1x288x128xf32>
    tpu.vector_store %arg7[%c0_116, %c0_117, %c0_118], %136 {strides = array<i32>} : memref<1x288x128xf32, #tpu.memory_space<vmem>>, vector<1x288x128xf32>,
    return
  }
  func.func @transform_0(%arg0: i32) -> (i32, i32, i32) {
    %c0_i32 = arith.constant 0 : i32
    %c0_i32_0 = arith.constant 0 : i32
    %c0_i32_1 = arith.constant 0 : i32
    return %arg0, %c0_i32, %c0_i32_0 : i32, i32, i32
  }
  func.func @transform_1(%arg0: i32) -> (i32, i32) {
    %c0_i32 = arith.constant 0 : i32
    %c0_i32_0 = arith.constant 0 : i32
    %c0_i32_1 = arith.constant 0 : i32
    return %c0_i32, %c0_i32_0 : i32, i32
  }
  func.func @transform_2(%arg0: i32) -> (i32, i32, i32) {
    %c0_i32 = arith.constant 0 : i32
    %c0_i32_0 = arith.constant 0 : i32
    %c0_i32_1 = arith.constant 0 : i32
    %c0_i32_2 = arith.constant 0 : i32
    return %c0_i32, %c0_i32_0, %c0_i32_1 : i32, i32, i32
  }
  func.func @transform_3(%arg0: i32) -> (i32, i32) {
    %c0_i32 = arith.constant 0 : i32
    %c0_i32_0 = arith.constant 0 : i32
    %c0_i32_1 = arith.constant 0 : i32
    return %c0_i32, %c0_i32_0 : i32, i32
  }
  func.func @transform_4(%arg0: i32) -> (i32, i32, i32) {
    %c0_i32 = arith.constant 0 : i32
    %c0_i32_0 = arith.constant 0 : i32
    %c0_i32_1 = arith.constant 0 : i32
    %c0_i32_2 = arith.constant 0 : i32
    return %c0_i32, %c0_i32_0, %c0_i32_1 : i32, i32, i32
  }
  func.func @transform_5(%arg0: i32) -> (i32, i32) {
    %c0_i32 = arith.constant 0 : i32
    %c0_i32_0 = arith.constant 0 : i32
    %c0_i32_1 = arith.constant 0 : i32
    return %c0_i32, %c0_i32_0 : i32, i32
  }
  func.func @transform_6(%arg0: i32) -> (i32, i32, i32) {
    %c0_i32 = arith.constant 0 : i32
    %c0_i32_0 = arith.constant 0 : i32
    %c0_i32_1 = arith.constant 0 : i32
    return %arg0, %c0_i32, %c0_i32_0 : i32, i32, i32
  }
}

module attributes {stable_mosaic.version = 11 : i64} {
  func.func @_encoder_layer_kernel(%arg0: i32, %arg1: memref<1x64x128xf32, #tpu.memory_space<vmem>>, %arg2: memref<3x4x128x128xbf16, #tpu.memory_space<vmem>>, %arg3: memref<3x4x1x128xf32, #tpu.memory_space<vmem>>, %arg4: memref<4x128x128xbf16, #tpu.memory_space<vmem>>, %arg5: memref<1x128xf32, #tpu.memory_space<vmem>>, %arg6: memref<1x128xf32, #tpu.memory_space<vmem>>, %arg7: memref<1x128xf32, #tpu.memory_space<vmem>>, %arg8: memref<128x2048xbf16, #tpu.memory_space<vmem>>, %arg9: memref<1x2048xf32, #tpu.memory_space<vmem>>, %arg10: memref<2048x128xbf16, #tpu.memory_space<vmem>>, %arg11: memref<1x128xf32, #tpu.memory_space<vmem>>, %arg12: memref<1x128xf32, #tpu.memory_space<vmem>>, %arg13: memref<1x128xf32, #tpu.memory_space<vmem>>, %arg14: memref<1x64x128xf32, #tpu.memory_space<vmem>>) attributes {dimension_semantics = [#tpu.dimension_semantics<parallel>], iteration_bounds = array<i64: 2>, scalar_prefetch = 0 : i64, scratch_operands = 0 : i64, tpu.core_type = #tpu.core_type<tc>, window_params = [{transform_indices = @transform_0, window_bounds = array<i64: 1, 64, 128>}, {pipeline_mode = #tpu.pipeline_mode<synchronous>, transform_indices = @transform_1, window_bounds = array<i64: 3, 4, 128, 128>}, {pipeline_mode = #tpu.pipeline_mode<synchronous>, transform_indices = @transform_2, window_bounds = array<i64: 3, 4, 1, 128>}, {pipeline_mode = #tpu.pipeline_mode<synchronous>, transform_indices = @transform_3, window_bounds = array<i64: 4, 128, 128>}, {pipeline_mode = #tpu.pipeline_mode<synchronous>, transform_indices = @transform_4, window_bounds = array<i64: 1, 128>}, {pipeline_mode = #tpu.pipeline_mode<synchronous>, transform_indices = @transform_5, window_bounds = array<i64: 1, 128>}, {pipeline_mode = #tpu.pipeline_mode<synchronous>, transform_indices = @transform_6, window_bounds = array<i64: 1, 128>}, {pipeline_mode = #tpu.pipeline_mode<synchronous>, transform_indices = @transform_7, window_bounds = array<i64: 128, 2048>}, {pipeline_mode = #tpu.pipeline_mode<synchronous>, transform_indices = @transform_8, window_bounds = array<i64: 1, 2048>}, {pipeline_mode = #tpu.pipeline_mode<synchronous>, transform_indices = @transform_9, window_bounds = array<i64: 2048, 128>}, {pipeline_mode = #tpu.pipeline_mode<synchronous>, transform_indices = @transform_10, window_bounds = array<i64: 1, 128>}, {pipeline_mode = #tpu.pipeline_mode<synchronous>, transform_indices = @transform_11, window_bounds = array<i64: 1, 128>}, {pipeline_mode = #tpu.pipeline_mode<synchronous>, transform_indices = @transform_12, window_bounds = array<i64: 1, 128>}, {transform_indices = @transform_13, window_bounds = array<i64: 1, 64, 128>}]} {
    %c0 = arith.constant 0 : index
    %c0_0 = arith.constant 0 : index
    %c0_1 = arith.constant 0 : index
    %0 = vector.load %arg1[%c0, %c0_0, %c0_1] : memref<1x64x128xf32, #tpu.memory_space<vmem>>, vector<1x64x128xf32>
    %1 = vector.shape_cast %0 : vector<1x64x128xf32> to vector<64x128xf32>
    %2 = arith.truncf %1 : vector<64x128xf32> to vector<64x128xbf16>
    %cst = arith.constant 0.000000e+00 : f32
    %3 = vector.broadcast %cst : f32 to vector<64x128xf32>
    %c0_2 = arith.constant 0 : index
    %c0_3 = arith.constant 0 : index
    %c0_4 = arith.constant 0 : index
    %c0_5 = arith.constant 0 : index
    %4 = vector.load %arg2[%c0_2, %c0_3, %c0_4, %c0_5] : memref<3x4x128x128xbf16, #tpu.memory_space<vmem>>, vector<1x1x128x128xbf16>
    %5 = vector.shape_cast %4 : vector<1x1x128x128xbf16> to vector<128x128xbf16>
    %cst_6 = arith.constant dense<0.000000e+00> : vector<64x128xf32>
    %6 = tpu.matmul %2, %5, %cst_6 {dimension_numbers = #tpu.dot_dimension_numbers<[1], [0], [0], [1], [0, 0, 1, 1], [], []>} : vector<64x128xbf16>, vector<128x128xbf16>, vector<64x128xf32> -> vector<64x128xf32>
    %c0_7 = arith.constant 0 : index
    %c0_8 = arith.constant 0 : index
    %c0_9 = arith.constant 0 : index
    %c0_10 = arith.constant 0 : index
    %7 = vector.load %arg3[%c0_7, %c0_8, %c0_9, %c0_10] : memref<3x4x1x128xf32, #tpu.memory_space<vmem>>, vector<1x1x1x128xf32>
    %8 = vector.shape_cast %7 : vector<1x1x1x128xf32> to vector<1x128xf32>
    %9 = vector.broadcast %8 : vector<1x128xf32> to vector<64x128xf32>
    %10 = arith.addf %6, %9 : vector<64x128xf32>
    %c1 = arith.constant 1 : index
    %c0_11 = arith.constant 0 : index
    %c0_12 = arith.constant 0 : index
    %c0_13 = arith.constant 0 : index
    %11 = vector.load %arg2[%c1, %c0_11, %c0_12, %c0_13] : memref<3x4x128x128xbf16, #tpu.memory_space<vmem>>, vector<1x1x128x128xbf16>
    %12 = vector.shape_cast %11 : vector<1x1x128x128xbf16> to vector<128x128xbf16>
    %cst_14 = arith.constant dense<0.000000e+00> : vector<64x128xf32>
    %13 = tpu.matmul %2, %12, %cst_14 {dimension_numbers = #tpu.dot_dimension_numbers<[1], [0], [0], [1], [0, 0, 1, 1], [], []>} : vector<64x128xbf16>, vector<128x128xbf16>, vector<64x128xf32> -> vector<64x128xf32>
    %c1_15 = arith.constant 1 : index
    %c0_16 = arith.constant 0 : index
    %c0_17 = arith.constant 0 : index
    %c0_18 = arith.constant 0 : index
    %14 = vector.load %arg3[%c1_15, %c0_16, %c0_17, %c0_18] : memref<3x4x1x128xf32, #tpu.memory_space<vmem>>, vector<1x1x1x128xf32>
    %15 = vector.shape_cast %14 : vector<1x1x1x128xf32> to vector<1x128xf32>
    %16 = vector.broadcast %15 : vector<1x128xf32> to vector<64x128xf32>
    %17 = arith.addf %13, %16 : vector<64x128xf32>
    %c2 = arith.constant 2 : index
    %c0_19 = arith.constant 0 : index
    %c0_20 = arith.constant 0 : index
    %c0_21 = arith.constant 0 : index
    %18 = vector.load %arg2[%c2, %c0_19, %c0_20, %c0_21] : memref<3x4x128x128xbf16, #tpu.memory_space<vmem>>, vector<1x1x128x128xbf16>
    %19 = vector.shape_cast %18 : vector<1x1x128x128xbf16> to vector<128x128xbf16>
    %cst_22 = arith.constant dense<0.000000e+00> : vector<64x128xf32>
    %20 = tpu.matmul %2, %19, %cst_22 {dimension_numbers = #tpu.dot_dimension_numbers<[1], [0], [0], [1], [0, 0, 1, 1], [], []>} : vector<64x128xbf16>, vector<128x128xbf16>, vector<64x128xf32> -> vector<64x128xf32>
    %c2_23 = arith.constant 2 : index
    %c0_24 = arith.constant 0 : index
    %c0_25 = arith.constant 0 : index
    %c0_26 = arith.constant 0 : index
    %21 = vector.load %arg3[%c2_23, %c0_24, %c0_25, %c0_26] : memref<3x4x1x128xf32, #tpu.memory_space<vmem>>, vector<1x1x1x128xf32>
    %22 = vector.shape_cast %21 : vector<1x1x1x128xf32> to vector<1x128xf32>
    %23 = vector.broadcast %22 : vector<1x128xf32> to vector<64x128xf32>
    %24 = arith.addf %20, %23 : vector<64x128xf32>
    %25 = arith.truncf %10 : vector<64x128xf32> to vector<64x128xbf16>
    %26 = arith.truncf %17 : vector<64x128xf32> to vector<64x128xbf16>
    %cst_27 = arith.constant dense<0.000000e+00> : vector<64x64xf32>
    %27 = tpu.matmul %25, %26, %cst_27 {dimension_numbers = #tpu.dot_dimension_numbers<[1], [1], [0], [0], [0, 0, 1, 0], [], []>} : vector<64x128xbf16>, vector<64x128xbf16>, vector<64x64xf32> -> vector<64x64xf32>
    %cst_28 = arith.constant dense<0xFF800000> : vector<64xf32>
    %28 = vector.multi_reduction <maximumf>, %27, %cst_28 [1] : vector<64x64xf32> to vector<64xf32>
    %29 = vector.shape_cast %28 : vector<64xf32> to vector<64x1xf32>
    %30 = vector.broadcast %29 : vector<64x1xf32> to vector<64x64xf32>
    %31 = arith.subf %27, %30 : vector<64x64xf32>
    %32 = math.exp %31 : vector<64x64xf32>
    %cst_29 = arith.constant dense<0.000000e+00> : vector<64xf32>
    %33 = vector.multi_reduction <add>, %32, %cst_29 [1] : vector<64x64xf32> to vector<64xf32>
    %34 = vector.shape_cast %33 : vector<64xf32> to vector<64x1xf32>
    %35 = tpu.reciprocal %34 {approx = true} : vector<64x1xf32> -> vector<64x1xf32>
    %36 = vector.broadcast %35 : vector<64x1xf32> to vector<64x64xf32>
    %37 = arith.mulf %32, %36 : vector<64x64xf32>
    %38 = arith.truncf %37 : vector<64x64xf32> to vector<64x64xbf16>
    %39 = arith.truncf %24 : vector<64x128xf32> to vector<64x128xbf16>
    %cst_30 = arith.constant dense<0.000000e+00> : vector<64x128xf32>
    %40 = tpu.matmul %38, %39, %cst_30 {dimension_numbers = #tpu.dot_dimension_numbers<[1], [0], [0], [1], [0, 0, 1, 1], [], []>} : vector<64x64xbf16>, vector<64x128xbf16>, vector<64x128xf32> -> vector<64x128xf32>
    %41 = arith.truncf %40 : vector<64x128xf32> to vector<64x128xbf16>
    %c0_31 = arith.constant 0 : index
    %c0_32 = arith.constant 0 : index
    %c0_33 = arith.constant 0 : index
    %42 = vector.load %arg4[%c0_31, %c0_32, %c0_33] : memref<4x128x128xbf16, #tpu.memory_space<vmem>>, vector<1x128x128xbf16>
    %43 = vector.shape_cast %42 : vector<1x128x128xbf16> to vector<128x128xbf16>
    %cst_34 = arith.constant dense<0.000000e+00> : vector<64x128xf32>
    %44 = tpu.matmul %41, %43, %cst_34 {dimension_numbers = #tpu.dot_dimension_numbers<[1], [0], [0], [1], [0, 0, 1, 1], [], []>} : vector<64x128xbf16>, vector<128x128xbf16>, vector<64x128xf32> -> vector<64x128xf32>
    %45 = arith.addf %3, %44 : vector<64x128xf32>
    %c0_35 = arith.constant 0 : index
    %c1_36 = arith.constant 1 : index
    %c0_37 = arith.constant 0 : index
    %c0_38 = arith.constant 0 : index
    %46 = vector.load %arg2[%c0_35, %c1_36, %c0_37, %c0_38] : memref<3x4x128x128xbf16, #tpu.memory_space<vmem>>, vector<1x1x128x128xbf16>
    %47 = vector.shape_cast %46 : vector<1x1x128x128xbf16> to vector<128x128xbf16>
    %cst_39 = arith.constant dense<0.000000e+00> : vector<64x128xf32>
    %48 = tpu.matmul %2, %47, %cst_39 {dimension_numbers = #tpu.dot_dimension_numbers<[1], [0], [0], [1], [0, 0, 1, 1], [], []>} : vector<64x128xbf16>, vector<128x128xbf16>, vector<64x128xf32> -> vector<64x128xf32>
    %c0_40 = arith.constant 0 : index
    %c1_41 = arith.constant 1 : index
    %c0_42 = arith.constant 0 : index
    %c0_43 = arith.constant 0 : index
    %49 = vector.load %arg3[%c0_40, %c1_41, %c0_42, %c0_43] : memref<3x4x1x128xf32, #tpu.memory_space<vmem>>, vector<1x1x1x128xf32>
    %50 = vector.shape_cast %49 : vector<1x1x1x128xf32> to vector<1x128xf32>
    %51 = vector.broadcast %50 : vector<1x128xf32> to vector<64x128xf32>
    %52 = arith.addf %48, %51 : vector<64x128xf32>
    %c1_44 = arith.constant 1 : index
    %c1_45 = arith.constant 1 : index
    %c0_46 = arith.constant 0 : index
    %c0_47 = arith.constant 0 : index
    %53 = vector.load %arg2[%c1_44, %c1_45, %c0_46, %c0_47] : memref<3x4x128x128xbf16, #tpu.memory_space<vmem>>, vector<1x1x128x128xbf16>
    %54 = vector.shape_cast %53 : vector<1x1x128x128xbf16> to vector<128x128xbf16>
    %cst_48 = arith.constant dense<0.000000e+00> : vector<64x128xf32>
    %55 = tpu.matmul %2, %54, %cst_48 {dimension_numbers = #tpu.dot_dimension_numbers<[1], [0], [0], [1], [0, 0, 1, 1], [], []>} : vector<64x128xbf16>, vector<128x128xbf16>, vector<64x128xf32> -> vector<64x128xf32>
    %c1_49 = arith.constant 1 : index
    %c1_50 = arith.constant 1 : index
    %c0_51 = arith.constant 0 : index
    %c0_52 = arith.constant 0 : index
    %56 = vector.load %arg3[%c1_49, %c1_50, %c0_51, %c0_52] : memref<3x4x1x128xf32, #tpu.memory_space<vmem>>, vector<1x1x1x128xf32>
    %57 = vector.shape_cast %56 : vector<1x1x1x128xf32> to vector<1x128xf32>
    %58 = vector.broadcast %57 : vector<1x128xf32> to vector<64x128xf32>
    %59 = arith.addf %55, %58 : vector<64x128xf32>
    %c2_53 = arith.constant 2 : index
    %c1_54 = arith.constant 1 : index
    %c0_55 = arith.constant 0 : index
    %c0_56 = arith.constant 0 : index
    %60 = vector.load %arg2[%c2_53, %c1_54, %c0_55, %c0_56] : memref<3x4x128x128xbf16, #tpu.memory_space<vmem>>, vector<1x1x128x128xbf16>
    %61 = vector.shape_cast %60 : vector<1x1x128x128xbf16> to vector<128x128xbf16>
    %cst_57 = arith.constant dense<0.000000e+00> : vector<64x128xf32>
    %62 = tpu.matmul %2, %61, %cst_57 {dimension_numbers = #tpu.dot_dimension_numbers<[1], [0], [0], [1], [0, 0, 1, 1], [], []>} : vector<64x128xbf16>, vector<128x128xbf16>, vector<64x128xf32> -> vector<64x128xf32>
    %c2_58 = arith.constant 2 : index
    %c1_59 = arith.constant 1 : index
    %c0_60 = arith.constant 0 : index
    %c0_61 = arith.constant 0 : index
    %63 = vector.load %arg3[%c2_58, %c1_59, %c0_60, %c0_61] : memref<3x4x1x128xf32, #tpu.memory_space<vmem>>, vector<1x1x1x128xf32>
    %64 = vector.shape_cast %63 : vector<1x1x1x128xf32> to vector<1x128xf32>
    %65 = vector.broadcast %64 : vector<1x128xf32> to vector<64x128xf32>
    %66 = arith.addf %62, %65 : vector<64x128xf32>
    %67 = arith.truncf %52 : vector<64x128xf32> to vector<64x128xbf16>
    %68 = arith.truncf %59 : vector<64x128xf32> to vector<64x128xbf16>
    %cst_62 = arith.constant dense<0.000000e+00> : vector<64x64xf32>
    %69 = tpu.matmul %67, %68, %cst_62 {dimension_numbers = #tpu.dot_dimension_numbers<[1], [1], [0], [0], [0, 0, 1, 0], [], []>} : vector<64x128xbf16>, vector<64x128xbf16>, vector<64x64xf32> -> vector<64x64xf32>
    %cst_63 = arith.constant dense<0xFF800000> : vector<64xf32>
    %70 = vector.multi_reduction <maximumf>, %69, %cst_63 [1] : vector<64x64xf32> to vector<64xf32>
    %71 = vector.shape_cast %70 : vector<64xf32> to vector<64x1xf32>
    %72 = vector.broadcast %71 : vector<64x1xf32> to vector<64x64xf32>
    %73 = arith.subf %69, %72 : vector<64x64xf32>
    %74 = math.exp %73 : vector<64x64xf32>
    %cst_64 = arith.constant dense<0.000000e+00> : vector<64xf32>
    %75 = vector.multi_reduction <add>, %74, %cst_64 [1] : vector<64x64xf32> to vector<64xf32>
    %76 = vector.shape_cast %75 : vector<64xf32> to vector<64x1xf32>
    %77 = tpu.reciprocal %76 {approx = true} : vector<64x1xf32> -> vector<64x1xf32>
    %78 = vector.broadcast %77 : vector<64x1xf32> to vector<64x64xf32>
    %79 = arith.mulf %74, %78 : vector<64x64xf32>
    %80 = arith.truncf %79 : vector<64x64xf32> to vector<64x64xbf16>
    %81 = arith.truncf %66 : vector<64x128xf32> to vector<64x128xbf16>
    %cst_65 = arith.constant dense<0.000000e+00> : vector<64x128xf32>
    %82 = tpu.matmul %80, %81, %cst_65 {dimension_numbers = #tpu.dot_dimension_numbers<[1], [0], [0], [1], [0, 0, 1, 1], [], []>} : vector<64x64xbf16>, vector<64x128xbf16>, vector<64x128xf32> -> vector<64x128xf32>
    %83 = arith.truncf %82 : vector<64x128xf32> to vector<64x128xbf16>
    %c1_66 = arith.constant 1 : index
    %c0_67 = arith.constant 0 : index
    %c0_68 = arith.constant 0 : index
    %84 = vector.load %arg4[%c1_66, %c0_67, %c0_68] : memref<4x128x128xbf16, #tpu.memory_space<vmem>>, vector<1x128x128xbf16>
    %85 = vector.shape_cast %84 : vector<1x128x128xbf16> to vector<128x128xbf16>
    %cst_69 = arith.constant dense<0.000000e+00> : vector<64x128xf32>
    %86 = tpu.matmul %83, %85, %cst_69 {dimension_numbers = #tpu.dot_dimension_numbers<[1], [0], [0], [1], [0, 0, 1, 1], [], []>} : vector<64x128xbf16>, vector<128x128xbf16>, vector<64x128xf32> -> vector<64x128xf32>
    %87 = arith.addf %45, %86 : vector<64x128xf32>
    %c0_70 = arith.constant 0 : index
    %c2_71 = arith.constant 2 : index
    %c0_72 = arith.constant 0 : index
    %c0_73 = arith.constant 0 : index
    %88 = vector.load %arg2[%c0_70, %c2_71, %c0_72, %c0_73] : memref<3x4x128x128xbf16, #tpu.memory_space<vmem>>, vector<1x1x128x128xbf16>
    %89 = vector.shape_cast %88 : vector<1x1x128x128xbf16> to vector<128x128xbf16>
    %cst_74 = arith.constant dense<0.000000e+00> : vector<64x128xf32>
    %90 = tpu.matmul %2, %89, %cst_74 {dimension_numbers = #tpu.dot_dimension_numbers<[1], [0], [0], [1], [0, 0, 1, 1], [], []>} : vector<64x128xbf16>, vector<128x128xbf16>, vector<64x128xf32> -> vector<64x128xf32>
    %c0_75 = arith.constant 0 : index
    %c2_76 = arith.constant 2 : index
    %c0_77 = arith.constant 0 : index
    %c0_78 = arith.constant 0 : index
    %91 = vector.load %arg3[%c0_75, %c2_76, %c0_77, %c0_78] : memref<3x4x1x128xf32, #tpu.memory_space<vmem>>, vector<1x1x1x128xf32>
    %92 = vector.shape_cast %91 : vector<1x1x1x128xf32> to vector<1x128xf32>
    %93 = vector.broadcast %92 : vector<1x128xf32> to vector<64x128xf32>
    %94 = arith.addf %90, %93 : vector<64x128xf32>
    %c1_79 = arith.constant 1 : index
    %c2_80 = arith.constant 2 : index
    %c0_81 = arith.constant 0 : index
    %c0_82 = arith.constant 0 : index
    %95 = vector.load %arg2[%c1_79, %c2_80, %c0_81, %c0_82] : memref<3x4x128x128xbf16, #tpu.memory_space<vmem>>, vector<1x1x128x128xbf16>
    %96 = vector.shape_cast %95 : vector<1x1x128x128xbf16> to vector<128x128xbf16>
    %cst_83 = arith.constant dense<0.000000e+00> : vector<64x128xf32>
    %97 = tpu.matmul %2, %96, %cst_83 {dimension_numbers = #tpu.dot_dimension_numbers<[1], [0], [0], [1], [0, 0, 1, 1], [], []>} : vector<64x128xbf16>, vector<128x128xbf16>, vector<64x128xf32> -> vector<64x128xf32>
    %c1_84 = arith.constant 1 : index
    %c2_85 = arith.constant 2 : index
    %c0_86 = arith.constant 0 : index
    %c0_87 = arith.constant 0 : index
    %98 = vector.load %arg3[%c1_84, %c2_85, %c0_86, %c0_87] : memref<3x4x1x128xf32, #tpu.memory_space<vmem>>, vector<1x1x1x128xf32>
    %99 = vector.shape_cast %98 : vector<1x1x1x128xf32> to vector<1x128xf32>
    %100 = vector.broadcast %99 : vector<1x128xf32> to vector<64x128xf32>
    %101 = arith.addf %97, %100 : vector<64x128xf32>
    %c2_88 = arith.constant 2 : index
    %c2_89 = arith.constant 2 : index
    %c0_90 = arith.constant 0 : index
    %c0_91 = arith.constant 0 : index
    %102 = vector.load %arg2[%c2_88, %c2_89, %c0_90, %c0_91] : memref<3x4x128x128xbf16, #tpu.memory_space<vmem>>, vector<1x1x128x128xbf16>
    %103 = vector.shape_cast %102 : vector<1x1x128x128xbf16> to vector<128x128xbf16>
    %cst_92 = arith.constant dense<0.000000e+00> : vector<64x128xf32>
    %104 = tpu.matmul %2, %103, %cst_92 {dimension_numbers = #tpu.dot_dimension_numbers<[1], [0], [0], [1], [0, 0, 1, 1], [], []>} : vector<64x128xbf16>, vector<128x128xbf16>, vector<64x128xf32> -> vector<64x128xf32>
    %c2_93 = arith.constant 2 : index
    %c2_94 = arith.constant 2 : index
    %c0_95 = arith.constant 0 : index
    %c0_96 = arith.constant 0 : index
    %105 = vector.load %arg3[%c2_93, %c2_94, %c0_95, %c0_96] : memref<3x4x1x128xf32, #tpu.memory_space<vmem>>, vector<1x1x1x128xf32>
    %106 = vector.shape_cast %105 : vector<1x1x1x128xf32> to vector<1x128xf32>
    %107 = vector.broadcast %106 : vector<1x128xf32> to vector<64x128xf32>
    %108 = arith.addf %104, %107 : vector<64x128xf32>
    %109 = arith.truncf %94 : vector<64x128xf32> to vector<64x128xbf16>
    %110 = arith.truncf %101 : vector<64x128xf32> to vector<64x128xbf16>
    %cst_97 = arith.constant dense<0.000000e+00> : vector<64x64xf32>
    %111 = tpu.matmul %109, %110, %cst_97 {dimension_numbers = #tpu.dot_dimension_numbers<[1], [1], [0], [0], [0, 0, 1, 0], [], []>} : vector<64x128xbf16>, vector<64x128xbf16>, vector<64x64xf32> -> vector<64x64xf32>
    %cst_98 = arith.constant dense<0xFF800000> : vector<64xf32>
    %112 = vector.multi_reduction <maximumf>, %111, %cst_98 [1] : vector<64x64xf32> to vector<64xf32>
    %113 = vector.shape_cast %112 : vector<64xf32> to vector<64x1xf32>
    %114 = vector.broadcast %113 : vector<64x1xf32> to vector<64x64xf32>
    %115 = arith.subf %111, %114 : vector<64x64xf32>
    %116 = math.exp %115 : vector<64x64xf32>
    %cst_99 = arith.constant dense<0.000000e+00> : vector<64xf32>
    %117 = vector.multi_reduction <add>, %116, %cst_99 [1] : vector<64x64xf32> to vector<64xf32>
    %118 = vector.shape_cast %117 : vector<64xf32> to vector<64x1xf32>
    %119 = tpu.reciprocal %118 {approx = true} : vector<64x1xf32> -> vector<64x1xf32>
    %120 = vector.broadcast %119 : vector<64x1xf32> to vector<64x64xf32>
    %121 = arith.mulf %116, %120 : vector<64x64xf32>
    %122 = arith.truncf %121 : vector<64x64xf32> to vector<64x64xbf16>
    %123 = arith.truncf %108 : vector<64x128xf32> to vector<64x128xbf16>
    %cst_100 = arith.constant dense<0.000000e+00> : vector<64x128xf32>
    %124 = tpu.matmul %122, %123, %cst_100 {dimension_numbers = #tpu.dot_dimension_numbers<[1], [0], [0], [1], [0, 0, 1, 1], [], []>} : vector<64x64xbf16>, vector<64x128xbf16>, vector<64x128xf32> -> vector<64x128xf32>
    %125 = arith.truncf %124 : vector<64x128xf32> to vector<64x128xbf16>
    %c2_101 = arith.constant 2 : index
    %c0_102 = arith.constant 0 : index
    %c0_103 = arith.constant 0 : index
    %126 = vector.load %arg4[%c2_101, %c0_102, %c0_103] : memref<4x128x128xbf16, #tpu.memory_space<vmem>>, vector<1x128x128xbf16>
    %127 = vector.shape_cast %126 : vector<1x128x128xbf16> to vector<128x128xbf16>
    %cst_104 = arith.constant dense<0.000000e+00> : vector<64x128xf32>
    %128 = tpu.matmul %125, %127, %cst_104 {dimension_numbers = #tpu.dot_dimension_numbers<[1], [0], [0], [1], [0, 0, 1, 1], [], []>} : vector<64x128xbf16>, vector<128x128xbf16>, vector<64x128xf32> -> vector<64x128xf32>
    %129 = arith.addf %87, %128 : vector<64x128xf32>
    %c0_105 = arith.constant 0 : index
    %c3 = arith.constant 3 : index
    %c0_106 = arith.constant 0 : index
    %c0_107 = arith.constant 0 : index
    %130 = vector.load %arg2[%c0_105, %c3, %c0_106, %c0_107] : memref<3x4x128x128xbf16, #tpu.memory_space<vmem>>, vector<1x1x128x128xbf16>
    %131 = vector.shape_cast %130 : vector<1x1x128x128xbf16> to vector<128x128xbf16>
    %cst_108 = arith.constant dense<0.000000e+00> : vector<64x128xf32>
    %132 = tpu.matmul %2, %131, %cst_108 {dimension_numbers = #tpu.dot_dimension_numbers<[1], [0], [0], [1], [0, 0, 1, 1], [], []>} : vector<64x128xbf16>, vector<128x128xbf16>, vector<64x128xf32> -> vector<64x128xf32>
    %c0_109 = arith.constant 0 : index
    %c3_110 = arith.constant 3 : index
    %c0_111 = arith.constant 0 : index
    %c0_112 = arith.constant 0 : index
    %133 = vector.load %arg3[%c0_109, %c3_110, %c0_111, %c0_112] : memref<3x4x1x128xf32, #tpu.memory_space<vmem>>, vector<1x1x1x128xf32>
    %134 = vector.shape_cast %133 : vector<1x1x1x128xf32> to vector<1x128xf32>
    %135 = vector.broadcast %134 : vector<1x128xf32> to vector<64x128xf32>
    %136 = arith.addf %132, %135 : vector<64x128xf32>
    %c1_113 = arith.constant 1 : index
    %c3_114 = arith.constant 3 : index
    %c0_115 = arith.constant 0 : index
    %c0_116 = arith.constant 0 : index
    %137 = vector.load %arg2[%c1_113, %c3_114, %c0_115, %c0_116] : memref<3x4x128x128xbf16, #tpu.memory_space<vmem>>, vector<1x1x128x128xbf16>
    %138 = vector.shape_cast %137 : vector<1x1x128x128xbf16> to vector<128x128xbf16>
    %cst_117 = arith.constant dense<0.000000e+00> : vector<64x128xf32>
    %139 = tpu.matmul %2, %138, %cst_117 {dimension_numbers = #tpu.dot_dimension_numbers<[1], [0], [0], [1], [0, 0, 1, 1], [], []>} : vector<64x128xbf16>, vector<128x128xbf16>, vector<64x128xf32> -> vector<64x128xf32>
    %c1_118 = arith.constant 1 : index
    %c3_119 = arith.constant 3 : index
    %c0_120 = arith.constant 0 : index
    %c0_121 = arith.constant 0 : index
    %140 = vector.load %arg3[%c1_118, %c3_119, %c0_120, %c0_121] : memref<3x4x1x128xf32, #tpu.memory_space<vmem>>, vector<1x1x1x128xf32>
    %141 = vector.shape_cast %140 : vector<1x1x1x128xf32> to vector<1x128xf32>
    %142 = vector.broadcast %141 : vector<1x128xf32> to vector<64x128xf32>
    %143 = arith.addf %139, %142 : vector<64x128xf32>
    %c2_122 = arith.constant 2 : index
    %c3_123 = arith.constant 3 : index
    %c0_124 = arith.constant 0 : index
    %c0_125 = arith.constant 0 : index
    %144 = vector.load %arg2[%c2_122, %c3_123, %c0_124, %c0_125] : memref<3x4x128x128xbf16, #tpu.memory_space<vmem>>, vector<1x1x128x128xbf16>
    %145 = vector.shape_cast %144 : vector<1x1x128x128xbf16> to vector<128x128xbf16>
    %cst_126 = arith.constant dense<0.000000e+00> : vector<64x128xf32>
    %146 = tpu.matmul %2, %145, %cst_126 {dimension_numbers = #tpu.dot_dimension_numbers<[1], [0], [0], [1], [0, 0, 1, 1], [], []>} : vector<64x128xbf16>, vector<128x128xbf16>, vector<64x128xf32> -> vector<64x128xf32>
    %c2_127 = arith.constant 2 : index
    %c3_128 = arith.constant 3 : index
    %c0_129 = arith.constant 0 : index
    %c0_130 = arith.constant 0 : index
    %147 = vector.load %arg3[%c2_127, %c3_128, %c0_129, %c0_130] : memref<3x4x1x128xf32, #tpu.memory_space<vmem>>, vector<1x1x1x128xf32>
    %148 = vector.shape_cast %147 : vector<1x1x1x128xf32> to vector<1x128xf32>
    %149 = vector.broadcast %148 : vector<1x128xf32> to vector<64x128xf32>
    %150 = arith.addf %146, %149 : vector<64x128xf32>
    %151 = arith.truncf %136 : vector<64x128xf32> to vector<64x128xbf16>
    %152 = arith.truncf %143 : vector<64x128xf32> to vector<64x128xbf16>
    %cst_131 = arith.constant dense<0.000000e+00> : vector<64x64xf32>
    %153 = tpu.matmul %151, %152, %cst_131 {dimension_numbers = #tpu.dot_dimension_numbers<[1], [1], [0], [0], [0, 0, 1, 0], [], []>} : vector<64x128xbf16>, vector<64x128xbf16>, vector<64x64xf32> -> vector<64x64xf32>
    %cst_132 = arith.constant dense<0xFF800000> : vector<64xf32>
    %154 = vector.multi_reduction <maximumf>, %153, %cst_132 [1] : vector<64x64xf32> to vector<64xf32>
    %155 = vector.shape_cast %154 : vector<64xf32> to vector<64x1xf32>
    %156 = vector.broadcast %155 : vector<64x1xf32> to vector<64x64xf32>
    %157 = arith.subf %153, %156 : vector<64x64xf32>
    %158 = math.exp %157 : vector<64x64xf32>
    %cst_133 = arith.constant dense<0.000000e+00> : vector<64xf32>
    %159 = vector.multi_reduction <add>, %158, %cst_133 [1] : vector<64x64xf32> to vector<64xf32>
    %160 = vector.shape_cast %159 : vector<64xf32> to vector<64x1xf32>
    %161 = tpu.reciprocal %160 {approx = true} : vector<64x1xf32> -> vector<64x1xf32>
    %162 = vector.broadcast %161 : vector<64x1xf32> to vector<64x64xf32>
    %163 = arith.mulf %158, %162 : vector<64x64xf32>
    %164 = arith.truncf %163 : vector<64x64xf32> to vector<64x64xbf16>
    %165 = arith.truncf %150 : vector<64x128xf32> to vector<64x128xbf16>
    %cst_134 = arith.constant dense<0.000000e+00> : vector<64x128xf32>
    %166 = tpu.matmul %164, %165, %cst_134 {dimension_numbers = #tpu.dot_dimension_numbers<[1], [0], [0], [1], [0, 0, 1, 1], [], []>} : vector<64x64xbf16>, vector<64x128xbf16>, vector<64x128xf32> -> vector<64x128xf32>
    %167 = arith.truncf %166 : vector<64x128xf32> to vector<64x128xbf16>
    %c3_135 = arith.constant 3 : index
    %c0_136 = arith.constant 0 : index
    %c0_137 = arith.constant 0 : index
    %168 = vector.load %arg4[%c3_135, %c0_136, %c0_137] : memref<4x128x128xbf16, #tpu.memory_space<vmem>>, vector<1x128x128xbf16>
    %169 = vector.shape_cast %168 : vector<1x128x128xbf16> to vector<128x128xbf16>
    %cst_138 = arith.constant dense<0.000000e+00> : vector<64x128xf32>
    %170 = tpu.matmul %167, %169, %cst_138 {dimension_numbers = #tpu.dot_dimension_numbers<[1], [0], [0], [1], [0, 0, 1, 1], [], []>} : vector<64x128xbf16>, vector<128x128xbf16>, vector<64x128xf32> -> vector<64x128xf32>
    %171 = arith.addf %129, %170 : vector<64x128xf32>
    %c0_139 = arith.constant 0 : index
    %c0_140 = arith.constant 0 : index
    %172 = vector.load %arg5[%c0_139, %c0_140] : memref<1x128xf32, #tpu.memory_space<vmem>>, vector<1x128xf32>
    %173 = vector.broadcast %172 : vector<1x128xf32> to vector<64x128xf32>
    %174 = arith.addf %171, %173 : vector<64x128xf32>
    %175 = arith.addf %1, %174 : vector<64x128xf32>
    %c0_141 = arith.constant 0 : index
    %c0_142 = arith.constant 0 : index
    %176 = vector.load %arg6[%c0_141, %c0_142] : memref<1x128xf32, #tpu.memory_space<vmem>>, vector<1x128xf32>
    %c0_143 = arith.constant 0 : index
    %c0_144 = arith.constant 0 : index
    %177 = vector.load %arg7[%c0_143, %c0_144] : memref<1x128xf32, #tpu.memory_space<vmem>>, vector<1x128xf32>
    %cst_145 = arith.constant dense<0.000000e+00> : vector<64xf32>
    %178 = vector.multi_reduction <add>, %175, %cst_145 [1] : vector<64x128xf32> to vector<64xf32>
    %179 = vector.shape_cast %178 : vector<64xf32> to vector<64x1xf32>
    %cst_146 = arith.constant 3.125000e-02 : f32
    %180 = vector.broadcast %cst_146 : f32 to vector<64x1xf32>
    %181 = arith.mulf %179, %180 : vector<64x1xf32>
    %182 = arith.mulf %175, %175 : vector<64x128xf32>
    %cst_147 = arith.constant dense<0.000000e+00> : vector<64xf32>
    %183 = vector.multi_reduction <add>, %182, %cst_147 [1] : vector<64x128xf32> to vector<64xf32>
    %184 = vector.shape_cast %183 : vector<64xf32> to vector<64x1xf32>
    %cst_148 = arith.constant 3.125000e-02 : f32
    %185 = vector.broadcast %cst_148 : f32 to vector<64x1xf32>
    %186 = arith.mulf %184, %185 : vector<64x1xf32>
    %187 = arith.mulf %181, %181 : vector<64x1xf32>
    %188 = arith.subf %186, %187 : vector<64x1xf32>
    %189 = vector.broadcast %181 : vector<64x1xf32> to vector<64x128xf32>
    %190 = arith.subf %175, %189 : vector<64x128xf32>
    %cst_149 = arith.constant 9.99999974E-6 : f32
    %191 = vector.broadcast %cst_149 : f32 to vector<64x1xf32>
    %192 = arith.addf %188, %191 : vector<64x1xf32>
    %193 = math.rsqrt %192 : vector<64x1xf32>
    %194 = vector.broadcast %193 : vector<64x1xf32> to vector<64x128xf32>
    %195 = arith.mulf %190, %194 : vector<64x128xf32>
    %196 = vector.broadcast %176 : vector<1x128xf32> to vector<64x128xf32>
    %197 = arith.mulf %195, %196 : vector<64x128xf32>
    %198 = vector.broadcast %177 : vector<1x128xf32> to vector<64x128xf32>
    %199 = arith.addf %197, %198 : vector<64x128xf32>
    %200 = arith.truncf %199 : vector<64x128xf32> to vector<64x128xbf16>
    %c0_150 = arith.constant 0 : index
    %c0_151 = arith.constant 0 : index
    %201 = vector.load %arg8[%c0_150, %c0_151] : memref<128x2048xbf16, #tpu.memory_space<vmem>>, vector<128x2048xbf16>
    %cst_152 = arith.constant dense<0.000000e+00> : vector<64x2048xf32>
    %202 = tpu.matmul %200, %201, %cst_152 {dimension_numbers = #tpu.dot_dimension_numbers<[1], [0], [0], [1], [0, 0, 1, 1], [], []>} : vector<64x128xbf16>, vector<128x2048xbf16>, vector<64x2048xf32> -> vector<64x2048xf32>
    %c0_153 = arith.constant 0 : index
    %c0_154 = arith.constant 0 : index
    %203 = vector.load %arg9[%c0_153, %c0_154] : memref<1x2048xf32, #tpu.memory_space<vmem>>, vector<1x2048xf32>
    %204 = vector.broadcast %203 : vector<1x2048xf32> to vector<64x2048xf32>
    %205 = arith.addf %202, %204 : vector<64x2048xf32>
    %cst_155 = arith.constant 0.000000e+00 : f32
    %206 = vector.broadcast %cst_155 : f32 to vector<64x2048xf32>
    %207 = arith.maximumf %205, %206 : vector<64x2048xf32>
    %208 = arith.truncf %207 : vector<64x2048xf32> to vector<64x2048xbf16>
    %c0_156 = arith.constant 0 : index
    %c0_157 = arith.constant 0 : index
    %209 = vector.load %arg10[%c0_156, %c0_157] : memref<2048x128xbf16, #tpu.memory_space<vmem>>, vector<2048x128xbf16>
    %cst_158 = arith.constant dense<0.000000e+00> : vector<64x128xf32>
    %210 = tpu.matmul %208, %209, %cst_158 {dimension_numbers = #tpu.dot_dimension_numbers<[1], [0], [0], [1], [0, 0, 1, 1], [], []>} : vector<64x2048xbf16>, vector<2048x128xbf16>, vector<64x128xf32> -> vector<64x128xf32>
    %c0_159 = arith.constant 0 : index
    %c0_160 = arith.constant 0 : index
    %211 = vector.load %arg11[%c0_159, %c0_160] : memref<1x128xf32, #tpu.memory_space<vmem>>, vector<1x128xf32>
    %212 = vector.broadcast %211 : vector<1x128xf32> to vector<64x128xf32>
    %213 = arith.addf %210, %212 : vector<64x128xf32>
    %214 = arith.addf %199, %213 : vector<64x128xf32>
    %c0_161 = arith.constant 0 : index
    %c0_162 = arith.constant 0 : index
    %215 = vector.load %arg12[%c0_161, %c0_162] : memref<1x128xf32, #tpu.memory_space<vmem>>, vector<1x128xf32>
    %c0_163 = arith.constant 0 : index
    %c0_164 = arith.constant 0 : index
    %216 = vector.load %arg13[%c0_163, %c0_164] : memref<1x128xf32, #tpu.memory_space<vmem>>, vector<1x128xf32>
    %cst_165 = arith.constant dense<0.000000e+00> : vector<64xf32>
    %217 = vector.multi_reduction <add>, %214, %cst_165 [1] : vector<64x128xf32> to vector<64xf32>
    %218 = vector.shape_cast %217 : vector<64xf32> to vector<64x1xf32>
    %cst_166 = arith.constant 3.125000e-02 : f32
    %219 = vector.broadcast %cst_166 : f32 to vector<64x1xf32>
    %220 = arith.mulf %218, %219 : vector<64x1xf32>
    %221 = arith.mulf %214, %214 : vector<64x128xf32>
    %cst_167 = arith.constant dense<0.000000e+00> : vector<64xf32>
    %222 = vector.multi_reduction <add>, %221, %cst_167 [1] : vector<64x128xf32> to vector<64xf32>
    %223 = vector.shape_cast %222 : vector<64xf32> to vector<64x1xf32>
    %cst_168 = arith.constant 3.125000e-02 : f32
    %224 = vector.broadcast %cst_168 : f32 to vector<64x1xf32>
    %225 = arith.mulf %223, %224 : vector<64x1xf32>
    %226 = arith.mulf %220, %220 : vector<64x1xf32>
    %227 = arith.subf %225, %226 : vector<64x1xf32>
    %228 = vector.broadcast %220 : vector<64x1xf32> to vector<64x128xf32>
    %229 = arith.subf %214, %228 : vector<64x128xf32>
    %cst_169 = arith.constant 9.99999974E-6 : f32
    %230 = vector.broadcast %cst_169 : f32 to vector<64x1xf32>
    %231 = arith.addf %227, %230 : vector<64x1xf32>
    %232 = math.rsqrt %231 : vector<64x1xf32>
    %233 = vector.broadcast %232 : vector<64x1xf32> to vector<64x128xf32>
    %234 = arith.mulf %229, %233 : vector<64x128xf32>
    %235 = vector.broadcast %215 : vector<1x128xf32> to vector<64x128xf32>
    %236 = arith.mulf %234, %235 : vector<64x128xf32>
    %237 = vector.broadcast %216 : vector<1x128xf32> to vector<64x128xf32>
    %238 = arith.addf %236, %237 : vector<64x128xf32>
    %c0_170 = arith.constant 0 : index
    %c0_171 = arith.constant 0 : index
    %c0_172 = arith.constant 0 : index
    %239 = vector.load %arg14[%c0_170, %c0_171, %c0_172] : memref<1x64x128xf32, #tpu.memory_space<vmem>>, vector<1x64x128xf32>
    %240 = vector.shape_cast %239 : vector<1x64x128xf32> to vector<64x128xf32>
    %241 = vector.shape_cast %238 : vector<64x128xf32> to vector<1x64x128xf32>
    tpu.vector_store %arg14[%c0_170, %c0_171, %c0_172], %241 {strides = array<i32>} : memref<1x64x128xf32, #tpu.memory_space<vmem>>, vector<1x64x128xf32>,
    return
  }
  func.func @transform_0(%arg0: i32) -> (i32, i32, i32) {
    %c0_i32 = arith.constant 0 : i32
    %c0_i32_0 = arith.constant 0 : i32
    %c0_i32_1 = arith.constant 0 : i32
    return %arg0, %c0_i32, %c0_i32_0 : i32, i32, i32
  }
  func.func @transform_1(%arg0: i32) -> (i32, i32, i32, i32) {
    %c0_i32 = arith.constant 0 : i32
    %c0_i32_0 = arith.constant 0 : i32
    %c0_i32_1 = arith.constant 0 : i32
    %c0_i32_2 = arith.constant 0 : i32
    %c0_i32_3 = arith.constant 0 : i32
    return %c0_i32, %c0_i32_0, %c0_i32_1, %c0_i32_2 : i32, i32, i32, i32
  }
  func.func @transform_2(%arg0: i32) -> (i32, i32, i32, i32) {
    %c0_i32 = arith.constant 0 : i32
    %c0_i32_0 = arith.constant 0 : i32
    %c0_i32_1 = arith.constant 0 : i32
    %c0_i32_2 = arith.constant 0 : i32
    %c0_i32_3 = arith.constant 0 : i32
    return %c0_i32, %c0_i32_0, %c0_i32_1, %c0_i32_2 : i32, i32, i32, i32
  }
  func.func @transform_3(%arg0: i32) -> (i32, i32, i32) {
    %c0_i32 = arith.constant 0 : i32
    %c0_i32_0 = arith.constant 0 : i32
    %c0_i32_1 = arith.constant 0 : i32
    %c0_i32_2 = arith.constant 0 : i32
    return %c0_i32, %c0_i32_0, %c0_i32_1 : i32, i32, i32
  }
  func.func @transform_4(%arg0: i32) -> (i32, i32) {
    %c0_i32 = arith.constant 0 : i32
    %c0_i32_0 = arith.constant 0 : i32
    %c0_i32_1 = arith.constant 0 : i32
    return %c0_i32, %c0_i32_0 : i32, i32
  }
  func.func @transform_5(%arg0: i32) -> (i32, i32) {
    %c0_i32 = arith.constant 0 : i32
    %c0_i32_0 = arith.constant 0 : i32
    %c0_i32_1 = arith.constant 0 : i32
    return %c0_i32, %c0_i32_0 : i32, i32
  }
  func.func @transform_6(%arg0: i32) -> (i32, i32) {
    %c0_i32 = arith.constant 0 : i32
    %c0_i32_0 = arith.constant 0 : i32
    %c0_i32_1 = arith.constant 0 : i32
    return %c0_i32, %c0_i32_0 : i32, i32
  }
  func.func @transform_7(%arg0: i32) -> (i32, i32) {
    %c0_i32 = arith.constant 0 : i32
    %c0_i32_0 = arith.constant 0 : i32
    %c0_i32_1 = arith.constant 0 : i32
    return %c0_i32, %c0_i32_0 : i32, i32
  }
  func.func @transform_8(%arg0: i32) -> (i32, i32) {
    %c0_i32 = arith.constant 0 : i32
    %c0_i32_0 = arith.constant 0 : i32
    %c0_i32_1 = arith.constant 0 : i32
    return %c0_i32, %c0_i32_0 : i32, i32
  }
  func.func @transform_9(%arg0: i32) -> (i32, i32) {
    %c0_i32 = arith.constant 0 : i32
    %c0_i32_0 = arith.constant 0 : i32
    %c0_i32_1 = arith.constant 0 : i32
    return %c0_i32, %c0_i32_0 : i32, i32
  }
  func.func @transform_10(%arg0: i32) -> (i32, i32) {
    %c0_i32 = arith.constant 0 : i32
    %c0_i32_0 = arith.constant 0 : i32
    %c0_i32_1 = arith.constant 0 : i32
    return %c0_i32, %c0_i32_0 : i32, i32
  }
  func.func @transform_11(%arg0: i32) -> (i32, i32) {
    %c0_i32 = arith.constant 0 : i32
    %c0_i32_0 = arith.constant 0 : i32
    %c0_i32_1 = arith.constant 0 : i32
    return %c0_i32, %c0_i32_0 : i32, i32
  }
  func.func @transform_12(%arg0: i32) -> (i32, i32) {
    %c0_i32 = arith.constant 0 : i32
    %c0_i32_0 = arith.constant 0 : i32
    %c0_i32_1 = arith.constant 0 : i32
    return %c0_i32, %c0_i32_0 : i32, i32
  }
  func.func @transform_13(%arg0: i32) -> (i32, i32, i32) {
    %c0_i32 = arith.constant 0 : i32
    %c0_i32_0 = arith.constant 0 : i32
    %c0_i32_1 = arith.constant 0 : i32
    return %arg0, %c0_i32, %c0_i32_0 : i32, i32, i32
  }
}

module attributes {stable_mosaic.version = 11 : i64} {
  func.func @_head_kernel(%arg0: i32, %arg1: memref<1x64x128xf32, #tpu.memory_space<vmem>>, %arg2: memref<128x128xbf16, #tpu.memory_space<vmem>>, %arg3: memref<1x128xf32, #tpu.memory_space<vmem>>, %arg4: memref<128x128xbf16, #tpu.memory_space<vmem>>, %arg5: memref<1x128xf32, #tpu.memory_space<vmem>>, %arg6: memref<1x1x128xf32, #tpu.memory_space<vmem>>) attributes {dimension_semantics = [#tpu.dimension_semantics<parallel>], iteration_bounds = array<i64: 2>, scalar_prefetch = 0 : i64, scratch_operands = 0 : i64, tpu.core_type = #tpu.core_type<tc>, window_params = [{transform_indices = @transform_0, window_bounds = array<i64: 1, 64, 128>}, {pipeline_mode = #tpu.pipeline_mode<synchronous>, transform_indices = @transform_1, window_bounds = array<i64: 128, 128>}, {pipeline_mode = #tpu.pipeline_mode<synchronous>, transform_indices = @transform_2, window_bounds = array<i64: 1, 128>}, {pipeline_mode = #tpu.pipeline_mode<synchronous>, transform_indices = @transform_3, window_bounds = array<i64: 128, 128>}, {pipeline_mode = #tpu.pipeline_mode<synchronous>, transform_indices = @transform_4, window_bounds = array<i64: 1, 128>}, {transform_indices = @transform_5, window_bounds = array<i64: 1, 1, 128>}]} {
    %c0 = arith.constant 0 : index
    %c0_0 = arith.constant 0 : index
    %c0_1 = arith.constant 0 : index
    %0 = vector.load %arg1[%c0, %c0_0, %c0_1] : memref<1x64x128xf32, #tpu.memory_space<vmem>>, vector<1x64x128xf32>
    %1 = vector.shape_cast %0 : vector<1x64x128xf32> to vector<64x128xf32>
    %2 = arith.truncf %1 : vector<64x128xf32> to vector<64x128xbf16>
    %c0_2 = arith.constant 0 : index
    %c0_3 = arith.constant 0 : index
    %3 = vector.load %arg2[%c0_2, %c0_3] : memref<128x128xbf16, #tpu.memory_space<vmem>>, vector<128x128xbf16>
    %cst = arith.constant dense<0.000000e+00> : vector<64x128xf32>
    %4 = tpu.matmul %2, %3, %cst {dimension_numbers = #tpu.dot_dimension_numbers<[1], [0], [0], [1], [0, 0, 1, 1], [], []>} : vector<64x128xbf16>, vector<128x128xbf16>, vector<64x128xf32> -> vector<64x128xf32>
    %c0_4 = arith.constant 0 : index
    %c0_5 = arith.constant 0 : index
    %5 = vector.load %arg3[%c0_4, %c0_5] : memref<1x128xf32, #tpu.memory_space<vmem>>, vector<1x128xf32>
    %6 = vector.broadcast %5 : vector<1x128xf32> to vector<64x128xf32>
    %7 = arith.addf %4, %6 : vector<64x128xf32>
    %cst_6 = arith.constant dense<0.000000e+00> : vector<128xf32>
    %8 = vector.multi_reduction <add>, %7, %cst_6 [0] : vector<64x128xf32> to vector<128xf32>
    %9 = vector.shape_cast %8 : vector<128xf32> to vector<1x128xf32>
    %cst_7 = arith.constant 1.562500e-02 : f32
    %10 = vector.broadcast %cst_7 : f32 to vector<1x128xf32>
    %11 = arith.mulf %9, %10 : vector<1x128xf32>
    %12 = arith.truncf %11 : vector<1x128xf32> to vector<1x128xbf16>
    %c0_8 = arith.constant 0 : index
    %c0_9 = arith.constant 0 : index
    %13 = vector.load %arg4[%c0_8, %c0_9] : memref<128x128xbf16, #tpu.memory_space<vmem>>, vector<128x128xbf16>
    %cst_10 = arith.constant dense<0.000000e+00> : vector<1x128xf32>
    %14 = tpu.matmul %12, %13, %cst_10 {dimension_numbers = #tpu.dot_dimension_numbers<[1], [0], [0], [1], [0, 0, 1, 1], [], []>} : vector<1x128xbf16>, vector<128x128xbf16>, vector<1x128xf32> -> vector<1x128xf32>
    %c0_11 = arith.constant 0 : index
    %c0_12 = arith.constant 0 : index
    %15 = vector.load %arg5[%c0_11, %c0_12] : memref<1x128xf32, #tpu.memory_space<vmem>>, vector<1x128xf32>
    %16 = arith.addf %14, %15 : vector<1x128xf32>
    %c0_13 = arith.constant 0 : index
    %c0_14 = arith.constant 0 : index
    %c0_15 = arith.constant 0 : index
    %17 = vector.load %arg6[%c0_13, %c0_14, %c0_15] : memref<1x1x128xf32, #tpu.memory_space<vmem>>, vector<1x1x128xf32>
    %18 = vector.shape_cast %17 : vector<1x1x128xf32> to vector<1x128xf32>
    %19 = vector.shape_cast %16 : vector<1x128xf32> to vector<1x1x128xf32>
    tpu.vector_store %arg6[%c0_13, %c0_14, %c0_15], %19 {strides = array<i32>} : memref<1x1x128xf32, #tpu.memory_space<vmem>>, vector<1x1x128xf32>,
    return
  }
  func.func @transform_0(%arg0: i32) -> (i32, i32, i32) {
    %c0_i32 = arith.constant 0 : i32
    %c0_i32_0 = arith.constant 0 : i32
    %c0_i32_1 = arith.constant 0 : i32
    return %arg0, %c0_i32, %c0_i32_0 : i32, i32, i32
  }
  func.func @transform_1(%arg0: i32) -> (i32, i32) {
    %c0_i32 = arith.constant 0 : i32
    %c0_i32_0 = arith.constant 0 : i32
    %c0_i32_1 = arith.constant 0 : i32
    return %c0_i32, %c0_i32_0 : i32, i32
  }
  func.func @transform_2(%arg0: i32) -> (i32, i32) {
    %c0_i32 = arith.constant 0 : i32
    %c0_i32_0 = arith.constant 0 : i32
    %c0_i32_1 = arith.constant 0 : i32
    return %c0_i32, %c0_i32_0 : i32, i32
  }
  func.func @transform_3(%arg0: i32) -> (i32, i32) {
    %c0_i32 = arith.constant 0 : i32
    %c0_i32_0 = arith.constant 0 : i32
    %c0_i32_1 = arith.constant 0 : i32
    return %c0_i32, %c0_i32_0 : i32, i32
  }
  func.func @transform_4(%arg0: i32) -> (i32, i32) {
    %c0_i32 = arith.constant 0 : i32
    %c0_i32_0 = arith.constant 0 : i32
    %c0_i32_1 = arith.constant 0 : i32
    return %c0_i32, %c0_i32_0 : i32, i32
  }
  func.func @transform_5(%arg0: i32) -> (i32, i32, i32) {
    %c0_i32 = arith.constant 0 : i32
    %c0_i32_0 = arith.constant 0 : i32
    %c0_i32_1 = arith.constant 0 : i32
    return %arg0, %c0_i32, %c0_i32_0 : i32, i32, i32
  }
}

</mosaic_0001>

<bundles_post_ra>
// kernel: transformer_with_salt_forward.7
= control target key start
LH: loop header
LB: loop body
LE: loop exit
PB: predicated region body
PF: predicated region fallthrough
CT: control target
= control target key end

     0   :  { %10 = vsyncpa [#allocation3], 0  ;;  %s967_s0 = inlined_call_operand.vmem [shape: f32[2,64,128], index: 0, kind: input, shape index: {}]   ;;  %s968_s1 = inlined_call_operand.vmem [shape: bf16[128,128], index: 1, kind: input, shape index: {}]   ;;  %s969_s2 = inlined_call_operand.vmem [shape: f32[1,128], index: 2, kind: input, shape index: {}]   ;;  %s970_s3 = inlined_call_operand.vmem [shape: bf16[128,128], index: 3, kind: input, shape index: {}]   ;;  %s971_s4 = inlined_call_operand.vmem [shape: f32[1,128], index: 4, kind: input, shape index: {}]   ;;  %s972_s5 = inlined_call_operand.hbm [shape: f32[2,1,128], index: 5, kind: output, shape index: {}]  }
   0x1   :  { %12 = vsyncpa [#allocation3 + $0x1], 0  ;;  %s804_s18 = smov 0   ;;  %s806_s19 = smov 0  }
   0x2   :  { %s808_s20 = smov 0   ;;  %s810_s21 = smov 0  }
   0x3 LB: > { %s825_s22 = sadd.s32 4294967295, %s769_s21   ;;  %s560_s23 = sadd.s32 4294967294, %s769_s21   ;;  %s769_s21 = sphi %s810_s21, %s978_s21   ;;  %s765_s20 = sphi %s808_s20, %s977_s20   ;;  %s761_s19 = sphi %s806_s19, %s976_s19   ;;  %s757_s18 = sphi %s804_s18, %s975_s18  }
   0x4   : > { %s829_s24 = sadd.s32 1, %s769_s21   ;;  %s135_s25 = sadd.s32 1, %s765_s20 }
   0x5   : > { %s132_s26 = ssub.s32 %s769_s21, %s829_s24  ;;  %p145_p0 = scmp.ne.s32.totalorder %s765_s20, %s761_s19 }
   0x6   : > { %p133_p1 = scmp.eq.s32.totalorder %s132_s26, 0  ;;  %p146_p2 = scmp.eq.s32.totalorder %s825_s22, 1 }
   0x7   : > { %p151_p3 = scmp.ne.s32.totalorder %s761_s19, %s757_s18  ;;  %p152_p4 = scmp.eq.s32.totalorder %s560_s23, 1 }
   0x8   : > { %s840_s27 = scalar_select %p133_p1, %s765_s20, %s135_s25  }
   0x9   : > { %p842_p5 = por %p146_p2, %p145_p0  ;;  %p846_p6 = por %p152_p4, %p151_p3 }
   0xa   : > { %p563_p7 = scmp.ge.s32.totalorder %s769_s21, 1  ;;  %p190_p8 = scmp.lt.s32.totalorder %s769_s21, 3 }
   0xc   : > { %p191_p9 = pnand %p563_p7, %p190_p8 }
   0xd   : > { %p217_p10 = scmp.lt.s32.totalorder (!%p191_p9), %s825_s22, 1  ;;  %s583_s16 = sshll.u32 (!%p191_p9), %s825_s22, 4 }
   0xe   : > { %194 = sbr.rel (%p191_p9) target bundleno = 492 (0x1ec), region = 40  ;;  %s926_s26 = scalar_lea.hbm (!%p191_p9), %s972_s5, %s583_s16 }
  0x13   : > { %v693_v0 = vld [vmem:[%s968_s1 + $0x38] sm:$0xff]   ;;  %v694_v1 = vld [vmem:[%s968_s1 + $0x30] sm:$0xff]   ;;  %s218_s9 = scalar_select %p217_p10, %s825_s22, 1  ;;  %v695_v2 = vld [vmem:[%s968_s1 + $0x28] sm:$0xff]   ;;  %v771_v21 = vmov 0.0   ;;  %vm772_vm0 = vmmov 0  }
  0x14   : > { %608 = vmatprep.subr.bf16.mxu0 %v693_v0  ;;  %v696_v3 = vld [vmem:[%s968_s1 + $0x20] sm:$0xff]   ;;  %v697_v7 = vld [vmem:[%s968_s1 + $0x18] sm:$0xff]   ;;  %v698_v8 = vld [vmem:[%s968_s1 + $0x10] sm:$0xff]   ;;  %632 = vmatprep.subr.bf16.mxu1 %v771_v21  ;;  %s773_s22 = smov [#allocation2]  }
  0x15   : > { %609 = vmatpush3.bf16.msra.mxu0 %v693_v0  ;;  %s586_s12 = sshll.u32 %s218_s9, 6  ;;  %v699_v9 = vld [vmem:[%s968_s1 + $0x8] sm:$0xff]   ;;  %v700_v10 = vld [vmem:[%s968_s1] sm:$0xff]   ;;  %v701_v20 = vld [vmem:[%s970_s3 + $0x38] sm:$0xff]   ;;  %648 = vmatprep.mubr.msk.bf16.mxu1 %vm772_vm0, %v771_v21  ;;  %s713_s7 = sshll.u32 %s773_s22, 4  ;;  %s714_s7 = int_to_ptr.vmem [resolvable:$false] %s713_s7 }
  0x16   : > { %610 = vmatprep.subr.bf16.mxu0 %v694_v1  ;;  %s866_s15 = scalar_lea.vmem %s967_s0, %s586_s12  ;;  %633 = vmatpush3.bf16.msra.mxu1 %v701_v20  ;;  %v702_v22 = vld [vmem:[%s970_s3 + $0x30] sm:$0xff]   ;;  %v703_v23 = vld [vmem:[%s970_s3 + $0x28] sm:$0xff]   ;;  %v704_v24 = vld [vmem:[%s970_s3 + $0x20] sm:$0xff]   ;;  %s215_s12 = sand.u32 1, %s761_s19  }
  0x17   : > { %v223_v4 = vld [vmem:[%s866_s15] sm:$0xff]  ;;  %v224_v5 = vld [vmem:[%s866_s15 + $0x8] sm:$0xff]  ;;  %v225_v11 = vld [vmem:[%s866_s15 + $0x10] sm:$0xff]  ;;  %634 = vmatprep.subr.bf16.mxu1 %v771_v21  ;;  %s493_s30 = scalar_lea.sflag [#allocation3], %s215_s12  ;;  %s715_s8 = scalar_lea.vmem %s714_s7, 32 }
  0x18   : > { %v231_v6 = vpack.c.bf16 %v224_v5, %v223_v4  ;;  %v226_v12 = vld [vmem:[%s866_s15 + $0x18] sm:$0xff]  ;;  %v227_v13 = vld [vmem:[%s866_s15 + $0x20] sm:$0xff]  ;;  %v228_v14 = vld [vmem:[%s866_s15 + $0x28] sm:$0xff] }
  0x19   : > { %611 = vmatpush3.bf16.msra.mxu0 %v694_v1  ;;  %v232_v15 = vpack.c.bf16 %v226_v12, %v225_v11  ;;  %v233_v16 = vpack.c.bf16 %v228_v14, %v227_v13  ;;  %v229_v17 = vld [vmem:[%s866_s15 + $0x30] sm:$0xff]  ;;  %v230_v18 = vld [vmem:[%s866_s15 + $0x38] sm:$0xff]  ;;  %v707_v27 = vld [vmem:[%s970_s3 + $0x8] sm:$0xff]   ;;  %s216_s15 = scalar_lea.vmem [#allocation2], %s215_s12 }
  0x1a   : > { %612 = vmatprep.subr.bf16.mxu0 %v695_v2  ;;  %624 = vmatprep.mubr.bf16.mxu0 %v231_v6  ;;  %v234_v19 = vpack.c.bf16 %v230_v18, %v229_v17  ;;  %v705_v25 = vld [vmem:[%s970_s3 + $0x18] sm:$0xff]   ;;  %v706_v26 = vld [vmem:[%s970_s3 + $0x10] sm:$0xff]   ;;  %v708_v28 = vld [vmem:[%s970_s3] sm:$0xff]   ;;  %s505_s17 = sshll.u32 %s216_s15, 4  ;;  %s928_s17 = int_to_ptr.vmem [resolvable:$true] %s505_s17 }
  0x1b   : > { %635 = vmatpush3.bf16.msra.mxu1 %v702_v22  ;;  %v566_v32 = vld [vmem:[%s969_s2] ss:$0 sm:$0xff]  ;;  %s709_s6 = scalar_lea.vmem %s928_s17, 16  ;;  %p716_p0 = scmp.lt.s32.totalorder %s928_s17, %s714_s7 }
  0x1c   : > { %636 = vmatprep.subr.bf16.mxu1 %v771_v21  ;;  %v402_v61 = vld [vmem:[%s971_s4] sm:$0x1]  ;;  %p710_p11 = scmp.ne.s32.totalorder %s928_s17, %s709_s6  ;;  %p717_p1 = scmp.lt.s32.totalorder %s715_s8, %s709_s6 }
  0x1d   : > { %613 = vmatpush3.bf16.msra.mxu0 %v695_v2 }
  0x1e   : > { %614 = vmatprep.subr.bf16.mxu0 %v696_v3  ;;  %p711_p12 = pnand %p710_p11, %p842_p5  ;;  %p718_p2 = por %p717_p1, %p716_p0 }
  0x1f   : > { %637 = vmatpush3.bf16.msra.mxu1 %v703_v23 }
  0x20   : > { %638 = vmatprep.subr.bf16.mxu1 %v771_v21  ;;  %p712_p13 = pneg %p711_p12 }
  0x21   : > { %615 = vmatpush3.bf16.msra.mxu0 %v696_v3 }
  0x22   : > { %616 = vmatprep.subr.bf16.mxu0 %v697_v7  ;;  %p719_p3 = pnand %p718_p2, %p712_p13 }
  0x23   : > { %639 = vmatpush3.bf16.msra.mxu1 %v704_v24 }
  0x24   : > { %640 = vmatprep.subr.bf16.mxu1 %v771_v21 }
  0x25   : > { %617 = vmatpush3.bf16.msra.mxu0 %v697_v7 }
  0x26   : > { %618 = vmatprep.subr.bf16.mxu0 %v698_v8 }
  0x27   : > { %641 = vmatpush3.bf16.msra.mxu1 %v705_v25 }
  0x28   : > { %642 = vmatprep.subr.bf16.mxu1 %v771_v21 }
  0x29   : > { %619 = vmatpush3.bf16.msra.mxu0 %v698_v8 }
  0x2a   : > { %620 = vmatprep.subr.bf16.mxu0 %v699_v9 }
  0x2b   : > { %643 = vmatpush3.bf16.msra.mxu1 %v706_v26 }
  0x2c   : > { %644 = vmatprep.subr.bf16.mxu1 %v771_v21 }
  0x2d   : > { %621 = vmatpush3.bf16.msra.mxu0 %v699_v9 }
  0x2e   : > { %622 = vmatprep.subr.bf16.mxu0 %v700_v10 }
  0x2f   : > { %645 = vmatpush3.bf16.msra.mxu1 %v707_v27 }
  0x30   : > { %646 = vmatprep.subr.bf16.mxu1 %v771_v21 }
  0x31   : > { %623 = vmatpush3.bf16.msra.mxu0 %v700_v10 }
  0x33   : > { %647 = vmatpush3.bf16.msra.mxu1 %v708_v28 }
  0x34   : > { %625 = vmatmul.mubr.bf16.vlgmr.msra.gmra.mxu0 %v232_v15 }
  0x35   : > { %628 = vmatprep.mubr.bf16.mxu0 %v233_v16 }
  0x3c   : > { %629 = vmatmul.mubr.bf16.gmra.mxu0 %v234_v19 }
  0xf4   : > { %v626_v29 = vpop.f32.mrf.mxu0 }
  0xf5   : > { %v349_v37 = vadd.f32 %v626_v29, %v566_v32 }
  0xf6   : > { %v340_v30 = vpop.f32.mrf.mxu0 }
  0xf7   : > { %v341_v34 = vadd.f32 %v566_v32, %v340_v30 }
  0xf8   : > { %v627_v31 = vpop.f32.mrf.mxu0 }
  0xf9   : > { %v352_v40 = vadd.f32 %v627_v31, %v566_v32 }
  0xfa   : > { %v343_v33 = vpop.f32.mrf.mxu0 }
  0xfb   : > { %v344_v35 = vadd.f32 %v566_v32, %v343_v33 }
  0xfc   : > { %v630_v36 = vpop.f32.mrf.mxu0 }
  0xfd   : > { %v371_v38 = vadd.f32 %v344_v35, %v341_v34  ;;  %v365_v48 = vadd.f32 %v630_v36, %v566_v32 }
  0xfe   : > { %v356_v39 = vpop.f32.mrf.mxu0 }
  0xff   : > { %v372_v41 = vadd.f32 %v371_v38, %v349_v37  ;;  %v357_v43 = vadd.f32 %v566_v32, %v356_v39 }
 0x100   : > { %v631_v42 = vpop.f32.mrf.mxu0 }
 0x101   : > { %v373_v44 = vadd.f32 %v372_v41, %v352_v40  ;;  %v368_v50 = vadd.f32 %v631_v42, %v566_v32 }
 0x102   : > { %v359_v45 = vpop.f32.mrf.mxu0 }
 0x103   : > { %v374_v46 = vadd.f32 %v373_v44, %v357_v43  ;;  %v360_v47 = vadd.f32 %v566_v32, %v359_v45 }
 0x105   : > { %v375_v49 = vadd.f32 %v374_v46, %v360_v47 }
 0x107   : > { %v376_v51 = vadd.f32 %v375_v49, %v365_v48 }
 0x109   : > { %v377_v52 = vadd.f32 %v376_v51, %v368_v50 }
 0x10b   : > { %v378_v53 = vrot.slane %v377_v52, 4 }
 0x10d   : > { %v379_v54 = vadd.f32 %v378_v53, %v377_v52 }
 0x10f   : > { %v380_v55 = vrot.slane %v379_v54, 2 }
 0x111   : > { %v381_v56 = vadd.f32 %v380_v55, %v379_v54 }
 0x113   : > { %v382_v57 = vrot.slane %v381_v56, 1 }
 0x115   : > { %v383_v58 = vadd.f32 %v382_v57, %v381_v56 }
 0x117   : > { %v384_v59 = vmul.f32 0.015625, %v383_v58 }
 0x119   : > { %v385_v60 = vpack.c.bf16 %v384_v59, %v384_v59 }
 0x11b   : > { %649 = vmatmul.mubr.bf16.vlgmr.msra.gmra.mxu1 %v385_v60 }
 0x1db   : > { %v485_v62 = vpop.f32.mrf.mxu1 }
 0x1dc   : > { %v486_v63 = vadd.f32 %v485_v62, %v402_v61 }
 0x1dd   : > { %v650_v0 = vpop.f32.mrf.mxu1 }
 0x1de   : > { %491 = vst [vmem:[%s216_s15] sm:$0x1] %v486_v63 }
 0x1df   : > { %v488_v1 = vpop.f32.mrf.mxu1 }
 0x1e0   : > { %722 = shalt.err (!%p719_p3)
}
 0x1e1   : > { %s723_s9 = scalar_lea.hbm %s926_s26, 16  ;;  %s727_s12 = scalar_lea.hbm %s972_s5, 32 }
 0x1e2   : > { %p724_p4 = scmp.ne.s32.totalorder %s926_s26, %s723_s9  ;;  %p728_p9 = scmp.lt.s32.totalorder %s926_s26, %s972_s5 }
 0x1e3   : > { %p729_p10 = scmp.lt.s32.totalorder %s727_s12, %s723_s9 }
 0x1e4   : > { %p725_p7 = pnand %p724_p4, %p842_p5 }
 0x1e5   : > { %p730_p11 = por %p729_p10, %p728_p9 }
 0x1e6   : > { %p726_p8 = pneg %p725_p7 }
 0x1e8   : > { %p731_p12 = pnand %p730_p11, %p726_p8 }
 0x1ea   : > { %734 = shalt.err (!%p731_p12)
}
 0x1eb   : > { %652 = dma.vmem_to_hbm [thread:$0]  (%p842_p5), %s928_s17, 16, %s926_s26, %s493_s30   ;;  %v651_v2 = vpop.f32.mrf.mxu1 }
 0x1ec PF: > { %p658_p13 = scmp.ge.s32.totalorder %s769_s21, 2  ;;  %s517_s16 = sand.u32 1, %s757_s18  }
 0x1ed   : > { %s518_s15 = scalar_lea.sflag [#allocation3], %s517_s16 }
 0x1ee   : > { %p655_p0 = pnand %p658_p13, %p846_p6 }
 0x1f0   : > { %p656_p1 = pneg %p655_p0 }
 0x1f2   : > { %752 = dma.done.wait (%p656_p1), %s518_s15, 16  }
 0x1f3   : > { %754 = vsyncadd (%p656_p1), %s518_s15, 4294967280  ;;  %p15_p2 = scmp.ge.s32.totalorder %s829_s24, 4   ;;  %s975_s18 = smov %s761_s19 }
 0x1f4   : > { %s976_s19 = smov %s765_s20  ;;  %s977_s20 = smov %s840_s27 }
 0x1f5   : > { %s978_s21 = smov %s829_s24  ;;  %17 = sbr.rel (!%p15_p2) target bundleno = 3 (0x3), region = 75 }
 0x1fa   :  { %522 = vsyncpa [#allocation3], 1 }
 0x1fb   :  { %524 = vsyncpa [#allocation3 + $0x1], 1 }

// kernel: transformer_with_salt_forward.4
= control target key start
LH: loop header
LB: loop body
LE: loop exit
PB: predicated region body
PF: predicated region fallthrough
CT: control target
= control target key end

     0   :  { %s8496_s21 = smov 0   ;;  %s10724_s0 = inlined_call_operand.vmem [shape: f32[2,328,128], index: 0, kind: input, shape index: {}]   ;;  %s10725_s1 = inlined_call_operand.vmem [shape: f32[288,128], index: 1, kind: input, shape index: {}]   ;;  %s10726_s2 = inlined_call_operand.vmem [shape: bf16[9,128,128], index: 2, kind: input, shape index: {}]   ;;  %s10727_s3 = inlined_call_operand.vmem [shape: f32[1,128], index: 3, kind: input, shape index: {}]   ;;  %s10728_s4 = inlined_call_operand.vmem [shape: bf16[9,128,128], index: 4, kind: input, shape index: {}]   ;;  %s10729_s5 = inlined_call_operand.vmem [shape: f32[1,128], index: 5, kind: input, shape index: {}]   ;;  %s10730_s6 = inlined_call_operand.vmem [shape: f32[2,288,128], index: 6, kind: output, shape index: {}]  }
   0x1 LB: > { %s6481_s22 = sadd.s32 4294967295, %s8457_s21   ;;  %p6485_p0 = scmp.ge.s32.totalorder %s8457_s21, 1  ;;  %s8457_s21 = sphi %s8496_s21, %s16_s21  }
   0x2   : > { %p212_p1 = scmp.lt.s32.totalorder %s8457_s21, 3 }
   0x4   : > { %p213_p2 = pnand %p6485_p0, %p212_p1 }
   0x6   : > { %216 = sbr.rel (%p213_p2) target bundleno = 1111 (0x457), region = 44 }
   0xb   : > { %v8307_v0 = vld [vmem:[%s10726_s2 + $0x78] sm:$0xff]   ;;  %p242_p3 = scmp.lt.s32.totalorder %s6481_s22, 1  ;;  %v8309_v2 = vld [vmem:[%s10726_s2 + $0x70] sm:$0xff]   ;;  %v8311_v4 = vld [vmem:[%s10726_s2 + $0x68] sm:$0xff]  }
   0xc   : > { %v8308_v1 = vld [vmem:[%s10726_s2 + $0x38] sm:$0xff]   ;;  %7360 = vmatprep.subr.bf16.mxu0 %v8307_v0  ;;  %v8310_v3 = vld [vmem:[%s10726_s2 + $0x30] sm:$0xff]   ;;  %v8312_v5 = vld [vmem:[%s10726_s2 + $0x28] sm:$0xff]  }
   0xd   : > { %7412 = vmatprep.subr.bf16.mxu1 %v8308_v1  ;;  %7361 = vmatpush3.bf16.msra.mxu0 %v8307_v0  ;;  %s10816_s22 = smov (!%p242_p3, %s6481_s22), 1  ;;  %v8313_v6 = vld [vmem:[%s10726_s2 + $0x60] sm:$0xff]   ;;  %v8315_v8 = vld [vmem:[%s10726_s2 + $0x58] sm:$0xff]   ;;  %v8317_v10 = vld [vmem:[%s10726_s2 + $0x50] sm:$0xff]  }
   0xe   : > { %7413 = vmatpush3.bf16.msra.mxu1 %v8308_v1  ;;  %7362 = vmatprep.subr.bf16.mxu0 %v8309_v2  ;;  %v8314_v7 = vld [vmem:[%s10726_s2 + $0x20] sm:$0xff]   ;;  %s8296_s15 = smul.u32 328, %s10816_s22  ;;  %v8316_v9 = vld [vmem:[%s10726_s2 + $0x18] sm:$0xff]   ;;  %v8318_v14 = vld [vmem:[%s10726_s2 + $0x10] sm:$0xff]  }
   0xf   : > { %7414 = vmatprep.subr.bf16.mxu1 %v8310_v3  ;;  %v8319_v18 = vld [vmem:[%s10726_s2 + $0x48] sm:$0xff]   ;;  %v8321_v20 = vld [vmem:[%s10726_s2 + $0x40] sm:$0xff]   ;;  %v8323_v26 = vld [vmem:[%s10726_s2 + $0xb8] sm:$0xff]   ;;  %s8297_s18 = smul.u32 288, %s10816_s22 }
  0x10   : > { %s8540_s24 = scalar_lea.vmem %s10724_s0, %s8296_s15  ;;  %v8320_v19 = vld [vmem:[%s10726_s2 + $0x8] sm:$0xff]   ;;  %v8322_v21 = vld [vmem:[%s10726_s2] sm:$0xff]   ;;  %v8324_v35 = vld [vmem:[%s10726_s2 + $0xb0] sm:$0xff]  }
  0x11   : > { %7363 = vmatpush3.bf16.msra.mxu0 %v8309_v2  ;;  %v323_v11 = vld [vmem:[%s8540_s24 + $0x1] sm:$0xff]  ;;  %v324_v12 = vld [vmem:[%s8540_s24 + $0x9] sm:$0xff]  ;;  %v325_v22 = vld [vmem:[%s8540_s24 + $0x11] sm:$0xff]  ;;  %s10580_s25 = scalar_lea.vmem %s10730_s6, %s8297_s18 }
  0x12   : > { %7415 = vmatpush3.bf16.msra.mxu1 %v8310_v3  ;;  %7364 = vmatprep.subr.bf16.mxu0 %v8311_v4  ;;  %v253_v13 = vld [vmem:[%s8540_s24] sm:$0xff]  ;;  %v359_v15 = vpack.c.bf16 %v324_v12, %v323_v11  ;;  %v254_v16 = vld [vmem:[%s8540_s24 + $0x8] sm:$0xff]  ;;  %v255_v24 = vld [vmem:[%s8540_s24 + $0x10] sm:$0xff] }
  0x13   : > { %7416 = vmatprep.subr.bf16.mxu1 %v8312_v5  ;;  %v289_v17 = vpack.c.bf16 %v254_v16, %v253_v13  ;;  %v326_v23 = vld [vmem:[%s8540_s24 + $0x19] sm:$0xff]  ;;  %v327_v27 = vld [vmem:[%s8540_s24 + $0x21] sm:$0xff]  ;;  %v328_v28 = vld [vmem:[%s8540_s24 + $0x29] sm:$0xff] }
  0x14   : > { %7376 = vmatprep.mubr.bf16.mxu0 %v359_v15  ;;  %v256_v25 = vld [vmem:[%s8540_s24 + $0x18] sm:$0xff]  ;;  %v257_v29 = vld [vmem:[%s8540_s24 + $0x20] sm:$0xff]  ;;  %v258_v30 = vld [vmem:[%s8540_s24 + $0x28] sm:$0xff]  ;;  %v360_v31 = vpack.c.bf16 %v326_v23, %v325_v22  ;;  %v361_v33 = vpack.c.bf16 %v328_v28, %v327_v27 }
  0x15   : > { %7365 = vmatpush3.bf16.msra.mxu0 %v8311_v4  ;;  %7428 = vmatprep.mubr.bf16.mxu1 %v289_v17  ;;  %v290_v32 = vpack.c.bf16 %v256_v25, %v255_v24  ;;  %v291_v34 = vpack.c.bf16 %v258_v30, %v257_v29  ;;  %v329_v36 = vld [vmem:[%s8540_s24 + $0x31] sm:$0xff]  ;;  %v330_v37 = vld [vmem:[%s8540_s24 + $0x39] sm:$0xff]  ;;  %v331_v40 = vld [vmem:[%s8540_s24 + $0x41] sm:$0xff] }
  0x16   : > { %7417 = vmatpush3.bf16.msra.mxu1 %v8312_v5  ;;  %7366 = vmatprep.subr.bf16.mxu0 %v8313_v6  ;;  %v259_v38 = vld [vmem:[%s8540_s24 + $0x30] sm:$0xff]  ;;  %v260_v39 = vld [vmem:[%s8540_s24 + $0x38] sm:$0xff]  ;;  %v261_v42 = vld [vmem:[%s8540_s24 + $0x40] sm:$0xff]  ;;  %v362_v46 = vpack.c.bf16 %v330_v37, %v329_v36 }
  0x17   : > { %7418 = vmatprep.subr.bf16.mxu1 %v8314_v7  ;;  %v332_v41 = vld [vmem:[%s8540_s24 + $0x49] sm:$0xff]  ;;  %v8328_v45 = vld [vmem:[%s10726_s2 + $0xf8] sm:$0xff]   ;;  %v292_v47 = vpack.c.bf16 %v260_v39, %v259_v38  ;;  %v8326_v53 = vld [vmem:[%s10726_s2 + $0xa0] sm:$0xff]  }
  0x18   : > { %v262_v43 = vld [vmem:[%s8540_s24 + $0x48] sm:$0xff]  ;;  %v363_v48 = vpack.c.bf16 %v332_v41, %v331_v40  ;;  %v8330_v49 = vld [vmem:[%s10726_s2 + $0xf0] sm:$0xff]   ;;  %v334_v52 = vld [vmem:[%s8540_s24 + $0x59] sm:$0xff] }
  0x19   : > { %7367 = vmatpush3.bf16.msra.mxu0 %v8313_v6  ;;  %v8325_v44 = vld [vmem:[%s10726_s2 + $0xa8] sm:$0xff]   ;;  %v293_v50 = vpack.c.bf16 %v262_v43, %v261_v42  ;;  %v333_v51 = vld [vmem:[%s8540_s24 + $0x51] sm:$0xff]  ;;  %v265_v59 = vld [vmem:[%s8540_s24 + $0x60] sm:$0xff] }
  0x1a   : > { %7419 = vmatpush3.bf16.msra.mxu1 %v8314_v7  ;;  %7368 = vmatprep.subr.bf16.mxu0 %v8315_v8  ;;  %v263_v54 = vld [vmem:[%s8540_s24 + $0x50] sm:$0xff]  ;;  %v264_v55 = vld [vmem:[%s8540_s24 + $0x58] sm:$0xff]  ;;  %v335_v56 = vld [vmem:[%s8540_s24 + $0x61] sm:$0xff]  ;;  %v364_v62 = vpack.c.bf16 %v334_v52, %v333_v51 }
  0x1b   : > { %7420 = vmatprep.subr.bf16.mxu1 %v8316_v9  ;;  %v336_v57 = vld [vmem:[%s8540_s24 + $0x69] sm:$0xff]  ;;  %v8327_v61 = vld [vmem:[%s10726_s2 + $0x98] sm:$0xff]   ;;  %v8333_v63 = vld [vmem:[%s10726_s2 + $0xe0] sm:$0xff]   ;;  %v294_v0 = vpack.c.bf16 %v264_v55, %v263_v54 }
  0x1c   : > { %v8331_v58 = vld [vmem:[%s10726_s2 + $0xe8] sm:$0xff]   ;;  %v365_v1 = vpack.c.bf16 %v336_v57, %v335_v56  ;;  %v8329_v3 = vld [vmem:[%s10726_s2 + $0x90] sm:$0xff]   ;;  %v338_v5 = vld [vmem:[%s8540_s24 + $0x79] sm:$0xff] }
  0x1d   : > { %7369 = vmatpush3.bf16.msra.mxu0 %v8315_v8  ;;  %v266_v60 = vld [vmem:[%s8540_s24 + $0x68] sm:$0xff]  ;;  %v337_v4 = vld [vmem:[%s8540_s24 + $0x71] sm:$0xff]  ;;  %v269_v11 = vld [vmem:[%s8540_s24 + $0x80] sm:$0xff] }
  0x1e   : > { %7421 = vmatpush3.bf16.msra.mxu1 %v8316_v9  ;;  %7370 = vmatprep.subr.bf16.mxu0 %v8317_v10  ;;  %v295_v2 = vpack.c.bf16 %v266_v60, %v265_v59  ;;  %v8334_v6 = vld [vmem:[%s10726_s2 + $0xd8] sm:$0xff]   ;;  %v267_v7 = vld [vmem:[%s8540_s24 + $0x70] sm:$0xff]  ;;  %v339_v9 = vld [vmem:[%s8540_s24 + $0x81] sm:$0xff] }
  0x1f   : > { %7422 = vmatprep.subr.bf16.mxu1 %v8318_v14  ;;  %v268_v8 = vld [vmem:[%s8540_s24 + $0x78] sm:$0xff]  ;;  %v270_v12 = vld [vmem:[%s8540_s24 + $0x88] sm:$0xff]  ;;  %v8335_v15 = vld [vmem:[%s10726_s2 + $0xd0] sm:$0xff]  }
  0x20   : > { %v8332_v13 = vld [vmem:[%s10726_s2 + $0x88] sm:$0xff]   ;;  %v296_v16 = vpack.c.bf16 %v268_v8, %v267_v7  ;;  %v271_v23 = vld [vmem:[%s8540_s24 + $0x90] sm:$0xff]  ;;  %v272_v24 = vld [vmem:[%s8540_s24 + $0x98] sm:$0xff] }
  0x21   : > { %7371 = vmatpush3.bf16.msra.mxu0 %v8317_v10  ;;  %v340_v10 = vld [vmem:[%s8540_s24 + $0x89] sm:$0xff]  ;;  %v343_v25 = vld [vmem:[%s8540_s24 + $0xa1] sm:$0xff]  ;;  %v8652_v29 = vld [vmem:[%s10726_s2 + $0x138] sm:$0xff]  }
  0x22   : > { %7423 = vmatpush3.bf16.msra.mxu1 %v8318_v14  ;;  %7372 = vmatprep.subr.bf16.mxu0 %v8319_v18  ;;  %v366_v14 = vpack.c.bf16 %v338_v5, %v337_v4  ;;  %v367_v17 = vpack.c.bf16 %v340_v10, %v339_v9  ;;  %v8337_v22 = vld [vmem:[%s10726_s2 + $0xc8] sm:$0xff]   ;;  %v273_v27 = vld [vmem:[%s8540_s24 + $0xa0] sm:$0xff]  ;;  %v275_v37 = vld [vmem:[%s8540_s24 + $0xb0] sm:$0xff] }
  0x23   : > { %7424 = vmatprep.subr.bf16.mxu1 %v8320_v19  ;;  %v274_v28 = vld [vmem:[%s8540_s24 + $0xa8] sm:$0xff]  ;;  %v346_v36 = vld [vmem:[%s8540_s24 + $0xb9] sm:$0xff]  ;;  %v353_v60 = vld [vmem:[%s8540_s24 + $0xf1] sm:$0xff] }
  0x24   : > { %v276_v38 = vld [vmem:[%s8540_s24 + $0xb8] sm:$0xff]  ;;  %v347_v39 = vld [vmem:[%s8540_s24 + $0xc1] sm:$0xff]  ;;  %v348_v40 = vld [vmem:[%s8540_s24 + $0xc9] sm:$0xff] }
  0x25   : > { %7373 = vmatpush3.bf16.msra.mxu0 %v8319_v18  ;;  %v297_v18 = vpack.c.bf16 %v270_v12, %v269_v11  ;;  %v277_v41 = vld [vmem:[%s8540_s24 + $0xc0] sm:$0xff]  ;;  %v278_v42 = vld [vmem:[%s8540_s24 + $0xc8] sm:$0xff]  ;;  %v280_v51 = vld [vmem:[%s8540_s24 + $0xd8] sm:$0xff] }
  0x26   : > { %7425 = vmatpush3.bf16.msra.mxu1 %v8320_v19  ;;  %7374 = vmatprep.subr.bf16.mxu0 %v8321_v20  ;;  %v8336_v19 = vld [vmem:[%s10726_s2 + $0x80] sm:$0xff]   ;;  %v282_v55 = vld [vmem:[%s8540_s24 + $0xe8] sm:$0xff]  ;;  %v357_v8 = vld [vmem:[%s8540_s24 + $0x111] sm:$0xff] }
  0x27   : > { %7426 = vmatprep.subr.bf16.mxu1 %v8322_v21  ;;  %v351_v52 = vld [vmem:[%s8540_s24 + $0xe1] sm:$0xff]  ;;  %v358_v9 = vld [vmem:[%s8540_s24 + $0x119] sm:$0xff]  ;;  %v287_v10 = vld [vmem:[%s8540_s24 + $0x110] sm:$0xff] }
  0x28   : > { %v281_v54 = vld [vmem:[%s8540_s24 + $0xe0] sm:$0xff]  ;;  %v288_v11 = vld [vmem:[%s8540_s24 + $0x118] sm:$0xff] }
  0x29   : > { %7375 = vmatpush3.bf16.msra.mxu0 %v8321_v20  ;;  %v341_v20 = vld [vmem:[%s8540_s24 + $0x91] sm:$0xff]  ;;  %v303_v59 = vpack.c.bf16 %v282_v55, %v281_v54  ;;  %v844_v12 = vld [vmem:[%s8540_s24 + $0x2] sm:$0xff] }
  0x2a   : > { %7427 = vmatpush3.bf16.msra.mxu1 %v8322_v21  ;;  %7464 = vmatprep.subr.bf16.mxu0 %v8323_v26  ;;  %v342_v21 = vld [vmem:[%s8540_s24 + $0x99] sm:$0xff] }
  0x2b   : > { %7516 = vmatprep.subr.bf16.mxu1 %v8328_v45  ;;  %v368_v30 = vpack.c.bf16 %v342_v21, %v341_v20  ;;  %v1178_v20 = vld [vmem:[%s8540_s24 + $0x22] sm:$0xff]  ;;  %v1179_v21 = vld [vmem:[%s8540_s24 + $0x2a] sm:$0xff] }
  0x2c   : > { %7377 = vmatmul.mubr.bf16.vlgmr.msra.gmra.mxu0 %v360_v31  ;;  %v8338_v31 = vld [vmem:[%s10726_s2 + $0xc0] sm:$0xff]  }
  0x2d   : > { %7429 = vmatmul.mubr.bf16.vlgmr.msra.gmra.mxu1 %v290_v32  ;;  %7465 = vmatpush3.bf16.msra.mxu0 %v8323_v26  ;;  %v344_v26 = vld [vmem:[%s8540_s24 + $0xa9] sm:$0xff]  ;;  %v298_v32 = vpack.c.bf16 %v272_v24, %v271_v23  ;;  %v851_v23 = vld [vmem:[%s8540_s24 + $0x3a] sm:$0xff]  ;;  %v1213_v24 = vpack.c.bf16 %v1179_v21, %v1178_v20 }
  0x2e   : > { %7380 = vmatprep.mubr.bf16.mxu0 %v361_v33  ;;  %7432 = vmatprep.mubr.bf16.mxu1 %v291_v34  ;;  %v369_v33 = vpack.c.bf16 %v344_v26, %v343_v25  ;;  %v299_v34 = vpack.c.bf16 %v274_v28, %v273_v27  ;;  %v8340_v26 = vld [vmem:[%s10726_s2 + $0x130] sm:$0xff]   ;;  %v1182_v28 = vld [vmem:[%s8540_s24 + $0x42] sm:$0xff] }
  0x2f   : > { %7466 = vmatprep.subr.bf16.mxu0 %v8324_v35  ;;  %7517 = vmatpush3.bf16.msra.mxu1 %v8328_v45  ;;  %v300_v45 = vpack.c.bf16 %v276_v38, %v275_v37  ;;  %v8346_v27 = vld [vmem:[%s10726_s2 + $0x170] sm:$0xff]   ;;  %v8349_v37 = vld [vmem:[%s10726_s2 + $0x160] sm:$0xff]  }
  0x30   : > { %7518 = vmatprep.subr.bf16.mxu1 %v8330_v49  ;;  %v1186_v38 = vld [vmem:[%s8540_s24 + $0x62] sm:$0xff]  ;;  %v1211_v21 = vld [vmem:[%s8540_s24 + $0x12a] sm:$0xff] }
  0x31   : > { %7467 = vmatpush3.bf16.msra.mxu0 %v8324_v35  ;;  %v345_v35 = vld [vmem:[%s8540_s24 + $0xb1] sm:$0xff]  ;;  %v1210_v20 = vld [vmem:[%s8540_s24 + $0x122] sm:$0xff] }
  0x32   : > { %7468 = vmatprep.subr.bf16.mxu0 %v8325_v44  ;;  %v370_v43 = vpack.c.bf16 %v346_v36, %v345_v35  ;;  %v8342_v36 = vld [vmem:[%s10726_s2 + $0x120] sm:$0xff]  }
  0x33   : > { %7519 = vmatpush3.bf16.msra.mxu1 %v8330_v49  ;;  %v350_v49 = vld [vmem:[%s8540_s24 + $0xd9] sm:$0xff] }
  0x34   : > { %7381 = vmatmul.mubr.bf16.gmra.mxu0 %v362_v46  ;;  %7520 = vmatprep.subr.bf16.mxu1 %v8331_v58  ;;  %v371_v46 = vpack.c.bf16 %v348_v40, %v347_v39  ;;  %v1187_v39 = vld [vmem:[%s8540_s24 + $0x6a] sm:$0xff]  ;;  %v858_v40 = vld [vmem:[%s8540_s24 + $0x72] sm:$0xff] }
  0x35   : > { %7433 = vmatmul.mubr.bf16.gmra.mxu1 %v292_v47  ;;  %7384 = vmatprep.mubr.bf16.mxu0 %v363_v48  ;;  %v301_v47 = vpack.c.bf16 %v278_v42, %v277_v41  ;;  %v349_v48 = vld [vmem:[%s8540_s24 + $0xd1] sm:$0xff]  ;;  %v859_v41 = vld [vmem:[%s8540_s24 + $0x7a] sm:$0xff] }
  0x36   : > { %7436 = vmatprep.mubr.bf16.mxu1 %v293_v50  ;;  %7469 = vmatpush3.bf16.msra.mxu0 %v8325_v44  ;;  %v8669_v44 = vld [vmem:[%s10726_s2 + $0x178] sm:$0xff]   ;;  %v279_v50 = vld [vmem:[%s8540_s24 + $0xd0] sm:$0xff]  ;;  %v372_v56 = vpack.c.bf16 %v350_v49, %v349_v48 }
  0x37   : > { %7470 = vmatprep.subr.bf16.mxu0 %v8326_v53  ;;  %7521 = vmatpush3.bf16.msra.mxu1 %v8331_v58  ;;  %v302_v57 = vpack.c.bf16 %v280_v51, %v279_v50  ;;  %v8343_v42 = vld [vmem:[%s10726_s2 + $0x118] sm:$0xff]   ;;  %v8351_v48 = vld [vmem:[%s10726_s2 + $0x150] sm:$0xff]  }
  0x38   : > { %7522 = vmatprep.subr.bf16.mxu1 %v8333_v63  ;;  %v1191_v49 = vld [vmem:[%s8540_s24 + $0x8a] sm:$0xff]  ;;  %v862_v50 = vld [vmem:[%s8540_s24 + $0x92] sm:$0xff]  ;;  %v863_v51 = vld [vmem:[%s8540_s24 + $0x9a] sm:$0xff] }
  0x39   : > { %v889_v55 = vpack.c.bf16 %v863_v51, %v862_v50  ;;  %v1848_v50 = vld [vmem:[%s8540_s24 + $0x54] sm:$0xff]  ;;  %v1849_v51 = vld [vmem:[%s8540_s24 + $0x5c] sm:$0xff] }
  0x3a   : > { %7471 = vmatpush3.bf16.msra.mxu0 %v8326_v53  ;;  %v352_v53 = vld [vmem:[%s8540_s24 + $0xe9] sm:$0xff] }
  0x3b   : > { %7472 = vmatprep.subr.bf16.mxu0 %v8327_v61  ;;  %7523 = vmatpush3.bf16.msra.mxu1 %v8333_v63  ;;  %v373_v58 = vpack.c.bf16 %v352_v53, %v351_v52  ;;  %v284_v63 = vld [vmem:[%s8540_s24 + $0xf8] sm:$0xff]  ;;  %v8348_v52 = vld [vmem:[%s10726_s2 + $0x108] sm:$0xff]  }
  0x3c   : > { %7385 = vmatmul.mubr.bf16.gmra.mxu0 %v364_v62  ;;  %7524 = vmatprep.subr.bf16.mxu1 %v8334_v6  ;;  %v283_v62 = vld [vmem:[%s8540_s24 + $0xf0] sm:$0xff]  ;;  %v8353_v53 = vld [vmem:[%s10726_s2 + $0x148] sm:$0xff]  }
  0x3d   : > { %7437 = vmatmul.mubr.bf16.gmra.mxu1 %v294_v0  ;;  %7388 = vmatprep.mubr.bf16.mxu0 %v365_v1  ;;  %v355_v0 = vld [vmem:[%s8540_s24 + $0x101] sm:$0xff]  ;;  %v356_v1 = vld [vmem:[%s8540_s24 + $0x109] sm:$0xff]  ;;  %v304_v5 = vpack.c.bf16 %v284_v63, %v283_v62  ;;  %v8763_v62 = vld [vmem:[%s10726_s2 + $0x1b8] sm:$0xff]  }
  0x3e   : > { %7440 = vmatprep.mubr.bf16.mxu1 %v295_v2  ;;  %7473 = vmatpush3.bf16.msra.mxu0 %v8327_v61  ;;  %v354_v61 = vld [vmem:[%s8540_s24 + $0xf9] sm:$0xff] }
  0x3f   : > { %7474 = vmatprep.subr.bf16.mxu0 %v8329_v3  ;;  %7525 = vmatpush3.bf16.msra.mxu1 %v8334_v6  ;;  %v285_v2 = vld [vmem:[%s8540_s24 + $0x100] sm:$0xff]  ;;  %v374_v4 = vpack.c.bf16 %v354_v61, %v353_v60  ;;  %v375_v6 = vpack.c.bf16 %v356_v1, %v355_v0  ;;  %v866_v60 = vld [vmem:[%s8540_s24 + $0xb2] sm:$0xff] }
  0x40   : > { %7526 = vmatprep.subr.bf16.mxu1 %v8335_v15  ;;  %v867_v61 = vld [vmem:[%s8540_s24 + $0xba] sm:$0xff] }
  0x41   : > { %v8768_v63 = vld [vmem:[%s10726_s2 + $0x1f8] sm:$0xff]   ;;  %v891_v1 = vpack.c.bf16 %v867_v61, %v866_v60  ;;  %v1850_v60 = vld [vmem:[%s8540_s24 + $0x64] sm:$0xff]  ;;  %v1851_v61 = vld [vmem:[%s8540_s24 + $0x6c] sm:$0xff] }
  0x42   : > { %7475 = vmatpush3.bf16.msra.mxu0 %v8329_v3  ;;  %v286_v3 = vld [vmem:[%s8540_s24 + $0x108] sm:$0xff] }
  0x43   : > { %7476 = vmatprep.subr.bf16.mxu0 %v8332_v13  ;;  %7527 = vmatpush3.bf16.msra.mxu1 %v8335_v15  ;;  %v305_v7 = vpack.c.bf16 %v286_v3, %v285_v2  ;;  %v847_v15 = vld [vmem:[%s8540_s24 + $0x1a] sm:$0xff]  ;;  %v1198_v2 = vld [vmem:[%s8540_s24 + $0xc2] sm:$0xff]  ;;  %v1199_v3 = vld [vmem:[%s8540_s24 + $0xca] sm:$0xff] }
  0x44   : > { %7389 = vmatmul.mubr.bf16.gmra.mxu0 %v366_v14  ;;  %7528 = vmatprep.subr.bf16.mxu1 %v8337_v22  ;;  %v846_v14 = vld [vmem:[%s8540_s24 + $0x12] sm:$0xff] }
  0x45   : > { %7441 = vmatmul.mubr.bf16.gmra.mxu1 %v296_v16  ;;  %7392 = vmatprep.mubr.bf16.mxu0 %v367_v17  ;;  %v376_v16 = vpack.c.bf16 %v358_v9, %v357_v8  ;;  %v306_v17 = vpack.c.bf16 %v288_v11, %v287_v10  ;;  %v1202_v8 = vld [vmem:[%s8540_s24 + $0xe2] sm:$0xff]  ;;  %v1203_v9 = vld [vmem:[%s8540_s24 + $0xea] sm:$0xff]  ;;  %v874_v10 = vld [vmem:[%s8540_s24 + $0xf2] sm:$0xff] }
  0x46   : > { %7444 = vmatprep.mubr.bf16.mxu1 %v297_v18  ;;  %7477 = vmatpush3.bf16.msra.mxu0 %v8332_v13  ;;  %v845_v13 = vld [vmem:[%s8540_s24 + $0xa] sm:$0xff]  ;;  %v875_v11 = vld [vmem:[%s8540_s24 + $0xfa] sm:$0xff] }
  0x47   : > { %7478 = vmatprep.subr.bf16.mxu0 %v8336_v19  ;;  %7529 = vmatpush3.bf16.msra.mxu1 %v8337_v22  ;;  %v880_v18 = vpack.c.bf16 %v845_v13, %v844_v12  ;;  %v850_v22 = vld [vmem:[%s8540_s24 + $0x32] sm:$0xff]  ;;  %v1225_v12 = vpack.c.bf16 %v1203_v9, %v1202_v8  ;;  %v895_v13 = vpack.c.bf16 %v875_v11, %v874_v10  ;;  %v1522_v11 = vld [vmem:[%s8540_s24 + $0x83] sm:$0xff] }
  0x48   : > { %7530 = vmatprep.subr.bf16.mxu1 %v8338_v31  ;;  %v883_v25 = vpack.c.bf16 %v851_v23, %v850_v22  ;;  %v1508_v22 = vld [vmem:[%s8540_s24 + $0x13] sm:$0xff]  ;;  %v1509_v23 = vld [vmem:[%s8540_s24 + $0x1b] sm:$0xff] }
  0x49   : > { %v8361_v9 = vld [vmem:[%s10726_s2 + $0x190] sm:$0xff]  }
  0x4a   : > { %7479 = vmatpush3.bf16.msra.mxu0 %v8336_v19  ;;  %v881_v19 = vpack.c.bf16 %v847_v15, %v846_v14  ;;  %v1206_v14 = vld [vmem:[%s8540_s24 + $0x102] sm:$0xff]  ;;  %v1207_v15 = vld [vmem:[%s8540_s24 + $0x10a] sm:$0xff] }
  0x4b   : > { %7568 = vmatprep.subr.bf16.mxu0 %v8652_v29  ;;  %7531 = vmatpush3.bf16.msra.mxu1 %v8338_v31  ;;  %v8341_v31 = vld [vmem:[%s10726_s2 + $0x128] sm:$0xff]   ;;  %v8367_v10 = vld [vmem:[%s10726_s2 + $0x1d0] sm:$0xff]  }
  0x4c   : > { %7393 = vmatmul.mubr.bf16.gmra.mxu0 %v368_v30  ;;  %7620 = vmatprep.subr.bf16.mxu1 %v8669_v44  ;;  %v1183_v30 = vld [vmem:[%s8540_s24 + $0x4a] sm:$0xff] }
  0x4d   : > { %7445 = vmatmul.mubr.bf16.gmra.mxu1 %v298_v32  ;;  %7396 = vmatprep.mubr.bf16.mxu0 %v369_v33  ;;  %v854_v32 = vld [vmem:[%s8540_s24 + $0x52] sm:$0xff]  ;;  %v855_v33 = vld [vmem:[%s8540_s24 + $0x5a] sm:$0xff] }
  0x4e   : > { %7448 = vmatprep.mubr.bf16.mxu1 %v299_v34  ;;  %v1215_v34 = vpack.c.bf16 %v1183_v30, %v1182_v28  ;;  %v885_v35 = vpack.c.bf16 %v855_v33, %v854_v32  ;;  %v1510_v30 = vld [vmem:[%s8540_s24 + $0x23] sm:$0xff]  ;;  %v1843_v33 = vld [vmem:[%s8540_s24 + $0x2c] sm:$0xff] }
  0x4f   : > { %v1842_v32 = vld [vmem:[%s8540_s24 + $0x24] sm:$0xff] }
  0x54   : > { %7397 = vmatmul.mubr.bf16.gmra.mxu0 %v370_v43  ;;  %v8350_v43 = vld [vmem:[%s10726_s2 + $0x158] sm:$0xff]  }
  0x55   : > { %7449 = vmatmul.mubr.bf16.gmra.mxu1 %v300_v45  ;;  %7400 = vmatprep.mubr.bf16.mxu0 %v371_v46  ;;  %v887_v45 = vpack.c.bf16 %v859_v41, %v858_v40  ;;  %v8345_v46 = vld [vmem:[%s10726_s2 + $0x110] sm:$0xff]   ;;  %v1514_v41 = vld [vmem:[%s8540_s24 + $0x43] sm:$0xff] }
  0x56   : > { %7452 = vmatprep.mubr.bf16.mxu1 %v301_v47  ;;  %v1190_v47 = vld [vmem:[%s8540_s24 + $0x82] sm:$0xff] }
  0x57   : > { %v1219_v54 = vpack.c.bf16 %v1191_v49, %v1190_v47  ;;  %v1517_v47 = vld [vmem:[%s8540_s24 + $0x5b] sm:$0xff]  ;;  %v8362_v49 = vld [vmem:[%s10726_s2 + $0x1f0] sm:$0xff]  }
  0x5c   : > { %7401 = vmatmul.mubr.bf16.gmra.mxu0 %v372_v56  ;;  %v8352_v56 = vld [vmem:[%s10726_s2 + $0x100] sm:$0xff]  }
  0x5d   : > { %7453 = vmatmul.mubr.bf16.gmra.mxu1 %v302_v57  ;;  %7404 = vmatprep.mubr.bf16.mxu0 %v373_v58  ;;  %v1194_v57 = vld [vmem:[%s8540_s24 + $0xa2] sm:$0xff]  ;;  %v1195_v58 = vld [vmem:[%s8540_s24 + $0xaa] sm:$0xff] }
  0x5e   : > { %7456 = vmatprep.mubr.bf16.mxu1 %v303_v59  ;;  %v8354_v59 = vld [vmem:[%s10726_s2 + $0x140] sm:$0xff]   ;;  %v1221_v0 = vpack.c.bf16 %v1195_v58, %v1194_v57  ;;  %v1519_v58 = vld [vmem:[%s8540_s24 + $0x6b] sm:$0xff] }
  0x5f   : > { %v1518_v57 = vld [vmem:[%s8540_s24 + $0x63] sm:$0xff] }
  0x64   : > { %7405 = vmatmul.mubr.bf16.gmra.mxu0 %v374_v4  ;;  %v870_v4 = vld [vmem:[%s8540_s24 + $0xd2] sm:$0xff] }
  0x65   : > { %7457 = vmatmul.mubr.bf16.gmra.mxu1 %v304_v5  ;;  %7408 = vmatprep.mubr.bf16.mxu0 %v375_v6  ;;  %v871_v5 = vld [vmem:[%s8540_s24 + $0xda] sm:$0xff]  ;;  %v1223_v6 = vpack.c.bf16 %v1199_v3, %v1198_v2 }
  0x66   : > { %7460 = vmatprep.mubr.bf16.mxu1 %v305_v7  ;;  %v893_v7 = vpack.c.bf16 %v871_v5, %v870_v4  ;;  %v1853_v2 = vld [vmem:[%s8540_s24 + $0x7c] sm:$0xff]  ;;  %v1549_v5 = vpack.c.bf16 %v1519_v58, %v1518_v57  ;;  %v1535_v57 = vld [vmem:[%s8540_s24 + $0xeb] sm:$0xff] }
  0x67   : > { %v8359_v3 = vld [vmem:[%s10726_s2 + $0x198] sm:$0xff]   ;;  %v1866_v58 = vld [vmem:[%s8540_s24 + $0xe4] sm:$0xff] }
  0x68   : > { %v8366_v4 = vld [vmem:[%s10726_s2 + $0x1d8] sm:$0xff]  }
  0x6c   : > { %7409 = vmatmul.mubr.bf16.gmra.mxu0 %v376_v16  ;;  %v878_v16 = vld [vmem:[%s8540_s24 + $0x112] sm:$0xff] }
  0x6d   : > { %7461 = vmatmul.mubr.bf16.gmra.mxu1 %v306_v17  ;;  %7480 = vmatprep.mubr.bf16.mxu0 %v880_v18  ;;  %v879_v17 = vld [vmem:[%s8540_s24 + $0x11a] sm:$0xff]  ;;  %v1227_v18 = vpack.c.bf16 %v1207_v15, %v1206_v14  ;;  %v1855_v14 = vld [vmem:[%s8540_s24 + $0x8c] sm:$0xff] }
  0x6e   : > { %7532 = vmatprep.mubr.bf16.mxu1 %v881_v19  ;;  %v1524_v15 = vld [vmem:[%s8540_s24 + $0x93] sm:$0xff] }
  0x74   : > { %7481 = vmatmul.mubr.bf16.vlgmr.msra.gmra.mxu0 %v881_v19  ;;  %v897_v19 = vpack.c.bf16 %v879_v17, %v878_v16  ;;  %v1525_v16 = vld [vmem:[%s8540_s24 + $0x9b] sm:$0xff] }
  0x75   : > { %7569 = vmatpush3.bf16.msra.mxu0 %v8652_v29  ;;  %7533 = vmatmul.mubr.bf16.vlgmr.msra.gmra.mxu1 %v1213_v24  ;;  %v8347_v29 = vld [vmem:[%s10726_s2 + $0x168] sm:$0xff]   ;;  %v1856_v17 = vld [vmem:[%s8540_s24 + $0x94] sm:$0xff] }
  0x76   : > { %7484 = vmatprep.mubr.bf16.mxu0 %v1213_v24  ;;  %7536 = vmatprep.mubr.bf16.mxu1 %v883_v25  ;;  %v1840_v24 = vld [vmem:[%s8540_s24 + $0x14] sm:$0xff] }
  0x77   : > { %7570 = vmatprep.subr.bf16.mxu0 %v8340_v26  ;;  %7621 = vmatpush3.bf16.msra.mxu1 %v8669_v44  ;;  %v1217_v44 = vpack.c.bf16 %v1187_v39, %v1186_v38  ;;  %v8798_v38 = vpack.c.bf16 %v1843_v33, %v1842_v32  ;;  %v1528_v32 = vld [vmem:[%s8540_s24 + $0xb3] sm:$0xff]  ;;  %v1529_v33 = vld [vmem:[%s8540_s24 + $0xbb] sm:$0xff] }
  0x78   : > { %7622 = vmatprep.subr.bf16.mxu1 %v8346_v27 }
  0x79   : > { %7571 = vmatpush3.bf16.msra.mxu0 %v8340_v26  ;;  %v1229_v26 = vpack.c.bf16 %v1211_v21, %v1210_v20  ;;  %v8369_v21 = vld [vmem:[%s10726_s2 + $0x1c8] sm:$0xff]  }
  0x7a   : > { %7572 = vmatprep.subr.bf16.mxu0 %v8341_v31 }
  0x7b   : > { %7623 = vmatpush3.bf16.msra.mxu1 %v8346_v27  ;;  %v1544_v27 = vpack.c.bf16 %v1509_v23, %v1508_v22  ;;  %v1552_v23 = vpack.c.bf16 %v1525_v16, %v1524_v15  ;;  %v1541_v15 = vld [vmem:[%s8540_s24 + $0x11b] sm:$0xff] }
  0x7c   : > { %7485 = vmatmul.mubr.bf16.gmra.mxu0 %v883_v25  ;;  %7624 = vmatprep.subr.bf16.mxu1 %v8347_v29  ;;  %v1841_v25 = vld [vmem:[%s8540_s24 + $0x1c] sm:$0xff] }
  0x7d   : > { %7537 = vmatmul.mubr.bf16.gmra.mxu1 %v1215_v34  ;;  %7488 = vmatprep.mubr.bf16.mxu0 %v1215_v34  ;;  %v1876_v28 = vpack.c.bf16 %v1841_v25, %v1840_v24  ;;  %v1513_v34 = vld [vmem:[%s8540_s24 + $0x3b] sm:$0xff] }
  0x7e   : > { %7540 = vmatprep.mubr.bf16.mxu1 %v885_v35  ;;  %7573 = vmatpush3.bf16.msra.mxu0 %v8341_v31  ;;  %v1511_v31 = vld [vmem:[%s8540_s24 + $0x2b] sm:$0xff]  ;;  %v8368_v25 = vld [vmem:[%s10726_s2 + $0x180] sm:$0xff]  }
  0x7f   : > { %7574 = vmatprep.subr.bf16.mxu0 %v8342_v36  ;;  %7625 = vmatpush3.bf16.msra.mxu1 %v8347_v29  ;;  %v1512_v29 = vld [vmem:[%s8540_s24 + $0x33] sm:$0xff] }
  0x80   : > { %7626 = vmatprep.subr.bf16.mxu1 %v8349_v37  ;;  %v1546_v39 = vpack.c.bf16 %v1513_v34, %v1512_v29  ;;  %v1860_v29 = vld [vmem:[%s8540_s24 + $0xb4] sm:$0xff]  ;;  %v1861_v34 = vld [vmem:[%s8540_s24 + $0xbc] sm:$0xff] }
  0x82   : > { %7575 = vmatpush3.bf16.msra.mxu0 %v8342_v36  ;;  %v1845_v36 = vld [vmem:[%s8540_s24 + $0x3c] sm:$0xff] }
  0x83   : > { %7576 = vmatprep.subr.bf16.mxu0 %v8343_v42  ;;  %7627 = vmatpush3.bf16.msra.mxu1 %v8349_v37  ;;  %v1545_v37 = vpack.c.bf16 %v1511_v31, %v1510_v30  ;;  %v1858_v30 = vld [vmem:[%s8540_s24 + $0xa4] sm:$0xff]  ;;  %v1859_v31 = vld [vmem:[%s8540_s24 + $0xac] sm:$0xff] }
  0x84   : > { %7489 = vmatmul.mubr.bf16.gmra.mxu0 %v885_v35  ;;  %7628 = vmatprep.subr.bf16.mxu1 %v8350_v43  ;;  %v1844_v35 = vld [vmem:[%s8540_s24 + $0x34] sm:$0xff] }
  0x85   : > { %7541 = vmatmul.mubr.bf16.gmra.mxu1 %v1217_v44  ;;  %7492 = vmatprep.mubr.bf16.mxu0 %v1217_v44  ;;  %v8800_v40 = vpack.c.bf16 %v1845_v36, %v1844_v35  ;;  %v1846_v44 = vld [vmem:[%s8540_s24 + $0x44] sm:$0xff]  ;;  %v8901_v35 = vld [vmem:[%s10726_s2 + $0x238] sm:$0xff]  }
  0x86   : > { %7544 = vmatprep.mubr.bf16.mxu1 %v887_v45  ;;  %7577 = vmatpush3.bf16.msra.mxu0 %v8343_v42  ;;  %v1515_v42 = vld [vmem:[%s8540_s24 + $0x4b] sm:$0xff] }
  0x87   : > { %7578 = vmatprep.subr.bf16.mxu0 %v8345_v46  ;;  %7629 = vmatpush3.bf16.msra.mxu1 %v8350_v43  ;;  %v8356_v43 = vld [vmem:[%s10726_s2 + $0x1b0] sm:$0xff]  }
  0x88   : > { %7630 = vmatprep.subr.bf16.mxu1 %v8351_v48 }
  0x8a   : > { %7579 = vmatpush3.bf16.msra.mxu0 %v8345_v46  ;;  %v1516_v46 = vld [vmem:[%s8540_s24 + $0x53] sm:$0xff] }
  0x8b   : > { %7580 = vmatprep.subr.bf16.mxu0 %v8348_v52  ;;  %7631 = vmatpush3.bf16.msra.mxu1 %v8351_v48  ;;  %v8357_v48 = vld [vmem:[%s10726_s2 + $0x1a8] sm:$0xff]  }
  0x8c   : > { %7493 = vmatmul.mubr.bf16.gmra.mxu0 %v887_v45  ;;  %7632 = vmatprep.subr.bf16.mxu1 %v8353_v53  ;;  %v1847_v45 = vld [vmem:[%s8540_s24 + $0x4c] sm:$0xff] }
  0x8d   : > { %7545 = vmatmul.mubr.bf16.gmra.mxu1 %v1219_v54  ;;  %7496 = vmatprep.mubr.bf16.mxu0 %v1219_v54  ;;  %v8826_v54 = vpack.c.bf16 %v1847_v45, %v1846_v44  ;;  %v1862_v44 = vld [vmem:[%s8540_s24 + $0xc4] sm:$0xff]  ;;  %v1863_v45 = vld [vmem:[%s8540_s24 + $0xcc] sm:$0xff] }
  0x8e   : > { %7548 = vmatprep.mubr.bf16.mxu1 %v889_v55  ;;  %7581 = vmatpush3.bf16.msra.mxu0 %v8348_v52  ;;  %v8363_v52 = vld [vmem:[%s10726_s2 + $0x1e8] sm:$0xff]  }
  0x8f   : > { %7582 = vmatprep.subr.bf16.mxu0 %v8352_v56  ;;  %7633 = vmatpush3.bf16.msra.mxu1 %v8353_v53  ;;  %v1547_v53 = vpack.c.bf16 %v1515_v42, %v1514_v41  ;;  %v8905_v41 = vpack.c.bf16 %v1861_v34, %v1860_v29  ;;  %v1530_v42 = vld [vmem:[%s8540_s24 + $0xc3] sm:$0xff] }
  0x90   : > { %7634 = vmatprep.subr.bf16.mxu1 %v8354_v59  ;;  %v1542_v34 = vld [vmem:[%s8540_s24 + $0x123] sm:$0xff] }
  0x92   : > { %7583 = vmatpush3.bf16.msra.mxu0 %v8352_v56  ;;  %v8828_v56 = vpack.c.bf16 %v1849_v51, %v1848_v50  ;;  %v8918_v51 = vpack.c.bf16 %v1863_v45, %v1862_v44  ;;  %v1875_v44 = vld [vmem:[%s8540_s24 + $0x12c] sm:$0xff] }
  0x93   : > { %7635 = vmatpush3.bf16.msra.mxu1 %v8354_v59  ;;  %7672 = vmatprep.subr.bf16.mxu0 %v8763_v62  ;;  %v8358_v59 = vld [vmem:[%s10726_s2 + $0x1a0] sm:$0xff]  }
  0x94   : > { %7497 = vmatmul.mubr.bf16.gmra.mxu0 %v889_v55  ;;  %7724 = vmatprep.subr.bf16.mxu1 %v8768_v63  ;;  %v1548_v55 = vpack.c.bf16 %v1517_v47, %v1516_v46  ;;  %v1532_v46 = vld [vmem:[%s8540_s24 + $0xd3] sm:$0xff]  ;;  %v1533_v47 = vld [vmem:[%s8540_s24 + $0xdb] sm:$0xff] }
  0x95   : > { %7549 = vmatmul.mubr.bf16.gmra.mxu1 %v1221_v0  ;;  %7500 = vmatprep.mubr.bf16.mxu0 %v1221_v0  ;;  %v8365_v0 = vld [vmem:[%s10726_s2 + $0x1e0] sm:$0xff]  }
  0x96   : > { %7552 = vmatprep.mubr.bf16.mxu1 %v891_v1 }
  0x9c   : > { %7501 = vmatmul.mubr.bf16.gmra.mxu0 %v891_v1  ;;  %v1852_v1 = vld [vmem:[%s8540_s24 + $0x74] sm:$0xff] }
  0x9d   : > { %7553 = vmatmul.mubr.bf16.gmra.mxu1 %v1223_v6  ;;  %7504 = vmatprep.mubr.bf16.mxu0 %v1223_v6  ;;  %v8852_v6 = vpack.c.bf16 %v1851_v61, %v1850_v60  ;;  %v8854_v8 = vpack.c.bf16 %v1853_v2, %v1852_v1  ;;  %v1536_v60 = vld [vmem:[%s8540_s24 + $0xf3] sm:$0xff]  ;;  %v1537_v61 = vld [vmem:[%s8540_s24 + $0xfb] sm:$0xff] }
  0x9e   : > { %7556 = vmatprep.mubr.bf16.mxu1 %v893_v7  ;;  %v1558_v2 = vpack.c.bf16 %v1537_v61, %v1536_v60 }
  0xa4   : > { %7505 = vmatmul.mubr.bf16.gmra.mxu0 %v893_v7 }
  0xa5   : > { %7557 = vmatmul.mubr.bf16.gmra.mxu1 %v1225_v12  ;;  %7508 = vmatprep.mubr.bf16.mxu0 %v1225_v12  ;;  %v1523_v12 = vld [vmem:[%s8540_s24 + $0x8b] sm:$0xff] }
  0xa6   : > { %7560 = vmatprep.mubr.bf16.mxu1 %v895_v13  ;;  %v1551_v20 = vpack.c.bf16 %v1523_v12, %v1522_v11 }
  0xac   : > { %7509 = vmatmul.mubr.bf16.gmra.mxu0 %v895_v13  ;;  %v1854_v13 = vld [vmem:[%s8540_s24 + $0x84] sm:$0xff] }
  0xad   : > { %7561 = vmatmul.mubr.bf16.gmra.mxu1 %v1227_v18  ;;  %7512 = vmatprep.mubr.bf16.mxu0 %v1227_v18  ;;  %v1857_v18 = vld [vmem:[%s8540_s24 + $0x9c] sm:$0xff]  ;;  %v8878_v22 = vpack.c.bf16 %v1855_v14, %v1854_v13  ;;  %v1871_v13 = vld [vmem:[%s8540_s24 + $0x10c] sm:$0xff] }
  0xae   : > { %7564 = vmatprep.mubr.bf16.mxu1 %v897_v19  ;;  %v8880_v24 = vpack.c.bf16 %v1857_v18, %v1856_v17  ;;  %v1540_v14 = vld [vmem:[%s8540_s24 + $0x113] sm:$0xff]  ;;  %v1873_v18 = vld [vmem:[%s8540_s24 + $0x11c] sm:$0xff] }
  0xaf   : > { %v1872_v17 = vld [vmem:[%s8540_s24 + $0x114] sm:$0xff] }
  0xb4   : > { %7513 = vmatmul.mubr.bf16.gmra.mxu0 %v897_v19  ;;  %v8364_v19 = vld [vmem:[%s10726_s2 + $0x188] sm:$0xff]  }
  0xb5   : > { %7565 = vmatmul.mubr.bf16.gmra.mxu1 %v1229_v26  ;;  %7584 = vmatprep.mubr.bf16.mxu0 %v1544_v27  ;;  %v8370_v26 = vld [vmem:[%s10726_s2 + $0x1c0] sm:$0xff]  }
  0xb6   : > { %7636 = vmatprep.mubr.bf16.mxu1 %v1876_v28  ;;  %v1526_v27 = vld [vmem:[%s8540_s24 + $0xa3] sm:$0xff]  ;;  %v1527_v28 = vld [vmem:[%s8540_s24 + $0xab] sm:$0xff] }
  0xb7   : > { %v1553_v36 = vpack.c.bf16 %v1527_v28, %v1526_v27 }
  0xbc   : > { %7585 = vmatmul.mubr.bf16.vlgmr.msra.gmra.mxu0 %v1545_v37  ;;  %v8903_v37 = vpack.c.bf16 %v1859_v31, %v1858_v30  ;;  %v8954_v30 = vpack.c.bf16 %v1873_v18, %v1872_v17 }
  0xbd   : > { %7673 = vmatpush3.bf16.msra.mxu0 %v8763_v62  ;;  %7637 = vmatmul.mubr.bf16.vlgmr.msra.gmra.mxu1 %v8798_v38  ;;  %v1520_v62 = vld [vmem:[%s8540_s24 + $0x73] sm:$0xff] }
  0xbe   : > { %7588 = vmatprep.mubr.bf16.mxu0 %v1546_v39  ;;  %7640 = vmatprep.mubr.bf16.mxu1 %v8800_v40  ;;  %v1554_v39 = vpack.c.bf16 %v1529_v33, %v1528_v32 }
  0xbf   : > { %7674 = vmatprep.subr.bf16.mxu0 %v8356_v43  ;;  %7725 = vmatpush3.bf16.msra.mxu1 %v8768_v63  ;;  %v1521_v63 = vld [vmem:[%s8540_s24 + $0x7b] sm:$0xff] }
  0xc0   : > { %7726 = vmatprep.subr.bf16.mxu1 %v8362_v49  ;;  %v1550_v7 = vpack.c.bf16 %v1521_v63, %v1520_v62  ;;  %v1868_v62 = vld [vmem:[%s8540_s24 + $0xf4] sm:$0xff]  ;;  %v1869_v63 = vld [vmem:[%s8540_s24 + $0xfc] sm:$0xff] }
  0xc1   : > { %7675 = vmatpush3.bf16.msra.mxu0 %v8356_v43  ;;  %v1531_v43 = vld [vmem:[%s8540_s24 + $0xcb] sm:$0xff] }
  0xc2   : > { %7676 = vmatprep.subr.bf16.mxu0 %v8357_v48  ;;  %v1555_v50 = vpack.c.bf16 %v1531_v43, %v1530_v42  ;;  %v1874_v43 = vld [vmem:[%s8540_s24 + $0x124] sm:$0xff] }
  0xc3   : > { %7727 = vmatpush3.bf16.msra.mxu1 %v8362_v49  ;;  %v1865_v49 = vld [vmem:[%s8540_s24 + $0xdc] sm:$0xff] }
  0xc4   : > { %7589 = vmatmul.mubr.bf16.gmra.mxu0 %v1547_v53  ;;  %7728 = vmatprep.subr.bf16.mxu1 %v8363_v52 }
  0xc5   : > { %7641 = vmatmul.mubr.bf16.gmra.mxu1 %v8826_v54  ;;  %7592 = vmatprep.mubr.bf16.mxu0 %v1548_v55  ;;  %v1534_v55 = vld [vmem:[%s8540_s24 + $0xe3] sm:$0xff] }
  0xc6   : > { %7644 = vmatprep.mubr.bf16.mxu1 %v8828_v56  ;;  %7677 = vmatpush3.bf16.msra.mxu0 %v8357_v48  ;;  %v1864_v48 = vld [vmem:[%s8540_s24 + $0xd4] sm:$0xff] }
  0xc7   : > { %7678 = vmatprep.subr.bf16.mxu0 %v8358_v59  ;;  %7729 = vmatpush3.bf16.msra.mxu1 %v8363_v52  ;;  %v1556_v52 = vpack.c.bf16 %v1533_v47, %v1532_v46  ;;  %v8920_v53 = vpack.c.bf16 %v1865_v49, %v1864_v48  ;;  %v2504_v46 = vld [vmem:[%s8540_s24 + $0x25] sm:$0xff]  ;;  %v2505_v47 = vld [vmem:[%s8540_s24 + $0x2d] sm:$0xff] }
  0xc8   : > { %7730 = vmatprep.subr.bf16.mxu1 %v8365_v0 }
  0xca   : > { %7679 = vmatpush3.bf16.msra.mxu0 %v8358_v59  ;;  %v1867_v59 = vld [vmem:[%s8540_s24 + $0xec] sm:$0xff] }
  0xcb   : > { %7680 = vmatprep.subr.bf16.mxu0 %v8359_v3  ;;  %7731 = vmatpush3.bf16.msra.mxu1 %v8365_v0  ;;  %v1557_v0 = vpack.c.bf16 %v1535_v57, %v1534_v55  ;;  %v8932_v1 = vpack.c.bf16 %v1867_v59, %v1866_v58  ;;  %v8970_v55 = vpack.c.bf16 %v1875_v44, %v1874_v43 }
  0xcc   : > { %7593 = vmatmul.mubr.bf16.gmra.mxu0 %v1549_v5  ;;  %7732 = vmatprep.subr.bf16.mxu1 %v8366_v4  ;;  %v2540_v59 = vpack.c.bf16 %v2505_v47, %v2504_v46 }
  0xcd   : > { %7645 = vmatmul.mubr.bf16.gmra.mxu1 %v8852_v6  ;;  %7596 = vmatprep.mubr.bf16.mxu0 %v1550_v7  ;;  %v1538_v7 = vld [vmem:[%s8540_s24 + $0x103] sm:$0xff] }
  0xce   : > { %7648 = vmatprep.mubr.bf16.mxu1 %v8854_v8  ;;  %7681 = vmatpush3.bf16.msra.mxu0 %v8359_v3  ;;  %v8934_v3 = vpack.c.bf16 %v1869_v63, %v1868_v62 }
  0xcf   : > { %7682 = vmatprep.subr.bf16.mxu0 %v8361_v9  ;;  %7733 = vmatpush3.bf16.msra.mxu1 %v8366_v4 }
  0xd0   : > { %7734 = vmatprep.subr.bf16.mxu1 %v8367_v10 }
  0xd2   : > { %7683 = vmatpush3.bf16.msra.mxu0 %v8361_v9  ;;  %v1539_v9 = vld [vmem:[%s8540_s24 + $0x10b] sm:$0xff] }
  0xd3   : > { %7684 = vmatprep.subr.bf16.mxu0 %v8364_v19  ;;  %7735 = vmatpush3.bf16.msra.mxu1 %v8367_v10  ;;  %v1870_v10 = vld [vmem:[%s8540_s24 + $0x104] sm:$0xff] }
  0xd4   : > { %7597 = vmatmul.mubr.bf16.gmra.mxu0 %v1551_v20  ;;  %7736 = vmatprep.subr.bf16.mxu1 %v8369_v21 }
  0xd5   : > { %7649 = vmatmul.mubr.bf16.gmra.mxu1 %v8878_v22  ;;  %7600 = vmatprep.mubr.bf16.mxu0 %v1552_v23 }
  0xd6   : > { %7652 = vmatprep.mubr.bf16.mxu1 %v8880_v24  ;;  %7685 = vmatpush3.bf16.msra.mxu0 %v8364_v19 }
  0xd7   : > { %7686 = vmatprep.subr.bf16.mxu0 %v8368_v25  ;;  %7737 = vmatpush3.bf16.msra.mxu1 %v8369_v21  ;;  %v1559_v21 = vpack.c.bf16 %v1539_v9, %v1538_v7  ;;  %v2508_v9 = vld [vmem:[%s8540_s24 + $0x45] sm:$0xff] }
  0xd8   : > { %7738 = vmatprep.subr.bf16.mxu1 %v8370_v26 }
  0xda   : > { %7687 = vmatpush3.bf16.msra.mxu0 %v8368_v25  ;;  %v8950_v25 = vpack.c.bf16 %v1871_v13, %v1870_v10  ;;  %v2509_v10 = vld [vmem:[%s8540_s24 + $0x4d] sm:$0xff] }
  0xdb   : > { %7739 = vmatpush3.bf16.msra.mxu1 %v8370_v26  ;;  %7776 = vmatprep.subr.bf16.mxu0 %v8901_v35  ;;  %v1560_v26 = vpack.c.bf16 %v1541_v15, %v1540_v14 }
  0xdc   : > { %7601 = vmatmul.mubr.bf16.gmra.mxu0 %v1553_v36  ;;  %v1543_v36 = vld [vmem:[%s8540_s24 + $0x12b] sm:$0xff] }
  0xdd   : > { %7653 = vmatmul.mubr.bf16.gmra.mxu1 %v8903_v37  ;;  %7604 = vmatprep.mubr.bf16.mxu0 %v1554_v39 }
  0xde   : > { %7656 = vmatprep.mubr.bf16.mxu1 %v8905_v41 }
  0xe4   : > { %7605 = vmatmul.mubr.bf16.gmra.mxu0 %v1555_v50  ;;  %v1561_v50 = vpack.c.bf16 %v1543_v36, %v1542_v34  ;;  %v8373_v34 = vld [vmem:[%s10726_s2 + $0x228] sm:$0xff]  }
  0xe5   : > { %7657 = vmatmul.mubr.bf16.gmra.mxu1 %v8918_v51  ;;  %7608 = vmatprep.mubr.bf16.mxu0 %v1556_v52 }
  0xe6   : > { %7660 = vmatprep.mubr.bf16.mxu1 %v8920_v53 }
  0xec   : > { %v7378_v4 = vpop.f32.mrf.mxu0  ;;  %7609 = vmatmul.mubr.bf16.gmra.mxu0 %v1557_v0 }
  0xed   : > { %v7430_v5 = vpop.f32.mrf.mxu1  ;;  %7661 = vmatmul.mubr.bf16.gmra.mxu1 %v8932_v1  ;;  %7612 = vmatprep.mubr.bf16.mxu0 %v1558_v2 }
  0xee   : > { %v8940_v11 = vadd.f32 %v7430_v5, %v7378_v4  ;;  %v476_v12 = vpop.f32.mrf.mxu0  ;;  %7664 = vmatprep.mubr.bf16.mxu1 %v8934_v3  ;;  %v2506_v4 = vld [vmem:[%s8540_s24 + $0x35] sm:$0xff]  ;;  %v2507_v5 = vld [vmem:[%s8540_s24 + $0x3d] sm:$0xff] }
  0xef   : > { %v701_v16 = vpop.f32.mrf.mxu1  ;;  %v2541_v15 = vpack.c.bf16 %v2507_v5, %v2506_v4  ;;  %v2516_v5 = vld [vmem:[%s8540_s24 + $0x85] sm:$0xff] }
  0xf0   : > { %v8948_v19 = vadd.f32 %v701_v16, %v476_v12  ;;  %v7379_v20 = vpop.f32.mrf.mxu0 }
  0xf1   : > { %v7431_v23 = vpop.f32.mrf.mxu1 }
  0xf2   : > { %v8952_v27 = vadd.f32 %v7431_v23, %v7379_v20  ;;  %v479_v28 = vpop.f32.mrf.mxu0  ;;  %v8372_v20 = vld [vmem:[%s10726_s2 + $0x230] sm:$0xff]  }
  0xf3   : > { %v704_v31 = vpop.f32.mrf.mxu1 }
  0xf4   : > { %v8956_v32 = vadd.f32 %v704_v31, %v479_v28  ;;  %v7382_v33 = vpop.f32.mrf.mxu0  ;;  %7613 = vmatmul.mubr.bf16.gmra.mxu0 %v1559_v21 }
  0xf5   : > { %v7434_v29 = vpop.f32.mrf.mxu1  ;;  %7665 = vmatmul.mubr.bf16.gmra.mxu1 %v8950_v25  ;;  %7616 = vmatprep.mubr.bf16.mxu0 %v1560_v26 }
  0xf6   : > { %v8961_v39 = vadd.f32 %v7434_v29, %v7382_v33  ;;  %v492_v42 = vpop.f32.mrf.mxu0  ;;  %7668 = vmatprep.mubr.bf16.mxu1 %v8954_v30  ;;  %v2510_v33 = vld [vmem:[%s8540_s24 + $0x55] sm:$0xff]  ;;  %v2511_v29 = vld [vmem:[%s8540_s24 + $0x5d] sm:$0xff] }
  0xf7   : > { %v717_v45 = vpop.f32.mrf.mxu1 }
  0xf8   : > { %v8968_v48 = vadd.f32 %v717_v45, %v492_v42  ;;  %v7383_v49 = vpop.f32.mrf.mxu0  ;;  %v2512_v42 = vld [vmem:[%s8540_s24 + $0x65] sm:$0xff]  ;;  %v2543_v45 = vpack.c.bf16 %v2511_v29, %v2510_v33  ;;  %v2518_v29 = vld [vmem:[%s8540_s24 + $0x95] sm:$0xff] }
  0xf9   : > { %v7435_v52 = vpop.f32.mrf.mxu1 }
  0xfa   : > { %v8972_v57 = vadd.f32 %v7435_v52, %v7383_v49  ;;  %v495_v58 = vpop.f32.mrf.mxu0 }
  0xfb   : > { %v720_v60 = vpop.f32.mrf.mxu1 }
  0xfc   : > { %v8974_v61 = vadd.f32 %v720_v60, %v495_v58  ;;  %v7386_v62 = vpop.f32.mrf.mxu0  ;;  %7617 = vmatmul.mubr.bf16.gmra.mxu0 %v1561_v50  ;;  %v8374_v50 = vld [vmem:[%s10726_s2 + $0x220] sm:$0xff]  }
  0xfd   : > { %v7438_v63 = vpop.f32.mrf.mxu1  ;;  %7669 = vmatmul.mubr.bf16.gmra.mxu1 %v8970_v55  ;;  %7688 = vmatprep.mubr.bf16.mxu0 %v8798_v38  ;;  %v2542_v38 = vpack.c.bf16 %v2509_v10, %v2508_v9  ;;  %v8375_v9 = vld [vmem:[%s10726_s2 + $0x218] sm:$0xff]  }
  0xfe   : > { %v8978_v0 = vadd.f32 %v7438_v63, %v7386_v62  ;;  %v508_v2 = vpop.f32.mrf.mxu0  ;;  %7740 = vmatprep.mubr.bf16.mxu1 %v2540_v59  ;;  %v2514_v63 = vld [vmem:[%s8540_s24 + $0x75] sm:$0xff] }
  0xff   : > { %v733_v7 = vpop.f32.mrf.mxu1 }
 0x100   : > { %v8984_v12 = vadd.f32 %v733_v7, %v508_v2  ;;  %v7387_v13 = vpop.f32.mrf.mxu0  ;;  %v2515_v2 = vld [vmem:[%s8540_s24 + $0x7d] sm:$0xff]  ;;  %v2517_v7 = vld [vmem:[%s8540_s24 + $0x8d] sm:$0xff] }
 0x101   : > { %v7439_v14 = vpop.f32.mrf.mxu1 }
 0x102   : > { %v8986_v16 = vadd.f32 %v7439_v14, %v7387_v13  ;;  %v511_v17 = vpop.f32.mrf.mxu0 }
 0x103   : > { %v736_v18 = vpop.f32.mrf.mxu1 }
 0x104   : > { %v8991_v21 = vadd.f32 %v736_v18, %v511_v17  ;;  %v7390_v23 = vpop.f32.mrf.mxu0  ;;  %7689 = vmatmul.mubr.bf16.vlgmr.msra.gmra.mxu0 %v8800_v40  ;;  %v2513_v40 = vld [vmem:[%s8540_s24 + $0x6d] sm:$0xff]  ;;  %v2546_v17 = vpack.c.bf16 %v2517_v7, %v2516_v5  ;;  %v2522_v5 = vld [vmem:[%s8540_s24 + $0xb5] sm:$0xff]  ;;  %v2523_v7 = vld [vmem:[%s8540_s24 + $0xbd] sm:$0xff] }
 0x105   : > { %v7442_v26 = vpop.f32.mrf.mxu1  ;;  %7777 = vmatpush3.bf16.msra.mxu0 %v8901_v35  ;;  %7741 = vmatmul.mubr.bf16.vlgmr.msra.gmra.mxu1 %v2541_v15  ;;  %v2544_v47 = vpack.c.bf16 %v2513_v40, %v2512_v42  ;;  %v8376_v18 = vld [vmem:[%s10726_s2 + $0x210] sm:$0xff]   ;;  %v2520_v42 = vld [vmem:[%s8540_s24 + $0xa5] sm:$0xff] }
 0x106   : > { %v8995_v28 = vadd.f32 %v7442_v26, %v7390_v23  ;;  %v524_v31 = vpop.f32.mrf.mxu0  ;;  %7692 = vmatprep.mubr.bf16.mxu0 %v8826_v54  ;;  %7744 = vmatprep.mubr.bf16.mxu1 %v2542_v38  ;;  %v2521_v40 = vld [vmem:[%s8540_s24 + $0xad] sm:$0xff] }
 0x107   : > { %v749_v36 = vpop.f32.mrf.mxu1  ;;  %7778 = vmatprep.subr.bf16.mxu0 %v8372_v20 }
 0x108   : > { %v9005_v43 = vadd.f32 %v749_v36, %v524_v31  ;;  %v7391_v35 = vpop.f32.mrf.mxu0 }
 0x109   : > { %v7443_v44 = vpop.f32.mrf.mxu1  ;;  %7779 = vmatpush3.bf16.msra.mxu0 %v8372_v20 }
 0x10a   : > { %v9007_v46 = vadd.f32 %v7443_v44, %v7391_v35  ;;  %v527_v54 = vpop.f32.mrf.mxu0  ;;  %7780 = vmatprep.subr.bf16.mxu0 %v8373_v34  ;;  %v8377_v35 = vld [vmem:[%s10726_s2 + $0x208] sm:$0xff]  }
 0x10b   : > { %v752_v49 = vpop.f32.mrf.mxu1 }
 0x10c   : > { %v9012_v52 = vadd.f32 %v752_v49, %v527_v54  ;;  %v7394_v58 = vpop.f32.mrf.mxu0  ;;  %7693 = vmatmul.mubr.bf16.gmra.mxu0 %v8828_v56  ;;  %v2548_v49 = vpack.c.bf16 %v2521_v40, %v2520_v42  ;;  %v2526_v42 = vld [vmem:[%s8540_s24 + $0xd5] sm:$0xff]  ;;  %v2527_v40 = vld [vmem:[%s8540_s24 + $0xdd] sm:$0xff] }
 0x10d   : > { %v7446_v59 = vpop.f32.mrf.mxu1  ;;  %7745 = vmatmul.mubr.bf16.gmra.mxu1 %v2543_v45  ;;  %7696 = vmatprep.mubr.bf16.mxu0 %v8852_v6  ;;  %v2545_v6 = vpack.c.bf16 %v2515_v2, %v2514_v63 }
 0x10e   : > { %v9016_v60 = vadd.f32 %v7446_v59, %v7394_v58  ;;  %v540_v62 = vpop.f32.mrf.mxu0  ;;  %7748 = vmatprep.mubr.bf16.mxu1 %v2544_v47  ;;  %7781 = vmatpush3.bf16.msra.mxu0 %v8373_v34  ;;  %v2519_v34 = vld [vmem:[%s8540_s24 + $0x9d] sm:$0xff] }
 0x10f   : > { %v765_v4 = vpop.f32.mrf.mxu1  ;;  %7782 = vmatprep.subr.bf16.mxu0 %v8374_v50  ;;  %v8378_v58 = vld [vmem:[%s10726_s2 + $0x200] sm:$0xff]  }
 0x110   : > { %v9025_v56 = vadd.f32 %v765_v4, %v540_v62  ;;  %v7395_v10 = vpop.f32.mrf.mxu0 }
 0x111   : > { %v7447_v13 = vpop.f32.mrf.mxu1 }
 0x112   : > { %v9027_v14 = vadd.f32 %v7447_v13, %v7395_v10  ;;  %v543_v15 = vpop.f32.mrf.mxu0  ;;  %7783 = vmatpush3.bf16.msra.mxu0 %v8374_v50  ;;  %v2524_v10 = vld [vmem:[%s8540_s24 + $0xc5] sm:$0xff]  ;;  %v2525_v13 = vld [vmem:[%s8540_s24 + $0xcd] sm:$0xff] }
 0x113   : > { %v768_v38 = vpop.f32.mrf.mxu1  ;;  %7784 = vmatprep.subr.bf16.mxu0 %v8375_v9 }
 0x114   : > { %v9032_v20 = vadd.f32 %v768_v38, %v543_v15  ;;  %v7398_v23 = vpop.f32.mrf.mxu0  ;;  %7697 = vmatmul.mubr.bf16.gmra.mxu0 %v8854_v8 }
 0x115   : > { %v7450_v26 = vpop.f32.mrf.mxu1  ;;  %7749 = vmatmul.mubr.bf16.gmra.mxu1 %v2545_v6  ;;  %7700 = vmatprep.mubr.bf16.mxu0 %v8878_v22  ;;  %v2547_v22 = vpack.c.bf16 %v2519_v34, %v2518_v29 }
 0x116   : > { %v9036_v31 = vadd.f32 %v7450_v26, %v7398_v23  ;;  %v556_v33 = vpop.f32.mrf.mxu0  ;;  %7752 = vmatprep.mubr.bf16.mxu1 %v2546_v17  ;;  %7785 = vmatpush3.bf16.msra.mxu0 %v8375_v9 }
 0x117   : > { %v781_v36 = vpop.f32.mrf.mxu1  ;;  %7786 = vmatprep.subr.bf16.mxu0 %v8376_v18 }
 0x118   : > { %v9045_v8 = vadd.f32 %v781_v36, %v556_v33  ;;  %v7399_v44 = vpop.f32.mrf.mxu0 }
 0x119   : > { %v7451_v45 = vpop.f32.mrf.mxu1 }
 0x11a   : > { %v9047_v54 = vadd.f32 %v7451_v45, %v7399_v44  ;;  %v559_v47 = vpop.f32.mrf.mxu0  ;;  %7787 = vmatpush3.bf16.msra.mxu0 %v8376_v18  ;;  %v2550_v18 = vpack.c.bf16 %v2525_v13, %v2524_v10  ;;  %v2528_v44 = vld [vmem:[%s8540_s24 + $0xe5] sm:$0xff]  ;;  %v2529_v45 = vld [vmem:[%s8540_s24 + $0xed] sm:$0xff]  ;;  %v2530_v10 = vld [vmem:[%s8540_s24 + $0xf5] sm:$0xff] }
 0x11b   : > { %v784_v50 = vpop.f32.mrf.mxu1  ;;  %7788 = vmatprep.subr.bf16.mxu0 %v8377_v35  ;;  %v2531_v13 = vld [vmem:[%s8540_s24 + $0xfd] sm:$0xff] }
 0x11c   : > { %v9052_v59 = vadd.f32 %v784_v50, %v559_v47  ;;  %v7402_v62 = vpop.f32.mrf.mxu0  ;;  %7701 = vmatmul.mubr.bf16.gmra.mxu0 %v8880_v24  ;;  %v2549_v24 = vpack.c.bf16 %v2523_v7, %v2522_v5 }
 0x11d   : > { %v7454_v63 = vpop.f32.mrf.mxu1  ;;  %7753 = vmatmul.mubr.bf16.gmra.mxu1 %v2547_v22  ;;  %7704 = vmatprep.mubr.bf16.mxu0 %v8903_v37 }
 0x11e   : > { %v9056_v2 = vadd.f32 %v7454_v63, %v7402_v62  ;;  %v572_v4 = vpop.f32.mrf.mxu0  ;;  %7756 = vmatprep.mubr.bf16.mxu1 %v2548_v49  ;;  %7789 = vmatpush3.bf16.msra.mxu0 %v8377_v35 }
 0x11f   : > { %v797_v9 = vpop.f32.mrf.mxu1  ;;  %7790 = vmatprep.subr.bf16.mxu0 %v8378_v58 }
 0x120   : > { %v9062_v6 = vadd.f32 %v797_v9, %v572_v4  ;;  %v7403_v15 = vpop.f32.mrf.mxu0 }
 0x121   : > { %v7455_v17 = vpop.f32.mrf.mxu1 }
 0x122   : > { %v9064_v38 = vadd.f32 %v7455_v17, %v7403_v15  ;;  %v575_v37 = vpop.f32.mrf.mxu0  ;;  %7791 = vmatpush3.bf16.msra.mxu0 %v8378_v58  ;;  %v2552_v58 = vpack.c.bf16 %v2529_v45, %v2528_v44  ;;  %v2532_v17 = vld [vmem:[%s8540_s24 + $0x105] sm:$0xff]  ;;  %v2534_v45 = vld [vmem:[%s8540_s24 + $0x115] sm:$0xff] }
 0x123   : > { %v800_v23 = vpop.f32.mrf.mxu1 }
 0x124   : > { %v9066_v26 = vadd.f32 %v800_v23, %v575_v37  ;;  %v7406_v33 = vpop.f32.mrf.mxu0  ;;  %7705 = vmatmul.mubr.bf16.gmra.mxu0 %v8905_v41  ;;  %v2551_v41 = vpack.c.bf16 %v2527_v40, %v2526_v42 }
 0x125   : > { %v7458_v29 = vpop.f32.mrf.mxu1  ;;  %7757 = vmatmul.mubr.bf16.gmra.mxu1 %v2549_v24  ;;  %7708 = vmatprep.mubr.bf16.mxu0 %v8918_v51  ;;  %v2533_v24 = vld [vmem:[%s8540_s24 + $0x10d] sm:$0xff] }
 0x126   : > { %v9070_v34 = vadd.f32 %v7458_v29, %v7406_v33  ;;  %v588_v36 = vpop.f32.mrf.mxu0  ;;  %7760 = vmatprep.mubr.bf16.mxu1 %v2550_v18 }
 0x127   : > { %v813_v35 = vpop.f32.mrf.mxu1 }
 0x128   : > { %v9076_v22 = vadd.f32 %v813_v35, %v588_v36  ;;  %v7407_v47 = vpop.f32.mrf.mxu0 }
 0x129   : > { %v7459_v49 = vpop.f32.mrf.mxu1 }
 0x12a   : > { %v9078_v50 = vadd.f32 %v7459_v49, %v7407_v47  ;;  %v591_v51 = vpop.f32.mrf.mxu0  ;;  %v2535_v47 = vld [vmem:[%s8540_s24 + $0x11d] sm:$0xff] }
 0x12b   : > { %v816_v62 = vpop.f32.mrf.mxu1 }
 0x12c   : > { %v9080_v63 = vadd.f32 %v816_v62, %v591_v51  ;;  %v7410_v4 = vpop.f32.mrf.mxu0  ;;  %7709 = vmatmul.mubr.bf16.gmra.mxu0 %v8920_v53  ;;  %v2553_v53 = vpack.c.bf16 %v2531_v13, %v2530_v10  ;;  %v2537_v62 = vld [vmem:[%s8540_s24 + $0x12d] sm:$0xff] }
 0x12d   : > { %v7462_v5 = vpop.f32.mrf.mxu1  ;;  %7761 = vmatmul.mubr.bf16.gmra.mxu1 %v2551_v41  ;;  %7712 = vmatprep.mubr.bf16.mxu0 %v8932_v1  ;;  %v2554_v1 = vpack.c.bf16 %v2533_v24, %v2532_v17 }
 0x12e   : > { %v9084_v7 = vadd.f32 %v7462_v5, %v7410_v4  ;;  %v604_v9 = vpop.f32.mrf.mxu0  ;;  %7764 = vmatprep.mubr.bf16.mxu1 %v2552_v58  ;;  %v2536_v58 = vld [vmem:[%s8540_s24 + $0x125] sm:$0xff]  ;;  %v2555_v5 = vpack.c.bf16 %v2535_v47, %v2534_v45 }
 0x12f   : > { %v829_v15 = vpop.f32.mrf.mxu1  ;;  %v2556_v10 = vpack.c.bf16 %v2537_v62, %v2536_v58 }
 0x130   : > { %v9090_v37 = vadd.f32 %v829_v15, %v604_v9  ;;  %v7411_v18 = vpop.f32.mrf.mxu0 }
 0x131   : > { %v7463_v23 = vpop.f32.mrf.mxu1 }
 0x132   : > { %v9092_v33 = vadd.f32 %v7463_v23, %v7411_v18  ;;  %v9094_v29 = vpop.f32.mrf.mxu0  ;;  %v2206_v18 = vld [vmem:[%s8540_s24 + $0x134] sm:$0xff]  ;;  %v2207_v23 = vld [vmem:[%s8540_s24 + $0x13c] sm:$0xff] }
 0x133   : > { %10733 = vst [vmem:[#allocation3_spill] sm:$0xff] %v9094_v29  ;;  %v9096_v36 = vpop.f32.mrf.mxu1  ;;  %v2225_v47 = vpack.c.bf16 %v2207_v23, %v2206_v18 }
 0x134   : > { %10734 = vst [vmem:[#allocation4_spill] sm:$0xff] %v9096_v36  ;;  %v7482_v42 = vpop.f32.mrf.mxu0  ;;  %7713 = vmatmul.mubr.bf16.gmra.mxu0 %v8934_v3 }
 0x135   : > { %v1142_v40 = vadd.f32 %v7482_v42, %v8940_v11  ;;  %v7534_v35 = vpop.f32.mrf.mxu1  ;;  %7765 = vmatmul.mubr.bf16.gmra.mxu1 %v2553_v53  ;;  %7716 = vmatprep.mubr.bf16.mxu0 %v8950_v25  ;;  %v2538_v53 = vld [vmem:[%s8540_s24 + $0x135] sm:$0xff]  ;;  %v2836_v42 = vld [vmem:[%s8540_s24 + $0x26] sm:$0xff] }
 0x136   : > { %v997_v44 = vpop.f32.mrf.mxu0  ;;  %7768 = vmatprep.mubr.bf16.mxu1 %v2554_v1 }
 0x137   : > { %v1140_v49 = vadd.f32 %v997_v44, %v8948_v19  ;;  %v9104_v41 = vadd.f32 %v7534_v35, %v1142_v40  ;;  %v1329_v51 = vpop.f32.mrf.mxu1  ;;  %v2837_v40 = vld [vmem:[%s8540_s24 + $0x2e] sm:$0xff] }
 0x138   : > { %v7483_v4 = vpop.f32.mrf.mxu0  ;;  %v2872_v58 = vpack.c.bf16 %v2837_v40, %v2836_v42 }
 0x139   : > { %v1143_v3 = vadd.f32 %v7483_v4, %v8952_v27  ;;  %v9109_v11 = vadd.f32 %v1329_v51, %v1140_v49  ;;  %v7535_v25 = vpop.f32.mrf.mxu1 }
 0x13a   : > { %v1000_v9 = vpop.f32.mrf.mxu0 }
 0x13b   : > { %v9112_v19 = vadd.f32 %v1000_v9, %v8956_v32  ;;  %v9114_v13 = vadd.f32 %v7535_v25, %v1143_v3  ;;  %v9116_v15 = vpop.f32.mrf.mxu1  ;;  %v2539_v32 = vld [vmem:[%s8540_s24 + $0x13d] sm:$0xff] }
 0x13c   : > { %v7486_v17 = vpop.f32.mrf.mxu0  ;;  %7717 = vmatmul.mubr.bf16.gmra.mxu0 %v8954_v30  ;;  %v2557_v51 = vpack.c.bf16 %v2539_v32, %v2538_v53  ;;  %v2838_v9 = vld [vmem:[%s8540_s24 + $0x36] sm:$0xff] }
 0x13d   : > { %v1146_v27 = vadd.f32 %v7486_v17, %v8961_v39  ;;  %v7538_v24 = vpop.f32.mrf.mxu1  ;;  %7769 = vmatmul.mubr.bf16.gmra.mxu1 %v2555_v5  ;;  %7720 = vmatprep.mubr.bf16.mxu0 %v8970_v55 }
 0x13e   : > { %v1013_v1 = vpop.f32.mrf.mxu0  ;;  %7772 = vmatprep.mubr.bf16.mxu1 %v2556_v10  ;;  %v2839_v10 = vld [vmem:[%s8540_s24 + $0x3e] sm:$0xff] }
 0x13f   : > { %v1144_v35 = vadd.f32 %v1013_v1, %v8968_v48  ;;  %v9128_v44 = vadd.f32 %v7538_v24, %v1146_v27  ;;  %v1345_v45 = vpop.f32.mrf.mxu1  ;;  %v2840_v27 = vld [vmem:[%s8540_s24 + $0x46] sm:$0xff]  ;;  %v2841_v24 = vld [vmem:[%s8540_s24 + $0x4e] sm:$0xff]  ;;  %v2873_v1 = vpack.c.bf16 %v2839_v10, %v2838_v9 }
 0x140   : > { %v7487_v30 = vpop.f32.mrf.mxu0  ;;  %v2874_v40 = vpack.c.bf16 %v2841_v24, %v2840_v27 }
 0x141   : > { %v1147_v39 = vadd.f32 %v7487_v30, %v8972_v57  ;;  %v9131_v55 = vadd.f32 %v1345_v45, %v1144_v35  ;;  %v7539_v49 = vpop.f32.mrf.mxu1 }
 0x142   : > { %v1016_v62 = vpop.f32.mrf.mxu0 }
 0x143   : > { %v9134_v4 = vadd.f32 %v1016_v62, %v8974_v61  ;;  %v9136_v48 = vadd.f32 %v7539_v49, %v1147_v39  ;;  %v9138_v3 = vpop.f32.mrf.mxu1  ;;  %v2844_v62 = vld [vmem:[%s8540_s24 + $0x66] sm:$0xff] }
 0x144   : > { %v7490_v25 = vpop.f32.mrf.mxu0  ;;  %7721 = vmatmul.mubr.bf16.gmra.mxu0 %v2225_v47 }
 0x145   : > { %v1150_v57 = vadd.f32 %v7490_v25, %v8978_v0  ;;  %v7542_v5 = vpop.f32.mrf.mxu1  ;;  %7773 = vmatmul.mubr.bf16.gmra.mxu1 %v2557_v51  ;;  %7792 = vmatprep.mubr.bf16.mxu0 %v2872_v58  ;;  %v2843_v51 = vld [vmem:[%s8540_s24 + $0x5e] sm:$0xff]  ;;  %v2845_v25 = vld [vmem:[%s8540_s24 + $0x6e] sm:$0xff] }
 0x146   : > { %v1029_v17 = vpop.f32.mrf.mxu0  ;;  %v2876_v24 = vpack.c.bf16 %v2845_v25, %v2844_v62 }
 0x147   : > { %v1148_v18 = vadd.f32 %v1029_v17, %v8984_v12  ;;  %v9146_v61 = vadd.f32 %v7542_v5, %v1150_v57  ;;  %v1361_v23 = vpop.f32.mrf.mxu1 }
 0x148   : > { %v7491_v53 = vpop.f32.mrf.mxu0 }
 0x149   : > { %v1151_v32 = vadd.f32 %v7491_v53, %v8986_v16  ;;  %v9149_v0 = vadd.f32 %v1361_v23, %v1148_v18  ;;  %v7543_v42 = vpop.f32.mrf.mxu1  ;;  %v2842_v16 = vld [vmem:[%s8540_s24 + $0x56] sm:$0xff] }
 0x14a   : > { %v1032_v35 = vpop.f32.mrf.mxu0  ;;  %v2875_v10 = vpack.c.bf16 %v2843_v51, %v2842_v16 }
 0x14b   : > { %v9152_v45 = vadd.f32 %v1032_v35, %v8991_v21  ;;  %v9154_v12 = vadd.f32 %v7543_v42, %v1151_v32  ;;  %v9156_v30 = vpop.f32.mrf.mxu1 }
 0x14c   : > { %v7494_v47 = vpop.f32.mrf.mxu0  ;;  %7793 = vmatmul.mubr.bf16.vlgmr.msra.gmra.mxu0 %v2873_v1 }
 0x14d   : > { %v1154_v39 = vadd.f32 %v7494_v47, %v8995_v28  ;;  %v7546_v49 = vpop.f32.mrf.mxu1  ;;  %7796 = vmatprep.mubr.bf16.mxu0 %v2874_v40  ;;  %v2847_v40 = vld [vmem:[%s8540_s24 + $0x7e] sm:$0xff]  ;;  %v2848_v47 = vld [vmem:[%s8540_s24 + $0x86] sm:$0xff] }
 0x14e   : > { %v1045_v58 = vpop.f32.mrf.mxu0 }
 0x14f   : > { %v1152_v57 = vadd.f32 %v1045_v58, %v9005_v43  ;;  %v9164_v5 = vadd.f32 %v7546_v49, %v1154_v39  ;;  %v1377_v21 = vpop.f32.mrf.mxu1  ;;  %v2849_v39 = vld [vmem:[%s8540_s24 + $0x8e] sm:$0xff] }
 0x150   : > { %v7495_v9 = vpop.f32.mrf.mxu0 }
 0x151   : > { %v1155_v17 = vadd.f32 %v7495_v9, %v9007_v46  ;;  %v9167_v28 = vadd.f32 %v1377_v21, %v1152_v57  ;;  %v7547_v27 = vpop.f32.mrf.mxu1  ;;  %v2846_v46 = vld [vmem:[%s8540_s24 + $0x76] sm:$0xff]  ;;  %v2878_v57 = vpack.c.bf16 %v2849_v39, %v2848_v47 }
 0x152   : > { %v1048_v18 = vpop.f32.mrf.mxu0  ;;  %v2877_v58 = vpack.c.bf16 %v2847_v40, %v2846_v46 }
 0x153   : > { %v9170_v23 = vadd.f32 %v1048_v18, %v9012_v52  ;;  %v9172_v43 = vadd.f32 %v7547_v27, %v1155_v17  ;;  %v9174_v53 = vpop.f32.mrf.mxu1  ;;  %v2851_v18 = vld [vmem:[%s8540_s24 + $0x9e] sm:$0xff] }
 0x154   : > { %v7498_v1 = vpop.f32.mrf.mxu0  ;;  %7797 = vmatmul.mubr.bf16.gmra.mxu0 %v2875_v10 }
 0x155   : > { %v1158_v32 = vadd.f32 %v7498_v1, %v9016_v60  ;;  %v7550_v42 = vpop.f32.mrf.mxu1  ;;  %7800 = vmatprep.mubr.bf16.mxu0 %v2876_v24  ;;  %v8379_v1 = vld [vmem:[%s10728_s4 + $0x78] sm:$0xff]  }
 0x156   : > { %v1061_v35 = vpop.f32.mrf.mxu0  ;;  %7828 = vmatprep.subr.bf16.mxu1 %v8379_v1 }
 0x157   : > { %v1156_v49 = vadd.f32 %v1061_v35, %v9025_v56  ;;  %v9182_v16 = vadd.f32 %v7550_v42, %v1158_v32  ;;  %v1393_v52 = vpop.f32.mrf.mxu1  ;;  %v2852_v42 = vld [vmem:[%s8540_s24 + $0xa6] sm:$0xff]  ;;  %7829 = vmatpush3.bf16.msra.mxu1 %v8379_v1 }
 0x158   : > { %v7499_v51 = vpop.f32.mrf.mxu0 }
 0x159   : > { %v1159_v62 = vadd.f32 %v7499_v51, %v9027_v14  ;;  %v9185_v25 = vadd.f32 %v1393_v52, %v1156_v49  ;;  %v7551_v60 = vpop.f32.mrf.mxu1  ;;  %v2850_v14 = vld [vmem:[%s8540_s24 + $0x96] sm:$0xff] }
 0x15a   : > { %v1064_v21 = vpop.f32.mrf.mxu0 }
 0x15b   : > { %v9188_v9 = vadd.f32 %v1064_v21, %v9032_v20  ;;  %v9190_v56 = vadd.f32 %v7551_v60, %v1159_v62  ;;  %v9192_v10 = vpop.f32.mrf.mxu1  ;;  %v2853_v20 = vld [vmem:[%s8540_s24 + $0xae] sm:$0xff] }
 0x15c   : > { %10736 = vst [vmem:[#allocation6_spill] sm:$0xff] %v9192_v10  ;;  %v7502_v17 = vpop.f32.mrf.mxu0  ;;  %7801 = vmatmul.mubr.bf16.gmra.mxu0 %v2877_v58  ;;  %v2880_v51 = vpack.c.bf16 %v2853_v20, %v2852_v42  ;;  %v8380_v42 = vld [vmem:[%s10728_s4 + $0x70] sm:$0xff]  }
 0x15d   : > { %10735 = vst [vmem:[#allocation5_spill] sm:$0xff] %v9188_v9  ;;  %v1162_v27 = vadd.f32 %v7502_v17, %v9036_v31  ;;  %v7554_v24 = vpop.f32.mrf.mxu1  ;;  %7804 = vmatprep.mubr.bf16.mxu0 %v2878_v57  ;;  %v2879_v31 = vpack.c.bf16 %v2851_v18, %v2850_v14  ;;  %v2856_v14 = vld [vmem:[%s8540_s24 + $0xc6] sm:$0xff]  ;;  %v2857_v18 = vld [vmem:[%s8540_s24 + $0xce] sm:$0xff]  ;;  %7830 = vmatprep.subr.bf16.mxu1 %v8380_v42 }
 0x15e   : > { %v1077_v32 = vpop.f32.mrf.mxu0  ;;  %7831 = vmatpush3.bf16.msra.mxu1 %v8380_v42 }
 0x15f   : > { %v1160_v46 = vadd.f32 %v1077_v32, %v9045_v8  ;;  %v9203_v40 = vadd.f32 %v7554_v24, %v1162_v27  ;;  %v1409_v35 = vpop.f32.mrf.mxu1  ;;  %v2855_v27 = vld [vmem:[%s8540_s24 + $0xbe] sm:$0xff] }
 0x160   : > { %v7503_v47 = vpop.f32.mrf.mxu0 }
 0x161   : > { %v1163_v39 = vadd.f32 %v7503_v47, %v9047_v54  ;;  %v9206_v49 = vadd.f32 %v1409_v35, %v1160_v46  ;;  %v7555_v52 = vpop.f32.mrf.mxu1  ;;  %v2854_v54 = vld [vmem:[%s8540_s24 + $0xb6] sm:$0xff] }
 0x162   : > { %v1080_v58 = vpop.f32.mrf.mxu0  ;;  %v2881_v46 = vpack.c.bf16 %v2855_v27, %v2854_v54  ;;  %v2860_v27 = vld [vmem:[%s8540_s24 + $0xe6] sm:$0xff] }
 0x163   : > { %v9209_v8 = vadd.f32 %v1080_v58, %v9052_v59  ;;  %v9211_v62 = vadd.f32 %v7555_v52, %v1163_v39  ;;  %v9213_v60 = vpop.f32.mrf.mxu1 }
 0x164   : > { %10738 = vst [vmem:[#allocation8_spill] sm:$0xff] %v9213_v60  ;;  %v7506_v57 = vpop.f32.mrf.mxu0  ;;  %7805 = vmatmul.mubr.bf16.gmra.mxu0 %v2879_v31  ;;  %v2882_v31 = vpack.c.bf16 %v2857_v18, %v2856_v14 }
 0x165   : > { %10737 = vst [vmem:[#allocation7_spill] sm:$0xff] %v9209_v8  ;;  %v1166_v21 = vadd.f32 %v7506_v57, %v9056_v2  ;;  %v7558_v17 = vpop.f32.mrf.mxu1  ;;  %7808 = vmatprep.mubr.bf16.mxu0 %v2880_v51 }
 0x166   : > { %v1093_v24 = vpop.f32.mrf.mxu0 }
 0x167   : > { %v1164_v1 = vadd.f32 %v1093_v24, %v9062_v6  ;;  %v9221_v32 = vadd.f32 %v7558_v17, %v1166_v21  ;;  %v1425_v59 = vpop.f32.mrf.mxu1  ;;  %v2858_v21 = vld [vmem:[%s8540_s24 + $0xd6] sm:$0xff]  ;;  %v2859_v17 = vld [vmem:[%s8540_s24 + $0xde] sm:$0xff]  ;;  %v2861_v24 = vld [vmem:[%s8540_s24 + $0xee] sm:$0xff] }
 0x168   : > { %v7507_v20 = vpop.f32.mrf.mxu0  ;;  %v2883_v42 = vpack.c.bf16 %v2859_v17, %v2858_v21  ;;  %v2863_v21 = vld [vmem:[%s8540_s24 + $0xfe] sm:$0xff] }
 0x169   : > { %v1167_v2 = vadd.f32 %v7507_v20, %v9064_v38  ;;  %v9227_v35 = vadd.f32 %v1425_v59, %v1164_v1  ;;  %v7559_v47 = vpop.f32.mrf.mxu1  ;;  %v8381_v1 = vld [vmem:[%s10728_s4 + $0x68] sm:$0xff]  }
 0x16a   : > { %v1096_v6 = vpop.f32.mrf.mxu0  ;;  %7832 = vmatprep.subr.bf16.mxu1 %v8381_v1 }
 0x16b   : > { %v9230_v39 = vadd.f32 %v1096_v6, %v9066_v26  ;;  %v9232_v52 = vadd.f32 %v7559_v47, %v1167_v2  ;;  %v9234_v51 = vpop.f32.mrf.mxu1  ;;  %v2884_v2 = vpack.c.bf16 %v2861_v24, %v2860_v27  ;;  %7833 = vmatpush3.bf16.msra.mxu1 %v8381_v1  ;;  %v2865_v27 = vld [vmem:[%s8540_s24 + $0x10e] sm:$0xff] }
 0x16c   : > { %10740 = vst [vmem:[#allocation10_spill] sm:$0xff] %v9234_v51  ;;  %v7510_v58 = vpop.f32.mrf.mxu0  ;;  %7809 = vmatmul.mubr.bf16.gmra.mxu0 %v2881_v46 }
 0x16d   : > { %10739 = vst [vmem:[#allocation9_spill] sm:$0xff] %v9230_v39  ;;  %v1170_v38 = vadd.f32 %v7510_v58, %v9070_v34  ;;  %v7562_v57 = vpop.f32.mrf.mxu1  ;;  %7812 = vmatprep.mubr.bf16.mxu0 %v2882_v31 }
 0x16e   : > { %v1109_v54 = vpop.f32.mrf.mxu0 }
 0x16f   : > { %v1168_v14 = vadd.f32 %v1109_v54, %v9076_v22  ;;  %v9242_v18 = vadd.f32 %v7562_v57, %v1170_v38  ;;  %v1441_v26 = vpop.f32.mrf.mxu1  ;;  %v2862_v57 = vld [vmem:[%s8540_s24 + $0xf6] sm:$0xff]  ;;  %v2864_v54 = vld [vmem:[%s8540_s24 + $0x106] sm:$0xff] }
 0x170   : > { %v7511_v59 = vpop.f32.mrf.mxu0  ;;  %v2885_v1 = vpack.c.bf16 %v2863_v21, %v2862_v57  ;;  %v2867_v57 = vld [vmem:[%s8540_s24 + $0x11e] sm:$0xff] }
 0x171   : > { %v1171_v34 = vadd.f32 %v7511_v59, %v9078_v50  ;;  %v9248_v20 = vadd.f32 %v1441_v26, %v1168_v14  ;;  %v7563_v46 = vpop.f32.mrf.mxu1 }
 0x172   : > { %v1112_v22 = vpop.f32.mrf.mxu0 }
 0x173   : > { %v9251_v47 = vadd.f32 %v1112_v22, %v9080_v63  ;;  %v9253_v31 = vadd.f32 %v7563_v46, %v1171_v34  ;;  %v9255_v6 = vpop.f32.mrf.mxu1  ;;  %v2886_v34 = vpack.c.bf16 %v2865_v27, %v2864_v54  ;;  %v8382_v46 = vld [vmem:[%s10728_s4 + $0x60] sm:$0xff]   ;;  %v2869_v54 = vld [vmem:[%s8540_s24 + $0x12e] sm:$0xff] }
 0x174   : > { %10742 = vst [vmem:[#allocation12_spill] sm:$0xff] %v9255_v6  ;;  %v7514_v58 = vpop.f32.mrf.mxu0  ;;  %7813 = vmatmul.mubr.bf16.gmra.mxu0 %v2883_v42  ;;  %7834 = vmatprep.subr.bf16.mxu1 %v8382_v46 }
 0x175   : > { %10741 = vst [vmem:[#allocation11_spill] sm:$0xff] %v9251_v47  ;;  %v1174_v50 = vadd.f32 %v7514_v58, %v9084_v7  ;;  %v7566_v38 = vpop.f32.mrf.mxu1  ;;  %7816 = vmatprep.mubr.bf16.mxu0 %v2884_v2  ;;  %7835 = vmatpush3.bf16.msra.mxu1 %v8382_v46  ;;  %v8383_v46 = vld [vmem:[%s10728_s4 + $0x58] sm:$0xff]  }
 0x176   : > { %v1125_v17 = vpop.f32.mrf.mxu0  ;;  %7836 = vmatprep.subr.bf16.mxu1 %v8383_v46 }
 0x177   : > { %v1172_v24 = vadd.f32 %v1125_v17, %v9090_v37  ;;  %v9263_v14 = vadd.f32 %v7566_v38, %v1174_v50  ;;  %v1457_v63 = vpop.f32.mrf.mxu1  ;;  %v2866_v38 = vld [vmem:[%s8540_s24 + $0x116] sm:$0xff]  ;;  %v2868_v17 = vld [vmem:[%s8540_s24 + $0x126] sm:$0xff] }
 0x178   : > { %v7515_v26 = vpop.f32.mrf.mxu0 }
 0x179   : > { %v1175_v59 = vadd.f32 %v7515_v26, %v9092_v33  ;;  %v9266_v42 = vadd.f32 %v1457_v63, %v1172_v24  ;;  %v7567_v7 = vpop.f32.mrf.mxu1  ;;  %7837 = vmatpush3.bf16.msra.mxu1 %v8383_v46 }
 0x17a   : > { %v9271_v37 = vpop.f32.mrf.mxu0 }
 0x17b   : > { %10743 = vst [vmem:[#allocation13_spill] sm:$0xff] %v9271_v37  ;;  %v9273_v2 = vadd.f32 %v7567_v7, %v1175_v59  ;;  %v9275_v22 = vpop.f32.mrf.mxu1  ;;  %v2887_v59 = vpack.c.bf16 %v2867_v57, %v2866_v38 }
 0x17c   : > { %10744 = vst [vmem:[#allocation14_spill] sm:$0xff] %v9275_v22  ;;  %v7586_v58 = vpop.f32.mrf.mxu0  ;;  %7817 = vmatmul.mubr.bf16.gmra.mxu0 %v2885_v1 }
 0x17d   : > { %v1806_v33 = vadd.f32 %v7586_v58, %v9104_v41  ;;  %v7638_v50 = vpop.f32.mrf.mxu1  ;;  %7820 = vmatprep.mubr.bf16.mxu0 %v2886_v34  ;;  %v2888_v34 = vpack.c.bf16 %v2869_v54, %v2868_v17  ;;  %v2871_v17 = vld [vmem:[%s8540_s24 + $0x13e] sm:$0xff] }
 0x17e   : > { %v1661_v21 = vpop.f32.mrf.mxu0 }
 0x17f   : > { %v1804_v27 = vadd.f32 %v1661_v21, %v9109_v11  ;;  %v9283_v24 = vadd.f32 %v7638_v50, %v1806_v33  ;;  %v1993_v63 = vpop.f32.mrf.mxu1  ;;  %v2870_v21 = vld [vmem:[%s8540_s24 + $0x136] sm:$0xff] }
 0x180   : > { %v7587_v26 = vpop.f32.mrf.mxu0 }
 0x181   : > { %v1807_v7 = vadd.f32 %v7587_v26, %v9114_v13  ;;  %v9286_v1 = vadd.f32 %v1993_v63, %v1804_v27  ;;  %v7639_v41 = vpop.f32.mrf.mxu1  ;;  %v8384_v13 = vld [vmem:[%s10728_s4 + $0x38] sm:$0xff]  }
 0x182   : > { %v9291_v58 = vpop.f32.mrf.mxu0  ;;  %7880 = vmatprep.subr.bf16.mxu0 %v8384_v13 }
 0x183   : > { %v9293_v11 = vadd.f32 %v7639_v41, %v1807_v7  ;;  %v9295_v33 = vpop.f32.mrf.mxu1  ;;  %7881 = vmatpush3.bf16.msra.mxu0 %v8384_v13  ;;  %v2889_v7 = vpack.c.bf16 %v2871_v17, %v2870_v21  ;;  %v8385_v41 = vld [vmem:[%s10728_s4 + $0x30] sm:$0xff]  }
 0x184   : > { %v7590_v50 = vpop.f32.mrf.mxu0  ;;  %7821 = vmatmul.mubr.bf16.gmra.mxu0 %v2887_v59  ;;  %7882 = vmatprep.subr.bf16.mxu0 %v8385_v41  ;;  %v8386_v13 = vld [vmem:[%s10728_s4 + $0x50] sm:$0xff]  }
 0x185   : > { %v1810_v38 = vadd.f32 %v7590_v50, %v9128_v44  ;;  %v7642_v57 = vpop.f32.mrf.mxu1  ;;  %7824 = vmatprep.mubr.bf16.mxu0 %v2888_v34  ;;  %7838 = vmatprep.subr.bf16.mxu1 %v8386_v13 }
 0x186   : > { %v1677_v54 = vpop.f32.mrf.mxu0  ;;  %7839 = vmatpush3.bf16.msra.mxu1 %v8386_v13 }
 0x187   : > { %v1808_v27 = vadd.f32 %v1677_v54, %v9131_v55  ;;  %v9304_v63 = vadd.f32 %v7642_v57, %v1810_v38  ;;  %v2009_v26 = vpop.f32.mrf.mxu1  ;;  %7883 = vmatpush3.bf16.msra.mxu0 %v8385_v41 }
 0x188   : > { %v7591_v59 = vpop.f32.mrf.mxu0 }
 0x189   : > { %v1811_v44 = vadd.f32 %v7591_v59, %v9136_v48  ;;  %v9310_v46 = vadd.f32 %v2009_v26, %v1808_v27  ;;  %v7643_v34 = vpop.f32.mrf.mxu1  ;;  %v8387_v48 = vld [vmem:[%s10728_s4 + $0x28] sm:$0xff]  }
 0x18a   : > { %v9312_v50 = vpop.f32.mrf.mxu0  ;;  %7884 = vmatprep.subr.bf16.mxu0 %v8387_v48 }
 0x18b   : > { %v9314_v22 = vadd.f32 %v7643_v34, %v1811_v44  ;;  %v9316_v55 = vpop.f32.mrf.mxu1  ;;  %7885 = vmatpush3.bf16.msra.mxu0 %v8387_v48  ;;  %v8459_v48 = vmov 0.0  }
 0x18c   : > { %v7594_v38 = vpop.f32.mrf.mxu0  ;;  %7825 = vmatmul.mubr.bf16.gmra.mxu0 %v2889_v7  ;;  %v8388_v7 = vld [vmem:[%s10728_s4 + $0x20] sm:$0xff]   ;;  %3323 = vst [vmem:[#allocation2 + $0x20] sm:$0xff] %v8459_v48  ;;  %3324 = vst [vmem:[#allocation2 + $0x28] sm:$0xff] %v8459_v48 }
 0x18d   : > { %v1814_v57 = vadd.f32 %v7594_v38, %v9146_v61  ;;  %v7646_v21 = vpop.f32.mrf.mxu1  ;;  %7886 = vmatprep.subr.bf16.mxu0 %v8388_v7  ;;  %3319 = vst [vmem:[#allocation2] sm:$0xff] %v8459_v48  ;;  %3320 = vst [vmem:[#allocation2 + $0x8] sm:$0xff] %v8459_v48 }
 0x18e   : > { %v1693_v17 = vpop.f32.mrf.mxu0  ;;  %3321 = vst [vmem:[#allocation2 + $0x10] sm:$0xff] %v8459_v48  ;;  %3322 = vst [vmem:[#allocation2 + $0x18] sm:$0xff] %v8459_v48 }
 0x18f   : > { %v1812_v54 = vadd.f32 %v1693_v17, %v9149_v0  ;;  %v9326_v27 = vadd.f32 %v7646_v21, %v1814_v57  ;;  %v2025_v26 = vpop.f32.mrf.mxu1  ;;  %7887 = vmatpush3.bf16.msra.mxu0 %v8388_v7  ;;  %3325 = vst [vmem:[#allocation2 + $0x30] sm:$0xff] %v8459_v48  ;;  %3326 = vst [vmem:[#allocation2 + $0x38] sm:$0xff] %v8459_v48 }
 0x190   : > { %v7595_v59 = vpop.f32.mrf.mxu0  ;;  %3327 = vst [vmem:[#allocation2 + $0x40] sm:$0xff] %v8459_v48  ;;  %3328 = vst [vmem:[#allocation2 + $0x48] sm:$0xff] %v8459_v48 }
 0x191   : > { %v1815_v41 = vadd.f32 %v7595_v59, %v9154_v12  ;;  %v9332_v44 = vadd.f32 %v2025_v26, %v1812_v54  ;;  %v7647_v61 = vpop.f32.mrf.mxu1  ;;  %3329 = vst [vmem:[#allocation2 + $0x50] sm:$0xff] %v8459_v48  ;;  %3330 = vst [vmem:[#allocation2 + $0x58] sm:$0xff] %v8459_v48  ;;  %v8390_v12 = vld [vmem:[%s10728_s4 + $0x18] sm:$0xff]  }
 0x192   : > { %v9334_v34 = vpop.f32.mrf.mxu0  ;;  %3331 = vst [vmem:[#allocation2 + $0x60] sm:$0xff] %v8459_v48  ;;  %3332 = vst [vmem:[#allocation2 + $0x68] sm:$0xff] %v8459_v48  ;;  %7888 = vmatprep.subr.bf16.mxu0 %v8390_v12 }
 0x193   : > { %v9336_v13 = vadd.f32 %v7647_v61, %v1815_v41  ;;  %v9338_v0 = vpop.f32.mrf.mxu1  ;;  %3333 = vst [vmem:[#allocation2 + $0x70] sm:$0xff] %v8459_v48  ;;  %3334 = vst [vmem:[#allocation2 + $0x78] sm:$0xff] %v8459_v48  ;;  %7889 = vmatpush3.bf16.msra.mxu0 %v8390_v12  ;;  %v8391_v41 = vld [vmem:[%s10728_s4 + $0x10] sm:$0xff]   ;;  %v8389_v12 = vld [vmem:[%s10728_s4 + $0x48] sm:$0xff]  }
 0x194   : > { %v7598_v38 = vpop.f32.mrf.mxu0  ;;  %3335 = vst [vmem:[#allocation2 + $0x80] sm:$0xff] %v8459_v48  ;;  %3336 = vst [vmem:[#allocation2 + $0x88] sm:$0xff] %v8459_v48  ;;  %7890 = vmatprep.subr.bf16.mxu0 %v8391_v41  ;;  %7840 = vmatprep.subr.bf16.mxu1 %v8389_v12 }
 0x195   : > { %3337 = vst [vmem:[#allocation2 + $0x90] sm:$0xff] %v8459_v48  ;;  %3338 = vst [vmem:[#allocation2 + $0x98] sm:$0xff] %v8459_v48  ;;  %v1818_v57 = vadd.f32 %v7598_v38, %v9164_v5  ;;  %v7650_v21 = vpop.f32.mrf.mxu1  ;;  %7841 = vmatpush3.bf16.msra.mxu1 %v8389_v12 }
 0x196   : > { %3339 = vst [vmem:[#allocation2 + $0xa0] sm:$0xff] %v8459_v48  ;;  %3340 = vst [vmem:[#allocation2 + $0xa8] sm:$0xff] %v8459_v48  ;;  %v1709_v17 = vpop.f32.mrf.mxu0 }
 0x197   : > { %3341 = vst [vmem:[#allocation2 + $0xb0] sm:$0xff] %v8459_v48  ;;  %3342 = vst [vmem:[#allocation2 + $0xb8] sm:$0xff] %v8459_v48  ;;  %v1816_v54 = vadd.f32 %v1709_v17, %v9167_v28  ;;  %v9345_v26 = vadd.f32 %v7650_v21, %v1818_v57  ;;  %v2041_v59 = vpop.f32.mrf.mxu1  ;;  %7891 = vmatpush3.bf16.msra.mxu0 %v8391_v41  ;;  %v8392_v41 = vld [vmem:[%s10728_s4 + $0x40] sm:$0xff]  }
 0x198   : > { %3343 = vst [vmem:[#allocation2 + $0xc0] sm:$0xff] %v8459_v48  ;;  %3344 = vst [vmem:[#allocation2 + $0xc8] sm:$0xff] %v8459_v48  ;;  %v7599_v7 = vpop.f32.mrf.mxu0  ;;  %7842 = vmatprep.subr.bf16.mxu1 %v8392_v41 }
 0x199   : > { %3345 = vst [vmem:[#allocation2 + $0xd0] sm:$0xff] %v8459_v48  ;;  %3346 = vst [vmem:[#allocation2 + $0xd8] sm:$0xff] %v8459_v48  ;;  %v1819_v61 = vadd.f32 %v7599_v7, %v9172_v43  ;;  %v7651_v37 = vpop.f32.mrf.mxu1  ;;  %v8393_v43 = vld [vmem:[%s10728_s4 + $0x8] sm:$0xff]   ;;  %7843 = vmatpush3.bf16.msra.mxu1 %v8392_v41 }
 0x19a   : > { %3347 = vst [vmem:[#allocation2 + $0xe0] sm:$0xff] %v8459_v48  ;;  %3348 = vst [vmem:[#allocation2 + $0xe8] sm:$0xff] %v8459_v48  ;;  %v9353_v5 = vpop.f32.mrf.mxu0  ;;  %7892 = vmatprep.subr.bf16.mxu0 %v8393_v43 }
 0x19b   : > { %3349 = vst [vmem:[#allocation2 + $0xf0] sm:$0xff] %v8459_v48  ;;  %3350 = vst [vmem:[#allocation2 + $0xf8] sm:$0xff] %v8459_v48  ;;  %v9355_v38 = vadd.f32 %v7651_v37, %v1819_v61  ;;  %v9357_v28 = vpop.f32.mrf.mxu1  ;;  %7893 = vmatpush3.bf16.msra.mxu0 %v8393_v43  ;;  %v3467_v43 = vld [vmem:[#allocation2 + $0x9] sm:$0xff] }
 0x19c   : > { %3351 = vst [vmem:[#allocation2 + $0x100] sm:$0xff] %v8459_v48  ;;  %3352 = vst [vmem:[#allocation2 + $0x108] sm:$0xff] %v8459_v48  ;;  %v7602_v57 = vpop.f32.mrf.mxu0 }
 0x19d   : > { %3353 = vst [vmem:[#allocation2 + $0x110] sm:$0xff] %v8459_v48  ;;  %3354 = vst [vmem:[#allocation2 + $0x118] sm:$0xff] %v8459_v48  ;;  %v1822_v21 = vadd.f32 %v7602_v57, %v9182_v16  ;;  %v7654_v17 = vpop.f32.mrf.mxu1  ;;  %v8394_v16 = vld [vmem:[%s10728_s4] sm:$0xff]  }
 0x19e   : > { %3355 = vst [vmem:[#allocation2 + $0x120] sm:$0xff] %v8459_v48  ;;  %3356 = vst [vmem:[#allocation2 + $0x128] sm:$0xff] %v8459_v48  ;;  %7894 = vmatprep.subr.bf16.mxu0 %v8394_v16 }
 0x19f   : > { %3357 = vst [vmem:[#allocation2 + $0x130] sm:$0xff] %v8459_v48  ;;  %3358 = vst [vmem:[#allocation2 + $0x138] sm:$0xff] %v8459_v48  ;;  %v2057_v7 = vpop.f32.mrf.mxu1  ;;  %7895 = vmatpush3.bf16.msra.mxu0 %v8394_v16 }
 0x1a0   : > { %3359 = vst [vmem:[#allocation2 + $0x140] sm:$0xff] %v8459_v48  ;;  %v9351_v48 = vadd.f32 %v2041_v59, %v1816_v54  ;;  %10745 = vst [vmem:[#allocation15_spill] sm:$0xff] %v9357_v28  ;;  %v1725_v54 = vpop.f32.mrf.mxu0  ;;  %v9367_v59 = vadd.f32 %v7654_v17, %v1822_v21 }
 0x1a1   : > { %v1820_v37 = vadd.f32 %v1725_v54, %v9185_v25  ;;  %v7655_v12 = vpop.f32.mrf.mxu1  ;;  %v3466_v25 = vld [vmem:[#allocation2 + $0x1] sm:$0xff] }
 0x1a2   : > { %v7603_v61 = vpop.f32.mrf.mxu0  ;;  %v3502_v54 = vpack.c.bf16 %v3467_v43, %v3466_v25 }
 0x1a3   : > { %v1823_v57 = vadd.f32 %v7603_v61, %v9190_v56  ;;  %v9376_v6 = vadd.f32 %v2057_v7, %v1820_v37  ;;  %v9382_v17 = vpop.f32.mrf.mxu1  ;;  %v8460_v7 = vmov 0.0|0.0  }
 0x1a4   : > { %v9378_v47 = vpop.f32.mrf.mxu0  ;;  %10747 = vst [vmem:[#allocation17_spill] sm:$0xff] %v9382_v17  ;;  %7844 = vmatprep.mubr.bf16.mxu1 %v3502_v54  ;;  %7896 = vmatprep.mubr.bf16.mxu0 %v8460_v7 }
 0x1a5   : > { %10746 = vst [vmem:[#allocation16_spill] sm:$0xff] %v9378_v47  ;;  %v9380_v21 = vadd.f32 %v7655_v12, %v1823_v57  ;;  %v7658_v56 = vpop.f32.mrf.mxu1 }
 0x1a6   : > { %v7606_v36 = vpop.f32.mrf.mxu0 }
 0x1a7   : > { %v1826_v29 = vadd.f32 %v7606_v36, %v9203_v40  ;;  %v2073_v39 = vpop.f32.mrf.mxu1 }
 0x1a8   : > { %v1741_v37 = vpop.f32.mrf.mxu0 }
 0x1a9   : > { %v1824_v61 = vadd.f32 %v1741_v37, %v9206_v49  ;;  %v9386_v51 = vadd.f32 %v7658_v56, %v1826_v29  ;;  %v7659_v41 = vpop.f32.mrf.mxu1  ;;  %v9401_v29 = vld [vmem:[%s10728_s4 + $0xb8] sm:$0xff]  }
 0x1aa   : > { %v7607_v57 = vpop.f32.mrf.mxu0  ;;  %10750 = vst [vmem:[#allocation20_spill] sm:$0xff] %v9401_v29  ;;  %7932 = vmatprep.subr.bf16.mxu1 %v9401_v29 }
 0x1ab   : > { %v1827_v12 = vadd.f32 %v7607_v57, %v9211_v62  ;;  %v9389_v17 = vadd.f32 %v2073_v39, %v1824_v61  ;;  %v9395_v36 = vpop.f32.mrf.mxu1 }
 0x1ac   : > { %v9391_v16 = vpop.f32.mrf.mxu0  ;;  %10749 = vst [vmem:[#allocation19_spill] sm:$0xff] %v9395_v36 }
 0x1ad   : > { %10748 = vst [vmem:[#allocation18_spill] sm:$0xff] %v9391_v16  ;;  %v9393_v25 = vadd.f32 %v7659_v41, %v1827_v12  ;;  %v7662_v54 = vpop.f32.mrf.mxu1 }
 0x1ae   : > { %v7610_v40 = vpop.f32.mrf.mxu0 }
 0x1af   : > { %v1830_v43 = vadd.f32 %v7610_v40, %v9221_v32  ;;  %v2089_v56 = vpop.f32.mrf.mxu1 }
 0x1b0   : > { %v1757_v49 = vpop.f32.mrf.mxu0 }
 0x1b1   : > { %v1828_v62 = vadd.f32 %v1757_v49, %v9227_v35  ;;  %v9404_v39 = vadd.f32 %v7662_v54, %v1830_v43  ;;  %v7663_v32 = vpop.f32.mrf.mxu1 }
 0x1b2   : > { %v7611_v37 = vpop.f32.mrf.mxu0 }
 0x1b3   : > { %v1831_v7 = vadd.f32 %v7611_v37, %v9232_v52  ;;  %v9408_v61 = vadd.f32 %v2089_v56, %v1828_v62  ;;  %v9414_v41 = vpop.f32.mrf.mxu1 }
 0x1b4   : > { %v9410_v57 = vpop.f32.mrf.mxu0  ;;  %10752 = vst [vmem:[#allocation22_spill] sm:$0xff] %v9414_v41 }
 0x1b5   : > { %10751 = vst [vmem:[#allocation21_spill] sm:$0xff] %v9410_v57  ;;  %v9412_v12 = vadd.f32 %v7663_v32, %v1831_v7  ;;  %v7666_v43 = vpop.f32.mrf.mxu1 }
 0x1b6   : > { %v7614_v40 = vpop.f32.mrf.mxu0 }
 0x1b7   : > { %v1834_v35 = vadd.f32 %v7614_v40, %v9242_v18  ;;  %v2105_v16 = vpop.f32.mrf.mxu1 }
 0x1b8   : > { %v1773_v54 = vpop.f32.mrf.mxu0 }
 0x1b9   : > { %v1832_v49 = vadd.f32 %v1773_v54, %v9248_v20  ;;  %v9418_v36 = vadd.f32 %v7666_v43, %v1834_v35  ;;  %v7667_v37 = vpop.f32.mrf.mxu1 }
 0x1ba   : > { %v7615_v52 = vpop.f32.mrf.mxu0 }
 0x1bb   : > { %v1835_v62 = vadd.f32 %v7615_v52, %v9253_v31  ;;  %v9421_v56 = vadd.f32 %v2105_v16, %v1832_v49  ;;  %v9427_v41 = vpop.f32.mrf.mxu1 }
 0x1bc   : > { %v9423_v7 = vpop.f32.mrf.mxu0  ;;  %10754 = vst [vmem:[#allocation24_spill] sm:$0xff] %v9427_v41 }
 0x1bd   : > { %10753 = vst [vmem:[#allocation23_spill] sm:$0xff] %v9423_v7  ;;  %v9425_v32 = vadd.f32 %v7667_v37, %v1835_v62  ;;  %v7670_v57 = vpop.f32.mrf.mxu1 }
 0x1be   : > { %v7618_v18 = vpop.f32.mrf.mxu0 }
 0x1bf   : > { %v1838_v40 = vadd.f32 %v7618_v18, %v9263_v14  ;;  %v2121_v54 = vpop.f32.mrf.mxu1 }
 0x1c0   : > { %v1789_v20 = vpop.f32.mrf.mxu0 }
 0x1c1   : > { %v1836_v35 = vadd.f32 %v1789_v20, %v9266_v42  ;;  %v9431_v43 = vadd.f32 %v7670_v57, %v1838_v40  ;;  %v7671_v52 = vpop.f32.mrf.mxu1 }
 0x1c2   : > { %v7619_v31 = vpop.f32.mrf.mxu0 }
 0x1c3   : > { %v1839_v16 = vadd.f32 %v7619_v31, %v9273_v2  ;;  %v9434_v49 = vadd.f32 %v2121_v54, %v1836_v35  ;;  %v9440_v41 = vpop.f32.mrf.mxu1 }
 0x1c4   : > { %v9436_v62 = vpop.f32.mrf.mxu0  ;;  %10756 = vst [vmem:[#allocation26_spill] sm:$0xff] %v9440_v41 }
 0x1c5   : > { %10755 = vst [vmem:[#allocation25_spill] sm:$0xff] %v9436_v62  ;;  %v9438_v37 = vadd.f32 %v7671_v52, %v1839_v16  ;;  %v9445_v42 = vpop.f32.mrf.mxu1 }
 0x1c6   : > { %v7690_v14 = vpop.f32.mrf.mxu0 }
 0x1c7   : > { %v9443_v18 = vadd.f32 %v7690_v14, %v9283_v24  ;;  %v9450_v2 = vpop.f32.mrf.mxu1  ;;  %v9462_v24 = vld [vmem:[%s10728_s4 + $0xf8] sm:$0xff]  }
 0x1c8   : > { %v2325_v57 = vpop.f32.mrf.mxu0  ;;  %10757 = vst [vmem:[#allocation27_spill] sm:$0xff] %v9462_v24  ;;  %7984 = vmatprep.subr.bf16.mxu0 %v9462_v24 }
 0x1c9   : > { %v9448_v40 = vadd.f32 %v2325_v57, %v9286_v1  ;;  %v9455_v54 = vpop.f32.mrf.mxu1 }
 0x1ca   : > { %v7691_v20 = vpop.f32.mrf.mxu0 }
 0x1cb   : > { %v9453_v35 = vadd.f32 %v7691_v20, %v9293_v11  ;;  %v9467_v1 = vpop.f32.mrf.mxu1 }
 0x1cc   : > { %v9457_v31 = vpop.f32.mrf.mxu0 }
 0x1cd   : > { %v9473_v20 = vpop.f32.mrf.mxu1 }
 0x1ce   : > { %v7694_v16 = vpop.f32.mrf.mxu0 }
 0x1cf   : > { %v9465_v52 = vadd.f32 %v7694_v16, %v9304_v63  ;;  %v9480_v29 = vpop.f32.mrf.mxu1 }
 0x1d0   : > { %v2341_v14 = vpop.f32.mrf.mxu0 }
 0x1d1   : > { %v9471_v11 = vadd.f32 %v2341_v14, %v9310_v46  ;;  %v9488_v14 = vpop.f32.mrf.mxu1 }
 0x1d2   : > { %v7695_v57 = vpop.f32.mrf.mxu0 }
 0x1d3   : > { %v9476_v41 = vadd.f32 %v7695_v57, %v9314_v22  ;;  %v9495_v8 = vpop.f32.mrf.mxu1 }
 0x1d4   : > { %v9478_v62 = vpop.f32.mrf.mxu0 }
 0x1d6   : > { %v7698_v7 = vpop.f32.mrf.mxu0 }
 0x1d7   : > { %v9483_v63 = vadd.f32 %v7698_v7, %v9326_v27 }
 0x1d8   : > { %v2357_v16 = vpop.f32.mrf.mxu0 }
 0x1d9   : > { %v9486_v24 = vadd.f32 %v2357_v16, %v9332_v44  ;;  %v9503_v16 = vpop.f32.mrf.mxu1 }
 0x1da   : > { %v7699_v46 = vpop.f32.mrf.mxu0 }
 0x1db   : > { %v9491_v60 = vadd.f32 %v7699_v46, %v9336_v13  ;;  %v9510_v10 = vpop.f32.mrf.mxu1 }
 0x1dc   : > { %v9493_v22 = vpop.f32.mrf.mxu0 }
 0x1de   : > { %v7702_v57 = vpop.f32.mrf.mxu0 }
 0x1df   : > { %v9498_v47 = vadd.f32 %v7702_v57, %v9345_v26 }
 0x1e0   : > { %v2373_v27 = vpop.f32.mrf.mxu0 }
 0x1e1   : > { %v9501_v7 = vadd.f32 %v2373_v27, %v9351_v48  ;;  %v9518_v27 = vpop.f32.mrf.mxu1 }
 0x1e2   : > { %v7703_v44 = vpop.f32.mrf.mxu0 }
 0x1e3   : > { %10758 = vst [vmem:[#allocation28_spill] sm:$0xff] %v9501_v7  ;;  %v9506_v28 = vadd.f32 %v7703_v44, %v9355_v38 }
 0x1e4   : > { %v9508_v13 = vpop.f32.mrf.mxu0 }
 0x1e5   : > { %10759 = vst [vmem:[#allocation29_spill] sm:$0xff] %v9506_v28  ;;  %10760 = vst [vmem:[#allocation30_spill] sm:$0xff] %v9508_v13  ;;  %v9525_v28 = vpop.f32.mrf.mxu1 }
 0x1e6   : > { %v7706_v46 = vpop.f32.mrf.mxu0 }
 0x1e7   : > { %v9513_v9 = vadd.f32 %v7706_v46, %v9367_v59 }
 0x1e8   : > { %v2389_v26 = vpop.f32.mrf.mxu0 }
 0x1e9   : > { %v9516_v57 = vadd.f32 %v2389_v26, %v9376_v6  ;;  %v9533_v26 = vpop.f32.mrf.mxu1 }
 0x1ea   : > { %v7707_v48 = vpop.f32.mrf.mxu0 }
 0x1eb   : > { %10761 = vst [vmem:[#allocation31_spill] sm:$0xff] %v9516_v57  ;;  %v9521_v7 = vadd.f32 %v7707_v48, %v9380_v21 }
 0x1ec   : > { %v9523_v38 = vpop.f32.mrf.mxu0 }
 0x1ed   : > { %10762 = vst [vmem:[#allocation32_spill] sm:$0xff] %v9521_v7  ;;  %10763 = vst [vmem:[#allocation33_spill] sm:$0xff] %v9523_v38  ;;  %v9540_v7 = vpop.f32.mrf.mxu1 }
 0x1ee   : > { %v7710_v44 = vpop.f32.mrf.mxu0 }
 0x1ef   : > { %v9528_v13 = vadd.f32 %v7710_v44, %v9386_v51 }
 0x1f0   : > { %v2405_v59 = vpop.f32.mrf.mxu0 }
 0x1f1   : > { %v9531_v46 = vadd.f32 %v2405_v59, %v9389_v17  ;;  %v9548_v59 = vpop.f32.mrf.mxu1 }
 0x1f2   : > { %v7711_v6 = vpop.f32.mrf.mxu0 }
 0x1f3   : > { %10764 = vst [vmem:[#allocation34_spill] sm:$0xff] %v9531_v46  ;;  %v9536_v57 = vadd.f32 %v7711_v6, %v9393_v25 }
 0x1f4   : > { %v9538_v21 = vpop.f32.mrf.mxu0 }
 0x1f5   : > { %10765 = vst [vmem:[#allocation35_spill] sm:$0xff] %v9536_v57  ;;  %10766 = vst [vmem:[#allocation36_spill] sm:$0xff] %v9538_v21  ;;  %v9555_v57 = vpop.f32.mrf.mxu1 }
 0x1f6   : > { %v7714_v48 = vpop.f32.mrf.mxu0 }
 0x1f7   : > { %v9543_v38 = vadd.f32 %v7714_v48, %v9404_v39 }
 0x1f8   : > { %v2421_v51 = vpop.f32.mrf.mxu0 }
 0x1f9   : > { %v9546_v44 = vadd.f32 %v2421_v51, %v9408_v61  ;;  %v9563_v51 = vpop.f32.mrf.mxu1 }
 0x1fa   : > { %v7715_v17 = vpop.f32.mrf.mxu0 }
 0x1fb   : > { %10767 = vst [vmem:[#allocation37_spill] sm:$0xff] %v9546_v44  ;;  %v9551_v46 = vadd.f32 %v7715_v17, %v9412_v12 }
 0x1fc   : > { %v9553_v25 = vpop.f32.mrf.mxu0 }
 0x1fd   : > { %10768 = vst [vmem:[#allocation38_spill] sm:$0xff] %v9551_v46  ;;  %10769 = vst [vmem:[#allocation39_spill] sm:$0xff] %v9553_v25  ;;  %v1473_v46 = vadd.f32 %v9116_v15, %v9112_v19  ;;  %v9572_v25 = vpop.f32.mrf.mxu1  ;;  %v2802_v15 = vadd.f32 %v9445_v42, %v9443_v18 }
 0x1fe   : > { %v7718_v6 = vpop.f32.mrf.mxu0 }
 0x1ff   : > { %v9558_v21 = vadd.f32 %v7718_v6, %v9418_v36 }
 0x200   : > { %v2437_v39 = vpop.f32.mrf.mxu0 }
 0x201   : > { %v9561_v48 = vadd.f32 %v2437_v39, %v9421_v56  ;;  %v1805_v56 = vadd.f32 %v9291_v58, %v1473_v46 }
 0x202   : > { %v7719_v61 = vpop.f32.mrf.mxu0 }
 0x203   : > { %10770 = vst [vmem:[#allocation40_spill] sm:$0xff] %v9561_v48  ;;  %v9566_v44 = vadd.f32 %v7719_v61, %v9425_v32  ;;  %v9581_v32 = vpop.f32.mrf.mxu1  ;;  %v2137_v19 = vadd.f32 %v9295_v33, %v1805_v56 }
 0x204   : > { %v9568_v12 = vpop.f32.mrf.mxu0 }
 0x205   : > { %10771 = vst [vmem:[#allocation41_spill] sm:$0xff] %v9566_v44  ;;  %v2469_v46 = vadd.f32 %v9457_v31, %v2137_v19 }
 0x206   : > { %v7722_v17 = vpop.f32.mrf.mxu0 }
 0x207   : > { %v9575_v36 = vadd.f32 %v7722_v17, %v9431_v43  ;;  %v1477_v43 = vadd.f32 %v9138_v3, %v9134_v4  ;;  %v2803_v4 = vadd.f32 %v9455_v54, %v9453_v35  ;;  %v2806_v35 = vadd.f32 %v9473_v20, %v9465_v52  ;;  %v3247_v54 = vld [vmem:[%s10725_s1] sm:$0xff]  ;;  %v3250_v52 = vld [vmem:[%s10725_s1 + $0x18] sm:$0xff] }
 0x208   : > { %v2453_v6 = vpop.f32.mrf.mxu0 }
 0x209   : > { %v9579_v39 = vadd.f32 %v2453_v6, %v9434_v49  ;;  %v9596_v49 = vld [vmem:[%s10727_s3] ss:$0 sm:$0xff]  ;;  %v1809_v17 = vadd.f32 %v9312_v50, %v1477_v43  ;;  %v3249_v6 = vld [vmem:[%s10725_s1 + $0x10] sm:$0xff] }
 0x20a   : > { %v7723_v48 = vpop.f32.mrf.mxu0 }
 0x20b   : > { %v9584_v61 = vadd.f32 %v7723_v48, %v9438_v37  ;;  %v2800_v37 = vadd.f32 %v9450_v2, %v9448_v40  ;;  %v9601_v48 = vpop.f32.mrf.mxu1  ;;  %v2801_v40 = vadd.f32 %v9467_v1, %v2469_v46 }
 0x20c   : > { %v9586_v44 = vpop.f32.mrf.mxu0 }
 0x20d   : > { %v9611_v2 = vpop.f32.mrf.mxu1 }
 0x20e   : > { %v7794_v58 = vpop.f32.mrf.mxu0 }
 0x20f   : > { %v3134_v33 = vadd.f32 %v7794_v58, %v2802_v15  ;;  %v2141_v15 = vadd.f32 %v9316_v55, %v1809_v17  ;;  %v9629_v17 = vpop.f32.mrf.mxu1 }
 0x210   : > { %v2989_v18 = vpop.f32.mrf.mxu0 }
 0x211   : > { %v3177_v3 = vadd.f32 %v9596_v49, %v3134_v33  ;;  %v3132_v42 = vadd.f32 %v2989_v18, %v2800_v37  ;;  %v1481_v33 = vadd.f32 %v9156_v30, %v9152_v45  ;;  %v2804_v18 = vadd.f32 %v9480_v29, %v9471_v11  ;;  %v3248_v29 = vld [vmem:[%s10725_s1 + $0x8] sm:$0xff] }
 0x212   : > { %v7795_v56 = vpop.f32.mrf.mxu0  ;;  %v2473_v55 = vadd.f32 %v9478_v62, %v2141_v15  ;;  %v2807_v30 = vadd.f32 %v9488_v14, %v9476_v41  ;;  %v9643_v15 = vpop.f32.mrf.mxu1 }
 0x213   : > { %v3213_v31 = vmax.f32 %v3177_v3, 0.0  ;;  %v3175_v19 = vadd.f32 %v9596_v49, %v3132_v42  ;;  %v3135_v50 = vadd.f32 %v7795_v56, %v2803_v4  ;;  %v1813_v45 = vadd.f32 %v9334_v34, %v1481_v33  ;;  %v3253_v34 = vld [vmem:[%s10725_s1 + $0x30] sm:$0xff] }
 0x214   : > { %v2992_v43 = vpop.f32.mrf.mxu0 }
 0x215   : > { %v3285_v58 = vmul.f32 %v3249_v6, %v3213_v31  ;;  %v3211_v37 = vmax.f32 %v3175_v19, 0.0  ;;  %v3178_v1 = vadd.f32 %v9596_v49, %v3135_v50  ;;  %v3133_v46 = vadd.f32 %v2992_v43, %v2801_v40 }
 0x216   : > { %v7798_v20 = vpop.f32.mrf.mxu0  ;;  %v2805_v19 = vadd.f32 %v9495_v8, %v2473_v55  ;;  %v1485_v43 = vadd.f32 %v9174_v53, %v9170_v23  ;;  %v2810_v8 = vadd.f32 %v9503_v16, %v9483_v63  ;;  %v2808_v23 = vadd.f32 %v9510_v10, %v9486_v24  ;;  %v9662_v16 = vpop.f32.mrf.mxu1  ;;  %v3252_v10 = vld [vmem:[%s10725_s1 + $0x28] sm:$0xff] }
 0x217   : > { %3362 = vst [vmem:[#allocation2 + $0x23] sm:$0xff] %v3285_v58  ;;  %v3283_v4 = vmul.f32 %v3247_v54, %v3211_v37  ;;  %v3214_v3 = vmax.f32 %v3178_v1, 0.0  ;;  %v3176_v42 = vadd.f32 %v9596_v49, %v3133_v46  ;;  %v3138_v6 = vadd.f32 %v7798_v20, %v2806_v35  ;;  %v3251_v37 = vld [vmem:[%s10725_s1 + $0x20] sm:$0xff] }
 0x218   : > { %v3005_v62 = vpop.f32.mrf.mxu0  ;;  %v2145_v58 = vadd.f32 %v9338_v0, %v1813_v45  ;;  %v3254_v0 = vld [vmem:[%s10725_s1 + $0x38] sm:$0xff] }
 0x219   : > { %3360 = vst [vmem:[#allocation2 + $0x13] sm:$0xff] %v3283_v4  ;;  %v3286_v11 = vmul.f32 %v3250_v52, %v3214_v3  ;;  %v3212_v56 = vmax.f32 %v3176_v42, 0.0  ;;  %v3181_v40 = vadd.f32 %v9596_v49, %v3138_v6  ;;  %v3136_v31 = vadd.f32 %v3005_v62, %v2804_v18  ;;  %v10773_v62 = vld [vmem:[#allocation6_spill] sm:$0xff] }
 0x21a   : > { %v7799_v50 = vpop.f32.mrf.mxu0  ;;  %v1817_v52 = vadd.f32 %v9353_v5, %v1485_v43  ;;  %v2477_v53 = vadd.f32 %v9493_v22, %v2145_v58  ;;  %v2811_v5 = vadd.f32 %v9518_v27, %v9491_v60  ;;  %v3257_v60 = vld [vmem:[%s10725_s1 + $0x50] sm:$0xff] }
 0x21b   : > { %3363 = vst [vmem:[#allocation2 + $0x2b] sm:$0xff] %v3286_v11  ;;  %v3284_v41 = vmul.f32 %v3248_v29, %v3212_v56  ;;  %v3217_v14 = vmax.f32 %v3181_v40, 0.0  ;;  %v3179_v35 = vadd.f32 %v9596_v49, %v3136_v31  ;;  %v3139_v54 = vadd.f32 %v7799_v50, %v2807_v30  ;;  %v10772_v29 = vld [vmem:[#allocation5_spill] sm:$0xff]  ;;  %v10774_v56 = vld [vmem:[#allocation15_spill] sm:$0xff] }
 0x21c   : > { %v3008_v1 = vpop.f32.mrf.mxu0  ;;  %v1489_v11 = vadd.f32 %v10773_v62, %v10772_v29  ;;  %v2149_v40 = vadd.f32 %v10774_v56, %v1817_v52  ;;  %v2809_v31 = vadd.f32 %v9525_v28, %v2477_v53  ;;  %v10775_v28 = vld [vmem:[#allocation16_spill] sm:$0xff]  ;;  %v10778_v56 = vld [vmem:[#allocation29_spill] sm:$0xff] }
 0x21d   : > { %3361 = vst [vmem:[#allocation2 + $0x1b] sm:$0xff] %v3284_v41  ;;  %v3289_v46 = vmul.f32 %v3253_v34, %v3217_v14  ;;  %v3215_v33 = vmax.f32 %v3179_v35, 0.0  ;;  %v3182_v18 = vadd.f32 %v9596_v49, %v3139_v54  ;;  %v3137_v55 = vadd.f32 %v3008_v1, %v2805_v19  ;;  %v9678_v19 = vpop.f32.mrf.mxu1  ;;  %v3255_v14 = vld [vmem:[%s10725_s1 + $0x40] sm:$0xff]  ;;  %v8396_v62 = vld [vmem:[%s10728_s4 + $0xb0] sm:$0xff]  }
 0x21e   : > { %v7802_v63 = vpop.f32.mrf.mxu0  ;;  %v1821_v58 = vadd.f32 %v10775_v28, %v1489_v11  ;;  %v9703_v11 = vld [vmem:[%s10728_s4 + $0xf0] sm:$0xff]  }
 0x21f   : > { %3366 = vst [vmem:[#allocation2 + $0x43] sm:$0xff] %v3289_v46  ;;  %v3287_v20 = vmul.f32 %v3251_v37, %v3215_v33  ;;  %v3218_v4 = vmax.f32 %v3182_v18, 0.0  ;;  %v3180_v3 = vadd.f32 %v9596_v49, %v3137_v55  ;;  %v3142_v42 = vadd.f32 %v7802_v63, %v2810_v8  ;;  %v10776_v37 = vld [vmem:[#allocation28_spill] sm:$0xff]  ;;  %v10777_v46 = vld [vmem:[#allocation30_spill] sm:$0xff] }
 0x220   : > { %v3021_v24 = vpop.f32.mrf.mxu0  ;;  %v3468_v54 = vld [vmem:[#allocation2 + $0x11] sm:$0xff]  ;;  %v2814_v8 = vadd.f32 %v9533_v26, %v9498_v47  ;;  %v2812_v1 = vadd.f32 %v9540_v7, %v10776_v37  ;;  %v2481_v33 = vadd.f32 %v10777_v46, %v2149_v40  ;;  %v2815_v40 = vadd.f32 %v9548_v59, %v10778_v56  ;;  %v3259_v37 = vld [vmem:[%s10725_s1 + $0x60] sm:$0xff] }
 0x221   : > { %3364 = vst [vmem:[#allocation2 + $0x33] sm:$0xff] %v3287_v20  ;;  %v3290_v22 = vmul.f32 %v3254_v0, %v3218_v4  ;;  %v3216_v6 = vmax.f32 %v3180_v3, 0.0  ;;  %v3185_v45 = vadd.f32 %v9596_v49, %v3142_v42  ;;  %v3140_v30 = vadd.f32 %v3021_v24, %v2808_v23  ;;  %v3398_v43 = vld [vmem:[#allocation2 + $0x10] sm:$0xff]  ;;  %v3258_v47 = vld [vmem:[%s10725_s1 + $0x58] sm:$0xff] }
 0x222   : > { %v7803_v27 = vpop.f32.mrf.mxu0  ;;  %v3471_v4 = vld [vmem:[#allocation2 + $0x29] sm:$0xff]  ;;  %v2813_v28 = vadd.f32 %v9555_v57, %v2481_v33 }
 0x223   : > { %3367 = vst [vmem:[#allocation2 + $0x4b] sm:$0xff] %v3290_v22  ;;  %v3288_v34 = vmul.f32 %v3252_v10, %v3216_v6  ;;  %v3221_v50 = vmax.f32 %v3185_v45, 0.0  ;;  %v3183_v41 = vadd.f32 %v9596_v49, %v3140_v30  ;;  %v3143_v35 = vadd.f32 %v7803_v27, %v2811_v5  ;;  %v3401_v42 = vld [vmem:[#allocation2 + $0x28] sm:$0xff]  ;;  %v9694_v22 = vpop.f32.mrf.mxu1  ;;  %v10782_v46 = vld [vmem:[#allocation20_spill] sm:$0xff] }
 0x224   : > { %v3024_v18 = vpop.f32.mrf.mxu0  ;;  %v3469_v55 = vld [vmem:[#allocation2 + $0x19] sm:$0xff]  ;;  %v3470_v23 = vld [vmem:[#allocation2 + $0x21] sm:$0xff] }
 0x225   : > { %v3399_v52 = vld [vmem:[#allocation2 + $0x18] sm:$0xff]  ;;  %3365 = vst [vmem:[#allocation2 + $0x3b] sm:$0xff] %v3288_v34  ;;  %v3293_v53 = vmul.f32 %v3257_v60, %v3221_v50  ;;  %v3219_v0 = vmax.f32 %v3183_v41, 0.0  ;;  %v3186_v63 = vadd.f32 %v9596_v49, %v3143_v35  ;;  %v3141_v20 = vadd.f32 %v3024_v18, %v2809_v31  ;;  %v3400_v3 = vld [vmem:[#allocation2 + $0x20] sm:$0xff]  ;;  %v3256_v31 = vld [vmem:[%s10725_s1 + $0x48] sm:$0xff] }
 0x226   : > { %v7806_v7 = vpop.f32.mrf.mxu0  ;;  %v3503_v26 = vpack.c.bf16 %v3469_v55, %v3468_v54  ;;  %v3433_v5 = vpack.c.bf16 %v3399_v52, %v3398_v43  ;;  %v3504_v10 = vpack.c.bf16 %v3471_v4, %v3470_v23  ;;  %v3434_v24 = vpack.c.bf16 %v3401_v42, %v3400_v3  ;;  %v10780_v35 = vld [vmem:[#allocation8_spill] sm:$0xff]  ;;  %v10781_v43 = vld [vmem:[#allocation17_spill] sm:$0xff]  ;;  %v10783_v18 = vld [vmem:[#allocation27_spill] sm:$0xff]  ;;  %v9723_v55 = vpop.f32.mrf.mxu1 }
 0x227   : > { %3370 = vst [vmem:[#allocation2 + $0x63] sm:$0xff] %v3293_v53  ;;  %v3291_v6 = vmul.f32 %v3255_v14, %v3219_v0  ;;  %v3222_v45 = vmax.f32 %v3186_v63, 0.0  ;;  %v3184_v30 = vadd.f32 %v9596_v49, %v3141_v20  ;;  %v3146_v29 = vadd.f32 %v7806_v7, %v2814_v8  ;;  %v10779_v14 = vld [vmem:[#allocation7_spill] sm:$0xff]  ;;  %v3261_v8 = vld [vmem:[%s10725_s1 + $0x70] sm:$0xff]  ;;  %v10784_v63 = vld [vmem:[#allocation18_spill] sm:$0xff] }
 0x228   : > { %7845 = vmatmul.mubr.bf16.vlgmr.msra.gmra.mxu1 %v3503_v26  ;;  %7897 = vmatmul.mubr.bf16.vlgmr.msra.gmra.mxu0 %v3433_v5  ;;  %v3037_v60 = vpop.f32.mrf.mxu0  ;;  %v1493_v54 = vadd.f32 %v10780_v35, %v10779_v14  ;;  %v2153_v59 = vadd.f32 %v10781_v43, %v1821_v58  ;;  %v3472_v23 = vld [vmem:[#allocation2 + $0x31] sm:$0xff]  ;;  %v8397_v0 = vld [vmem:[%s10728_s4 + $0xa8] sm:$0xff]   ;;  %v2818_v4 = vadd.f32 %v9563_v51, %v9513_v9 }
 0x229   : > { %3368 = vst [vmem:[#allocation2 + $0x53] sm:$0xff] %v3291_v6  ;;  %v3294_v27 = vmul.f32 %v3258_v47, %v3222_v45  ;;  %v3220_v34 = vmax.f32 %v3184_v30, 0.0  ;;  %v3189_v50 = vadd.f32 %v9596_v49, %v3146_v29  ;;  %v3144_v41 = vadd.f32 %v3037_v60, %v2812_v1  ;;  %7848 = vmatprep.mubr.bf16.mxu1 %v3504_v10  ;;  %v3402_v53 = vld [vmem:[#allocation2 + $0x30] sm:$0xff]  ;;  %v10785_v3 = vld [vmem:[#allocation31_spill] sm:$0xff]  ;;  %v10786_v47 = vld [vmem:[#allocation33_spill] sm:$0xff] }
 0x22a   : > { %7900 = vmatprep.mubr.bf16.mxu0 %v3434_v24  ;;  %7933 = vmatpush3.bf16.msra.mxu1 %v10782_v46  ;;  %v7807_v1 = vpop.f32.mrf.mxu0  ;;  %v1825_v20 = vadd.f32 %v10784_v63, %v1493_v54  ;;  %v2816_v42 = vadd.f32 %v9572_v25, %v10785_v3  ;;  %v2485_v7 = vadd.f32 %v10786_v47, %v2153_v59  ;;  %v3475_v56 = vld [vmem:[#allocation2 + $0x49] sm:$0xff]  ;;  %v3262_v9 = vld [vmem:[%s10725_s1 + $0x78] sm:$0xff]  ;;  %v8398_v59 = vld [vmem:[%s10728_s4 + $0xa0] sm:$0xff]  }
 0x22b   : > { %7985 = vmatpush3.bf16.msra.mxu0 %v10783_v18  ;;  %3371 = vst [vmem:[#allocation2 + $0x6b] sm:$0xff] %v3294_v27  ;;  %v3292_v52 = vmul.f32 %v3256_v31, %v3220_v34  ;;  %v3225_v58 = vmax.f32 %v3189_v50, 0.0  ;;  %v3187_v57 = vadd.f32 %v9596_v49, %v3144_v41  ;;  %v3147_v33 = vadd.f32 %v7807_v1, %v2815_v40  ;;  %v3405_v31 = vld [vmem:[#allocation2 + $0x48] sm:$0xff]  ;;  %v9743_v41 = vpop.f32.mrf.mxu1  ;;  %v8404_v46 = vld [vmem:[%s10728_s4 + $0xe0] sm:$0xff]   ;;  %v3265_v63 = vld [vmem:[%s10725_s1 + $0x90] sm:$0xff] }
 0x22c   : > { %7934 = vmatprep.subr.bf16.mxu1 %v8396_v62  ;;  %7986 = vmatprep.subr.bf16.mxu0 %v9703_v11  ;;  %v3040_v26 = vpop.f32.mrf.mxu0  ;;  %v3473_v5 = vld [vmem:[#allocation2 + $0x39] sm:$0xff]  ;;  %v3474_v24 = vld [vmem:[#allocation2 + $0x41] sm:$0xff] }
 0x22d   : > { %v3403_v10 = vld [vmem:[#allocation2 + $0x38] sm:$0xff]  ;;  %3369 = vst [vmem:[#allocation2 + $0x5b] sm:$0xff] %v3292_v52  ;;  %v3297_v6 = vmul.f32 %v3261_v8, %v3225_v58  ;;  %v3223_v45 = vmax.f32 %v3187_v57, 0.0  ;;  %v3190_v30 = vadd.f32 %v9596_v49, %v3147_v33  ;;  %v3145_v29 = vadd.f32 %v3040_v26, %v2813_v28  ;;  %v3404_v40 = vld [vmem:[#allocation2 + $0x40] sm:$0xff]  ;;  %v8403_v50 = vld [vmem:[%s10728_s4 + $0xe8] sm:$0xff]  }
 0x22e   : > { %v7810_v25 = vpop.f32.mrf.mxu0  ;;  %v3505_v51 = vpack.c.bf16 %v3473_v5, %v3472_v23  ;;  %v3435_v60 = vpack.c.bf16 %v3403_v10, %v3402_v53  ;;  %v3506_v27 = vpack.c.bf16 %v3475_v56, %v3474_v24  ;;  %v3436_v34 = vpack.c.bf16 %v3405_v31, %v3404_v40  ;;  %7935 = vmatpush3.bf16.msra.mxu1 %v8396_v62  ;;  %v10787_v62 = vld [vmem:[#allocation32_spill] sm:$0xff]  ;;  %v3260_v8 = vld [vmem:[%s10725_s1 + $0x68] sm:$0xff]  ;;  %v10789_v58 = vld [vmem:[#allocation10_spill] sm:$0xff] }
 0x22f   : > { %3374 = vst [vmem:[#allocation2 + $0x83] sm:$0xff] %v3297_v6  ;;  %v3295_v14 = vmul.f32 %v3259_v37, %v3223_v45  ;;  %v3226_v35 = vmax.f32 %v3190_v30, 0.0  ;;  %v3188_v54 = vadd.f32 %v9596_v49, %v3145_v29  ;;  %v3150_v43 = vadd.f32 %v7810_v25, %v2818_v4  ;;  %7936 = vmatprep.subr.bf16.mxu1 %v8397_v0  ;;  %v10790_v33 = vld [vmem:[#allocation19_spill] sm:$0xff]  ;;  %v3263_v4 = vld [vmem:[%s10725_s1 + $0x80] sm:$0xff]  ;;  %v8399_v10 = vld [vmem:[%s10728_s4 + $0x98] sm:$0xff]  }
 0x230   : > { %7987 = vmatpush3.bf16.msra.mxu0 %v9703_v11  ;;  %v2819_v28 = vadd.f32 %v9581_v32, %v10787_v62  ;;  %7849 = vmatmul.mubr.bf16.gmra.mxu1 %v3505_v51  ;;  %v3053_v37 = vpop.f32.mrf.mxu0  ;;  %v10788_v32 = vld [vmem:[#allocation9_spill] sm:$0xff]  ;;  %v2157_v23 = vadd.f32 %v10790_v33, %v1825_v20  ;;  %v2817_v53 = vadd.f32 %v9601_v48, %v2485_v7  ;;  %v3406_v7 = vld [vmem:[#allocation2 + $0x50] sm:$0xff]  ;;  %v10792_v45 = vld [vmem:[#allocation34_spill] sm:$0xff] }
 0x231   : > { %7901 = vmatmul.mubr.bf16.gmra.mxu0 %v3435_v60  ;;  %3372 = vst [vmem:[#allocation2 + $0x73] sm:$0xff] %v3295_v14  ;;  %v3298_v1 = vmul.f32 %v3262_v9, %v3226_v35  ;;  %v3224_v18 = vmax.f32 %v3188_v54, 0.0  ;;  %v3193_v52 = vadd.f32 %v9596_v49, %v3150_v43  ;;  %v3148_v11 = vadd.f32 %v3053_v37, %v2816_v42  ;;  %v9769_v42 = vpop.f32.mrf.mxu1  ;;  %v3476_v48 = vld [vmem:[#allocation2 + $0x51] sm:$0xff] }
 0x232   : > { %7852 = vmatprep.mubr.bf16.mxu1 %v3506_v27  ;;  %7904 = vmatprep.mubr.bf16.mxu0 %v3436_v34  ;;  %v1497_v57 = vadd.f32 %v10789_v58, %v10788_v32  ;;  %v7811_v3 = vpop.f32.mrf.mxu0  ;;  %v10791_v24 = vld [vmem:[#allocation21_spill] sm:$0xff]  ;;  %v2820_v30 = vadd.f32 %v9629_v17, %v10792_v45  ;;  %v10793_v29 = vld [vmem:[#allocation36_spill] sm:$0xff]  ;;  %v3409_v35 = vld [vmem:[#allocation2 + $0x68] sm:$0xff] }
 0x233   : > { %7937 = vmatpush3.bf16.msra.mxu1 %v8397_v0  ;;  %7988 = vmatprep.subr.bf16.mxu0 %v8403_v50  ;;  %3375 = vst [vmem:[#allocation2 + $0x8b] sm:$0xff] %v3298_v1  ;;  %v3296_v47 = vmul.f32 %v3260_v8, %v3224_v18  ;;  %v3229_v26 = vmax.f32 %v3193_v52, 0.0  ;;  %v3191_v20 = vadd.f32 %v9596_v49, %v3148_v11  ;;  %v9788_v8 = vpop.f32.mrf.mxu1  ;;  %v8402_v11 = vld [vmem:[%s10728_s4 + $0x90] sm:$0xff]   ;;  %v10794_v32 = vld [vmem:[#allocation3_spill] sm:$0xff] }
 0x234   : > { %v3151_v5 = vadd.f32 %v7811_v3, %v2819_v28  ;;  %7938 = vmatprep.subr.bf16.mxu1 %v8398_v59  ;;  %7989 = vmatpush3.bf16.msra.mxu0 %v8403_v50  ;;  %v1829_v6 = vadd.f32 %v10791_v24, %v1497_v57  ;;  %v2822_v0 = vadd.f32 %v9611_v2, %v9528_v13  ;;  %v3056_v40 = vpop.f32.mrf.mxu0  ;;  %v3477_v31 = vld [vmem:[#allocation2 + $0x59] sm:$0xff]  ;;  %v3478_v25 = vld [vmem:[#allocation2 + $0x61] sm:$0xff]  ;;  %v3479_v50 = vld [vmem:[#allocation2 + $0x69] sm:$0xff] }
 0x235   : > { %v2489_v56 = vadd.f32 %v10793_v29, %v2157_v23  ;;  %v3407_v9 = vld [vmem:[#allocation2 + $0x58] sm:$0xff]  ;;  %7990 = vmatprep.subr.bf16.mxu0 %v8404_v46  ;;  %3373 = vst [vmem:[#allocation2 + $0x7b] sm:$0xff] %v3296_v47  ;;  %v3301_v51 = vmul.f32 %v3265_v63, %v3229_v26  ;;  %v3227_v60 = vmax.f32 %v3191_v20, 0.0  ;;  %v3149_v34 = vadd.f32 %v3056_v40, %v2817_v53  ;;  %v3408_v14 = vld [vmem:[#allocation2 + $0x60] sm:$0xff]  ;;  %v10796_v57 = vld [vmem:[#allocation11_spill] sm:$0xff] }
 0x236   : > { %v3194_v27 = vadd.f32 %v9596_v49, %v3151_v5  ;;  %v3266_v13 = vld [vmem:[%s10725_s1 + $0x98] sm:$0xff]  ;;  %v7814_v2 = vpop.f32.mrf.mxu0  ;;  %v3507_v17 = vpack.c.bf16 %v3477_v31, %v3476_v48  ;;  %v3437_v54 = vpack.c.bf16 %v3407_v9, %v3406_v7  ;;  %v3508_v43 = vpack.c.bf16 %v3479_v50, %v3478_v25  ;;  %v10797_v33 = vld [vmem:[#allocation12_spill] sm:$0xff]  ;;  %v10798_v53 = vld [vmem:[#allocation35_spill] sm:$0xff] }
 0x237   : > { %v3438_v62 = vpack.c.bf16 %v3409_v35, %v3408_v14  ;;  %7939 = vmatpush3.bf16.msra.mxu1 %v8398_v59  ;;  %v8406_v28 = vld [vmem:[%s10728_s4 + $0xd8] sm:$0xff]   ;;  %3378 = vst [vmem:[#allocation2 + $0xa3] sm:$0xff] %v3301_v51  ;;  %v3299_v37 = vmul.f32 %v3263_v4, %v3227_v60  ;;  %v3192_v18 = vadd.f32 %v9596_v49, %v3149_v34  ;;  %v10795_v59 = vld [vmem:[#allocation4_spill] sm:$0xff]  ;;  %v3264_v4 = vld [vmem:[%s10725_s1 + $0x88] sm:$0xff] }
 0x238   : > { %v3230_v1 = vmax.f32 %v3194_v27, 0.0  ;;  %v3154_v52 = vadd.f32 %v7814_v2, %v2822_v0  ;;  %7940 = vmatprep.subr.bf16.mxu1 %v8399_v10  ;;  %7991 = vmatpush3.bf16.msra.mxu0 %v8404_v46  ;;  %v833_v58 = vadd.f32 %v10795_v59, %v10794_v32  ;;  %v1501_v23 = vadd.f32 %v10797_v33, %v10796_v57  ;;  %v3069_v3 = vpop.f32.mrf.mxu0  ;;  %v8407_v46 = vld [vmem:[%s10728_s4 + $0xd0] sm:$0xff]   ;;  %v10800_v7 = vld [vmem:[#allocation22_spill] sm:$0xff]  ;;  %v8405_v51 = vld [vmem:[%s10728_s4 + $0x88] sm:$0xff]  }
 0x239   : > { %v2823_v63 = vadd.f32 %v9643_v15, %v10798_v53  ;;  %7853 = vmatmul.mubr.bf16.gmra.mxu1 %v3507_v17  ;;  %7905 = vmatmul.mubr.bf16.gmra.mxu0 %v3437_v54  ;;  %3376 = vst [vmem:[#allocation2 + $0x93] sm:$0xff] %v3299_v37  ;;  %v3228_v26 = vmax.f32 %v3192_v18, 0.0  ;;  %v3152_v5 = vadd.f32 %v3069_v3, %v2820_v30  ;;  %v10799_v15 = vld [vmem:[#allocation13_spill] sm:$0xff]  ;;  %v3269_v45 = vld [vmem:[%s10725_s1 + $0xb0] sm:$0xff]  ;;  %v3267_v29 = vld [vmem:[%s10725_s1 + $0xa0] sm:$0xff]  ;;  %v9818_v30 = vpop.f32.mrf.mxu1 }
 0x23a   : > { %v3302_v47 = vmul.f32 %v3266_v13, %v3230_v1  ;;  %v3197_v20 = vadd.f32 %v9596_v49, %v3154_v52  ;;  %7856 = vmatprep.mubr.bf16.mxu1 %v3508_v43  ;;  %7908 = vmatprep.mubr.bf16.mxu0 %v3438_v62  ;;  %v9808_v48 = vadd.f32 %v10799_v15, %v833_v58  ;;  %v7815_v40 = vpop.f32.mrf.mxu0  ;;  %v10801_v60 = vld [vmem:[#allocation23_spill] sm:$0xff]  ;;  %v10802_v34 = vld [vmem:[#allocation37_spill] sm:$0xff]  ;;  %v8408_v3 = vld [vmem:[%s10728_s4 + $0x80] sm:$0xff]  }
 0x23b   : > { %v2161_v24 = vadd.f32 %v10800_v7, %v1829_v6  ;;  %v2821_v0 = vadd.f32 %v9662_v16, %v2489_v56  ;;  %7941 = vmatpush3.bf16.msra.mxu1 %v8399_v10  ;;  %7992 = vmatprep.subr.bf16.mxu0 %v8406_v28  ;;  %v3300_v31 = vmul.f32 %v3264_v4, %v3228_v26  ;;  %v3480_v16 = vld [vmem:[#allocation2 + $0x71] sm:$0xff]  ;;  %v10803_v14 = vld [vmem:[#allocation39_spill] sm:$0xff]  ;;  %v9837_v33 = vpop.f32.mrf.mxu1 }
 0x23c   : > { %3379 = vst [vmem:[#allocation2 + $0xab] sm:$0xff] %v3302_v47  ;;  %v3233_v9 = vmax.f32 %v3197_v20, 0.0  ;;  %v3195_v6 = vadd.f32 %v9596_v49, %v3152_v5  ;;  %v3155_v25 = vadd.f32 %v7815_v40, %v2823_v63  ;;  %v3410_v56 = vld [vmem:[#allocation2 + $0x70] sm:$0xff]  ;;  %7942 = vmatprep.subr.bf16.mxu1 %v8402_v11  ;;  %7993 = vmatpush3.bf16.msra.mxu0 %v8406_v28  ;;  %v3072_v13 = vpop.f32.mrf.mxu0  ;;  %v3481_v2 = vld [vmem:[#allocation2 + $0x79] sm:$0xff]  ;;  %v3482_v54 = vld [vmem:[#allocation2 + $0x81] sm:$0xff] }
 0x23d   : > { %v1833_v27 = vadd.f32 %v10801_v60, %v1501_v23  ;;  %v2826_v10 = vadd.f32 %v9678_v19, %v9543_v38  ;;  %v2824_v50 = vadd.f32 %v9694_v22, %v10802_v34  ;;  %v2493_v35 = vadd.f32 %v10803_v14, %v2161_v24  ;;  %v3411_v17 = vld [vmem:[#allocation2 + $0x78] sm:$0xff]  ;;  %7994 = vmatprep.subr.bf16.mxu0 %v8407_v46  ;;  %v3483_v1 = vld [vmem:[#allocation2 + $0x89] sm:$0xff]  ;;  %v3412_v18 = vld [vmem:[#allocation2 + $0x80] sm:$0xff] }
 0x23e   : > { %3377 = vst [vmem:[#allocation2 + $0x9b] sm:$0xff] %v3300_v31  ;;  %v3305_v43 = vmul.f32 %v3269_v45, %v3233_v9  ;;  %v3231_v62 = vmax.f32 %v3195_v6, 0.0  ;;  %v3198_v28 = vadd.f32 %v9596_v49, %v3155_v25  ;;  %v3153_v37 = vadd.f32 %v3072_v13, %v2821_v0  ;;  %v3413_v52 = vld [vmem:[#allocation2 + $0x88] sm:$0xff]  ;;  %v3270_v38 = vld [vmem:[%s10725_s1 + $0xb8] sm:$0xff]  ;;  %v7818_v19 = vpop.f32.mrf.mxu0  ;;  %v10804_v47 = vld [vmem:[#allocation38_spill] sm:$0xff]  ;;  %v9862_v25 = vpop.f32.mrf.mxu1 }
 0x23f   : > { %v3509_v22 = vpack.c.bf16 %v3481_v2, %v3480_v16  ;;  %v3439_v32 = vpack.c.bf16 %v3411_v17, %v3410_v56  ;;  %v3510_v59 = vpack.c.bf16 %v3483_v1, %v3482_v54  ;;  %v3440_v58 = vpack.c.bf16 %v3413_v52, %v3412_v18  ;;  %7943 = vmatpush3.bf16.msra.mxu1 %v8402_v11  ;;  %v8409_v57 = vld [vmem:[%s10728_s4 + $0xc8] sm:$0xff]   ;;  %v8410_v5 = vld [vmem:[%s10728_s4 + $0xc0] sm:$0xff]   ;;  %v10806_v45 = vld [vmem:[#allocation24_spill] sm:$0xff] }
 0x240   : > { %3382 = vst [vmem:[#allocation2 + $0xc3] sm:$0xff] %v3305_v43  ;;  %v3303_v23 = vmul.f32 %v3267_v29, %v3231_v62  ;;  %v3234_v53 = vmax.f32 %v3198_v28, 0.0  ;;  %v3196_v63 = vadd.f32 %v9596_v49, %v3153_v37  ;;  %v3158_v4 = vadd.f32 %v7818_v19, %v2826_v10  ;;  %7944 = vmatprep.subr.bf16.mxu1 %v8405_v51  ;;  %v3268_v26 = vld [vmem:[%s10725_s1 + $0xa8] sm:$0xff]  ;;  %v3085_v20 = vpop.f32.mrf.mxu0  ;;  %v3273_v31 = vld [vmem:[%s10725_s1 + $0xd0] sm:$0xff]  ;;  %v3271_v9 = vld [vmem:[%s10725_s1 + $0xc0] sm:$0xff] }
 0x241   : > { %7995 = vmatpush3.bf16.msra.mxu0 %v8407_v46  ;;  %v2827_v11 = vadd.f32 %v9723_v55, %v10804_v47  ;;  %7857 = vmatmul.mubr.bf16.gmra.mxu1 %v3509_v22  ;;  %v3156_v24 = vadd.f32 %v3085_v20, %v2824_v50  ;;  %v10805_v55 = vld [vmem:[#allocation14_spill] sm:$0xff]  ;;  %v2165_v29 = vadd.f32 %v10806_v45, %v1833_v27  ;;  %v3414_v27 = vld [vmem:[#allocation2 + $0x90] sm:$0xff]  ;;  %v9868_v10 = vld [vmem:[%s10728_s4 + $0x138] sm:$0xff]  }
 0x242   : > { %7909 = vmatmul.mubr.bf16.gmra.mxu0 %v3439_v32  ;;  %3380 = vst [vmem:[#allocation2 + $0xb3] sm:$0xff] %v3303_v23  ;;  %v3306_v46 = vmul.f32 %v3270_v38, %v3234_v53  ;;  %v3232_v15 = vmax.f32 %v3196_v63, 0.0  ;;  %v3201_v7 = vadd.f32 %v9596_v49, %v3158_v4  ;;  %7860 = vmatprep.mubr.bf16.mxu1 %v3510_v59  ;;  %v7819_v6 = vpop.f32.mrf.mxu0  ;;  %v10807_v34 = vld [vmem:[#allocation25_spill] sm:$0xff]  ;;  %v10808_v14 = vld [vmem:[#allocation40_spill] sm:$0xff]  ;;  %v2785_v59 = vpop.f32.mrf.mxu1 }
 0x243   : > { %7912 = vmatprep.mubr.bf16.mxu0 %v3440_v58  ;;  %v1505_v0 = vadd.f32 %v10805_v55, %v9808_v48  ;;  %v2825_v40 = vadd.f32 %v9743_v41, %v2493_v35  ;;  %7945 = vmatpush3.bf16.msra.mxu1 %v8405_v51  ;;  %v3199_v56 = vadd.f32 %v9596_v49, %v3156_v24  ;;  %v3484_v41 = vld [vmem:[#allocation2 + $0x91] sm:$0xff]  ;;  %v3487_v18 = vld [vmem:[#allocation2 + $0xa9] sm:$0xff] }
 0x244   : > { %7996 = vmatprep.subr.bf16.mxu0 %v8409_v57  ;;  %3383 = vst [vmem:[#allocation2 + $0xcb] sm:$0xff] %v3306_v46  ;;  %v3304_v16 = vmul.f32 %v3268_v26, %v3232_v15  ;;  %v3237_v48 = vmax.f32 %v3201_v7, 0.0  ;;  %v3159_v60 = vadd.f32 %v7819_v6, %v2827_v11  ;;  %7946 = vmatprep.subr.bf16.mxu1 %v8408_v3  ;;  %v3088_v2 = vpop.f32.mrf.mxu0  ;;  %v3417_v38 = vld [vmem:[#allocation2 + $0xa8] sm:$0xff]  ;;  %v9883_v32 = vld [vmem:[%s10728_s4 + $0x178] sm:$0xff]   ;;  %v7775_v55 = vpop.f32.mrf.mxu1 }
 0x245   : > { %7997 = vmatpush3.bf16.msra.mxu0 %v8409_v57  ;;  %v1837_v51 = vadd.f32 %v10807_v34, %v1505_v0  ;;  %v2830_v50 = vadd.f32 %v9769_v42, %v9558_v21  ;;  %v2828_v35 = vadd.f32 %v9788_v8, %v10808_v14  ;;  %v2497_v13 = vadd.f32 %v9568_v12, %v2165_v29  ;;  %v3485_v17 = vld [vmem:[#allocation2 + $0x99] sm:$0xff]  ;;  %v3486_v43 = vld [vmem:[#allocation2 + $0xa1] sm:$0xff] }
 0x246   : > { %v3415_v54 = vld [vmem:[#allocation2 + $0x98] sm:$0xff]  ;;  %7998 = vmatprep.subr.bf16.mxu0 %v8410_v5  ;;  %3381 = vst [vmem:[#allocation2 + $0xbb] sm:$0xff] %v3304_v16  ;;  %v3309_v62 = vmul.f32 %v3273_v31, %v3237_v48  ;;  %v3235_v28 = vmax.f32 %v3199_v56, 0.0  ;;  %v3202_v37 = vadd.f32 %v9596_v49, %v3159_v60  ;;  %v3157_v1 = vadd.f32 %v3088_v2, %v2825_v40  ;;  %v3416_v52 = vld [vmem:[#allocation2 + $0xa0] sm:$0xff]  ;;  %v7822_v42 = vpop.f32.mrf.mxu0 }
 0x247   : > { %v3274_v21 = vld [vmem:[%s10725_s1 + $0xd8] sm:$0xff]  ;;  %v3511_v12 = vpack.c.bf16 %v3485_v17, %v3484_v41  ;;  %v3441_v8 = vpack.c.bf16 %v3415_v54, %v3414_v27  ;;  %v3512_v19 = vpack.c.bf16 %v3487_v18, %v3486_v43  ;;  %v3442_v22 = vpack.c.bf16 %v3417_v38, %v3416_v52  ;;  %7947 = vmatpush3.bf16.msra.mxu1 %v8408_v3  ;;  %v3272_v3 = vld [vmem:[%s10725_s1 + $0xc8] sm:$0xff]  ;;  %v3275_v40 = vld [vmem:[%s10725_s1 + $0xe0] sm:$0xff]  ;;  %v2788_v43 = vpop.f32.mrf.mxu1 }
 0x248   : > { %3386 = vst [vmem:[#allocation2 + $0xe3] sm:$0xff] %v3309_v62  ;;  %v3307_v58 = vmul.f32 %v3271_v9, %v3235_v28  ;;  %v3238_v57 = vmax.f32 %v3202_v37, 0.0  ;;  %v3200_v23 = vadd.f32 %v9596_v49, %v3157_v1  ;;  %v3162_v53 = vadd.f32 %v7822_v42, %v2830_v50  ;;  %8036 = vmatprep.subr.bf16.mxu1 %v9868_v10  ;;  %v10809_v63 = vld [vmem:[#allocation41_spill] sm:$0xff]  ;;  %v3101_v47 = vpop.f32.mrf.mxu0  ;;  %v3276_v52 = vld [vmem:[%s10725_s1 + $0xe8] sm:$0xff] }
 0x249   : > { %7999 = vmatpush3.bf16.msra.mxu0 %v8410_v5  ;;  %v2831_v4 = vadd.f32 %v9818_v30, %v10809_v63  ;;  %7861 = vmatmul.mubr.bf16.gmra.mxu1 %v3511_v12  ;;  %v3160_v46 = vadd.f32 %v3101_v47, %v2828_v35  ;;  %v10810_v5 = vld [vmem:[#allocation26_spill] sm:$0xff]  ;;  %v2829_v7 = vadd.f32 %v9837_v33, %v2497_v13  ;;  %v3277_v30 = vld [vmem:[%s10725_s1 + $0xf0] sm:$0xff] }
 0x24a   : > { %7913 = vmatmul.mubr.bf16.gmra.mxu0 %v3441_v8  ;;  %3384 = vst [vmem:[#allocation2 + $0xd3] sm:$0xff] %v3307_v58  ;;  %v3310_v11 = vmul.f32 %v3274_v21, %v3238_v57  ;;  %v3236_v26 = vmax.f32 %v3200_v23, 0.0  ;;  %v3205_v20 = vadd.f32 %v9596_v49, %v3162_v53  ;;  %7864 = vmatprep.mubr.bf16.mxu1 %v3512_v19  ;;  %v7823_v24 = vpop.f32.mrf.mxu0  ;;  %v3488_v9 = vld [vmem:[#allocation2 + $0xb1] sm:$0xff]  ;;  %v3279_v23 = vld [vmem:[%s10725_s1 + $0x100] sm:$0xff] }
 0x24b   : > { %7916 = vmatprep.mubr.bf16.mxu0 %v3442_v22  ;;  %v2169_v15 = vadd.f32 %v10810_v5, %v1837_v51  ;;  %8088 = vmatprep.subr.bf16.mxu0 %v9883_v32  ;;  %v3203_v29 = vadd.f32 %v9596_v49, %v3160_v46  ;;  %v3163_v31 = vadd.f32 %v7823_v24, %v2831_v4  ;;  %v3418_v33 = vld [vmem:[#allocation2 + $0xb0] sm:$0xff]  ;;  %v3421_v2 = vld [vmem:[#allocation2 + $0xc8] sm:$0xff] }
 0x24c   : > { %3387 = vst [vmem:[#allocation2 + $0xeb] sm:$0xff] %v3310_v11  ;;  %v3308_v0 = vmul.f32 %v3272_v3, %v3236_v26  ;;  %v3241_v45 = vmax.f32 %v3205_v20, 0.0  ;;  %v2834_v6 = vadd.f32 %v9862_v25, %v9575_v36  ;;  %v2832_v16 = vadd.f32 %v2785_v59, %v9579_v39  ;;  %v3104_v56 = vpop.f32.mrf.mxu0  ;;  %v3491_v35 = vld [vmem:[#allocation2 + $0xc9] sm:$0xff]  ;;  %v3278_v36 = vld [vmem:[%s10725_s1 + $0xf8] sm:$0xff] }
 0x24d   : > { %v2501_v48 = vadd.f32 %v9586_v44, %v2169_v15  ;;  %v3489_v60 = vld [vmem:[#allocation2 + $0xb9] sm:$0xff]  ;;  %v3490_v27 = vld [vmem:[#allocation2 + $0xc1] sm:$0xff]  ;;  %v3239_v51 = vmax.f32 %v3203_v29, 0.0  ;;  %v3206_v50 = vadd.f32 %v9596_v49, %v3163_v31  ;;  %v3161_v14 = vadd.f32 %v3104_v56, %v2829_v7 }
 0x24e   : > { %v3419_v41 = vld [vmem:[#allocation2 + $0xb8] sm:$0xff]  ;;  %3385 = vst [vmem:[#allocation2 + $0xdb] sm:$0xff] %v3308_v0  ;;  %v3313_v34 = vmul.f32 %v3277_v30, %v3241_v45  ;;  %v3420_v13 = vld [vmem:[#allocation2 + $0xc0] sm:$0xff]  ;;  %v7826_v39 = vpop.f32.mrf.mxu0  ;;  %v3513_v25 = vpack.c.bf16 %v3489_v60, %v3488_v9  ;;  %v3514_v17 = vpack.c.bf16 %v3491_v35, %v3490_v27  ;;  %v2835_v18 = vadd.f32 %v7775_v55, %v9584_v61  ;;  %v3281_v61 = vld [vmem:[%s10725_s1 + $0x110] sm:$0xff] }
 0x24f   : > { %v3443_v44 = vpack.c.bf16 %v3419_v41, %v3418_v33  ;;  %v3444_v54 = vpack.c.bf16 %v3421_v2, %v3420_v13  ;;  %v3311_v62 = vmul.f32 %v3275_v40, %v3239_v51  ;;  %v3242_v28 = vmax.f32 %v3206_v50, 0.0  ;;  %v3282_v55 = vld [vmem:[%s10725_s1 + $0x118] sm:$0xff] }
 0x250   : > { %3390 = vst [vmem:[#allocation2 + $0x103] sm:$0xff] %v3313_v34  ;;  %v3204_v37 = vadd.f32 %v9596_v49, %v3161_v14  ;;  %v3166_v1 = vadd.f32 %v7826_v39, %v2834_v6  ;;  %v3117_v38 = vpop.f32.mrf.mxu0  ;;  %v2833_v19 = vadd.f32 %v2788_v43, %v2501_v48  ;;  %v3280_v6 = vld [vmem:[%s10725_s1 + $0x108] sm:$0xff] }
 0x251   : > { %7865 = vmatmul.mubr.bf16.gmra.mxu1 %v3513_v25  ;;  %3388 = vst [vmem:[#allocation2 + $0xf3] sm:$0xff] %v3311_v62  ;;  %v3314_v21 = vmul.f32 %v3278_v36, %v3242_v28  ;;  %v3164_v8 = vadd.f32 %v3117_v38, %v2832_v16  ;;  %v3492_v63 = vld [vmem:[#allocation2 + $0xd1] sm:$0xff]  ;;  %v3987_v39 = vld [vmem:[#allocation2 + $0x2] sm:$0xff] }
 0x252   : > { %7917 = vmatmul.mubr.bf16.gmra.mxu0 %v3443_v44  ;;  %v3240_v42 = vmax.f32 %v3204_v37, 0.0  ;;  %v3209_v12 = vadd.f32 %v9596_v49, %v3166_v1  ;;  %7868 = vmatprep.mubr.bf16.mxu1 %v3514_v17  ;;  %v7827_v22 = vpop.f32.mrf.mxu0  ;;  %v3422_v4 = vld [vmem:[#allocation2 + $0xd0] sm:$0xff]  ;;  %v4320_v17 = vld [vmem:[#allocation2 + $0x1a] sm:$0xff]  ;;  %v4321_v38 = vld [vmem:[#allocation2 + $0x22] sm:$0xff] }
 0x253   : > { %7920 = vmatprep.mubr.bf16.mxu0 %v3444_v54  ;;  %3391 = vst [vmem:[#allocation2 + $0x10b] sm:$0xff] %v3314_v21  ;;  %v3207_v57 = vadd.f32 %v9596_v49, %v3164_v8  ;;  %v3167_v53 = vadd.f32 %v7827_v22, %v2835_v18  ;;  %v3495_v7 = vld [vmem:[#allocation2 + $0xe9] sm:$0xff]  ;;  %v4319_v18 = vld [vmem:[#allocation2 + $0x12] sm:$0xff]  ;;  %v4324_v21 = vld [vmem:[#allocation2 + $0x3a] sm:$0xff] }
 0x254   : > { %v3312_v59 = vmul.f32 %v3276_v52, %v3240_v42  ;;  %v3245_v58 = vmax.f32 %v3209_v12, 0.0  ;;  %v3120_v3 = vpop.f32.mrf.mxu0  ;;  %v3425_v24 = vld [vmem:[#allocation2 + $0xe8] sm:$0xff]  ;;  %v4355_v52 = vpack.c.bf16 %v4320_v17, %v4319_v18  ;;  %v4323_v8 = vld [vmem:[#allocation2 + $0x32] sm:$0xff] }
 0x255   : > { %v3493_v47 = vld [vmem:[#allocation2 + $0xd9] sm:$0xff]  ;;  %v3494_v26 = vld [vmem:[#allocation2 + $0xe1] sm:$0xff]  ;;  %v3243_v46 = vmax.f32 %v3207_v57, 0.0  ;;  %v3210_v5 = vadd.f32 %v9596_v49, %v3167_v53  ;;  %v3165_v15 = vadd.f32 %v3120_v3, %v2833_v19  ;;  %v3988_v25 = vld [vmem:[#allocation2 + $0xa] sm:$0xff]  ;;  %v4357_v19 = vpack.c.bf16 %v4324_v21, %v4323_v8 }
 0x256   : > { %v3423_v11 = vld [vmem:[#allocation2 + $0xd8] sm:$0xff]  ;;  %3389 = vst [vmem:[#allocation2 + $0xfb] sm:$0xff] %v3312_v59  ;;  %v3317_v20 = vmul.f32 %v3281_v61, %v3245_v58  ;;  %v3424_v30 = vld [vmem:[#allocation2 + $0xe0] sm:$0xff]  ;;  %v3515_v0 = vpack.c.bf16 %v3493_v47, %v3492_v63  ;;  %v3516_v29 = vpack.c.bf16 %v3495_v7, %v3494_v26  ;;  %v4023_v1 = vpack.c.bf16 %v3988_v25, %v3987_v39  ;;  %v4322_v42 = vld [vmem:[#allocation2 + $0x2a] sm:$0xff] }
 0x257   : > { %v3445_v45 = vpack.c.bf16 %v3423_v11, %v3422_v4  ;;  %v3446_v40 = vpack.c.bf16 %v3425_v24, %v3424_v30  ;;  %v3315_v31 = vmul.f32 %v3279_v23, %v3243_v46  ;;  %v3246_v9 = vmax.f32 %v3210_v5, 0.0  ;;  %v8412_v61 = vld [vmem:[%s10728_s4 + $0x130] sm:$0xff]   ;;  %v4325_v59 = vld [vmem:[#allocation2 + $0x42] sm:$0xff]  ;;  %v4328_v23 = vld [vmem:[#allocation2 + $0x5a] sm:$0xff] }
 0x258   : > { %3394 = vst [vmem:[#allocation2 + $0x123] sm:$0xff] %v3317_v20  ;;  %v3208_v33 = vadd.f32 %v9596_v49, %v3165_v15  ;;  %v3496_v60 = vld [vmem:[#allocation2 + $0xf1] sm:$0xff]  ;;  %v4356_v12 = vpack.c.bf16 %v4322_v42, %v4321_v38  ;;  %v8413_v58 = vld [vmem:[%s10728_s4 + $0x128] sm:$0xff]   ;;  %v8420_v3 = vld [vmem:[%s10728_s4 + $0x160] sm:$0xff]  }
 0x259   : > { %7869 = vmatmul.mubr.bf16.gmra.mxu1 %v3515_v0  ;;  %3392 = vst [vmem:[#allocation2 + $0x113] sm:$0xff] %v3315_v31  ;;  %v3318_v16 = vmul.f32 %v3282_v55, %v3246_v9  ;;  %v3426_v41 = vld [vmem:[#allocation2 + $0xf0] sm:$0xff]  ;;  %v8419_v57 = vld [vmem:[%s10728_s4 + $0x168] sm:$0xff]   ;;  %v8415_v11 = vld [vmem:[%s10728_s4 + $0x118] sm:$0xff]  }
 0x25a   : > { %7921 = vmatmul.mubr.bf16.gmra.mxu0 %v3445_v45  ;;  %v3244_v48 = vmax.f32 %v3208_v33, 0.0  ;;  %7872 = vmatprep.mubr.bf16.mxu1 %v3516_v29  ;;  %v3499_v27 = vld [vmem:[#allocation2 + $0x109] sm:$0xff]  ;;  %v4327_v4 = vld [vmem:[#allocation2 + $0x52] sm:$0xff]  ;;  %v4332_v20 = vld [vmem:[#allocation2 + $0x7a] sm:$0xff] }
 0x25b   : > { %7924 = vmatprep.mubr.bf16.mxu0 %v3446_v40  ;;  %3395 = vst [vmem:[#allocation2 + $0x12b] sm:$0xff] %v3318_v16  ;;  %v3429_v2 = vld [vmem:[#allocation2 + $0x108] sm:$0xff]  ;;  %v8417_v22 = vld [vmem:[%s10728_s4 + $0x170] sm:$0xff]   ;;  %v8422_v26 = vld [vmem:[%s10728_s4 + $0x158] sm:$0xff]  }
 0x25c   : > { %v3316_v56 = vmul.f32 %v3280_v6, %v3244_v48  ;;  %v4326_v53 = vld [vmem:[#allocation2 + $0x4a] sm:$0xff]  ;;  %v4329_v47 = vld [vmem:[#allocation2 + $0x62] sm:$0xff]  ;;  %v4331_v15 = vld [vmem:[#allocation2 + $0x72] sm:$0xff] }
 0x25d   : > { %v3497_v34 = vld [vmem:[#allocation2 + $0xf9] sm:$0xff]  ;;  %v3498_v50 = vld [vmem:[#allocation2 + $0x101] sm:$0xff]  ;;  %v4358_v63 = vpack.c.bf16 %v4326_v53, %v4325_v59  ;;  %v4330_v46 = vld [vmem:[#allocation2 + $0x6a] sm:$0xff]  ;;  %v4361_v7 = vpack.c.bf16 %v4332_v20, %v4331_v15 }
 0x25e   : > { %v3427_v51 = vld [vmem:[#allocation2 + $0xf8] sm:$0xff]  ;;  %3393 = vst [vmem:[#allocation2 + $0x11b] sm:$0xff] %v3316_v56  ;;  %v3517_v49 = vpack.c.bf16 %v3497_v34, %v3496_v60  ;;  %v3518_v35 = vpack.c.bf16 %v3499_v27, %v3498_v50  ;;  %v3428_v13 = vld [vmem:[#allocation2 + $0x100] sm:$0xff]  ;;  %v4360_v5 = vpack.c.bf16 %v4330_v46, %v4329_v47  ;;  %v8418_v30 = vld [vmem:[%s10728_s4 + $0x110] sm:$0xff]  }
 0x25f   : > { %v3447_v14 = vpack.c.bf16 %v3427_v51, %v3426_v41  ;;  %v3448_v36 = vpack.c.bf16 %v3429_v2, %v3428_v13  ;;  %v8423_v24 = vld [vmem:[%s10728_s4 + $0x150] sm:$0xff]   ;;  %v4333_v55 = vld [vmem:[#allocation2 + $0x82] sm:$0xff]  ;;  %v4336_v29 = vld [vmem:[#allocation2 + $0x9a] sm:$0xff] }
 0x260   : > { %v3500_v44 = vld [vmem:[#allocation2 + $0x111] sm:$0xff]  ;;  %v8421_v0 = vld [vmem:[%s10728_s4 + $0x108] sm:$0xff]   ;;  %v8424_v6 = vld [vmem:[%s10728_s4 + $0x100] sm:$0xff]  }
 0x261   : > { %7873 = vmatmul.mubr.bf16.gmra.mxu1 %v3517_v49  ;;  %v3430_v43 = vld [vmem:[#allocation2 + $0x110] sm:$0xff]  ;;  %v8425_v45 = vld [vmem:[%s10728_s4 + $0x148] sm:$0xff]   ;;  %v8426_v16 = vld [vmem:[%s10728_s4 + $0x140] sm:$0xff]  }
 0x262   : > { %7925 = vmatmul.mubr.bf16.gmra.mxu0 %v3447_v14  ;;  %7876 = vmatprep.mubr.bf16.mxu1 %v3518_v35  ;;  %v4334_v40 = vld [vmem:[#allocation2 + $0x8a] sm:$0xff]  ;;  %v4335_v9 = vld [vmem:[#allocation2 + $0x92] sm:$0xff]  ;;  %v4337_v48 = vld [vmem:[#allocation2 + $0xa2] sm:$0xff] }
 0x263   : > { %7928 = vmatprep.mubr.bf16.mxu0 %v3448_v36  ;;  %v4362_v31 = vpack.c.bf16 %v4334_v40, %v4333_v55  ;;  %v4363_v33 = vpack.c.bf16 %v4336_v29, %v4335_v9  ;;  %v9979_v56 = vld [vmem:[%s10728_s4 + $0x1b8] sm:$0xff]   ;;  %v4338_v27 = vld [vmem:[#allocation2 + $0xaa] sm:$0xff]  ;;  %v4341_v49 = vld [vmem:[#allocation2 + $0xc2] sm:$0xff] }
 0x264   : > { %v9984_v60 = vld [vmem:[%s10728_s4 + $0x1f8] sm:$0xff]   ;;  %v4364_v34 = vpack.c.bf16 %v4338_v27, %v4337_v48  ;;  %v4342_v35 = vld [vmem:[#allocation2 + $0xca] sm:$0xff]  ;;  %v4345_v39 = vld [vmem:[#allocation2 + $0xe2] sm:$0xff] }
 0x265   : > { %v3501_v54 = vld [vmem:[#allocation2 + $0x119] sm:$0xff]  ;;  %v4366_v13 = vpack.c.bf16 %v4342_v35, %v4341_v49  ;;  %v4353_v38 = vld [vmem:[#allocation2 + $0x122] sm:$0xff]  ;;  %v4354_v8 = vld [vmem:[#allocation2 + $0x12a] sm:$0xff] }
 0x266   : > { %v3431_v62 = vld [vmem:[#allocation2 + $0x118] sm:$0xff]  ;;  %v3519_v28 = vpack.c.bf16 %v3501_v54, %v3500_v44  ;;  %v4346_v44 = vld [vmem:[#allocation2 + $0xea] sm:$0xff]  ;;  %v8436_v48 = vld [vmem:[%s10728_s4 + $0x1e0] sm:$0xff]  }
 0x267   : > { %v3449_v37 = vpack.c.bf16 %v3431_v62, %v3430_v43  ;;  %v4340_v41 = vld [vmem:[#allocation2 + $0xba] sm:$0xff]  ;;  %v4339_v51 = vld [vmem:[#allocation2 + $0xb2] sm:$0xff]  ;;  %v4368_v17 = vpack.c.bf16 %v4346_v44, %v4345_v39  ;;  %v4349_v62 = vld [vmem:[#allocation2 + $0x102] sm:$0xff] }
 0x268   : > { %v4365_v50 = vpack.c.bf16 %v4340_v41, %v4339_v51  ;;  %v4344_v14 = vld [vmem:[#allocation2 + $0xda] sm:$0xff]  ;;  %v4343_v2 = vld [vmem:[#allocation2 + $0xd2] sm:$0xff]  ;;  %v4989_v29 = vld [vmem:[#allocation2 + $0x44] sm:$0xff] }
 0x269   : > { %7877 = vmatmul.mubr.bf16.gmra.mxu1 %v3519_v28  ;;  %v4367_v36 = vpack.c.bf16 %v4344_v14, %v4343_v2  ;;  %v4348_v25 = vld [vmem:[#allocation2 + $0xfa] sm:$0xff]  ;;  %v4347_v54 = vld [vmem:[#allocation2 + $0xf2] sm:$0xff]  ;;  %v4661_v49 = vld [vmem:[#allocation2 + $0x63] sm:$0xff] }
 0x26a   : > { %7929 = vmatmul.mubr.bf16.gmra.mxu0 %v3449_v37  ;;  %7948 = vmatprep.mubr.bf16.mxu1 %v4023_v1  ;;  %v4369_v43 = vpack.c.bf16 %v4348_v25, %v4347_v54  ;;  %v4352_v28 = vld [vmem:[#allocation2 + $0x11a] sm:$0xff]  ;;  %v4350_v37 = vld [vmem:[#allocation2 + $0x10a] sm:$0xff]  ;;  %v4351_v18 = vld [vmem:[#allocation2 + $0x112] sm:$0xff] }
 0x26b   : > { %8000 = vmatprep.mubr.bf16.mxu0 %v4355_v52  ;;  %v4370_v1 = vpack.c.bf16 %v4350_v37, %v4349_v62  ;;  %v4652_v21 = vld [vmem:[#allocation2 + $0x1b] sm:$0xff]  ;;  %v4655_v47 = vld [vmem:[#allocation2 + $0x33] sm:$0xff]  ;;  %v4993_v14 = vld [vmem:[#allocation2 + $0x64] sm:$0xff] }
 0x26c   : > { %v4983_v42 = vld [vmem:[#allocation2 + $0x14] sm:$0xff]  ;;  %v4990_v15 = vld [vmem:[#allocation2 + $0x4c] sm:$0xff] }
 0x26d   : > { %v4987_v53 = vld [vmem:[#allocation2 + $0x34] sm:$0xff]  ;;  %v4998_v54 = vld [vmem:[#allocation2 + $0x8c] sm:$0xff] }
 0x26e   : > { %v8428_v20 = vld [vmem:[%s10728_s4 + $0x1b0] sm:$0xff]   ;;  %v8431_v41 = vld [vmem:[%s10728_s4 + $0x198] sm:$0xff]   ;;  %v8441_v62 = vld [vmem:[%s10728_s4 + $0x1c8] sm:$0xff]  }
 0x26f   : > { %v8433_v46 = vld [vmem:[%s10728_s4 + $0x1f0] sm:$0xff]   ;;  %v8438_v27 = vld [vmem:[%s10728_s4 + $0x1d8] sm:$0xff]  }
 0x270   : > { %v4991_v55 = vld [vmem:[#allocation2 + $0x54] sm:$0xff] }
 0x271   : > { %7949 = vmatmul.mubr.bf16.vlgmr.msra.gmra.mxu1 %v4355_v52  ;;  %v4371_v52 = vpack.c.bf16 %v4352_v28, %v4351_v18  ;;  %v4659_v9 = vld [vmem:[#allocation2 + $0x53] sm:$0xff]  ;;  %v4668_v28 = vld [vmem:[#allocation2 + $0x9b] sm:$0xff]  ;;  %v4665_v18 = vld [vmem:[#allocation2 + $0x83] sm:$0xff] }
 0x272   : > { %8001 = vmatmul.mubr.bf16.vlgmr.msra.gmra.mxu0 %v4356_v12  ;;  %7952 = vmatprep.mubr.bf16.mxu1 %v4356_v12  ;;  %v4984_v12 = vld [vmem:[#allocation2 + $0x1c] sm:$0xff]  ;;  %v4995_v51 = vld [vmem:[#allocation2 + $0x74] sm:$0xff] }
 0x273   : > { %8004 = vmatprep.mubr.bf16.mxu0 %v4357_v19  ;;  %8037 = vmatpush3.bf16.msra.mxu1 %v9868_v10  ;;  %v4359_v10 = vpack.c.bf16 %v4328_v23, %v4327_v4  ;;  %v5019_v59 = vpack.c.bf16 %v4984_v12, %v4983_v42  ;;  %v4656_v23 = vld [vmem:[#allocation2 + $0x3b] sm:$0xff]  ;;  %v4653_v4 = vld [vmem:[#allocation2 + $0x23] sm:$0xff]  ;;  %v4663_v2 = vld [vmem:[#allocation2 + $0x73] sm:$0xff] }
 0x274   : > { %8089 = vmatpush3.bf16.msra.mxu0 %v9883_v32  ;;  %8038 = vmatprep.subr.bf16.mxu1 %v8412_v61  ;;  %v8414_v32 = vld [vmem:[%s10728_s4 + $0x120] sm:$0xff]   ;;  %v8434_v25 = vld [vmem:[%s10728_s4 + $0x190] sm:$0xff]  }
 0x275   : > { %8090 = vmatprep.subr.bf16.mxu0 %v8417_v22  ;;  %v8439_v44 = vld [vmem:[%s10728_s4 + $0x1d0] sm:$0xff]  }
 0x276   : > { %v4999_v37 = vld [vmem:[#allocation2 + $0x94] sm:$0xff] }
 0x277   : > { %8039 = vmatpush3.bf16.msra.mxu1 %v8412_v61  ;;  %v4651_v61 = vld [vmem:[#allocation2 + $0x13] sm:$0xff] }
 0x278   : > { %8091 = vmatpush3.bf16.msra.mxu0 %v8417_v22  ;;  %8040 = vmatprep.subr.bf16.mxu1 %v8413_v58  ;;  %v4687_v22 = vpack.c.bf16 %v4652_v21, %v4651_v61  ;;  %v4667_v42 = vld [vmem:[#allocation2 + $0x93] sm:$0xff]  ;;  %v8442_v61 = vld [vmem:[%s10728_s4 + $0x1c0] sm:$0xff]  }
 0x279   : > { %8092 = vmatprep.subr.bf16.mxu0 %v8419_v57  ;;  %7953 = vmatmul.mubr.bf16.gmra.mxu1 %v4357_v19  ;;  %v4372_v19 = vpack.c.bf16 %v4354_v8, %v4353_v38  ;;  %v4695_v12 = vpack.c.bf16 %v4668_v28, %v4667_v42  ;;  %v5013_v42 = vld [vmem:[#allocation2 + $0x104] sm:$0xff] }
 0x27a   : > { %8005 = vmatmul.mubr.bf16.gmra.mxu0 %v4358_v63  ;;  %7956 = vmatprep.mubr.bf16.mxu1 %v4358_v63  ;;  %v4988_v63 = vld [vmem:[#allocation2 + $0x3c] sm:$0xff] }
 0x27b   : > { %8008 = vmatprep.mubr.bf16.mxu0 %v4359_v10  ;;  %8041 = vmatpush3.bf16.msra.mxu1 %v8413_v58  ;;  %v4654_v58 = vld [vmem:[#allocation2 + $0x2b] sm:$0xff] }
 0x27c   : > { %8093 = vmatpush3.bf16.msra.mxu0 %v8419_v57  ;;  %8042 = vmatprep.subr.bf16.mxu1 %v8414_v32  ;;  %v4986_v57 = vld [vmem:[#allocation2 + $0x2c] sm:$0xff] }
 0x27d   : > { %8094 = vmatprep.subr.bf16.mxu0 %v8420_v3 }
 0x27f   : > { %8043 = vmatpush3.bf16.msra.mxu1 %v8414_v32  ;;  %v4688_v32 = vpack.c.bf16 %v4654_v58, %v4653_v4  ;;  %v10059_v58 = vld [vmem:[%s10728_s4 + $0x238] sm:$0xff]   ;;  %v5001_v4 = vld [vmem:[#allocation2 + $0xa4] sm:$0xff] }
 0x280   : > { %8095 = vmatpush3.bf16.msra.mxu0 %v8420_v3  ;;  %8044 = vmatprep.subr.bf16.mxu1 %v8415_v11 }
 0x281   : > { %8096 = vmatprep.subr.bf16.mxu0 %v8422_v26  ;;  %7957 = vmatmul.mubr.bf16.gmra.mxu1 %v4359_v10  ;;  %v4985_v10 = vld [vmem:[#allocation2 + $0x24] sm:$0xff] }
 0x282   : > { %8009 = vmatmul.mubr.bf16.gmra.mxu0 %v4360_v5  ;;  %7960 = vmatprep.mubr.bf16.mxu1 %v4360_v5  ;;  %v9988_v3 = vpack.c.bf16 %v4986_v57, %v4985_v10  ;;  %v4658_v5 = vld [vmem:[#allocation2 + $0x4b] sm:$0xff]  ;;  %v4672_v57 = vld [vmem:[#allocation2 + $0xbb] sm:$0xff] }
 0x283   : > { %8012 = vmatprep.mubr.bf16.mxu0 %v4361_v7  ;;  %8045 = vmatpush3.bf16.msra.mxu1 %v8415_v11  ;;  %v4689_v11 = vpack.c.bf16 %v4656_v23, %v4655_v47  ;;  %v5003_v23 = vld [vmem:[#allocation2 + $0xb4] sm:$0xff] }
 0x284   : > { %8097 = vmatpush3.bf16.msra.mxu0 %v8422_v26  ;;  %8046 = vmatprep.subr.bf16.mxu1 %v8418_v30  ;;  %v9990_v26 = vpack.c.bf16 %v4988_v63, %v4987_v53  ;;  %v5004_v53 = vld [vmem:[#allocation2 + $0xbc] sm:$0xff]  ;;  %v4671_v47 = vld [vmem:[#allocation2 + $0xb3] sm:$0xff] }
 0x285   : > { %8098 = vmatprep.subr.bf16.mxu0 %v8423_v24  ;;  %v4669_v63 = vld [vmem:[#allocation2 + $0xa3] sm:$0xff] }
 0x287   : > { %8047 = vmatpush3.bf16.msra.mxu1 %v8418_v30  ;;  %v8435_v30 = vld [vmem:[%s10728_s4 + $0x1e8] sm:$0xff]  }
 0x288   : > { %8099 = vmatpush3.bf16.msra.mxu0 %v8423_v24  ;;  %8048 = vmatprep.subr.bf16.mxu1 %v8421_v0  ;;  %v4660_v24 = vld [vmem:[#allocation2 + $0x5b] sm:$0xff] }
 0x289   : > { %8100 = vmatprep.subr.bf16.mxu0 %v8425_v45  ;;  %7961 = vmatmul.mubr.bf16.gmra.mxu1 %v4361_v7  ;;  %v8429_v7 = vld [vmem:[%s10728_s4 + $0x1a8] sm:$0xff]  }
 0x28a   : > { %8013 = vmatmul.mubr.bf16.gmra.mxu0 %v4362_v31  ;;  %7964 = vmatprep.mubr.bf16.mxu1 %v4362_v31  ;;  %v10008_v31 = vpack.c.bf16 %v4990_v15, %v4989_v29  ;;  %v4676_v15 = vld [vmem:[#allocation2 + $0xdb] sm:$0xff]  ;;  %v4675_v29 = vld [vmem:[#allocation2 + $0xd3] sm:$0xff] }
 0x28b   : > { %8016 = vmatprep.mubr.bf16.mxu0 %v4363_v33  ;;  %8049 = vmatpush3.bf16.msra.mxu1 %v8421_v0  ;;  %v4992_v0 = vld [vmem:[#allocation2 + $0x5c] sm:$0xff] }
 0x28c   : > { %8101 = vmatpush3.bf16.msra.mxu0 %v8425_v45  ;;  %8050 = vmatprep.subr.bf16.mxu1 %v8424_v6  ;;  %v4657_v45 = vld [vmem:[#allocation2 + $0x43] sm:$0xff] }
 0x28d   : > { %8102 = vmatprep.subr.bf16.mxu0 %v8426_v16  ;;  %v4690_v40 = vpack.c.bf16 %v4658_v5, %v4657_v45  ;;  %v5006_v5 = vld [vmem:[#allocation2 + $0xcc] sm:$0xff] }
 0x28f   : > { %8051 = vmatpush3.bf16.msra.mxu1 %v8424_v6  ;;  %v10010_v6 = vpack.c.bf16 %v4992_v0, %v4991_v55  ;;  %v5005_v55 = vld [vmem:[#allocation2 + $0xc4] sm:$0xff] }
 0x290   : > { %8103 = vmatpush3.bf16.msra.mxu0 %v8426_v16  ;;  %8140 = vmatprep.subr.bf16.mxu1 %v9979_v56  ;;  %v8430_v16 = vld [vmem:[%s10728_s4 + $0x1a0] sm:$0xff]   ;;  %v10068_v45 = vpack.c.bf16 %v5006_v5, %v5005_v55  ;;  %v4686_v5 = vld [vmem:[#allocation2 + $0x12b] sm:$0xff] }
 0x291   : > { %8192 = vmatprep.subr.bf16.mxu0 %v9984_v60  ;;  %7965 = vmatmul.mubr.bf16.gmra.mxu1 %v4363_v33  ;;  %v4691_v33 = vpack.c.bf16 %v4660_v24, %v4659_v9  ;;  %v4673_v24 = vld [vmem:[#allocation2 + $0xc3] sm:$0xff]  ;;  %v5648_v55 = vld [vmem:[#allocation2 + $0x2d] sm:$0xff] }
 0x292   : > { %8017 = vmatmul.mubr.bf16.gmra.mxu0 %v4364_v34  ;;  %7968 = vmatprep.mubr.bf16.mxu1 %v4364_v34  ;;  %v4664_v34 = vld [vmem:[#allocation2 + $0x7b] sm:$0xff] }
 0x293   : > { %8020 = vmatprep.mubr.bf16.mxu0 %v4365_v50 }
 0x299   : > { %7969 = vmatmul.mubr.bf16.gmra.mxu1 %v4365_v50  ;;  %v4996_v50 = vld [vmem:[#allocation2 + $0x7c] sm:$0xff] }
 0x29a   : > { %8021 = vmatmul.mubr.bf16.gmra.mxu0 %v4366_v13  ;;  %7972 = vmatprep.mubr.bf16.mxu1 %v4366_v13  ;;  %v10028_v39 = vpack.c.bf16 %v4996_v50, %v4995_v51  ;;  %v4679_v50 = vld [vmem:[#allocation2 + $0xf3] sm:$0xff] }
 0x29b   : > { %8024 = vmatprep.mubr.bf16.mxu0 %v4367_v36 }
 0x2a1   : > { %7973 = vmatmul.mubr.bf16.gmra.mxu1 %v4367_v36  ;;  %v4693_v36 = vpack.c.bf16 %v4664_v34, %v4663_v2 }
 0x2a2   : > { %8025 = vmatmul.mubr.bf16.gmra.mxu0 %v4368_v17  ;;  %7976 = vmatprep.mubr.bf16.mxu1 %v4368_v17  ;;  %v4666_v17 = vld [vmem:[#allocation2 + $0x8b] sm:$0xff] }
 0x2a3   : > { %8028 = vmatprep.mubr.bf16.mxu0 %v4369_v43  ;;  %v4694_v38 = vpack.c.bf16 %v4666_v17, %v4665_v18  ;;  %v5016_v18 = vld [vmem:[#allocation2 + $0x11c] sm:$0xff] }
 0x2a9   : > { %7977 = vmatmul.mubr.bf16.gmra.mxu1 %v4369_v43  ;;  %v8437_v43 = vld [vmem:[%s10728_s4 + $0x188] sm:$0xff]  }
 0x2aa   : > { %8029 = vmatmul.mubr.bf16.gmra.mxu0 %v4370_v1  ;;  %7980 = vmatprep.mubr.bf16.mxu1 %v4370_v1  ;;  %v5000_v1 = vld [vmem:[#allocation2 + $0x9c] sm:$0xff] }
 0x2ab   : > { %8032 = vmatprep.mubr.bf16.mxu0 %v4371_v52  ;;  %v10046_v8 = vpack.c.bf16 %v5000_v1, %v4999_v37  ;;  %v4684_v37 = vld [vmem:[#allocation2 + $0x11b] sm:$0xff] }
 0x2ac   : > { %v5015_v1 = vld [vmem:[#allocation2 + $0x114] sm:$0xff] }
 0x2b1   : > { %7981 = vmatmul.mubr.bf16.gmra.mxu1 %v4371_v52  ;;  %v4997_v52 = vld [vmem:[#allocation2 + $0x84] sm:$0xff] }
 0x2b2   : > { %8033 = vmatmul.mubr.bf16.gmra.mxu0 %v4372_v19  ;;  %8052 = vmatprep.mubr.bf16.mxu1 %v4687_v22  ;;  %v10044_v21 = vpack.c.bf16 %v4998_v54, %v4997_v52  ;;  %v8440_v19 = vld [vmem:[%s10728_s4 + $0x180] sm:$0xff]   ;;  %v4670_v22 = vld [vmem:[#allocation2 + $0xab] sm:$0xff] }
 0x2b3   : > { %8104 = vmatprep.mubr.bf16.mxu0 %v5019_v59  ;;  %v5002_v59 = vld [vmem:[#allocation2 + $0xac] sm:$0xff]  ;;  %v4696_v10 = vpack.c.bf16 %v4670_v22, %v4669_v63 }
 0x2b4   : > { %v4682_v54 = vld [vmem:[#allocation2 + $0x10b] sm:$0xff] }
 0x2b9   : > { %8053 = vmatmul.mubr.bf16.vlgmr.msra.gmra.mxu1 %v4688_v32  ;;  %v10061_v32 = vpack.c.bf16 %v5002_v59, %v5001_v4  ;;  %v4683_v59 = vld [vmem:[#allocation2 + $0x113] sm:$0xff] }
 0x2ba   : > { %8105 = vmatmul.mubr.bf16.vlgmr.msra.gmra.mxu0 %v9988_v3  ;;  %8056 = vmatprep.mubr.bf16.mxu1 %v4689_v11  ;;  %v4697_v11 = vpack.c.bf16 %v4672_v57, %v4671_v47 }
 0x2bb   : > { %8108 = vmatprep.mubr.bf16.mxu0 %v9990_v26  ;;  %8141 = vmatpush3.bf16.msra.mxu1 %v9979_v56  ;;  %v4662_v56 = vld [vmem:[#allocation2 + $0x6b] sm:$0xff] }
 0x2bc   : > { %8193 = vmatpush3.bf16.msra.mxu0 %v9984_v60  ;;  %8142 = vmatprep.subr.bf16.mxu1 %v8428_v20  ;;  %v4994_v60 = vld [vmem:[#allocation2 + $0x6c] sm:$0xff]  ;;  %v4692_v35 = vpack.c.bf16 %v4662_v56, %v4661_v49  ;;  %v5011_v56 = vld [vmem:[#allocation2 + $0xf4] sm:$0xff] }
 0x2bd   : > { %8194 = vmatprep.subr.bf16.mxu0 %v8433_v46  ;;  %v10026_v13 = vpack.c.bf16 %v4994_v60, %v4993_v14  ;;  %v5012_v60 = vld [vmem:[#allocation2 + $0xfc] sm:$0xff] }
 0x2be   : > { %v10076_v14 = vpack.c.bf16 %v5012_v60, %v5011_v56  ;;  %v5647_v56 = vld [vmem:[#allocation2 + $0x25] sm:$0xff] }
 0x2bf   : > { %8143 = vmatpush3.bf16.msra.mxu1 %v8428_v20  ;;  %v10063_v20 = vpack.c.bf16 %v5004_v53, %v5003_v23  ;;  %v4703_v23 = vpack.c.bf16 %v4684_v37, %v4683_v59  ;;  %v10090_v53 = vpack.c.bf16 %v5016_v18, %v5015_v1 }
 0x2c0   : > { %8195 = vmatpush3.bf16.msra.mxu0 %v8433_v46  ;;  %8144 = vmatprep.subr.bf16.mxu1 %v8429_v7  ;;  %v4674_v46 = vld [vmem:[#allocation2 + $0xcb] sm:$0xff] }
 0x2c1   : > { %8196 = vmatprep.subr.bf16.mxu0 %v8435_v30  ;;  %8057 = vmatmul.mubr.bf16.gmra.mxu1 %v4690_v40  ;;  %v4698_v0 = vpack.c.bf16 %v4674_v46, %v4673_v24  ;;  %v4699_v40 = vpack.c.bf16 %v4676_v15, %v4675_v29  ;;  %v5017_v15 = vld [vmem:[#allocation2 + $0x124] sm:$0xff] }
 0x2c2   : > { %8109 = vmatmul.mubr.bf16.gmra.mxu0 %v10008_v31  ;;  %8060 = vmatprep.mubr.bf16.mxu1 %v4691_v33  ;;  %v4678_v33 = vld [vmem:[#allocation2 + $0xeb] sm:$0xff]  ;;  %v4685_v29 = vld [vmem:[#allocation2 + $0x123] sm:$0xff] }
 0x2c3   : > { %8112 = vmatprep.mubr.bf16.mxu0 %v10010_v6  ;;  %8145 = vmatpush3.bf16.msra.mxu1 %v8429_v7  ;;  %v5007_v7 = vld [vmem:[#allocation2 + $0xd4] sm:$0xff] }
 0x2c4   : > { %8197 = vmatpush3.bf16.msra.mxu0 %v8435_v30  ;;  %8146 = vmatprep.subr.bf16.mxu1 %v8430_v16  ;;  %v5008_v30 = vld [vmem:[#allocation2 + $0xdc] sm:$0xff] }
 0x2c5   : > { %8198 = vmatprep.subr.bf16.mxu0 %v8436_v48  ;;  %v10070_v9 = vpack.c.bf16 %v5008_v30, %v5007_v7  ;;  %v5018_v7 = vld [vmem:[#allocation2 + $0x12c] sm:$0xff] }
 0x2c7   : > { %8147 = vmatpush3.bf16.msra.mxu1 %v8430_v16  ;;  %v5010_v16 = vld [vmem:[#allocation2 + $0xec] sm:$0xff] }
 0x2c8   : > { %8199 = vmatpush3.bf16.msra.mxu0 %v8436_v48  ;;  %8148 = vmatprep.subr.bf16.mxu1 %v8431_v41  ;;  %v4680_v48 = vld [vmem:[#allocation2 + $0xfb] sm:$0xff] }
 0x2c9   : > { %8200 = vmatprep.subr.bf16.mxu0 %v8438_v27  ;;  %8061 = vmatmul.mubr.bf16.gmra.mxu1 %v4692_v35  ;;  %v4701_v49 = vpack.c.bf16 %v4680_v48, %v4679_v50  ;;  %v10100_v48 = vpack.c.bf16 %v5018_v7, %v5017_v15  ;;  %v5656_v7 = vld [vmem:[#allocation2 + $0x6d] sm:$0xff] }
 0x2ca   : > { %8113 = vmatmul.mubr.bf16.gmra.mxu0 %v10026_v13  ;;  %8064 = vmatprep.mubr.bf16.mxu1 %v4693_v36 }
 0x2cb   : > { %8116 = vmatprep.mubr.bf16.mxu0 %v10028_v39  ;;  %8149 = vmatpush3.bf16.msra.mxu1 %v8431_v41  ;;  %v4677_v41 = vld [vmem:[#allocation2 + $0xe3] sm:$0xff] }
 0x2cc   : > { %8201 = vmatpush3.bf16.msra.mxu0 %v8438_v27  ;;  %8150 = vmatprep.subr.bf16.mxu1 %v8434_v25  ;;  %v5009_v27 = vld [vmem:[#allocation2 + $0xe4] sm:$0xff]  ;;  %v4700_v34 = vpack.c.bf16 %v4678_v33, %v4677_v41  ;;  %v5683_v41 = vpack.c.bf16 %v5648_v55, %v5647_v56 }
 0x2cd   : > { %8202 = vmatprep.subr.bf16.mxu0 %v8439_v44  ;;  %v10074_v51 = vpack.c.bf16 %v5010_v16, %v5009_v27  ;;  %v4704_v16 = vpack.c.bf16 %v4686_v5, %v4685_v29  ;;  %v8445_v5 = vld [vmem:[%s10728_s4 + $0x228] sm:$0xff]  }
 0x2cf   : > { %8151 = vmatpush3.bf16.msra.mxu1 %v8434_v25 }
 0x2d0   : > { %8203 = vmatpush3.bf16.msra.mxu0 %v8439_v44  ;;  %8152 = vmatprep.subr.bf16.mxu1 %v8437_v43 }
 0x2d1   : > { %8204 = vmatprep.subr.bf16.mxu0 %v8441_v62  ;;  %8065 = vmatmul.mubr.bf16.gmra.mxu1 %v4694_v38  ;;  %v4681_v38 = vld [vmem:[#allocation2 + $0x103] sm:$0xff] }
 0x2d2   : > { %8117 = vmatmul.mubr.bf16.gmra.mxu0 %v10044_v21  ;;  %8068 = vmatprep.mubr.bf16.mxu1 %v4695_v12 }
 0x2d3   : > { %8120 = vmatprep.mubr.bf16.mxu0 %v10046_v8  ;;  %8153 = vmatpush3.bf16.msra.mxu1 %v8437_v43  ;;  %v5014_v43 = vld [vmem:[#allocation2 + $0x10c] sm:$0xff] }
 0x2d4   : > { %8205 = vmatpush3.bf16.msra.mxu0 %v8441_v62  ;;  %8154 = vmatprep.subr.bf16.mxu1 %v8440_v19  ;;  %v10086_v22 = vpack.c.bf16 %v5014_v43, %v5013_v42 }
 0x2d5   : > { %8206 = vmatprep.subr.bf16.mxu0 %v8442_v61 }
 0x2d7   : > { %8155 = vmatpush3.bf16.msra.mxu1 %v8440_v19 }
 0x2d8   : > { %8207 = vmatpush3.bf16.msra.mxu0 %v8442_v61  ;;  %8244 = vmatprep.subr.bf16.mxu1 %v10059_v58  ;;  %v4702_v61 = vpack.c.bf16 %v4682_v54, %v4681_v38  ;;  %v5651_v38 = vld [vmem:[#allocation2 + $0x45] sm:$0xff] }
 0x2d9   : > { %8069 = vmatmul.mubr.bf16.gmra.mxu1 %v4696_v10 }
 0x2da   : > { %8121 = vmatmul.mubr.bf16.gmra.mxu0 %v10061_v32  ;;  %8072 = vmatprep.mubr.bf16.mxu1 %v4697_v11 }
 0x2db   : > { %8124 = vmatprep.mubr.bf16.mxu0 %v10063_v20 }
 0x2e1   : > { %8073 = vmatmul.mubr.bf16.gmra.mxu1 %v4698_v0 }
 0x2e2   : > { %8125 = vmatmul.mubr.bf16.gmra.mxu0 %v10068_v45  ;;  %8076 = vmatprep.mubr.bf16.mxu1 %v4699_v40 }
 0x2e3   : > { %8128 = vmatprep.mubr.bf16.mxu0 %v10070_v9 }
 0x2e8   : > { %v7846_v35 = vpop.f32.mrf.mxu1  ;;  %v7898_v2 = vpop.f32.mrf.mxu0 }
 0x2e9   : > { %8077 = vmatmul.mubr.bf16.gmra.mxu1 %v4700_v34  ;;  %v10079_v36 = vadd.f32 %v7898_v2, %v7846_v35 }
 0x2ea   : > { %8129 = vmatmul.mubr.bf16.gmra.mxu0 %v10074_v51  ;;  %8080 = vmatprep.mubr.bf16.mxu1 %v4701_v49  ;;  %v3619_v25 = vpop.f32.mrf.mxu1  ;;  %v3844_v44 = vpop.f32.mrf.mxu0 }
 0x2eb   : > { %8132 = vmatprep.mubr.bf16.mxu0 %v10076_v14  ;;  %v10082_v17 = vadd.f32 %v3844_v44, %v3619_v25  ;;  %v5649_v25 = vld [vmem:[#allocation2 + $0x35] sm:$0xff]  ;;  %v5650_v44 = vld [vmem:[#allocation2 + $0x3d] sm:$0xff] }
 0x2ec   : > { %v7847_v62 = vpop.f32.mrf.mxu1  ;;  %v7899_v28 = vpop.f32.mrf.mxu0  ;;  %v5684_v18 = vpack.c.bf16 %v5650_v44, %v5649_v25  ;;  %v5658_v25 = vld [vmem:[#allocation2 + $0x7d] sm:$0xff] }
 0x2ed   : > { %v10084_v52 = vadd.f32 %v7899_v28, %v7847_v62  ;;  %v5652_v62 = vld [vmem:[#allocation2 + $0x4d] sm:$0xff]  ;;  %v8447_v44 = vld [vmem:[%s10728_s4 + $0x218] sm:$0xff]  }
 0x2ee   : > { %v3622_v12 = vpop.f32.mrf.mxu1  ;;  %v3847_v19 = vpop.f32.mrf.mxu0 }
 0x2ef   : > { %v10088_v57 = vadd.f32 %v3847_v19, %v3622_v12  ;;  %v5685_v12 = vpack.c.bf16 %v5652_v62, %v5651_v38 }
 0x2f0   : > { %v7850_v63 = vpop.f32.mrf.mxu1 }
 0x2f1   : > { %v7902_v4 = vpop.f32.mrf.mxu0  ;;  %8081 = vmatmul.mubr.bf16.gmra.mxu1 %v4702_v61 }
 0x2f2   : > { %8133 = vmatmul.mubr.bf16.gmra.mxu0 %v10086_v22  ;;  %v10093_v10 = vadd.f32 %v7902_v4, %v7850_v63  ;;  %8084 = vmatprep.mubr.bf16.mxu1 %v4703_v23  ;;  %v3635_v47 = vpop.f32.mrf.mxu1 }
 0x2f3   : > { %8136 = vmatprep.mubr.bf16.mxu0 %v10090_v53  ;;  %v3860_v11 = vpop.f32.mrf.mxu0 }
 0x2f4   : > { %v10096_v46 = vadd.f32 %v3860_v11, %v3635_v47  ;;  %v7851_v30 = vpop.f32.mrf.mxu1  ;;  %v5653_v47 = vld [vmem:[#allocation2 + $0x55] sm:$0xff]  ;;  %v5654_v11 = vld [vmem:[#allocation2 + $0x5d] sm:$0xff] }
 0x2f5   : > { %v7903_v24 = vpop.f32.mrf.mxu0  ;;  %v5686_v55 = vpack.c.bf16 %v5654_v11, %v5653_v47 }
 0x2f6   : > { %v10098_v0 = vadd.f32 %v7903_v24, %v7851_v30  ;;  %v3638_v40 = vpop.f32.mrf.mxu1 }
 0x2f7   : > { %v3863_v33 = vpop.f32.mrf.mxu0 }
 0x2f8   : > { %v10102_v60 = vadd.f32 %v3863_v33, %v3638_v40  ;;  %v8446_v33 = vld [vmem:[%s10728_s4 + $0x220] sm:$0xff]  }
 0x2f9   : > { %v7854_v27 = vpop.f32.mrf.mxu1  ;;  %v7906_v34 = vpop.f32.mrf.mxu0  ;;  %8085 = vmatmul.mubr.bf16.gmra.mxu1 %v4704_v16 }
 0x2fa   : > { %8137 = vmatmul.mubr.bf16.gmra.mxu0 %v10100_v48  ;;  %v10105_v50 = vadd.f32 %v7906_v34, %v7854_v27  ;;  %8156 = vmatprep.mubr.bf16.mxu1 %v9988_v3  ;;  %v8444_v3 = vld [vmem:[%s10728_s4 + $0x230] sm:$0xff]  }
 0x2fb   : > { %8208 = vmatprep.mubr.bf16.mxu0 %v5683_v41  ;;  %v3651_v49 = vpop.f32.mrf.mxu1  ;;  %v3876_v35 = vpop.f32.mrf.mxu0 }
 0x2fc   : > { %v10108_v2 = vadd.f32 %v3876_v35, %v3651_v49  ;;  %v5657_v35 = vld [vmem:[#allocation2 + $0x75] sm:$0xff] }
 0x2fd   : > { %v7855_v54 = vpop.f32.mrf.mxu1  ;;  %v7907_v43 = vpop.f32.mrf.mxu0 }
 0x2fe   : > { %v10110_v28 = vadd.f32 %v7907_v43, %v7855_v54  ;;  %v5660_v43 = vld [vmem:[#allocation2 + $0x8d] sm:$0xff] }
 0x2ff   : > { %v3654_v37 = vpop.f32.mrf.mxu1  ;;  %v3879_v1 = vpop.f32.mrf.mxu0 }
 0x300   : > { %v10112_v42 = vadd.f32 %v3879_v1, %v3654_v37  ;;  %v5688_v1 = vpack.c.bf16 %v5658_v25, %v5657_v35 }
 0x301   : > { %v7858_v19 = vpop.f32.mrf.mxu1  ;;  %8157 = vmatmul.mubr.bf16.vlgmr.msra.gmra.mxu1 %v9990_v26 }
 0x302   : > { %v7910_v61 = vpop.f32.mrf.mxu0  ;;  %8209 = vmatmul.mubr.bf16.vlgmr.msra.gmra.mxu0 %v5684_v18  ;;  %8160 = vmatprep.mubr.bf16.mxu1 %v10008_v31  ;;  %v5659_v18 = vld [vmem:[#allocation2 + $0x85] sm:$0xff] }
 0x303   : > { %v10118_v59 = vadd.f32 %v7910_v61, %v7858_v19  ;;  %8212 = vmatprep.mubr.bf16.mxu0 %v5685_v12  ;;  %8245 = vmatpush3.bf16.msra.mxu1 %v10059_v58  ;;  %v3667_v23 = vpop.f32.mrf.mxu1  ;;  %v5655_v58 = vld [vmem:[#allocation2 + $0x65] sm:$0xff]  ;;  %v5689_v12 = vpack.c.bf16 %v5660_v43, %v5659_v18  ;;  %v5666_v43 = vld [vmem:[#allocation2 + $0xbd] sm:$0xff] }
 0x304   : > { %v3892_v63 = vpop.f32.mrf.mxu0  ;;  %8246 = vmatprep.subr.bf16.mxu1 %v8444_v3  ;;  %v5687_v40 = vpack.c.bf16 %v5656_v7, %v5655_v58 }
 0x305   : > { %v10122_v4 = vadd.f32 %v3892_v63, %v3667_v23  ;;  %v7859_v26 = vpop.f32.mrf.mxu1 }
 0x306   : > { %v7911_v15 = vpop.f32.mrf.mxu0 }
 0x307   : > { %v10127_v30 = vadd.f32 %v7911_v15, %v7859_v26  ;;  %v3670_v31 = vpop.f32.mrf.mxu1  ;;  %8247 = vmatpush3.bf16.msra.mxu1 %v8444_v3  ;;  %v8448_v3 = vld [vmem:[%s10728_s4 + $0x210] sm:$0xff]   ;;  %v5662_v26 = vld [vmem:[#allocation2 + $0x9d] sm:$0xff]  ;;  %v8449_v15 = vld [vmem:[%s10728_s4 + $0x208] sm:$0xff]  }
 0x308   : > { %v3895_v24 = vpop.f32.mrf.mxu0  ;;  %8248 = vmatprep.subr.bf16.mxu1 %v8445_v5 }
 0x309   : > { %v10129_v29 = vadd.f32 %v3895_v24, %v3670_v31  ;;  %v7862_v16 = vpop.f32.mrf.mxu1  ;;  %8161 = vmatmul.mubr.bf16.gmra.mxu1 %v10010_v6  ;;  %v5664_v31 = vld [vmem:[#allocation2 + $0xad] sm:$0xff] }
 0x30a   : > { %v7914_v56 = vpop.f32.mrf.mxu0  ;;  %8213 = vmatmul.mubr.bf16.gmra.mxu0 %v5686_v55  ;;  %8164 = vmatprep.mubr.bf16.mxu1 %v10026_v13 }
 0x30b   : > { %v10135_v41 = vadd.f32 %v7914_v56, %v7862_v16  ;;  %8216 = vmatprep.mubr.bf16.mxu0 %v5687_v40  ;;  %v3683_v27 = vpop.f32.mrf.mxu1  ;;  %8249 = vmatpush3.bf16.msra.mxu1 %v8445_v5  ;;  %v5661_v5 = vld [vmem:[#allocation2 + $0x95] sm:$0xff]  ;;  %v5663_v40 = vld [vmem:[#allocation2 + $0xa5] sm:$0xff] }
 0x30c   : > { %v3908_v34 = vpop.f32.mrf.mxu0  ;;  %8250 = vmatprep.subr.bf16.mxu1 %v8446_v33  ;;  %v5690_v58 = vpack.c.bf16 %v5662_v26, %v5661_v5  ;;  %v5691_v16 = vpack.c.bf16 %v5664_v31, %v5663_v40  ;;  %v8450_v56 = vld [vmem:[%s10728_s4 + $0x200] sm:$0xff]  }
 0x30d   : > { %v10138_v49 = vadd.f32 %v3908_v34, %v3683_v27  ;;  %v7863_v54 = vpop.f32.mrf.mxu1  ;;  %v5670_v31 = vld [vmem:[#allocation2 + $0xdd] sm:$0xff] }
 0x30e   : > { %v7915_v6 = vpop.f32.mrf.mxu0 }
 0x30f   : > { %v10143_v62 = vadd.f32 %v7915_v6, %v7863_v54  ;;  %v3686_v37 = vpop.f32.mrf.mxu1  ;;  %8251 = vmatpush3.bf16.msra.mxu1 %v8446_v33  ;;  %v5665_v6 = vld [vmem:[#allocation2 + $0xb5] sm:$0xff] }
 0x310   : > { %v3911_v13 = vpop.f32.mrf.mxu0  ;;  %8252 = vmatprep.subr.bf16.mxu1 %v8447_v44 }
 0x311   : > { %v10145_v38 = vadd.f32 %v3911_v13, %v3686_v37  ;;  %v7866_v19 = vpop.f32.mrf.mxu1  ;;  %8165 = vmatmul.mubr.bf16.gmra.mxu1 %v10028_v39 }
 0x312   : > { %v7918_v61 = vpop.f32.mrf.mxu0  ;;  %8217 = vmatmul.mubr.bf16.gmra.mxu0 %v5688_v1  ;;  %8168 = vmatprep.mubr.bf16.mxu1 %v10044_v21  ;;  %v5668_v1 = vld [vmem:[#allocation2 + $0xcd] sm:$0xff] }
 0x313   : > { %v10151_v23 = vadd.f32 %v7918_v61, %v7866_v19  ;;  %8220 = vmatprep.mubr.bf16.mxu0 %v5689_v12  ;;  %v3699_v63 = vpop.f32.mrf.mxu1  ;;  %8253 = vmatpush3.bf16.msra.mxu1 %v8447_v44  ;;  %v5667_v19 = vld [vmem:[#allocation2 + $0xc5] sm:$0xff] }
 0x314   : > { %v3924_v47 = vpop.f32.mrf.mxu0  ;;  %8254 = vmatprep.subr.bf16.mxu1 %v8448_v3  ;;  %v5693_v61 = vpack.c.bf16 %v5668_v1, %v5667_v19  ;;  %v5673_v1 = vld [vmem:[#allocation2 + $0xf5] sm:$0xff]  ;;  %v5676_v19 = vld [vmem:[#allocation2 + $0x10d] sm:$0xff] }
 0x315   : > { %v10154_v11 = vadd.f32 %v3924_v47, %v3699_v63  ;;  %v7867_v7 = vpop.f32.mrf.mxu1 }
 0x316   : > { %v7919_v39 = vpop.f32.mrf.mxu0 }
 0x317   : > { %v10159_v24 = vadd.f32 %v7919_v39, %v7867_v7  ;;  %v3702_v55 = vpop.f32.mrf.mxu1  ;;  %8255 = vmatpush3.bf16.msra.mxu1 %v8448_v3  ;;  %v5692_v3 = vpack.c.bf16 %v5666_v43, %v5665_v6  ;;  %v5669_v39 = vld [vmem:[#allocation2 + $0xd5] sm:$0xff] }
 0x318   : > { %v3927_v21 = vpop.f32.mrf.mxu0  ;;  %8256 = vmatprep.subr.bf16.mxu1 %v8449_v15 }
 0x319   : > { %v10161_v33 = vadd.f32 %v3927_v21, %v3702_v55  ;;  %v7870_v27 = vpop.f32.mrf.mxu1  ;;  %8169 = vmatmul.mubr.bf16.gmra.mxu1 %v10046_v8 }
 0x31a   : > { %v7922_v34 = vpop.f32.mrf.mxu0  ;;  %8221 = vmatmul.mubr.bf16.gmra.mxu0 %v5690_v58  ;;  %8172 = vmatprep.mubr.bf16.mxu1 %v10061_v32  ;;  %v5672_v58 = vld [vmem:[#allocation2 + $0xed] sm:$0xff] }
 0x31b   : > { %v10167_v35 = vadd.f32 %v7922_v34, %v7870_v27  ;;  %8224 = vmatprep.mubr.bf16.mxu0 %v5691_v16  ;;  %v3715_v25 = vpop.f32.mrf.mxu1  ;;  %8257 = vmatpush3.bf16.msra.mxu1 %v8449_v15  ;;  %v5671_v27 = vld [vmem:[#allocation2 + $0xe5] sm:$0xff] }
 0x31c   : > { %v3940_v44 = vpop.f32.mrf.mxu0  ;;  %8258 = vmatprep.subr.bf16.mxu1 %v8450_v56 }
 0x31d   : > { %v10170_v54 = vadd.f32 %v3940_v44, %v3715_v25  ;;  %v7871_v37 = vpop.f32.mrf.mxu1  ;;  %v5695_v25 = vpack.c.bf16 %v5672_v58, %v5671_v27  ;;  %v5678_v27 = vld [vmem:[#allocation2 + $0x11d] sm:$0xff] }
 0x31e   : > { %v7923_v13 = vpop.f32.mrf.mxu0 }
 0x31f   : > { %v10172_v18 = vadd.f32 %v7923_v13, %v7871_v37  ;;  %v3718_v8 = vpop.f32.mrf.mxu1  ;;  %8259 = vmatpush3.bf16.msra.mxu1 %v8450_v56 }
 0x320   : > { %v3943_v12 = vpop.f32.mrf.mxu0 }
 0x321   : > { %v10174_v32 = vadd.f32 %v3943_v12, %v3718_v8  ;;  %v7874_v63 = vpop.f32.mrf.mxu1  ;;  %8173 = vmatmul.mubr.bf16.gmra.mxu1 %v10063_v20  ;;  %v5694_v20 = vpack.c.bf16 %v5670_v31, %v5669_v39  ;;  %v5674_v8 = vld [vmem:[#allocation2 + $0xfd] sm:$0xff] }
 0x322   : > { %v7926_v47 = vpop.f32.mrf.mxu0  ;;  %8225 = vmatmul.mubr.bf16.gmra.mxu0 %v5692_v3  ;;  %8176 = vmatprep.mubr.bf16.mxu1 %v10068_v45 }
 0x323   : > { %v10177_v5 = vadd.f32 %v7926_v47, %v7874_v63  ;;  %8228 = vmatprep.mubr.bf16.mxu0 %v5693_v61  ;;  %v3731_v26 = vpop.f32.mrf.mxu1 }
 0x324   : > { %v3956_v15 = vpop.f32.mrf.mxu0 }
 0x325   : > { %v10180_v7 = vadd.f32 %v3956_v15, %v3731_v26  ;;  %v7875_v55 = vpop.f32.mrf.mxu1  ;;  %v5675_v26 = vld [vmem:[#allocation2 + $0x105] sm:$0xff] }
 0x326   : > { %v7927_v21 = vpop.f32.mrf.mxu0  ;;  %v5697_v39 = vpack.c.bf16 %v5676_v19, %v5675_v26  ;;  %v5681_v26 = vld [vmem:[#allocation2 + $0x135] sm:$0xff] }
 0x327   : > { %v10182_v40 = vadd.f32 %v7927_v21, %v7875_v55  ;;  %v3734_v16 = vpop.f32.mrf.mxu1 }
 0x328   : > { %v3959_v56 = vpop.f32.mrf.mxu0 }
 0x329   : > { %v10184_v34 = vadd.f32 %v3959_v56, %v3734_v16  ;;  %v7878_v45 = vpop.f32.mrf.mxu1  ;;  %8177 = vmatmul.mubr.bf16.gmra.mxu1 %v10070_v9  ;;  %v5696_v9 = vpack.c.bf16 %v5674_v8, %v5673_v1 }
 0x32a   : > { %v7930_v44 = vpop.f32.mrf.mxu0  ;;  %8229 = vmatmul.mubr.bf16.gmra.mxu0 %v5694_v20  ;;  %8180 = vmatprep.mubr.bf16.mxu1 %v10074_v51  ;;  %v5677_v20 = vld [vmem:[#allocation2 + $0x115] sm:$0xff] }
 0x32b   : > { %v10187_v6 = vadd.f32 %v7930_v44, %v7878_v45  ;;  %8232 = vmatprep.mubr.bf16.mxu0 %v5695_v25  ;;  %v3747_v43 = vpop.f32.mrf.mxu1  ;;  %v5679_v44 = vld [vmem:[#allocation2 + $0x125] sm:$0xff] }
 0x32c   : > { %v3972_v37 = vpop.f32.mrf.mxu0 }
 0x32d   : > { %v10190_v13 = vadd.f32 %v3972_v37, %v3747_v43  ;;  %v7879_v12 = vpop.f32.mrf.mxu1  ;;  %v5680_v43 = vld [vmem:[#allocation2 + $0x12d] sm:$0xff] }
 0x32e   : > { %v7931_v3 = vpop.f32.mrf.mxu0 }
 0x32f   : > { %v10192_v61 = vadd.f32 %v7931_v3, %v7879_v12  ;;  %v3750_v63 = vpop.f32.mrf.mxu1  ;;  %v5699_v3 = vpack.c.bf16 %v5680_v43, %v5679_v44 }
 0x330   : > { %v3975_v47 = vpop.f32.mrf.mxu0 }
 0x331   : > { %v10194_v15 = vadd.f32 %v3975_v47, %v3750_v63  ;;  %v7950_v51 = vpop.f32.mrf.mxu1  ;;  %8181 = vmatmul.mubr.bf16.gmra.mxu1 %v10076_v14  ;;  %v5349_v63 = vld [vmem:[#allocation2 + $0x134] sm:$0xff] }
 0x332   : > { %v8002_v31 = vpop.f32.mrf.mxu0  ;;  %8233 = vmatmul.mubr.bf16.gmra.mxu0 %v5696_v9  ;;  %v4285_v55 = vadd.f32 %v7950_v51, %v10079_v36  ;;  %8184 = vmatprep.mubr.bf16.mxu1 %v10086_v22  ;;  %v5698_v22 = vpack.c.bf16 %v5678_v27, %v5677_v20 }
 0x333   : > { %8236 = vmatprep.mubr.bf16.mxu0 %v5697_v39  ;;  %v4140_v21 = vpop.f32.mrf.mxu1  ;;  %v5682_v39 = vld [vmem:[#allocation2 + $0x13d] sm:$0xff] }
 0x334   : > { %v4472_v58 = vpop.f32.mrf.mxu0  ;;  %v10199_v16 = vadd.f32 %v8002_v31, %v4285_v55  ;;  %v4283_v56 = vadd.f32 %v4140_v21, %v10082_v17  ;;  %v5700_v20 = vpack.c.bf16 %v5682_v39, %v5681_v26 }
 0x335   : > { %v7951_v25 = vpop.f32.mrf.mxu1 }
 0x336   : > { %v8003_v45 = vpop.f32.mrf.mxu0  ;;  %v10202_v37 = vadd.f32 %v4472_v58, %v4283_v56  ;;  %v4286_v14 = vadd.f32 %v7951_v25, %v10084_v52  ;;  %v5350_v52 = vld [vmem:[#allocation2 + $0x13c] sm:$0xff]  ;;  %v5980_v56 = vld [vmem:[#allocation2 + $0x2e] sm:$0xff] }
 0x337   : > { %v4143_v36 = vpop.f32.mrf.mxu1  ;;  %v5368_v58 = vpack.c.bf16 %v5350_v52, %v5349_v63  ;;  %v5982_v63 = vld [vmem:[#allocation2 + $0x3e] sm:$0xff]  ;;  %v5984_v52 = vld [vmem:[#allocation2 + $0x4e] sm:$0xff] }
 0x338   : > { %v4475_v1 = vpop.f32.mrf.mxu0  ;;  %v10205_v8 = vadd.f32 %v8003_v45, %v4286_v14  ;;  %v4284_v12 = vadd.f32 %v4143_v36, %v10088_v57  ;;  %v5979_v45 = vld [vmem:[#allocation2 + $0x26] sm:$0xff] }
 0x339   : > { %v7954_v19 = vpop.f32.mrf.mxu1  ;;  %8185 = vmatmul.mubr.bf16.gmra.mxu1 %v10090_v53  ;;  %v6015_v14 = vpack.c.bf16 %v5980_v56, %v5979_v45 }
 0x33a   : > { %v8006_v17 = vpop.f32.mrf.mxu0  ;;  %8237 = vmatmul.mubr.bf16.gmra.mxu0 %v5698_v22  ;;  %v10209_v47 = vadd.f32 %v4475_v1, %v4284_v12  ;;  %v4289_v9 = vadd.f32 %v7954_v19, %v10093_v10  ;;  %8188 = vmatprep.mubr.bf16.mxu1 %v10100_v48 }
 0x33b   : > { %8240 = vmatprep.mubr.bf16.mxu0 %v5699_v3  ;;  %v4156_v51 = vpop.f32.mrf.mxu1 }
 0x33c   : > { %v4488_v31 = vpop.f32.mrf.mxu0  ;;  %v10213_v57 = vadd.f32 %v8006_v17, %v4289_v9  ;;  %v4287_v55 = vadd.f32 %v4156_v51, %v10096_v46  ;;  %v5981_v17 = vld [vmem:[#allocation2 + $0x36] sm:$0xff] }
 0x33d   : > { %v7955_v21 = vpop.f32.mrf.mxu1 }
 0x33e   : > { %v8007_v53 = vpop.f32.mrf.mxu0  ;;  %v10216_v27 = vadd.f32 %v4488_v31, %v4287_v55  ;;  %v4290_v10 = vadd.f32 %v7955_v21, %v10098_v0  ;;  %v6016_v55 = vpack.c.bf16 %v5982_v63, %v5981_v17 }
 0x33f   : > { %v4159_v48 = vpop.f32.mrf.mxu1 }
 0x340   : > { %v4491_v25 = vpop.f32.mrf.mxu0  ;;  %v10219_v44 = vadd.f32 %v8007_v53, %v4290_v10  ;;  %v4288_v43 = vadd.f32 %v4159_v48, %v10102_v60 }
 0x341   : > { %v7958_v36 = vpop.f32.mrf.mxu1  ;;  %8189 = vmatmul.mubr.bf16.gmra.mxu1 %v5368_v58 }
 0x342   : > { %v8010_v1 = vpop.f32.mrf.mxu0  ;;  %8241 = vmatmul.mubr.bf16.gmra.mxu0 %v5700_v20  ;;  %v10222_v46 = vadd.f32 %v4491_v25, %v4288_v43  ;;  %v4293_v22 = vadd.f32 %v7958_v36, %v10105_v50  ;;  %8260 = vmatprep.mubr.bf16.mxu1 %v6015_v14  ;;  %v5983_v50 = vld [vmem:[#allocation2 + $0x46] sm:$0xff]  ;;  %v5985_v43 = vld [vmem:[#allocation2 + $0x56] sm:$0xff]  ;;  %v5986_v14 = vld [vmem:[#allocation2 + $0x5e] sm:$0xff] }
 0x343   : > { %v4172_v12 = vpop.f32.mrf.mxu1  ;;  %v6017_v58 = vpack.c.bf16 %v5984_v52, %v5983_v50  ;;  %v6018_v17 = vpack.c.bf16 %v5986_v14, %v5985_v43 }
 0x344   : > { %v4504_v3 = vpop.f32.mrf.mxu0  ;;  %v10225_v0 = vadd.f32 %v8010_v1, %v4293_v22  ;;  %v4291_v19 = vadd.f32 %v4172_v12, %v10108_v2 }
 0x345   : > { %v7959_v9 = vpop.f32.mrf.mxu1 }
 0x346   : > { %v8011_v60 = vpop.f32.mrf.mxu0  ;;  %v10228_v26 = vadd.f32 %v4504_v3, %v4291_v19  ;;  %v4294_v39 = vadd.f32 %v7959_v9, %v10110_v28 }
 0x347   : > { %v4175_v51 = vpop.f32.mrf.mxu1 }
 0x348   : > { %v4507_v31 = vpop.f32.mrf.mxu0  ;;  %v10231_v21 = vadd.f32 %v8011_v60, %v4294_v39  ;;  %v4292_v53 = vadd.f32 %v4175_v51, %v10112_v42  ;;  %v5988_v42 = vld [vmem:[#allocation2 + $0x6e] sm:$0xff] }
 0x349   : > { %v7962_v56 = vpop.f32.mrf.mxu1  ;;  %8261 = vmatmul.mubr.bf16.vlgmr.msra.gmra.mxu1 %v6016_v55 }
 0x34a   : > { %v8014_v2 = vpop.f32.mrf.mxu0  ;;  %v10234_v20 = vadd.f32 %v4507_v31, %v4292_v53  ;;  %v4297_v10 = vadd.f32 %v7962_v56, %v10118_v59  ;;  %8264 = vmatprep.mubr.bf16.mxu1 %v6017_v58  ;;  %v5987_v59 = vld [vmem:[#allocation2 + $0x66] sm:$0xff]  ;;  %v5989_v53 = vld [vmem:[#allocation2 + $0x76] sm:$0xff]  ;;  %v5990_v58 = vld [vmem:[#allocation2 + $0x7e] sm:$0xff] }
 0x34b   : > { %v4188_v48 = vpop.f32.mrf.mxu1  ;;  %v6019_v60 = vpack.c.bf16 %v5988_v42, %v5987_v59  ;;  %v6020_v43 = vpack.c.bf16 %v5990_v58, %v5989_v53 }
 0x34c   : > { %v4520_v25 = vpop.f32.mrf.mxu0  ;;  %v10237_v28 = vadd.f32 %v8014_v2, %v4297_v10  ;;  %v4295_v45 = vadd.f32 %v4188_v48, %v10122_v4 }
 0x34d   : > { %v7963_v36 = vpop.f32.mrf.mxu1 }
 0x34e   : > { %v8015_v1 = vpop.f32.mrf.mxu0  ;;  %v10240_v22 = vadd.f32 %v4520_v25, %v4295_v45  ;;  %v4298_v12 = vadd.f32 %v7963_v36, %v10127_v30 }
 0x34f   : > { %v4191_v3 = vpop.f32.mrf.mxu1 }
 0x350   : > { %v4523_v19 = vpop.f32.mrf.mxu0  ;;  %v10243_v63 = vadd.f32 %v8015_v1, %v4298_v12  ;;  %v4296_v9 = vadd.f32 %v4191_v3, %v10129_v29  ;;  %v5992_v29 = vld [vmem:[#allocation2 + $0x8e] sm:$0xff] }
 0x351   : > { %v7966_v52 = vpop.f32.mrf.mxu1  ;;  %8265 = vmatmul.mubr.bf16.gmra.mxu1 %v6018_v17 }
 0x352   : > { %v8018_v4 = vpop.f32.mrf.mxu0  ;;  %v10246_v39 = vadd.f32 %v4523_v19, %v4296_v9  ;;  %v4301_v51 = vadd.f32 %v7966_v52, %v10135_v41  ;;  %8268 = vmatprep.mubr.bf16.mxu1 %v6019_v60  ;;  %v5991_v41 = vld [vmem:[#allocation2 + $0x86] sm:$0xff]  ;;  %v5993_v9 = vld [vmem:[#allocation2 + $0x96] sm:$0xff]  ;;  %v5994_v60 = vld [vmem:[#allocation2 + $0x9e] sm:$0xff] }
 0x353   : > { %v4204_v31 = vpop.f32.mrf.mxu1  ;;  %v6021_v1 = vpack.c.bf16 %v5992_v29, %v5991_v41  ;;  %v6022_v53 = vpack.c.bf16 %v5994_v60, %v5993_v9 }
 0x354   : > { %v4536_v55 = vpop.f32.mrf.mxu0  ;;  %v10249_v30 = vadd.f32 %v8018_v4, %v4301_v51  ;;  %v4299_v50 = vadd.f32 %v4204_v31, %v10138_v49 }
 0x355   : > { %v7967_v56 = vpop.f32.mrf.mxu1 }
 0x356   : > { %v8019_v2 = vpop.f32.mrf.mxu0  ;;  %v10252_v10 = vadd.f32 %v4536_v55, %v4299_v50  ;;  %v4302_v48 = vadd.f32 %v7967_v56, %v10143_v62 }
 0x357   : > { %v4207_v25 = vpop.f32.mrf.mxu1 }
 0x358   : > { %v4539_v45 = vpop.f32.mrf.mxu0  ;;  %v10255_v14 = vadd.f32 %v8019_v2, %v4302_v48  ;;  %v4300_v36 = vadd.f32 %v4207_v25, %v10145_v38  ;;  %v5996_v38 = vld [vmem:[#allocation2 + $0xae] sm:$0xff] }
 0x359   : > { %v7970_v42 = vpop.f32.mrf.mxu1  ;;  %8269 = vmatmul.mubr.bf16.gmra.mxu1 %v6020_v43 }
 0x35a   : > { %v8022_v49 = vpop.f32.mrf.mxu0  ;;  %v10258_v12 = vadd.f32 %v4539_v45, %v4300_v36  ;;  %v4305_v3 = vadd.f32 %v7970_v42, %v10151_v23  ;;  %8272 = vmatprep.mubr.bf16.mxu1 %v6021_v1  ;;  %v5995_v23 = vld [vmem:[#allocation2 + $0xa6] sm:$0xff]  ;;  %v5997_v36 = vld [vmem:[#allocation2 + $0xb6] sm:$0xff]  ;;  %v5998_v1 = vld [vmem:[#allocation2 + $0xbe] sm:$0xff] }
 0x35b   : > { %v4220_v19 = vpop.f32.mrf.mxu1  ;;  %v6023_v2 = vpack.c.bf16 %v5996_v38, %v5995_v23  ;;  %v6024_v9 = vpack.c.bf16 %v5998_v1, %v5997_v36 }
 0x35c   : > { %v4552_v17 = vpop.f32.mrf.mxu0  ;;  %v10261_v62 = vadd.f32 %v8022_v49, %v4305_v3  ;;  %v4303_v59 = vadd.f32 %v4220_v19, %v10154_v11 }
 0x35d   : > { %v7971_v52 = vpop.f32.mrf.mxu1 }
 0x35e   : > { %v8023_v4 = vpop.f32.mrf.mxu0  ;;  %v10264_v51 = vadd.f32 %v4552_v17, %v4303_v59  ;;  %v4306_v31 = vadd.f32 %v7971_v52, %v10159_v24 }
 0x35f   : > { %v4223_v55 = vpop.f32.mrf.mxu1 }
 0x360   : > { %v4555_v50 = vpop.f32.mrf.mxu0  ;;  %v10267_v58 = vadd.f32 %v8023_v4, %v4306_v31  ;;  %v4304_v56 = vadd.f32 %v4223_v55, %v10161_v33  ;;  %v6000_v33 = vld [vmem:[#allocation2 + $0xce] sm:$0xff] }
 0x361   : > { %v7974_v29 = vpop.f32.mrf.mxu1  ;;  %8273 = vmatmul.mubr.bf16.gmra.mxu1 %v6022_v53 }
 0x362   : > { %v8026_v11 = vpop.f32.mrf.mxu0  ;;  %v10270_v48 = vadd.f32 %v4555_v50, %v4304_v56  ;;  %v4309_v25 = vadd.f32 %v7974_v29, %v10167_v35  ;;  %8276 = vmatprep.mubr.bf16.mxu1 %v6023_v2  ;;  %v5999_v35 = vld [vmem:[#allocation2 + $0xc6] sm:$0xff]  ;;  %v6001_v56 = vld [vmem:[#allocation2 + $0xd6] sm:$0xff]  ;;  %v6002_v2 = vld [vmem:[#allocation2 + $0xde] sm:$0xff] }
 0x363   : > { %v4236_v45 = vpop.f32.mrf.mxu1  ;;  %v6025_v4 = vpack.c.bf16 %v6000_v33, %v5999_v35  ;;  %v6026_v36 = vpack.c.bf16 %v6002_v2, %v6001_v56 }
 0x364   : > { %v4568_v43 = vpop.f32.mrf.mxu0  ;;  %v10273_v24 = vadd.f32 %v8026_v11, %v4309_v25  ;;  %v4307_v41 = vadd.f32 %v4236_v45, %v10170_v54 }
 0x365   : > { %v7975_v42 = vpop.f32.mrf.mxu1 }
 0x366   : > { %v8027_v49 = vpop.f32.mrf.mxu0  ;;  %v10276_v3 = vadd.f32 %v4568_v43, %v4307_v41  ;;  %v4310_v19 = vadd.f32 %v7975_v42, %v10172_v18 }
 0x367   : > { %v4239_v17 = vpop.f32.mrf.mxu1 }
 0x368   : > { %v4571_v59 = vpop.f32.mrf.mxu0  ;;  %v10279_v60 = vadd.f32 %v8027_v49, %v4310_v19  ;;  %v4308_v52 = vadd.f32 %v4239_v17, %v10174_v32  ;;  %v6004_v32 = vld [vmem:[#allocation2 + $0xee] sm:$0xff] }
 0x369   : > { %v7978_v38 = vpop.f32.mrf.mxu1  ;;  %8277 = vmatmul.mubr.bf16.gmra.mxu1 %v6024_v9 }
 0x36a   : > { %v8030_v54 = vpop.f32.mrf.mxu0  ;;  %v10282_v31 = vadd.f32 %v4571_v59, %v4308_v52  ;;  %v4313_v55 = vadd.f32 %v7978_v38, %v10177_v5  ;;  %8280 = vmatprep.mubr.bf16.mxu1 %v6025_v4  ;;  %v6003_v5 = vld [vmem:[#allocation2 + $0xe6] sm:$0xff]  ;;  %v6005_v52 = vld [vmem:[#allocation2 + $0xf6] sm:$0xff]  ;;  %v6006_v4 = vld [vmem:[#allocation2 + $0xfe] sm:$0xff] }
 0x36b   : > { %v4252_v50 = vpop.f32.mrf.mxu1  ;;  %v6027_v49 = vpack.c.bf16 %v6004_v32, %v6003_v5  ;;  %v6028_v56 = vpack.c.bf16 %v6006_v4, %v6005_v52 }
 0x36c   : > { %v4584_v53 = vpop.f32.mrf.mxu0  ;;  %v10285_v18 = vadd.f32 %v8030_v54, %v4313_v55  ;;  %v4311_v23 = vadd.f32 %v4252_v50, %v10180_v7 }
 0x36d   : > { %v7979_v29 = vpop.f32.mrf.mxu1 }
 0x36e   : > { %v8031_v11 = vpop.f32.mrf.mxu0  ;;  %v10288_v25 = vadd.f32 %v4584_v53, %v4311_v23  ;;  %v4314_v45 = vadd.f32 %v7979_v29, %v10182_v40 }
 0x36f   : > { %v4255_v43 = vpop.f32.mrf.mxu1 }
 0x370   : > { %v4587_v41 = vpop.f32.mrf.mxu0  ;;  %v10291_v1 = vadd.f32 %v8031_v11, %v4314_v45  ;;  %v4312_v42 = vadd.f32 %v4255_v43, %v10184_v34  ;;  %v6008_v34 = vld [vmem:[#allocation2 + $0x10e] sm:$0xff] }
 0x371   : > { %v7982_v33 = vpop.f32.mrf.mxu1  ;;  %8281 = vmatmul.mubr.bf16.gmra.mxu1 %v6026_v36 }
 0x372   : > { %v8034_v7 = vpop.f32.mrf.mxu0  ;;  %v10294_v19 = vadd.f32 %v4587_v41, %v4312_v42  ;;  %v4317_v17 = vadd.f32 %v7982_v33, %v10187_v6  ;;  %8284 = vmatprep.mubr.bf16.mxu1 %v6027_v49  ;;  %v6007_v6 = vld [vmem:[#allocation2 + $0x106] sm:$0xff]  ;;  %v6009_v42 = vld [vmem:[#allocation2 + $0x116] sm:$0xff]  ;;  %v6010_v49 = vld [vmem:[#allocation2 + $0x11e] sm:$0xff] }
 0x373   : > { %v4268_v59 = vpop.f32.mrf.mxu1  ;;  %v6029_v11 = vpack.c.bf16 %v6008_v34, %v6007_v6 }
 0x374   : > { %v4600_v9 = vpop.f32.mrf.mxu0  ;;  %v10297_v40 = vadd.f32 %v8034_v7, %v4317_v17  ;;  %v4315_v35 = vadd.f32 %v4268_v59, %v10190_v13  ;;  %v6012_v17 = vld [vmem:[#allocation2 + $0x12e] sm:$0xff] }
 0x375   : > { %v7983_v38 = vpop.f32.mrf.mxu1 }
 0x376   : > { %v8035_v54 = vpop.f32.mrf.mxu0  ;;  %v10300_v55 = vadd.f32 %v4600_v9, %v4315_v35  ;;  %v4318_v50 = vadd.f32 %v7983_v38, %v10192_v61 }
 0x377   : > { %v4271_v53 = vpop.f32.mrf.mxu1 }
 0x378   : > { %v4603_v23 = vpop.f32.mrf.mxu0  ;;  %v10303_v2 = vadd.f32 %v8035_v54, %v4318_v50  ;;  %v4316_v29 = vadd.f32 %v4271_v53, %v10194_v15  ;;  %v6011_v15 = vld [vmem:[#allocation2 + $0x126] sm:$0xff] }
 0x379   : > { %v8054_v32 = vpop.f32.mrf.mxu1  ;;  %8285 = vmatmul.mubr.bf16.gmra.mxu1 %v6028_v56  ;;  %v6031_v54 = vpack.c.bf16 %v6012_v17, %v6011_v15  ;;  %v6014_v56 = vld [vmem:[#allocation2 + $0x13e] sm:$0xff] }
 0x37a   : > { %v8106_v13 = vpop.f32.mrf.mxu0  ;;  %v10306_v45 = vadd.f32 %v4603_v23, %v4316_v29  ;;  %v4949_v43 = vadd.f32 %v8054_v32, %v10199_v16  ;;  %8288 = vmatprep.mubr.bf16.mxu1 %v6029_v11  ;;  %v6030_v16 = vpack.c.bf16 %v6010_v49, %v6009_v42  ;;  %v6013_v23 = vld [vmem:[#allocation2 + $0x136] sm:$0xff] }
 0x37b   : > { %v4804_v41 = vpop.f32.mrf.mxu1 }
 0x37c   : > { %v5136_v36 = vpop.f32.mrf.mxu0  ;;  %v10309_v61 = vadd.f32 %v8106_v13, %v4949_v43  ;;  %v4947_v5 = vadd.f32 %v4804_v41, %v10202_v37 }
 0x37d   : > { %v8055_v33 = vpop.f32.mrf.mxu1 }
 0x37e   : > { %v8107_v7 = vpop.f32.mrf.mxu0  ;;  %v10312_v59 = vadd.f32 %v5136_v36, %v4947_v5  ;;  %v4950_v9 = vadd.f32 %v8055_v33, %v10205_v8 }
 0x37f   : > { %v4807_v35 = vpop.f32.mrf.mxu1 }
 0x380   : > { %v5139_v52 = vpop.f32.mrf.mxu0  ;;  %v10315_v4 = vadd.f32 %v8107_v7, %v4950_v9  ;;  %v4948_v38 = vadd.f32 %v4807_v35, %v10209_v47  ;;  %v6032_v47 = vpack.c.bf16 %v6014_v56, %v6013_v23 }
 0x381   : > { %v8058_v34 = vpop.f32.mrf.mxu1  ;;  %8289 = vmatmul.mubr.bf16.gmra.mxu1 %v6030_v16 }
 0x382   : > { %v8110_v37 = vpop.f32.mrf.mxu0  ;;  %v10318_v50 = vadd.f32 %v5139_v52, %v4948_v38  ;;  %v4953_v53 = vadd.f32 %v8058_v34, %v10213_v57  ;;  %8292 = vmatprep.mubr.bf16.mxu1 %v6031_v54 }
 0x383   : > { %v4820_v6 = vpop.f32.mrf.mxu1 }
 0x384   : > { %v5152_v8 = vpop.f32.mrf.mxu0  ;;  %v10321_v29 = vadd.f32 %v8110_v37, %v4953_v53  ;;  %v4951_v11 = vadd.f32 %v4820_v6, %v10216_v27 }
 0x385   : > { %v8059_v32 = vpop.f32.mrf.mxu1 }
 0x386   : > { %v8111_v13 = vpop.f32.mrf.mxu0  ;;  %v10324_v43 = vadd.f32 %v5152_v8, %v4951_v11  ;;  %v4954_v41 = vadd.f32 %v8059_v32, %v10219_v44 }
 0x387   : > { %v4823_v36 = vpop.f32.mrf.mxu1 }
 0x388   : > { %v5155_v5 = vpop.f32.mrf.mxu0  ;;  %v10327_v42 = vadd.f32 %v8111_v13, %v4954_v41  ;;  %v4952_v57 = vadd.f32 %v4823_v36, %v10222_v46 }
 0x389   : > { %v8062_v49 = vpop.f32.mrf.mxu1  ;;  %8293 = vmatmul.mubr.bf16.gmra.mxu1 %v6032_v47 }
 0x38a   : > { %v8114_v33 = vpop.f32.mrf.mxu0  ;;  %v10330_v7 = vadd.f32 %v5155_v5, %v4952_v57  ;;  %v4957_v27 = vadd.f32 %v8062_v49, %v10225_v0 }
 0x38b   : > { %v4836_v15 = vpop.f32.mrf.mxu1 }
 0x38c   : > { %v5168_v17 = vpop.f32.mrf.mxu0  ;;  %v10333_v9 = vadd.f32 %v8114_v33, %v4957_v27  ;;  %v4955_v35 = vadd.f32 %v4836_v15, %v10228_v26 }
 0x38d   : > { %v8063_v44 = vpop.f32.mrf.mxu1 }
 0x38e   : > { %v8115_v52 = vpop.f32.mrf.mxu0  ;;  %v10336_v16 = vadd.f32 %v5168_v17, %v4955_v35  ;;  %v4958_v38 = vadd.f32 %v8063_v44, %v10231_v21 }
 0x38f   : > { %v4839_v46 = vpop.f32.mrf.mxu1 }
 0x390   : > { %v5171_v54 = vpop.f32.mrf.mxu0  ;;  %v10339_v34 = vadd.f32 %v8115_v52, %v4958_v38  ;;  %v4956_v37 = vadd.f32 %v4839_v46, %v10234_v20 }
 0x391   : > { %v8066_v53 = vpop.f32.mrf.mxu1 }
 0x392   : > { %v8118_v0 = vpop.f32.mrf.mxu0  ;;  %v10342_v23 = vadd.f32 %v5171_v54, %v4956_v37  ;;  %v4961_v56 = vadd.f32 %v8066_v53, %v10237_v28 }
 0x393   : > { %v4852_v6 = vpop.f32.mrf.mxu1 }
 0x394   : > { %v5184_v26 = vpop.f32.mrf.mxu0  ;;  %v10345_v8 = vadd.f32 %v8118_v0, %v4961_v56  ;;  %v4959_v11 = vadd.f32 %v4852_v6, %v10240_v22 }
 0x395   : > { %v8067_v32 = vpop.f32.mrf.mxu1 }
 0x396   : > { %v8119_v21 = vpop.f32.mrf.mxu0  ;;  %v10348_v13 = vadd.f32 %v5184_v26, %v4959_v11  ;;  %v4962_v47 = vadd.f32 %v8067_v32, %v10243_v63 }
 0x397   : > { %v4855_v41 = vpop.f32.mrf.mxu1 }
 0x398   : > { %v5187_v20 = vpop.f32.mrf.mxu0  ;;  %v10351_v36 = vadd.f32 %v8119_v21, %v4962_v47  ;;  %v4960_v5 = vadd.f32 %v4855_v41, %v10246_v39 }
 0x399   : > { %v8070_v57 = vpop.f32.mrf.mxu1 }
 0x39a   : > { %v8122_v28 = vpop.f32.mrf.mxu0  ;;  %v10354_v49 = vadd.f32 %v5187_v20, %v4960_v5  ;;  %v4965_v33 = vadd.f32 %v8070_v57, %v10249_v30 }
 0x39b   : > { %v4868_v27 = vpop.f32.mrf.mxu1 }
 0x39c   : > { %v5200_v22 = vpop.f32.mrf.mxu0  ;;  %v10357_v15 = vadd.f32 %v8122_v28, %v4965_v33  ;;  %v4963_v17 = vadd.f32 %v4868_v27, %v10252_v10 }
 0x39d   : > { %v8071_v35 = vpop.f32.mrf.mxu1 }
 0x39e   : > { %v8123_v63 = vpop.f32.mrf.mxu0  ;;  %v10360_v44 = vadd.f32 %v5200_v22, %v4963_v17  ;;  %v4966_v52 = vadd.f32 %v8071_v35, %v10255_v14 }
 0x39f   : > { %v4871_v38 = vpop.f32.mrf.mxu1 }
 0x3a0   : > { %v5203_v39 = vpop.f32.mrf.mxu0  ;;  %v10363_v46 = vadd.f32 %v8123_v63, %v4966_v52  ;;  %v4964_v54 = vadd.f32 %v4871_v38, %v10258_v12 }
 0x3a1   : > { %v8074_v37 = vpop.f32.mrf.mxu1 }
 0x3a2   : > { %v8126_v30 = vpop.f32.mrf.mxu0  ;;  %v10366_v53 = vadd.f32 %v5203_v39, %v4964_v54  ;;  %v4969_v0 = vadd.f32 %v8074_v37, %v10261_v62 }
 0x3a3   : > { %v4884_v56 = vpop.f32.mrf.mxu1 }
 0x3a4   : > { %v5216_v10 = vpop.f32.mrf.mxu0  ;;  %v10369_v6 = vadd.f32 %v8126_v30, %v4969_v0  ;;  %v4967_v26 = vadd.f32 %v4884_v56, %v10264_v51 }
 0x3a5   : > { %v8075_v11 = vpop.f32.mrf.mxu1 }
 0x3a6   : > { %v8127_v14 = vpop.f32.mrf.mxu0  ;;  %v10372_v32 = vadd.f32 %v5216_v10, %v4967_v26  ;;  %v4970_v21 = vadd.f32 %v8075_v11, %v10267_v58 }
 0x3a7   : > { %v4887_v47 = vpop.f32.mrf.mxu1 }
 0x3a8   : > { %v5219_v12 = vpop.f32.mrf.mxu0  ;;  %v10375_v41 = vadd.f32 %v8127_v14, %v4970_v21  ;;  %v4968_v20 = vadd.f32 %v4887_v47, %v10270_v48 }
 0x3a9   : > { %v8078_v5 = vpop.f32.mrf.mxu1 }
 0x3aa   : > { %v8130_v62 = vpop.f32.mrf.mxu0  ;;  %v10378_v57 = vadd.f32 %v5219_v12, %v4968_v20  ;;  %v4973_v28 = vadd.f32 %v8078_v5, %v10273_v24 }
 0x3ab   : > { %v4900_v33 = vpop.f32.mrf.mxu1 }
 0x3ac   : > { %v5232_v51 = vpop.f32.mrf.mxu0  ;;  %v10381_v27 = vadd.f32 %v8130_v62, %v4973_v28  ;;  %v4971_v22 = vadd.f32 %v4900_v33, %v10276_v3 }
 0x3ad   : > { %v8079_v17 = vpop.f32.mrf.mxu1 }
 0x3ae   : > { %v8131_v58 = vpop.f32.mrf.mxu0  ;;  %v10384_v35 = vadd.f32 %v5232_v51, %v4971_v22  ;;  %v4974_v63 = vadd.f32 %v8079_v17, %v10279_v60 }
 0x3af   : > { %v4903_v52 = vpop.f32.mrf.mxu1 }
 0x3b0   : > { %v5235_v48 = vpop.f32.mrf.mxu0  ;;  %v10387_v38 = vadd.f32 %v8131_v58, %v4974_v63  ;;  %v4972_v39 = vadd.f32 %v4903_v52, %v10282_v31 }
 0x3b1   : > { %v8082_v54 = vpop.f32.mrf.mxu1 }
 0x3b2   : > { %v8134_v24 = vpop.f32.mrf.mxu0  ;;  %v10390_v37 = vadd.f32 %v5235_v48, %v4972_v39  ;;  %v4977_v30 = vadd.f32 %v8082_v54, %v10285_v18 }
 0x3b3   : > { %v4916_v0 = vpop.f32.mrf.mxu1 }
 0x3b4   : > { %v5248_v3 = vpop.f32.mrf.mxu0  ;;  %v10393_v56 = vadd.f32 %v8134_v24, %v4977_v30  ;;  %v4975_v10 = vadd.f32 %v4916_v0, %v10288_v25 }
 0x3b5   : > { %v8083_v26 = vpop.f32.mrf.mxu1 }
 0x3b6   : > { %v8135_v60 = vpop.f32.mrf.mxu0  ;;  %v10396_v11 = vadd.f32 %v5248_v3, %v4975_v10  ;;  %v4978_v14 = vadd.f32 %v8083_v26, %v10291_v1 }
 0x3b7   : > { %v4919_v21 = vpop.f32.mrf.mxu1 }
 0x3b8   : > { %v5251_v31 = vpop.f32.mrf.mxu0  ;;  %v10399_v47 = vadd.f32 %v8135_v60, %v4978_v14  ;;  %v4976_v12 = vadd.f32 %v4919_v21, %v10294_v19 }
 0x3b9   : > { %v8086_v20 = vpop.f32.mrf.mxu1 }
 0x3ba   : > { %v8138_v18 = vpop.f32.mrf.mxu0  ;;  %v10402_v5 = vadd.f32 %v5251_v31, %v4976_v12  ;;  %v4981_v62 = vadd.f32 %v8086_v20, %v10297_v40 }
 0x3bb   : > { %v4932_v28 = vpop.f32.mrf.mxu1 }
 0x3bc   : > { %v5264_v25 = vpop.f32.mrf.mxu0  ;;  %v10405_v33 = vadd.f32 %v8138_v18, %v4981_v62  ;;  %v4979_v51 = vadd.f32 %v4932_v28, %v10300_v55 }
 0x3bd   : > { %v8087_v22 = vpop.f32.mrf.mxu1 }
 0x3be   : > { %v8139_v1 = vpop.f32.mrf.mxu0  ;;  %v10408_v17 = vadd.f32 %v5264_v25, %v4979_v51  ;;  %v4982_v58 = vadd.f32 %v8087_v22, %v10303_v2 }
 0x3bf   : > { %v4935_v63 = vpop.f32.mrf.mxu1 }
 0x3c0   : > { %v5267_v19 = vpop.f32.mrf.mxu0  ;;  %v10411_v52 = vadd.f32 %v8139_v1, %v4982_v58  ;;  %v4980_v48 = vadd.f32 %v4935_v63, %v10306_v45 }
 0x3c1   : > { %v8158_v39 = vpop.f32.mrf.mxu1 }
 0x3c2   : > { %v10414_v40 = vpop.f32.mrf.mxu0  ;;  %v10416_v54 = vadd.f32 %v5267_v19, %v4980_v48  ;;  %v10419_v24 = vadd.f32 %v8158_v39, %v10309_v61 }
 0x3c3   : > { %v5468_v55 = vpop.f32.mrf.mxu1 }
 0x3c4   : > { %v10422_v30 = vadd.f32 %v5468_v55, %v10312_v59  ;;  %v10424_v0 = vpop.f32.mrf.mxu0 }
 0x3c5   : > { %v8159_v2 = vpop.f32.mrf.mxu1 }
 0x3c6   : > { %v10427_v3 = vadd.f32 %v8159_v2, %v10315_v4  ;;  %v10432_v26 = vpop.f32.mrf.mxu0 }
 0x3c7   : > { %v5471_v10 = vpop.f32.mrf.mxu1 }
 0x3c8   : > { %v10430_v45 = vadd.f32 %v5471_v10, %v10318_v50  ;;  %v10440_v21 = vpop.f32.mrf.mxu0 }
 0x3c9   : > { %v8162_v60 = vpop.f32.mrf.mxu1 }
 0x3ca   : > { %v10435_v61 = vadd.f32 %v8162_v60, %v10321_v29  ;;  %v10448_v20 = vpop.f32.mrf.mxu0 }
 0x3cb   : > { %v5484_v14 = vpop.f32.mrf.mxu1 }
 0x3cc   : > { %v10438_v59 = vadd.f32 %v5484_v14, %v10324_v43  ;;  %v10456_v28 = vpop.f32.mrf.mxu0 }
 0x3cd   : > { %v8163_v31 = vpop.f32.mrf.mxu1 }
 0x3ce   : > { %v10443_v4 = vadd.f32 %v8163_v31, %v10327_v42  ;;  %v10464_v22 = vpop.f32.mrf.mxu0 }
 0x3cf   : > { %v5487_v12 = vpop.f32.mrf.mxu1 }
 0x3d0   : > { %v10446_v50 = vadd.f32 %v5487_v12, %v10330_v7  ;;  %v10472_v63 = vpop.f32.mrf.mxu0 }
 0x3d1   : > { %v8166_v18 = vpop.f32.mrf.mxu1 }
 0x3d2   : > { %v10451_v29 = vadd.f32 %v8166_v18, %v10333_v9  ;;  %v10480_v39 = vpop.f32.mrf.mxu0 }
 0x3d3   : > { %v5500_v62 = vpop.f32.mrf.mxu1 }
 0x3d4   : > { %v10454_v43 = vadd.f32 %v5500_v62, %v10336_v16  ;;  %v10488_v10 = vpop.f32.mrf.mxu0 }
 0x3d5   : > { %v8167_v25 = vpop.f32.mrf.mxu1 }
 0x3d6   : > { %v10459_v42 = vadd.f32 %v8167_v25, %v10339_v34  ;;  %v10496_v31 = vpop.f32.mrf.mxu0 }
 0x3d7   : > { %v5503_v51 = vpop.f32.mrf.mxu1 }
 0x3d8   : > { %v10462_v7 = vadd.f32 %v5503_v51, %v10342_v23  ;;  %v10504_v62 = vpop.f32.mrf.mxu0 }
 0x3d9   : > { %v8170_v1 = vpop.f32.mrf.mxu1 }
 0x3da   : > { %v10467_v9 = vadd.f32 %v8170_v1, %v10345_v8  ;;  %v10512_v1 = vpop.f32.mrf.mxu0 }
 0x3db   : > { %v5516_v58 = vpop.f32.mrf.mxu1 }
 0x3dc   : > { %v10470_v16 = vadd.f32 %v5516_v58, %v10348_v13 }
 0x3dd   : > { %v8171_v19 = vpop.f32.mrf.mxu1 }
 0x3de   : > { %v10475_v34 = vadd.f32 %v8171_v19, %v10351_v36 }
 0x3df   : > { %v5519_v48 = vpop.f32.mrf.mxu1 }
 0x3e0   : > { %v10478_v23 = vadd.f32 %v5519_v48, %v10354_v49  ;;  %v10520_v48 = vpop.f32.mrf.mxu0 }
 0x3e1   : > { %v8174_v55 = vpop.f32.mrf.mxu1 }
 0x3e2   : > { %v10483_v8 = vadd.f32 %v8174_v55, %v10357_v15 }
 0x3e3   : > { %v5532_v2 = vpop.f32.mrf.mxu1 }
 0x3e4   : > { %v10486_v13 = vadd.f32 %v5532_v2, %v10360_v44 }
 0x3e5   : > { %v8175_v60 = vpop.f32.mrf.mxu1 }
 0x3e6   : > { %v10491_v36 = vadd.f32 %v8175_v60, %v10363_v46  ;;  %v10528_v60 = vpop.f32.mrf.mxu0 }
 0x3e7   : > { %v5535_v14 = vpop.f32.mrf.mxu1 }
 0x3e8   : > { %v10494_v49 = vadd.f32 %v5535_v14, %v10366_v53 }
 0x3e9   : > { %v8178_v12 = vpop.f32.mrf.mxu1 }
 0x3ea   : > { %v10499_v15 = vadd.f32 %v8178_v12, %v10369_v6 }
 0x3eb   : > { %v5548_v18 = vpop.f32.mrf.mxu1 }
 0x3ec   : > { %v10502_v44 = vadd.f32 %v5548_v18, %v10372_v32  ;;  %v10536_v18 = vpop.f32.mrf.mxu0 }
 0x3ed   : > { %v8179_v25 = vpop.f32.mrf.mxu1 }
 0x3ee   : > { %v10507_v46 = vadd.f32 %v8179_v25, %v10375_v41 }
 0x3ef   : > { %v5551_v51 = vpop.f32.mrf.mxu1 }
 0x3f0   : > { %v10510_v53 = vadd.f32 %v5551_v51, %v10378_v57 }
 0x3f1   : > { %v8182_v58 = vpop.f32.mrf.mxu1 }
 0x3f2   : > { %v10515_v6 = vadd.f32 %v8182_v58, %v10381_v27  ;;  %v10544_v58 = vpop.f32.mrf.mxu0 }
 0x3f3   : > { %v5564_v19 = vpop.f32.mrf.mxu1 }
 0x3f4   : > { %v10518_v32 = vadd.f32 %v5564_v19, %v10384_v35 }
 0x3f5   : > { %v8183_v55 = vpop.f32.mrf.mxu1 }
 0x3f6   : > { %v10523_v41 = vadd.f32 %v8183_v55, %v10387_v38 }
 0x3f7   : > { %v5567_v2 = vpop.f32.mrf.mxu1 }
 0x3f8   : > { %v10526_v57 = vadd.f32 %v5567_v2, %v10390_v37  ;;  %v10552_v2 = vpop.f32.mrf.mxu0 }
 0x3f9   : > { %v8186_v14 = vpop.f32.mrf.mxu1 }
 0x3fa   : > { %v10531_v27 = vadd.f32 %v8186_v14, %v10393_v56 }
 0x3fb   : > { %v5580_v12 = vpop.f32.mrf.mxu1 }
 0x3fc   : > { %v10534_v35 = vadd.f32 %v5580_v12, %v10396_v11 }
 0x3fd   : > { %v8187_v25 = vpop.f32.mrf.mxu1 }
 0x3fe   : > { %v10539_v38 = vadd.f32 %v8187_v25, %v10399_v47 }
 0x3ff   : > { %v5583_v51 = vpop.f32.mrf.mxu1 }
 0x400   : > { %v10542_v37 = vadd.f32 %v5583_v51, %v10402_v5  ;;  %v5945_v5 = vadd.f32 %v10414_v40, %v10419_v24  ;;  %v10562_v51 = vpop.f32.mrf.mxu0  ;;  %v5946_v40 = vadd.f32 %v10432_v26, %v10427_v3 }
 0x401   : > { %v8190_v19 = vpop.f32.mrf.mxu1 }
 0x402   : > { %v10547_v56 = vadd.f32 %v8190_v19, %v10405_v33 }
 0x403   : > { %v5596_v55 = vpop.f32.mrf.mxu1 }
 0x404   : > { %v10550_v11 = vadd.f32 %v5596_v55, %v10408_v17  ;;  %v10568_v17 = vld [vmem:[%s10729_s5] ss:$0 sm:$0xff] }
 0x405   : > { %v8191_v14 = vpop.f32.mrf.mxu1 }
 0x406   : > { %v10555_v47 = vadd.f32 %v8191_v14, %v10411_v52  ;;  %v5943_v52 = vadd.f32 %v10424_v0, %v10422_v30  ;;  %v10575_v14 = vpop.f32.mrf.mxu0  ;;  %v5944_v30 = vadd.f32 %v10440_v21, %v10430_v45  ;;  %v5947_v45 = vadd.f32 %v10456_v28, %v10438_v59 }
 0x407   : > { %v5599_v12 = vpop.f32.mrf.mxu1  ;;  %v5948_v59 = vadd.f32 %v10472_v63, %v10446_v50  ;;  %v5951_v50 = vadd.f32 %v10488_v10, %v10454_v43  ;;  %v5952_v43 = vadd.f32 %v10504_v62, %v10462_v7  ;;  %v5955_v7 = vadd.f32 %v10520_v48, %v10470_v16 }
 0x408   : > { %10811 = vst [vmem:[#allocation5_spill] sm:$0xff] %v10555_v47  ;;  %v10560_v25 = vadd.f32 %v5599_v12, %v10416_v54  ;;  %v5956_v16 = vadd.f32 %v10536_v18, %v10478_v23  ;;  %v5959_v23 = vadd.f32 %v10552_v2, %v10486_v13  ;;  %v5960_v13 = vadd.f32 %v10575_v14, %v10494_v49 }
 0x409   : > { %v8262_v33 = vpop.f32.mrf.mxu1 }
 0x40a   : > { %10812 = vst [vmem:[#allocation6_spill] sm:$0xff] %v10560_v25  ;;  %v6277_v19 = vadd.f32 %v8262_v33, %v5945_v5  ;;  %v5949_v33 = vadd.f32 %v10448_v20, %v10435_v61  ;;  %v10589_v25 = vpop.f32.mrf.mxu0  ;;  %v5950_v61 = vadd.f32 %v10464_v22, %v10443_v4  ;;  %v5953_v4 = vadd.f32 %v10480_v39, %v10451_v29 }
 0x40b   : > { %v6132_v55 = vpop.f32.mrf.mxu1  ;;  %v5954_v29 = vadd.f32 %v10496_v31, %v10459_v42  ;;  %v5957_v42 = vadd.f32 %v10512_v1, %v10467_v9  ;;  %v5958_v9 = vadd.f32 %v10528_v60, %v10475_v34  ;;  %v5961_v34 = vadd.f32 %v10544_v58, %v10483_v8 }
 0x40c   : > { %v6320_v54 = vadd.f32 %v10568_v17, %v6277_v19  ;;  %v6275_v24 = vadd.f32 %v6132_v55, %v5943_v52  ;;  %v5962_v8 = vadd.f32 %v10562_v51, %v10491_v36  ;;  %v5965_v36 = vadd.f32 %v10589_v25, %v10499_v15 }
 0x40d   : > { %v8263_v12 = vpop.f32.mrf.mxu1 }
 0x40e   : > { %v6356_v0 = vmax.f32 %v6320_v54, 0.0  ;;  %v6318_v5 = vadd.f32 %v10568_v17, %v6275_v24  ;;  %v6278_v3 = vadd.f32 %v8263_v12, %v5946_v40 }
 0x40f   : > { %v6135_v26 = vpop.f32.mrf.mxu1 }
 0x410   : > { %6392 = vst [vmem:[%s10580_s25 + $0x10] sm:$0xff] %v6356_v0  ;;  %v6354_v52 = vmax.f32 %v6318_v5, 0.0  ;;  %v6321_v19 = vadd.f32 %v10568_v17, %v6278_v3  ;;  %v6276_v55 = vadd.f32 %v6135_v26, %v5944_v30  ;;  %v10599_v0 = vpop.f32.mrf.mxu0 }
 0x411   : > { %v8266_v47 = vpop.f32.mrf.mxu1  ;;  %v5963_v49 = vadd.f32 %v10599_v0, %v10502_v44 }
 0x412   : > { %6390 = vst [vmem:[%s10580_s25] sm:$0xff] %v6354_v52  ;;  %v6357_v21 = vmax.f32 %v6321_v19, 0.0  ;;  %v6319_v40 = vadd.f32 %v10568_v17, %v6276_v55  ;;  %v6281_v54 = vadd.f32 %v8266_v47, %v5949_v33  ;;  %v10609_v19 = vpop.f32.mrf.mxu0 }
 0x413   : > { %v6148_v24 = vpop.f32.mrf.mxu1  ;;  %v5966_v15 = vadd.f32 %v10609_v19, %v10507_v46 }
 0x414   : > { %6393 = vst [vmem:[%s10580_s25 + $0x18] sm:$0xff] %v6357_v21  ;;  %v6355_v20 = vmax.f32 %v6319_v40, 0.0  ;;  %v6324_v12 = vadd.f32 %v10568_v17, %v6281_v54  ;;  %v6279_v30 = vadd.f32 %v6148_v24, %v5947_v45 }
 0x415   : > { %v8267_v5 = vpop.f32.mrf.mxu1 }
 0x416   : > { %6391 = vst [vmem:[%s10580_s25 + $0x8] sm:$0xff] %v6355_v20  ;;  %v6360_v28 = vmax.f32 %v6324_v12, 0.0  ;;  %v6322_v47 = vadd.f32 %v10568_v17, %v6279_v30  ;;  %v6282_v3 = vadd.f32 %v8267_v5, %v5950_v61  ;;  %v10619_v61 = vpop.f32.mrf.mxu0 }
 0x417   : > { %v6151_v26 = vpop.f32.mrf.mxu1  ;;  %v5964_v44 = vadd.f32 %v10619_v61, %v10510_v53 }
 0x418   : > { %6396 = vst [vmem:[%s10580_s25 + $0x30] sm:$0xff] %v6360_v28  ;;  %v6358_v22 = vmax.f32 %v6322_v47, 0.0  ;;  %v6325_v33 = vadd.f32 %v10568_v17, %v6282_v3  ;;  %v6280_v52 = vadd.f32 %v6151_v26, %v5948_v59  ;;  %v10629_v47 = vpop.f32.mrf.mxu0 }
 0x419   : > { %v8270_v55 = vpop.f32.mrf.mxu1  ;;  %v5969_v46 = vadd.f32 %v10629_v47, %v10515_v6 }
 0x41a   : > { %6394 = vst [vmem:[%s10580_s25 + $0x20] sm:$0xff] %v6358_v22  ;;  %v6361_v63 = vmax.f32 %v6325_v33, 0.0  ;;  %v6323_v45 = vadd.f32 %v10568_v17, %v6280_v52  ;;  %v6285_v21 = vadd.f32 %v8270_v55, %v5953_v4  ;;  %v10639_v55 = vpop.f32.mrf.mxu0 }
 0x41b   : > { %v6164_v40 = vpop.f32.mrf.mxu1  ;;  %v5967_v53 = vadd.f32 %v10639_v55, %v10518_v32 }
 0x41c   : > { %6397 = vst [vmem:[%s10580_s25 + $0x38] sm:$0xff] %v6361_v63  ;;  %v6359_v39 = vmax.f32 %v6323_v45, 0.0  ;;  %v6328_v54 = vadd.f32 %v10568_v17, %v6285_v21  ;;  %v6283_v24 = vadd.f32 %v6164_v40, %v5951_v50 }
 0x41d   : > { %v8271_v20 = vpop.f32.mrf.mxu1 }
 0x41e   : > { %6395 = vst [vmem:[%s10580_s25 + $0x28] sm:$0xff] %v6359_v39  ;;  %v6364_v10 = vmax.f32 %v6328_v54, 0.0  ;;  %v6326_v12 = vadd.f32 %v10568_v17, %v6283_v24  ;;  %v6286_v30 = vadd.f32 %v8271_v20, %v5954_v29  ;;  %v8235_v39 = vpop.f32.mrf.mxu0 }
 0x41f   : > { %v6167_v5 = vpop.f32.mrf.mxu1  ;;  %v5970_v6 = vadd.f32 %v8235_v39, %v10523_v41 }
 0x420   : > { %6400 = vst [vmem:[%s10580_s25 + $0x50] sm:$0xff] %v6364_v10  ;;  %v6362_v31 = vmax.f32 %v6326_v12, 0.0  ;;  %v6329_v59 = vadd.f32 %v10568_v17, %v6286_v30  ;;  %v6284_v28 = vadd.f32 %v6167_v5, %v5952_v43  ;;  %v5899_v30 = vpop.f32.mrf.mxu0 }
 0x421   : > { %v8274_v3 = vpop.f32.mrf.mxu1 }
 0x422   : > { %6398 = vst [vmem:[%s10580_s25 + $0x40] sm:$0xff] %v6362_v31  ;;  %v6365_v62 = vmax.f32 %v6329_v59, 0.0  ;;  %v6327_v26 = vadd.f32 %v10568_v17, %v6284_v28  ;;  %v6289_v4 = vadd.f32 %v8274_v3, %v5957_v42 }
 0x423   : > { %v6180_v22 = vpop.f32.mrf.mxu1 }
 0x424   : > { %6401 = vst [vmem:[%s10580_s25 + $0x58] sm:$0xff] %v6365_v62  ;;  %v6363_v1 = vmax.f32 %v6327_v26, 0.0  ;;  %v6332_v33 = vadd.f32 %v10568_v17, %v6289_v4  ;;  %v6287_v52 = vadd.f32 %v6180_v22, %v5955_v7  ;;  %v8238_v7 = vpop.f32.mrf.mxu0 }
 0x425   : > { %v8275_v50 = vpop.f32.mrf.mxu1  ;;  %v5973_v41 = vadd.f32 %v8238_v7, %v10531_v27 }
 0x426   : > { %6399 = vst [vmem:[%s10580_s25 + $0x48] sm:$0xff] %v6363_v1  ;;  %v6368_v48 = vmax.f32 %v6332_v33, 0.0  ;;  %v6330_v63 = vadd.f32 %v10568_v17, %v6287_v52  ;;  %v6290_v45 = vadd.f32 %v8275_v50, %v5958_v9  ;;  %v5912_v33 = vpop.f32.mrf.mxu0 }
 0x427   : > { %v6183_v21 = vpop.f32.mrf.mxu1 }
 0x428   : > { %6404 = vst [vmem:[%s10580_s25 + $0x70] sm:$0xff] %v6368_v48  ;;  %v6366_v60 = vmax.f32 %v6330_v63, 0.0  ;;  %v6333_v40 = vadd.f32 %v10568_v17, %v6290_v45  ;;  %v6288_v29 = vadd.f32 %v6183_v21, %v5956_v16  ;;  %v8239_v21 = vpop.f32.mrf.mxu0 }
 0x429   : > { %v8278_v54 = vpop.f32.mrf.mxu1 }
 0x42a   : > { %6402 = vst [vmem:[%s10580_s25 + $0x60] sm:$0xff] %v6366_v60  ;;  %v6369_v18 = vmax.f32 %v6333_v40, 0.0  ;;  %v6331_v24 = vadd.f32 %v10568_v17, %v6288_v29  ;;  %v6293_v20 = vadd.f32 %v8278_v54, %v5961_v34 }
 0x42b   : > { %v6196_v43 = vpop.f32.mrf.mxu1 }
 0x42c   : > { %6405 = vst [vmem:[%s10580_s25 + $0x78] sm:$0xff] %v6369_v18  ;;  %v6367_v58 = vmax.f32 %v6331_v24, 0.0  ;;  %v6336_v10 = vadd.f32 %v10568_v17, %v6293_v20  ;;  %v6291_v12 = vadd.f32 %v6196_v43, %v5959_v23  ;;  %v5915_v18 = vpop.f32.mrf.mxu0  ;;  %v5968_v20 = vadd.f32 %v5899_v30, %v10526_v57 }
 0x42d   : > { %v8279_v5 = vpop.f32.mrf.mxu1 }
 0x42e   : > { %6403 = vst [vmem:[%s10580_s25 + $0x68] sm:$0xff] %v6367_v58  ;;  %v6372_v2 = vmax.f32 %v6336_v10, 0.0  ;;  %v6334_v42 = vadd.f32 %v10568_v17, %v6291_v12  ;;  %v6294_v31 = vadd.f32 %v8279_v5, %v5962_v8  ;;  %v8242_v8 = vpop.f32.mrf.mxu0 }
 0x42f   : > { %v6199_v59 = vpop.f32.mrf.mxu1 }
 0x430   : > { %6408 = vst [vmem:[%s10580_s25 + $0x90] sm:$0xff] %v6372_v2  ;;  %v6370_v51 = vmax.f32 %v6334_v42, 0.0  ;;  %v6337_v28 = vadd.f32 %v10568_v17, %v6294_v31  ;;  %v6292_v3 = vadd.f32 %v6199_v59, %v5960_v13  ;;  %v5971_v13 = vadd.f32 %v5912_v33, %v10534_v35  ;;  %v5928_v42 = vpop.f32.mrf.mxu0 }
 0x431   : > { %v8282_v62 = vpop.f32.mrf.mxu1  ;;  %v5974_v59 = vadd.f32 %v8239_v21, %v10539_v38 }
 0x432   : > { %6406 = vst [vmem:[%s10580_s25 + $0x80] sm:$0xff] %v6370_v51  ;;  %v6373_v14 = vmax.f32 %v6337_v28, 0.0  ;;  %v6335_v26 = vadd.f32 %v10568_v17, %v6292_v3  ;;  %v6297_v4 = vadd.f32 %v8282_v62, %v5965_v36  ;;  %v5972_v3 = vadd.f32 %v5915_v18, %v10542_v37 }
 0x433   : > { %v6212_v22 = vpop.f32.mrf.mxu1 }
 0x434   : > { %6409 = vst [vmem:[%s10580_s25 + $0x98] sm:$0xff] %v6373_v14  ;;  %v6371_v25 = vmax.f32 %v6335_v26, 0.0  ;;  %v6340_v9 = vadd.f32 %v10568_v17, %v6297_v4  ;;  %v6295_v1 = vadd.f32 %v6212_v22, %v5963_v49  ;;  %v8243_v49 = vpop.f32.mrf.mxu0  ;;  %v5977_v26 = vadd.f32 %v8242_v8, %v10547_v56 }
 0x435   : > { %v8283_v52 = vpop.f32.mrf.mxu1 }
 0x436   : > { %6407 = vst [vmem:[%s10580_s25 + $0x88] sm:$0xff] %v6371_v25  ;;  %v6376_v0 = vmax.f32 %v6340_v9, 0.0  ;;  %v6338_v50 = vadd.f32 %v10568_v17, %v6295_v1  ;;  %v6298_v16 = vadd.f32 %v8283_v52, %v5966_v15  ;;  %v5975_v25 = vadd.f32 %v5928_v42, %v10550_v11  ;;  %v5931_v33 = vpop.f32.mrf.mxu0 }
 0x437   : > { %v6215_v48 = vpop.f32.mrf.mxu1 }
 0x438   : > { %6412 = vst [vmem:[%s10580_s25 + $0xb0] sm:$0xff] %v6376_v0  ;;  %v6374_v19 = vmax.f32 %v6338_v50, 0.0  ;;  %v6341_v63 = vadd.f32 %v10568_v17, %v6298_v16  ;;  %v6296_v45 = vadd.f32 %v6215_v48, %v5964_v44  ;;  %v10813_v44 = vld [vmem:[#allocation5_spill] sm:$0xff] }
 0x439   : > { %v8286_v34 = vpop.f32.mrf.mxu1  ;;  %v5978_v0 = vadd.f32 %v8243_v49, %v10813_v44 }
 0x43a   : > { %6410 = vst [vmem:[%s10580_s25 + $0xa0] sm:$0xff] %v6374_v19  ;;  %v6377_v61 = vmax.f32 %v6341_v63, 0.0  ;;  %v6339_v60 = vadd.f32 %v10568_v17, %v6296_v45  ;;  %v6301_v40 = vadd.f32 %v8286_v34, %v5969_v46  ;;  %v10814_v46 = vld [vmem:[#allocation6_spill] sm:$0xff] }
 0x43b   : > { %v6228_v29 = vpop.f32.mrf.mxu1  ;;  %v5976_v11 = vadd.f32 %v5931_v33, %v10814_v46 }
 0x43c   : > { %6413 = vst [vmem:[%s10580_s25 + $0xb8] sm:$0xff] %v6377_v61  ;;  %v6375_v47 = vmax.f32 %v6339_v60, 0.0  ;;  %v6344_v54 = vadd.f32 %v10568_v17, %v6301_v40  ;;  %v6299_v23 = vadd.f32 %v6228_v29, %v5967_v53 }
 0x43d   : > { %v8287_v24 = vpop.f32.mrf.mxu1 }
 0x43e   : > { %6411 = vst [vmem:[%s10580_s25 + $0xa8] sm:$0xff] %v6375_v47  ;;  %v6380_v32 = vmax.f32 %v6344_v54, 0.0  ;;  %v6342_v55 = vadd.f32 %v10568_v17, %v6299_v23  ;;  %v6302_v43 = vadd.f32 %v8287_v24, %v5970_v6 }
 0x43f   : > { %v6231_v58 = vpop.f32.mrf.mxu1 }
 0x440   : > { %6416 = vst [vmem:[%s10580_s25 + $0xd0] sm:$0xff] %v6380_v32  ;;  %v6378_v39 = vmax.f32 %v6342_v55, 0.0  ;;  %v6345_v10 = vadd.f32 %v10568_v17, %v6302_v43  ;;  %v6300_v12 = vadd.f32 %v6231_v58, %v5968_v20 }
 0x441   : > { %v8290_v5 = vpop.f32.mrf.mxu1 }
 0x442   : > { %6414 = vst [vmem:[%s10580_s25 + $0xc0] sm:$0xff] %v6378_v39  ;;  %v6381_v57 = vmax.f32 %v6345_v10, 0.0  ;;  %v6343_v30 = vadd.f32 %v10568_v17, %v6300_v12  ;;  %v6305_v2 = vadd.f32 %v8290_v5, %v5973_v41 }
 0x443   : > { %v6244_v31 = vpop.f32.mrf.mxu1 }
 0x444   : > { %6417 = vst [vmem:[%s10580_s25 + $0xd8] sm:$0xff] %v6381_v57  ;;  %v6379_v27 = vmax.f32 %v6343_v30, 0.0  ;;  %v6348_v36 = vadd.f32 %v10568_v17, %v6305_v2  ;;  %v6303_v51 = vadd.f32 %v6244_v31, %v5971_v13 }
 0x445   : > { %v8291_v28 = vpop.f32.mrf.mxu1 }
 0x446   : > { %6415 = vst [vmem:[%s10580_s25 + $0xc8] sm:$0xff] %v6379_v27  ;;  %v6384_v35 = vmax.f32 %v6348_v36, 0.0  ;;  %v6346_v7 = vadd.f32 %v10568_v17, %v6303_v51  ;;  %v6306_v62 = vadd.f32 %v8291_v28, %v5974_v59 }
 0x447   : > { %v6247_v14 = vpop.f32.mrf.mxu1 }
 0x448   : > { %6420 = vst [vmem:[%s10580_s25 + $0xf0] sm:$0xff] %v6384_v35  ;;  %v6382_v38 = vmax.f32 %v6346_v7, 0.0  ;;  %v6349_v4 = vadd.f32 %v10568_v17, %v6306_v62  ;;  %v6304_v22 = vadd.f32 %v6247_v14, %v5972_v3 }
 0x449   : > { %v8294_v15 = vpop.f32.mrf.mxu1 }
 0x44a   : > { %6418 = vst [vmem:[%s10580_s25 + $0xe0] sm:$0xff] %v6382_v38  ;;  %v6385_v37 = vmax.f32 %v6349_v4, 0.0  ;;  %v6347_v9 = vadd.f32 %v10568_v17, %v6304_v22  ;;  %v6309_v1 = vadd.f32 %v8294_v15, %v5977_v26 }
 0x44b   : > { %v6260_v52 = vpop.f32.mrf.mxu1 }
 0x44c   : > { %6421 = vst [vmem:[%s10580_s25 + $0xf8] sm:$0xff] %v6385_v37  ;;  %v6383_v56 = vmax.f32 %v6347_v9, 0.0  ;;  %v6352_v50 = vadd.f32 %v10568_v17, %v6309_v1  ;;  %v6307_v16 = vadd.f32 %v6260_v52, %v5975_v25 }
 0x44d   : > { %v8295_v48 = vpop.f32.mrf.mxu1 }
 0x44e   : > { %6419 = vst [vmem:[%s10580_s25 + $0xe8] sm:$0xff] %v6383_v56  ;;  %v6388_v19 = vmax.f32 %v6352_v50, 0.0  ;;  %v6350_v63 = vadd.f32 %v10568_v17, %v6307_v16  ;;  %v6310_v45 = vadd.f32 %v8295_v48, %v5978_v0 }
 0x44f   : > { %v6263_v21 = vpop.f32.mrf.mxu1 }
 0x450   : > { %6424 = vst [vmem:[%s10580_s25 + $0x110] sm:$0xff] %v6388_v19  ;;  %v6386_v34 = vmax.f32 %v6350_v63, 0.0  ;;  %v6353_v53 = vadd.f32 %v10568_v17, %v6310_v45  ;;  %v6308_v61 = vadd.f32 %v6263_v21, %v5976_v11 }
 0x452   : > { %6422 = vst [vmem:[%s10580_s25 + $0x100] sm:$0xff] %v6386_v34  ;;  %v6389_v60 = vmax.f32 %v6353_v53, 0.0  ;;  %v6351_v40 = vadd.f32 %v10568_v17, %v6308_v61 }
 0x454   : > { %6425 = vst [vmem:[%s10580_s25 + $0x118] sm:$0xff] %v6389_v60  ;;  %v6387_v29 = vmax.f32 %v6351_v40, 0.0 }
 0x456   : > { %6423 = vst [vmem:[%s10580_s25 + $0x108] sm:$0xff] %v6387_v29 }
 0x457 PF: > { %s16_s21 = sadd.s32 1, %s8457_s21  }
 0x458   : > { %p13_p4 = scmp.ge.s32.totalorder %s16_s21, 4  }
 0x45a   :  { %15 = sbr.rel (!%p13_p4) target bundleno = 1 (0x1), region = 90 }

// kernel: transformer_with_salt_forward.5
= control target key start
LH: loop header
LB: loop body
LE: loop exit
PB: predicated region body
PF: predicated region fallthrough
CT: control target
= control target key end

     0   :  { %s9455_s25 = smov 0   ;;  %s11801_s0 = inlined_call_operand.vmem [shape: f32[2,64,128], index: 0, kind: input, shape index: {}]   ;;  %s11802_s1 = inlined_call_operand.vmem [shape: bf16[3,4,128,128], index: 1, kind: input, shape index: {}]   ;;  %s11803_s2 = inlined_call_operand.vmem [shape: f32[3,4,1,128], index: 2, kind: input, shape index: {}]   ;;  %s11804_s3 = inlined_call_operand.vmem [shape: bf16[4,128,128], index: 3, kind: input, shape index: {}]   ;;  %s11805_s4 = inlined_call_operand.vmem [shape: f32[1,128], index: 4, kind: input, shape index: {}]   ;;  %s11806_s5 = inlined_call_operand.vmem [shape: f32[1,128], index: 5, kind: input, shape index: {}]   ;;  %s11807_s6 = inlined_call_operand.vmem [shape: f32[1,128], index: 6, kind: input, shape index: {}]   ;;  %s11808_s7 = inlined_call_operand.vmem [shape: bf16[128,2048], index: 7, kind: input, shape index: {}]   ;;  %s11809_s8 = inlined_call_operand.vmem [shape: f32[1,2048], index: 8, kind: input, shape index: {}]   ;;  %s11810_s9 = inlined_call_operand.vmem [shape: bf16[2048,128], index: 9, kind: input, shape index: {}]   ;;  %s11811_s10 = inlined_call_operand.vmem [shape: f32[1,128], index: 10, kind: input, shape index: {}]   ;;  %s11812_s11 = inlined_call_operand.vmem [shape: f32[1,128], index: 11, kind: input, shape index: {}]   ;;  %s11813_s12 = inlined_call_operand.vmem [shape: f32[1,128], index: 12, kind: input, shape index: {}]   ;;  %s11814_s13 = inlined_call_operand.vmem [shape: f32[2,64,128], index: 13, kind: output, shape index: {}]  }
   0x1 LB: > { %s7189_s26 = sadd.s32 4294967295, %s9382_s25   ;;  %p7193_p0 = scmp.ge.s32.totalorder %s9382_s25, 1  ;;  %s9382_s25 = sphi %s9455_s25, %s23_s25  }
   0x2   : > { %p387_p1 = scmp.lt.s32.totalorder %s9382_s25, 3 }
   0x4   : > { %p388_p2 = pnand %p7193_p0, %p387_p1 }
   0x6   : > { %391 = sbr.rel (%p388_p2) target bundleno = 4785 (0x12b1), region = 72 }
   0xb   : > { %v8952_v0 = vld [vmem:[%s11802_s1 + $0x138] sm:$0xff]   ;;  %p431_p3 = scmp.lt.s32.totalorder %s7189_s26, 1  ;;  %v8953_v1 = vld [vmem:[%s11802_s1 + $0x130] sm:$0xff]   ;;  %v8954_v2 = vld [vmem:[%s11802_s1 + $0x128] sm:$0xff]   ;;  %vm939_vm0 = vcmask 523264  }
   0xc   : > { %8455 = vmatprep.subr.bf16.mxu1 %v8952_v0  ;;  %v8955_v3 = vld [vmem:[%s11802_s1 + $0x120] sm:$0xff]   ;;  %v8960_v4 = vld [vmem:[%s11802_s1 + $0x38] sm:$0xff]   ;;  %v8961_v8 = vld [vmem:[%s11802_s1 + $0x30] sm:$0xff]  }
   0xd   : > { %s11866_s26 = smov (!%p431_p3, %s7189_s26), 1  ;;  %8456 = vmatpush3.bf16.msra.mxu1 %v8952_v0  ;;  %8431 = vmatprep.subr.bf16.mxu0 %v8960_v4  ;;  %v8956_v9 = vld [vmem:[%s11802_s1 + $0x118] sm:$0xff]   ;;  %v8962_v10 = vld [vmem:[%s11802_s1 + $0x28] sm:$0xff]   ;;  %v8957_v11 = vld [vmem:[%s11802_s1 + $0x110] sm:$0xff]  }
   0xe   : > { %8457 = vmatprep.subr.bf16.mxu1 %v8953_v1  ;;  %s7853_s16 = sshll.u32 %s11866_s26, 6  ;;  %8432 = vmatpush3.bf16.msra.mxu0 %v8960_v4  ;;  %v8963_v12 = vld [vmem:[%s11802_s1 + $0x20] sm:$0xff]   ;;  %v8958_v13 = vld [vmem:[%s11802_s1 + $0x108] sm:$0xff]   ;;  %v8964_v14 = vld [vmem:[%s11802_s1 + $0x18] sm:$0xff]  }
   0xf   : > { %s9480_s19 = scalar_lea.vmem %s11801_s0, %s7853_s16  ;;  %8433 = vmatprep.subr.bf16.mxu0 %v8961_v8  ;;  %v8959_v15 = vld [vmem:[%s11802_s1 + $0x100] sm:$0xff]   ;;  %v8965_v16 = vld [vmem:[%s11802_s1 + $0x10] sm:$0xff]   ;;  %v8966_v21 = vld [vmem:[%s11802_s1 + $0x8] sm:$0xff]   ;;  %s11764_s21 = scalar_lea.vmem %s11814_s13, %s7853_s16 }
  0x10   : > { %v442_v5 = vld [vmem:[%s9480_s19] sm:$0xff]  ;;  %v443_v6 = vld [vmem:[%s9480_s19 + $0x8] sm:$0xff]  ;;  %v444_v17 = vld [vmem:[%s9480_s19 + $0x10] sm:$0xff] }
  0x11   : > { %8458 = vmatpush3.bf16.msra.mxu1 %v8953_v1  ;;  %v9490_v7 = vpack.c.bf16 %v443_v6, %v442_v5  ;;  %v445_v18 = vld [vmem:[%s9480_s19 + $0x18] sm:$0xff]  ;;  %v446_v19 = vld [vmem:[%s9480_s19 + $0x20] sm:$0xff]  ;;  %v447_v20 = vld [vmem:[%s9480_s19 + $0x28] sm:$0xff] }
  0x12   : > { %8459 = vmatprep.subr.bf16.mxu1 %v8954_v2  ;;  %8434 = vmatpush3.bf16.msra.mxu0 %v8961_v8  ;;  %v9528_v22 = vpack.c.bf16 %v445_v18, %v444_v17  ;;  %v8967_v23 = vld [vmem:[%s11802_s1] sm:$0xff]   ;;  %v9533_v24 = vpack.c.bf16 %v447_v20, %v446_v19  ;;  %v448_v25 = vld [vmem:[%s9480_s19 + $0x30] sm:$0xff]  ;;  %v449_v26 = vld [vmem:[%s9480_s19 + $0x38] sm:$0xff] }
  0x13   : > { %8471 = vmatprep.mubr.bf16.mxu1 %v9490_v7  ;;  %8447 = vmatprep.mubr.bf16.mxu0 %v9490_v7  ;;  %v9539_v27 = vpack.c.bf16 %v449_v26, %v448_v25  ;;  %v7198_v35 = vld [vmem:[%s11803_s2] ss:$0 sm:$0xff]  ;;  %v7224_v37 = vld [vmem:[%s11803_s2 + $0x4] ss:$0 sm:$0xff]  ;;  %v8968_v6 = vld [vmem:[%s11802_s1 + $0x238] sm:$0xff]  }
  0x14   : > { %8435 = vmatprep.subr.bf16.mxu0 %v8962_v10  ;;  %v8969_v8 = vld [vmem:[%s11802_s1 + $0x230] sm:$0xff]  }
  0x15   : > { %8460 = vmatpush3.bf16.msra.mxu1 %v8954_v2 }
  0x16   : > { %8461 = vmatprep.subr.bf16.mxu1 %v8955_v3  ;;  %8436 = vmatpush3.bf16.msra.mxu0 %v8962_v10  ;;  %v8971_v10 = vld [vmem:[%s11802_s1 + $0x220] sm:$0xff]  }
  0x17   : > { %8437 = vmatprep.subr.bf16.mxu0 %v8963_v12 }
  0x19   : > { %8462 = vmatpush3.bf16.msra.mxu1 %v8955_v3 }
  0x1a   : > { %8463 = vmatprep.subr.bf16.mxu1 %v8956_v9  ;;  %8438 = vmatpush3.bf16.msra.mxu0 %v8963_v12  ;;  %v8973_v12 = vld [vmem:[%s11802_s1 + $0x210] sm:$0xff]  }
  0x1b   : > { %8439 = vmatprep.subr.bf16.mxu0 %v8964_v14 }
  0x1d   : > { %8464 = vmatpush3.bf16.msra.mxu1 %v8956_v9  ;;  %v8970_v9 = vld [vmem:[%s11802_s1 + $0x228] sm:$0xff]  }
  0x1e   : > { %8465 = vmatprep.subr.bf16.mxu1 %v8957_v11  ;;  %8440 = vmatpush3.bf16.msra.mxu0 %v8964_v14  ;;  %v8975_v14 = vld [vmem:[%s11802_s1 + $0x200] sm:$0xff]  }
  0x1f   : > { %8441 = vmatprep.subr.bf16.mxu0 %v8965_v16 }
  0x21   : > { %8466 = vmatpush3.bf16.msra.mxu1 %v8957_v11  ;;  %v8972_v11 = vld [vmem:[%s11802_s1 + $0x218] sm:$0xff]  }
  0x22   : > { %8467 = vmatprep.subr.bf16.mxu1 %v8958_v13  ;;  %8442 = vmatpush3.bf16.msra.mxu0 %v8965_v16 }
  0x23   : > { %8443 = vmatprep.subr.bf16.mxu0 %v8966_v21 }
  0x25   : > { %8468 = vmatpush3.bf16.msra.mxu1 %v8958_v13  ;;  %v8974_v13 = vld [vmem:[%s11802_s1 + $0x208] sm:$0xff]  }
  0x26   : > { %8469 = vmatprep.subr.bf16.mxu1 %v8959_v15  ;;  %8444 = vmatpush3.bf16.msra.mxu0 %v8966_v21 }
  0x27   : > { %8445 = vmatprep.subr.bf16.mxu0 %v8967_v23 }
  0x29   : > { %8470 = vmatpush3.bf16.msra.mxu1 %v8959_v15 }
  0x2a   : > { %8446 = vmatpush3.bf16.msra.mxu0 %v8967_v23 }
  0x2b   : > { %8479 = vmatprep.subr.bf16.mxu0 %v8968_v6 }
  0x2c   : > { %8472 = vmatmul.mubr.bf16.vlgmr.msra.gmra.mxu1 %v9528_v22 }
  0x2d   : > { %8475 = vmatprep.mubr.bf16.mxu1 %v9533_v24  ;;  %8448 = vmatmul.mubr.bf16.vlgmr.msra.gmra.mxu0 %v9528_v22 }
  0x2e   : > { %8451 = vmatprep.mubr.bf16.mxu0 %v9533_v24  ;;  %8480 = vmatpush3.bf16.msra.mxu0 %v8968_v6 }
  0x2f   : > { %8481 = vmatprep.subr.bf16.mxu0 %v8969_v8 }
  0x32   : > { %8482 = vmatpush3.bf16.msra.mxu0 %v8969_v8 }
  0x33   : > { %8483 = vmatprep.subr.bf16.mxu0 %v8970_v9 }
  0x34   : > { %8476 = vmatmul.mubr.bf16.gmra.mxu1 %v9539_v27 }
  0x35   : > { %8452 = vmatmul.mubr.bf16.gmra.mxu0 %v9539_v27 }
  0x36   : > { %8495 = vmatprep.mubr.bf16.mxu0 %v9490_v7  ;;  %8484 = vmatpush3.bf16.msra.mxu0 %v8970_v9 }
  0x37   : > { %8485 = vmatprep.subr.bf16.mxu0 %v8971_v10 }
  0x3a   : > { %8486 = vmatpush3.bf16.msra.mxu0 %v8971_v10 }
  0x3b   : > { %8487 = vmatprep.subr.bf16.mxu0 %v8972_v11 }
  0x3e   : > { %8488 = vmatpush3.bf16.msra.mxu0 %v8972_v11 }
  0x3f   : > { %8489 = vmatprep.subr.bf16.mxu0 %v8973_v12 }
  0x42   : > { %8490 = vmatpush3.bf16.msra.mxu0 %v8973_v12 }
  0x43   : > { %8491 = vmatprep.subr.bf16.mxu0 %v8974_v13 }
  0x46   : > { %8492 = vmatpush3.bf16.msra.mxu0 %v8974_v13 }
  0x47   : > { %8493 = vmatprep.subr.bf16.mxu0 %v8975_v14 }
  0x4a   : > { %8494 = vmatpush3.bf16.msra.mxu0 %v8975_v14 }
  0x4d   : > { %8496 = vmatmul.mubr.bf16.vlgmr.msra.gmra.mxu0 %v9528_v22 }
  0x4e   : > { %8499 = vmatprep.mubr.bf16.mxu0 %v9533_v24 }
  0x55   : > { %8500 = vmatmul.mubr.bf16.gmra.mxu0 %v9539_v27 }
  0x56   : > { %8575 = vmatprep.mubr.bf16.mxu0 %v9490_v7 }
  0xec   : > { %v8473_v28 = vpop.f32.mrf.mxu1 }
  0xed   : > { %v8449_v33 = vpop.f32.mrf.mxu0  ;;  %v706_v52 = vadd.f32 %v8473_v28, %v7224_v37 }
  0xee   : > { %v697_v29 = vpop.f32.mrf.mxu1  ;;  %v568_v63 = vadd.f32 %v8449_v33, %v7198_v35 }
  0xef   : > { %v559_v36 = vpop.f32.mrf.mxu0  ;;  %v698_v56 = vadd.f32 %v7224_v37, %v697_v29 }
  0xf0   : > { %v8474_v30 = vpop.f32.mrf.mxu1  ;;  %v560_v42 = vadd.f32 %v7198_v35, %v559_v36  ;;  %v8978_v36 = vld [vmem:[%s11802_s1 + $0x168] sm:$0xff]  }
  0xf1   : > { %v8450_v39 = vpop.f32.mrf.mxu0  ;;  %v709_v51 = vadd.f32 %v8474_v30, %v7224_v37 }
  0xf2   : > { %v700_v31 = vpop.f32.mrf.mxu1  ;;  %v571_v0 = vadd.f32 %v8450_v39, %v7198_v35  ;;  %v8981_v39 = vld [vmem:[%s11802_s1 + $0x150] sm:$0xff]  }
  0xf3   : > { %v562_v44 = vpop.f32.mrf.mxu0  ;;  %v871_v53 = vpack.c.bf16 %v709_v51, %v706_v52  ;;  %v701_v55 = vadd.f32 %v7224_v37, %v700_v31 }
  0xf4   : > { %v8477_v32 = vpop.f32.mrf.mxu1  ;;  %v563_v48 = vadd.f32 %v7198_v35, %v562_v44  ;;  %v867_v2 = vpack.c.bf16 %v571_v0, %v568_v63 }
  0xf5   : > { %v722_v40 = vadd.f32 %v8477_v32, %v7224_v37  ;;  %v8453_v54 = vpop.f32.mrf.mxu0  ;;  %v870_v58 = vpack.c.bf16 %v701_v55, %v698_v56 }
  0xf6   : > { %v713_v34 = vpop.f32.mrf.mxu1  ;;  %v866_v50 = vpack.c.bf16 %v563_v48, %v560_v42  ;;  %v584_v3 = vadd.f32 %v8453_v54, %v7198_v35 }
  0xf7   : > { %v714_v45 = vadd.f32 %v7224_v37, %v713_v34  ;;  %v575_v57 = vpop.f32.mrf.mxu0  ;;  %v8976_v34 = vld [vmem:[%s11802_s1 + $0x178] sm:$0xff]  }
  0xf8   : > { %v8478_v38 = vpop.f32.mrf.mxu1  ;;  %8511 = vmatprep.mubr.bf16.mxu1 %v866_v50  ;;  %v576_v61 = vadd.f32 %v7198_v35, %v575_v57  ;;  %8559 = vmatprep.subr.bf16.mxu0 %v8976_v34 }
  0xf9   : > { %v725_v41 = vadd.f32 %v8478_v38, %v7224_v37  ;;  %v8454_v59 = vpop.f32.mrf.mxu0  ;;  %8560 = vmatpush3.bf16.msra.mxu0 %v8976_v34  ;;  %v8980_v38 = vld [vmem:[%s11802_s1 + $0x158] sm:$0xff]  }
  0xfa   : > { %v716_v43 = vpop.f32.mrf.mxu1  ;;  %v587_v4 = vadd.f32 %v8454_v59, %v7198_v35 }
  0xfb   : > { %v873_v46 = vpack.c.bf16 %v725_v41, %v722_v40  ;;  %v717_v47 = vadd.f32 %v7224_v37, %v716_v43  ;;  %v578_v60 = vpop.f32.mrf.mxu0  ;;  %v8979_v37 = vld [vmem:[%s11802_s1 + $0x160] sm:$0xff]   ;;  %v8982_v40 = vld [vmem:[%s11802_s1 + $0x148] sm:$0xff]  }
  0xfc   : > { %v579_v62 = vadd.f32 %v7198_v35, %v578_v60  ;;  %v869_v5 = vpack.c.bf16 %v587_v4, %v584_v3  ;;  %v8977_v35 = vld [vmem:[%s11802_s1 + $0x170] sm:$0xff]   ;;  %v8983_v41 = vld [vmem:[%s11802_s1 + $0x140] sm:$0xff]  }
  0xfd   : > { %v872_v49 = vpack.c.bf16 %v717_v47, %v714_v45  ;;  %8503 = vmatprep.subr.bf16.mxu1 %v873_v46  ;;  %8561 = vmatprep.subr.bf16.mxu0 %v8977_v35 }
  0xfe   : > { %8504 = vmatpush3.bf16.xpose.msra.mxu1 %v873_v46  ;;  %v868_v1 = vpack.c.bf16 %v579_v62, %v576_v61  ;;  %8562 = vmatpush3.bf16.msra.mxu0 %v8977_v35  ;;  %v7250_v46 = vld [vmem:[%s11803_s2 + $0x8] ss:$0 sm:$0xff] }
  0xff   : > { %8505 = vmatprep.subr.bf16.mxu1 %v872_v49  ;;  %8563 = vmatprep.subr.bf16.mxu0 %v8978_v36 }
 0x102   : > { %8564 = vmatpush3.bf16.msra.mxu0 %v8978_v36 }
 0x103   : > { %8565 = vmatprep.subr.bf16.mxu0 %v8979_v37 }
 0x106   : > { %8506 = vmatpush3.bf16.xpose.msra.mxu1 %v872_v49  ;;  %8566 = vmatpush3.bf16.msra.mxu0 %v8979_v37 }
 0x107   : > { %8507 = vmatprep.subr.bf16.mxu1 %v871_v53  ;;  %8567 = vmatprep.subr.bf16.mxu0 %v8980_v38 }
 0x10a   : > { %8568 = vmatpush3.bf16.msra.mxu0 %v8980_v38 }
 0x10b   : > { %8569 = vmatprep.subr.bf16.mxu0 %v8981_v39 }
 0x10d   : > { %v8497_v42 = vpop.f32.mrf.mxu0 }
 0x10e   : > { %8508 = vmatpush3.bf16.xpose.msra.mxu1 %v871_v53  ;;  %8570 = vmatpush3.bf16.msra.mxu0 %v8981_v39  ;;  %v844_v54 = vadd.f32 %v8497_v42, %v7250_v46 }
 0x10f   : > { %8509 = vmatprep.subr.bf16.mxu1 %v870_v58  ;;  %8571 = vmatprep.subr.bf16.mxu0 %v8982_v40  ;;  %v835_v43 = vpop.f32.mrf.mxu0 }
 0x110   : > { %v836_v59 = vadd.f32 %v7250_v46, %v835_v43  ;;  %v9685_v43 = vld [vmem:[%s11802_s1 + $0x78] sm:$0xff]  }
 0x111   : > { %v8498_v44 = vpop.f32.mrf.mxu0 }
 0x112   : > { %8572 = vmatpush3.bf16.msra.mxu0 %v8982_v40  ;;  %v847_v55 = vadd.f32 %v8498_v44, %v7250_v46 }
 0x113   : > { %8573 = vmatprep.subr.bf16.mxu0 %v8983_v41  ;;  %v838_v45 = vpop.f32.mrf.mxu0 }
 0x114   : > { %v1033_v60 = vpack.c.bf16 %v847_v55, %v844_v54  ;;  %v839_v61 = vadd.f32 %v7250_v46, %v838_v45 }
 0x115   : > { %v8501_v47 = vpop.f32.mrf.mxu0 }
 0x116   : > { %8510 = vmatpush3.bf16.xpose.msra.mxu1 %v870_v58  ;;  %8574 = vmatpush3.bf16.msra.mxu0 %v8983_v41  ;;  %v860_v49 = vadd.f32 %v8501_v47, %v7250_v46 }
 0x117   : > { %v851_v48 = vpop.f32.mrf.mxu0 }
 0x118   : > { %v852_v51 = vadd.f32 %v7250_v46, %v851_v48  ;;  %v7306_v48 = vld [vmem:[%s11803_s2 + $0x5] ss:$0 sm:$0xff] }
 0x119   : > { %8576 = vmatmul.mubr.bf16.vlgmr.msra.gmra.mxu0 %v9528_v22  ;;  %v8502_v50 = vpop.f32.mrf.mxu0 }
 0x11a   : > { %8579 = vmatprep.mubr.bf16.mxu0 %v9533_v24  ;;  %v863_v52 = vadd.f32 %v8502_v50, %v7250_v46 }
 0x11b   : > { %v854_v53 = vpop.f32.mrf.mxu0 }
 0x11c   : > { %v1035_v56 = vpack.c.bf16 %v863_v52, %v860_v49  ;;  %v855_v57 = vadd.f32 %v7250_v46, %v854_v53 }
 0x11d   : > { %8512 = vmatmul.mubr.bf16.vlgmr.msra.gmra.mxu1 %v867_v2 }
 0x11e   : > { %8515 = vmatprep.mubr.bf16.mxu1 %v868_v1  ;;  %v1034_v58 = vpack.c.bf16 %v855_v57, %v852_v51  ;;  %8519 = vmatprep.subr.bf16.mxu1 %v1035_v56  ;;  %v1032_v1 = vpack.c.bf16 %v839_v61, %v836_v59 }
 0x11f   : > { %8520 = vmatpush3.bf16.msra.mxu1 %v1035_v56 }
 0x120   : > { %8521 = vmatprep.subr.bf16.mxu1 %v1034_v58 }
 0x121   : > { %8580 = vmatmul.mubr.bf16.gmra.mxu0 %v9539_v27 }
 0x123   : > { %8522 = vmatpush3.bf16.msra.mxu1 %v1034_v58 }
 0x124   : > { %8523 = vmatprep.subr.bf16.mxu1 %v1033_v60 }
 0x125   : > { %8516 = vmatmul.mubr.bf16.gmra.mxu1 %v869_v5 }
 0x127   : > { %8524 = vmatpush3.bf16.msra.mxu1 %v1033_v60 }
 0x128   : > { %8525 = vmatprep.subr.bf16.mxu1 %v1032_v1 }
 0x12b   : > { %8526 = vmatpush3.bf16.msra.mxu1 %v1032_v1 }
 0x12c   : > { %8535 = vmatprep.subr.bf16.mxu1 %v9685_v43 }
 0x1d9   : > { %v8577_v44 = vpop.f32.mrf.mxu0 }
 0x1da   : > { %v1387_v59 = vadd.f32 %v8577_v44, %v7306_v48 }
 0x1db   : > { %v1378_v45 = vpop.f32.mrf.mxu0 }
 0x1dc   : > { %v1379_v1 = vadd.f32 %v7306_v48, %v1378_v45 }
 0x1dd   : > { %v9580_v15 = vpop.f32.mrf.mxu1  ;;  %v8578_v46 = vpop.f32.mrf.mxu0 }
 0x1de   : > { %v946_v16 = vsel %vm939_vm0, %v9580_v15, -inf  ;;  %v1390_v60 = vadd.f32 %v8578_v46, %v7306_v48 }
 0x1df   : > { %947 = vmax.xlane.f32.xlu1 %v946_v16  ;;  %v9584_v17 = vpop.f32.mrf.mxu1  ;;  %v1381_v47 = vpop.f32.mrf.mxu0 }
 0x1e0   : > { %v940_v18 = vsel %vm939_vm0, %v9584_v17, -inf }
 0x1e1   : > { %941 = vmax.xlane.f32.xlu0 %v940_v18  ;;  %v9588_v19 = vpop.f32.mrf.mxu1  ;;  %v8581_v49 = vpop.f32.mrf.mxu0 }
 0x1e2   : > { %v949_v20 = vsel %vm939_vm0, %v9588_v19, -inf  ;;  %v1403_v51 = vadd.f32 %v8581_v49, %v7306_v48 }
 0x1e3   : > { %950 = vmax.xlane.f32.xlu1 %v949_v20  ;;  %v9592_v21 = vpop.f32.mrf.mxu1  ;;  %v1394_v50 = vpop.f32.mrf.mxu0 }
 0x1e4   : > { %v943_v23 = vsel %vm939_vm0, %v9592_v21, -inf  ;;  %v1395_v53 = vadd.f32 %v7306_v48, %v1394_v50 }
 0x1e5   : > { %944 = vmax.xlane.f32.xlu0 %v943_v23  ;;  %v9596_v25 = vpop.f32.mrf.mxu1  ;;  %v8582_v52 = vpop.f32.mrf.mxu0 }
 0x1e6   : > { %v958_v30 = vsel %vm939_vm0, %v9596_v25, -inf  ;;  %v1406_v54 = vadd.f32 %v8582_v52, %v7306_v48 }
 0x1e7   : > { %v9598_v26 = vpop.f32.mrf.mxu1  ;;  %v1397_v55 = vpop.f32.mrf.mxu0 }
 0x1e8   : > { %v952_v28 = vsel %vm939_vm0, %v9598_v26, -inf  ;;  %v1554_v56 = vpack.c.bf16 %v1406_v54, %v1403_v51  ;;  %v1398_v57 = vadd.f32 %v7306_v48, %v1397_v55 }
 0x1e9   : > { %953 = vmax.xlane.f32.xlu0 %v952_v28  ;;  %v9602_v29 = vpop.f32.mrf.mxu1 }
 0x1ea   : > { %v961_v33 = vsel %vm939_vm0, %v9602_v29, -inf  ;;  %8607 = vmatprep.subr.bf16.mxu0 %v1554_v56  ;;  %v1553_v58 = vpack.c.bf16 %v1398_v57, %v1395_v53  ;;  %v7280_v53 = vld [vmem:[%s11803_s2 + $0x1] ss:$0 sm:$0xff] }
 0x1eb   : > { %v9606_v31 = vpop.f32.mrf.mxu1  ;;  %8608 = vmatpush3.bf16.xpose.msra.mxu0 %v1554_v56 }
 0x1ec   : > { %v955_v32 = vsel %vm939_vm0, %v9606_v31, -inf  ;;  %8609 = vmatprep.subr.bf16.mxu0 %v1553_v58 }
 0x1ed   : > { %959 = vmax.xlane.f32.xlu0 %v958_v30  ;;  %956 = vmax.xlane.f32.xlu1 %v955_v32 }
 0x1f1   : > { %962 = vmax.xlane.f32.xlu1 %v961_v33 }
 0x1f3   : > { %8610 = vmatpush3.bf16.xpose.msra.mxu0 %v1553_v58 }
 0x268   : > { %v948_v62 = vpop.xlane.xlu1 %947 }
 0x269   : > { %v966_v63 = vsub.f32 %v9580_v15, %v948_v62  ;;  %v1552_v62 = vpack.c.bf16 %v1390_v60, %v1387_v59 }
 0x26a   : > { %v942_v0 = vpop.xlane.xlu0 %941 }
 0x26b   : > { %v964_v2 = vsub.f32 %v9584_v17, %v942_v0  ;;  %v976_v4 = vmul.f32 1.442695, %v966_v63  ;;  %8611 = vmatprep.subr.bf16.mxu0 %v1552_v62 }
 0x26c   : > { %v951_v3 = vpop.xlane.xlu1 %950  ;;  %8612 = vmatpush3.bf16.xpose.msra.mxu0 %v1552_v62 }
 0x26d   : > { %v972_v5 = vmul.f32 1.442695, %v964_v2  ;;  %v967_v6 = vsub.f32 %v9588_v19, %v951_v3  ;;  %v1382_v2 = vadd.f32 %v7306_v48, %v1381_v47 }
 0x26e   : > { %v945_v8 = vpop.xlane.xlu0 %944 }
 0x26f   : > { %9208 = vpow2.f32 %v972_v5  ;;  %v965_v9 = vsub.f32 %v9592_v21, %v945_v8  ;;  %v978_v10 = vmul.f32 1.442695, %v967_v6  ;;  %v1551_v5 = vpack.c.bf16 %v1382_v2, %v1379_v1 }
 0x270   : > { %9210 = vpow2.f32 %v976_v4 }
 0x271   : > { %v974_v11 = vmul.f32 1.442695, %v965_v9  ;;  %8613 = vmatprep.subr.bf16.mxu0 %v1551_v5 }
 0x272   : > { %v954_v12 = vpop.xlane.xlu0 %953 }
 0x273   : > { %9212 = vpow2.f32 %v974_v11  ;;  %v968_v13 = vsub.f32 %v9598_v26, %v954_v12 }
 0x274   : > { %9214 = vpow2.f32 %v978_v10  ;;  %8614 = vmatpush3.bf16.xpose.msra.mxu0 %v1551_v5 }
 0x275   : > { %v980_v14 = vmul.f32 1.442695, %v968_v13 }
 0x276   : > { %v960_v15 = vpop.xlane.xlu0 %959  ;;  %v957_v16 = vpop.xlane.xlu1 %956 }
 0x277   : > { %9216 = vpow2.f32 %v980_v14  ;;  %v970_v17 = vsub.f32 %v9596_v25, %v960_v15  ;;  %v969_v18 = vsub.f32 %v9606_v31, %v957_v16 }
 0x279   : > { %v984_v19 = vmul.f32 1.442695, %v970_v17  ;;  %v982_v20 = vmul.f32 1.442695, %v969_v18 }
 0x27a   : > { %v963_v21 = vpop.xlane.xlu1 %962 }
 0x27b   : > { %9218 = vpow2.f32 %v984_v19  ;;  %v971_v23 = vsub.f32 %v9602_v29, %v963_v21  ;;  %v8985_v21 = vld [vmem:[%s11802_s1 + $0x70] sm:$0xff]  }
 0x27c   : > { %v9650_v28 = vpop.eup %9208  ;;  %9220 = vpow2.f32 %v982_v20 }
 0x27d   : > { %v986_v30 = vmul.f32 1.442695, %v971_v23  ;;  %v988_v26 = vsel %vm939_vm0, %v9650_v28, 0.0  ;;  %v9654_v32 = vpop.eup %9210 }
 0x27e   : > { %989 = vadd.xlane.f32.xlu0 %v988_v26  ;;  %v994_v31 = vsel %vm939_vm0, %v9654_v32, 0.0 }
 0x27f   : > { %9222 = vpow2.f32 %v986_v30 }
 0x280   : > { %v9656_v25 = vpop.eup %9212 }
 0x281   : > { %v991_v33 = vsel %vm939_vm0, %v9656_v25, 0.0  ;;  %v9662_v29 = vpop.eup %9214 }
 0x282   : > { %995 = vadd.xlane.f32.xlu0 %v994_v31  ;;  %992 = vadd.xlane.f32.xlu1 %v991_v33  ;;  %v997_v36 = vsel %vm939_vm0, %v9662_v29, 0.0 }
 0x284   : > { %v9664_v34 = vpop.eup %9216 }
 0x285   : > { %v1000_v35 = vsel %vm939_vm0, %v9664_v34, 0.0 }
 0x286   : > { %1001 = vadd.xlane.f32.xlu0 %v1000_v35  ;;  %998 = vadd.xlane.f32.xlu1 %v997_v36  ;;  %v8987_v35 = vld [vmem:[%s11802_s1 + $0x60] sm:$0xff]   ;;  %v8988_v36 = vld [vmem:[%s11802_s1 + $0x58] sm:$0xff]  }
 0x288   : > { %v9670_v37 = vpop.eup %9218 }
 0x289   : > { %v9672_v38 = vpop.eup %9220  ;;  %v1006_v39 = vsel %vm939_vm0, %v9670_v37, 0.0 }
 0x28a   : > { %1007 = vadd.xlane.f32.xlu0 %v1006_v39  ;;  %v1003_v40 = vsel %vm939_vm0, %v9672_v38, 0.0  ;;  %v8991_v39 = vld [vmem:[%s11802_s1 + $0x40] sm:$0xff]  }
 0x28b   : > { %1004 = vadd.xlane.f32.xlu1 %v1003_v40 }
 0x28c   : > { %v9678_v41 = vpop.eup %9222 }
 0x28d   : > { %v1009_v42 = vsel %vm939_vm0, %v9678_v41, 0.0 }
 0x28f   : > { %1010 = vadd.xlane.f32.xlu1 %v1009_v42 }
 0x307   : > { %v990_v61 = vpop.xlane.xlu0 %989 }
 0x308   : > { %9224 = vrcp.f32 %v990_v61 }
 0x30b   : > { %v996_v63 = vpop.xlane.xlu0 %995  ;;  %v993_v0 = vpop.xlane.xlu1 %992 }
 0x30c   : > { %9226 = vrcp.f32 %v993_v0 }
 0x30d   : > { %9228 = vrcp.f32 %v996_v63 }
 0x30f   : > { %v1002_v3 = vpop.xlane.xlu0 %1001  ;;  %v999_v4 = vpop.xlane.xlu1 %998 }
 0x310   : > { %9230 = vrcp.f32 %v999_v4 }
 0x311   : > { %9232 = vrcp.f32 %v1002_v3 }
 0x313   : > { %v1008_v6 = vpop.xlane.xlu0 %1007 }
 0x314   : > { %v1005_v8 = vpop.xlane.xlu1 %1004 }
 0x315   : > { %9234 = vrcp.f32 %v1005_v8  ;;  %v9225_v9 = vpop.eup %9224  ;;  %v8992_v8 = vld [vmem:[%s11802_s1 + $0x278] sm:$0xff]  }
 0x316   : > { %9236 = vrcp.f32 %v1008_v6  ;;  %v1020_v12 = vmul.f32 %v9225_v9, %v9650_v28  ;;  %v8993_v9 = vld [vmem:[%s11802_s1 + $0x270] sm:$0xff]  }
 0x318   : > { %v1011_v10 = vpop.xlane.xlu1 %1010 }
 0x319   : > { %9238 = vrcp.f32 %v1011_v10  ;;  %v9227_v11 = vpop.eup %9226  ;;  %v8994_v10 = vld [vmem:[%s11802_s1 + $0x268] sm:$0xff]  }
 0x31a   : > { %v1021_v13 = vmul.f32 %v9227_v11, %v9656_v25  ;;  %v9229_v14 = vpop.eup %9228  ;;  %v8986_v25 = vld [vmem:[%s11802_s1 + $0x68] sm:$0xff]   ;;  %v8995_v11 = vld [vmem:[%s11802_s1 + $0x260] sm:$0xff]  }
 0x31b   : > { %v1022_v17 = vmul.f32 %v9229_v14, %v9654_v32  ;;  %v8998_v14 = vld [vmem:[%s11802_s1 + $0x248] sm:$0xff]  }
 0x31c   : > { %v1028_v15 = vpack.c.bf16 %v1021_v13, %v1020_v12  ;;  %v8996_v12 = vld [vmem:[%s11802_s1 + $0x258] sm:$0xff]   ;;  %v8997_v13 = vld [vmem:[%s11802_s1 + $0x250] sm:$0xff]  }
 0x31d   : > { %v9231_v16 = vpop.eup %9230 }
 0x31e   : > { %v1023_v18 = vmul.f32 %v9231_v16, %v9662_v29  ;;  %8527 = vmatprep.mubr.msk.bf16.mxu1 %vm939_vm0, %v1028_v15  ;;  %v9233_v19 = vpop.eup %9232  ;;  %v8999_v15 = vld [vmem:[%s11802_s1 + $0x240] sm:$0xff]  }
 0x31f   : > { %v1024_v28 = vmul.f32 %v9233_v19, %v9664_v34 }
 0x320   : > { %v1029_v20 = vpack.c.bf16 %v1023_v18, %v1022_v17 }
 0x322   : > { %v9235_v23 = vpop.eup %9234  ;;  %8528 = vmatmul.mubr.msk.bf16.vlgmr.msra.gmra.mxu1 %vm939_vm0, %v1029_v20 }
 0x323   : > { %v1025_v30 = vmul.f32 %v9235_v23, %v9672_v38  ;;  %v9237_v26 = vpop.eup %9236  ;;  %8536 = vmatpush3.bf16.msra.mxu1 %v9685_v43  ;;  %v8990_v38 = vld [vmem:[%s11802_s1 + $0x48] sm:$0xff]  }
 0x324   : > { %8537 = vmatprep.subr.bf16.mxu1 %v8985_v21  ;;  %v1026_v33 = vmul.f32 %v9237_v26, %v9670_v37  ;;  %v8989_v37 = vld [vmem:[%s11802_s1 + $0x50] sm:$0xff]  }
 0x325   : > { %v1030_v32 = vpack.c.bf16 %v1025_v30, %v1024_v28 }
 0x326   : > { %v9239_v31 = vpop.eup %9238 }
 0x327   : > { %8531 = vmatprep.mubr.msk.bf16.mxu1 %vm939_vm0, %v1030_v32  ;;  %v1027_v29 = vmul.f32 %v9239_v31, %v9678_v41  ;;  %8538 = vmatpush3.bf16.msra.mxu1 %v8985_v21 }
 0x328   : > { %8539 = vmatprep.subr.bf16.mxu1 %v8986_v25 }
 0x329   : > { %v1031_v34 = vpack.c.bf16 %v1027_v29, %v1026_v33 }
 0x32b   : > { %8532 = vmatmul.mubr.msk.bf16.gmra.mxu1 %vm939_vm0, %v1031_v34 }
 0x32c   : > { %8540 = vmatpush3.bf16.msra.mxu1 %v8986_v25  ;;  %8551 = vmatprep.mubr.bf16.mxu1 %v9490_v7 }
 0x32d   : > { %8541 = vmatprep.subr.bf16.mxu1 %v8987_v35 }
 0x330   : > { %8542 = vmatpush3.bf16.msra.mxu1 %v8987_v35 }
 0x331   : > { %8543 = vmatprep.subr.bf16.mxu1 %v8988_v36 }
 0x334   : > { %8544 = vmatpush3.bf16.msra.mxu1 %v8988_v36 }
 0x335   : > { %8545 = vmatprep.subr.bf16.mxu1 %v8989_v37 }
 0x338   : > { %8546 = vmatpush3.bf16.msra.mxu1 %v8989_v37 }
 0x339   : > { %8547 = vmatprep.subr.bf16.mxu1 %v8990_v38 }
 0x33c   : > { %8548 = vmatpush3.bf16.msra.mxu1 %v8990_v38 }
 0x33d   : > { %8549 = vmatprep.subr.bf16.mxu1 %v8991_v39 }
 0x340   : > { %8550 = vmatpush3.bf16.msra.mxu1 %v8991_v39  ;;  %v7332_v39 = vld [vmem:[%s11803_s2 + $0x9] ss:$0 sm:$0xff] }
 0x341   : > { %8583 = vmatprep.subr.bf16.mxu1 %v8992_v8 }
 0x343   : > { %8552 = vmatmul.mubr.bf16.vlgmr.msra.gmra.mxu1 %v9528_v22 }
 0x344   : > { %8555 = vmatprep.mubr.bf16.mxu1 %v9533_v24  ;;  %8584 = vmatpush3.bf16.msra.mxu1 %v8992_v8 }
 0x345   : > { %8585 = vmatprep.subr.bf16.mxu1 %v8993_v9 }
 0x348   : > { %8586 = vmatpush3.bf16.msra.mxu1 %v8993_v9 }
 0x349   : > { %8587 = vmatprep.subr.bf16.mxu1 %v8994_v10 }
 0x34b   : > { %8556 = vmatmul.mubr.bf16.gmra.mxu1 %v9539_v27 }
 0x34c   : > { %8599 = vmatprep.mubr.bf16.mxu1 %v9490_v7  ;;  %8588 = vmatpush3.bf16.msra.mxu1 %v8994_v10 }
 0x34d   : > { %8589 = vmatprep.subr.bf16.mxu1 %v8995_v11 }
 0x350   : > { %8590 = vmatpush3.bf16.msra.mxu1 %v8995_v11 }
 0x351   : > { %8591 = vmatprep.subr.bf16.mxu1 %v8996_v12 }
 0x354   : > { %8592 = vmatpush3.bf16.msra.mxu1 %v8996_v12 }
 0x355   : > { %8593 = vmatprep.subr.bf16.mxu1 %v8997_v13 }
 0x358   : > { %8594 = vmatpush3.bf16.msra.mxu1 %v8997_v13 }
 0x359   : > { %8595 = vmatprep.subr.bf16.mxu1 %v8998_v14 }
 0x35c   : > { %8596 = vmatpush3.bf16.msra.mxu1 %v8998_v14 }
 0x35d   : > { %8597 = vmatprep.subr.bf16.mxu1 %v8999_v15 }
 0x360   : > { %8598 = vmatpush3.bf16.msra.mxu1 %v8999_v15 }
 0x363   : > { %8600 = vmatmul.mubr.bf16.vlgmr.msra.gmra.mxu1 %v9528_v22 }
 0x364   : > { %8603 = vmatprep.mubr.bf16.mxu1 %v9533_v24 }
 0x36b   : > { %8604 = vmatmul.mubr.bf16.gmra.mxu1 %v9539_v27 }
 0x3e2   : > { %v9730_v40 = vpop.f32.mrf.mxu1 }
 0x3e4   : > { %v9732_v41 = vpop.f32.mrf.mxu1 }
 0x3e6   : > { %v9734_v42 = vpop.f32.mrf.mxu1 }
 0x3e7   : > { %v1114_v43 = vpack.c.bf16 %v9734_v42, %v9730_v40  ;;  %v9012_v40 = vld [vmem:[%s11802_s1 + $0x198] sm:$0xff]   ;;  %v9013_v42 = vld [vmem:[%s11802_s1 + $0x190] sm:$0xff]  }
 0x3e8   : > { %v9738_v44 = vpop.f32.mrf.mxu1 }
 0x3eb   : > { %v9740_v45 = vpop.f32.mrf.mxu1 }
 0x3ed   : > { %v9742_v46 = vpop.f32.mrf.mxu1 }
 0x3ef   : > { %v9744_v47 = vpop.f32.mrf.mxu1 }
 0x3f0   : > { %v1116_v48 = vpack.c.bf16 %v9744_v47, %v9740_v45  ;;  %v9015_v45 = vld [vmem:[%s11802_s1 + $0x180] sm:$0xff]  }
 0x3f1   : > { %v9748_v49 = vpop.f32.mrf.mxu1  ;;  %v9023_v47 = vld [vmem:[%s11804_s3 + $0x40] sm:$0xff]  }
 0x403   : > { %v8553_v50 = vpop.f32.mrf.mxu1 }
 0x404   : > { %v1249_v58 = vadd.f32 %v8553_v50, %v7280_v53 }
 0x405   : > { %v1240_v51 = vpop.f32.mrf.mxu1 }
 0x406   : > { %v1241_v56 = vadd.f32 %v7280_v53, %v1240_v51 }
 0x407   : > { %v8554_v52 = vpop.f32.mrf.mxu1 }
 0x408   : > { %v1252_v54 = vadd.f32 %v8554_v52, %v7280_v53 }
 0x409   : > { %v1243_v55 = vpop.f32.mrf.mxu1 }
 0x40a   : > { %v1244_v57 = vadd.f32 %v7280_v53, %v1243_v55  ;;  %v1548_v61 = vpack.c.bf16 %v1252_v54, %v1249_v58 }
 0x40b   : > { %v8557_v59 = vpop.f32.mrf.mxu1 }
 0x40c   : > { %v1547_v60 = vpack.c.bf16 %v1244_v57, %v1241_v56  ;;  %v1265_v63 = vadd.f32 %v8557_v59, %v7280_v53 }
 0x40d   : > { %v1256_v62 = vpop.f32.mrf.mxu1 }
 0x40e   : > { %8615 = vmatprep.mubr.bf16.mxu0 %v1547_v60  ;;  %v1257_v1 = vadd.f32 %v7280_v53, %v1256_v62 }
 0x40f   : > { %v8558_v0 = vpop.f32.mrf.mxu1  ;;  %8616 = vmatmul.mubr.bf16.vlgmr.msra.gmra.mxu0 %v1548_v61 }
 0x410   : > { %v1268_v2 = vadd.f32 %v8558_v0, %v7280_v53 }
 0x411   : > { %v1259_v3 = vpop.f32.mrf.mxu1 }
 0x412   : > { %v1260_v4 = vadd.f32 %v7280_v53, %v1259_v3  ;;  %v1550_v5 = vpack.c.bf16 %v1268_v2, %v1265_v63 }
 0x414   : > { %v1549_v6 = vpack.c.bf16 %v1260_v4, %v1257_v1 }
 0x416   : > { %8619 = vmatprep.mubr.bf16.mxu0 %v1549_v6 }
 0x417   : > { %8620 = vmatmul.mubr.bf16.gmra.mxu0 %v1550_v5 }
 0x423   : > { %v8601_v35 = vpop.f32.mrf.mxu1 }
 0x424   : > { %v1525_v57 = vadd.f32 %v8601_v35, %v7332_v39 }
 0x425   : > { %v1516_v36 = vpop.f32.mrf.mxu1 }
 0x426   : > { %v1517_v62 = vadd.f32 %v7332_v39, %v1516_v36 }
 0x427   : > { %v8602_v37 = vpop.f32.mrf.mxu1 }
 0x428   : > { %v1528_v58 = vadd.f32 %v8602_v37, %v7332_v39 }
 0x429   : > { %v1519_v38 = vpop.f32.mrf.mxu1 }
 0x42a   : > { %v1713_v63 = vpack.c.bf16 %v1528_v58, %v1525_v57  ;;  %v1520_v0 = vadd.f32 %v7332_v39, %v1519_v38  ;;  %v9016_v57 = vld [vmem:[%s11804_s3 + $0x78] sm:$0xff]   ;;  %v9017_v58 = vld [vmem:[%s11804_s3 + $0x70] sm:$0xff]  }
 0x42b   : > { %v8605_v50 = vpop.f32.mrf.mxu1  ;;  %8639 = vmatprep.subr.bf16.mxu0 %v9016_v57 }
 0x42c   : > { %v1541_v52 = vadd.f32 %v8605_v50, %v7332_v39  ;;  %v1712_v2 = vpack.c.bf16 %v1520_v0, %v1517_v62  ;;  %8640 = vmatpush3.bf16.msra.mxu0 %v9016_v57  ;;  %v9021_v62 = vld [vmem:[%s11804_s3 + $0x50] sm:$0xff]  }
 0x42d   : > { %v1532_v51 = vpop.f32.mrf.mxu1  ;;  %8641 = vmatprep.subr.bf16.mxu0 %v9017_v58 }
 0x42e   : > { %v1533_v54 = vadd.f32 %v7332_v39, %v1532_v51 }
 0x42f   : > { %v8606_v53 = vpop.f32.mrf.mxu1 }
 0x430   : > { %v1544_v55 = vadd.f32 %v8606_v53, %v7332_v39  ;;  %8642 = vmatpush3.bf16.msra.mxu0 %v9017_v58  ;;  %v9025_v58 = vld [vmem:[%s11802_s1 + $0xb0] sm:$0xff]  }
 0x431   : > { %v1535_v56 = vpop.f32.mrf.mxu1 }
 0x432   : > { %v1715_v59 = vpack.c.bf16 %v1544_v55, %v1541_v52  ;;  %v1536_v60 = vadd.f32 %v7332_v39, %v1535_v56  ;;  %v9000_v56 = vld [vmem:[%s11804_s3 + $0x38] sm:$0xff]  }
 0x434   : > { %v1714_v61 = vpack.c.bf16 %v1536_v60, %v1533_v54  ;;  %8623 = vmatprep.subr.bf16.mxu1 %v1715_v59  ;;  %v9019_v60 = vld [vmem:[%s11804_s3 + $0x60] sm:$0xff]  }
 0x435   : > { %8624 = vmatpush3.bf16.msra.mxu1 %v1715_v59  ;;  %v9018_v59 = vld [vmem:[%s11804_s3 + $0x68] sm:$0xff]  }
 0x436   : > { %8625 = vmatprep.subr.bf16.mxu1 %v1714_v61  ;;  %8643 = vmatprep.subr.bf16.mxu0 %v9018_v59 }
 0x437   : > { %8644 = vmatpush3.bf16.msra.mxu0 %v9018_v59 }
 0x438   : > { %8645 = vmatprep.subr.bf16.mxu0 %v9019_v60 }
 0x439   : > { %8626 = vmatpush3.bf16.msra.mxu1 %v1714_v61  ;;  %v9020_v61 = vld [vmem:[%s11804_s3 + $0x58] sm:$0xff]  }
 0x43a   : > { %8627 = vmatprep.subr.bf16.mxu1 %v1713_v63 }
 0x43b   : > { %8646 = vmatpush3.bf16.msra.mxu0 %v9019_v60 }
 0x43c   : > { %8647 = vmatprep.subr.bf16.mxu0 %v9020_v61 }
 0x43d   : > { %8628 = vmatpush3.bf16.msra.mxu1 %v1713_v63 }
 0x43e   : > { %8629 = vmatprep.subr.bf16.mxu1 %v1712_v2 }
 0x43f   : > { %8648 = vmatpush3.bf16.msra.mxu0 %v9020_v61  ;;  %v9026_v61 = vld [vmem:[%s11802_s1 + $0xa8] sm:$0xff]  }
 0x440   : > { %8649 = vmatprep.subr.bf16.mxu0 %v9021_v62 }
 0x441   : > { %8630 = vmatpush3.bf16.msra.mxu1 %v1712_v2 }
 0x442   : > { %8663 = vmatprep.subr.bf16.mxu1 %v9000_v56 }
 0x443   : > { %8650 = vmatpush3.bf16.msra.mxu0 %v9021_v62 }
 0x4cf   : > { %v8617_v16 = vpop.f32.mrf.mxu0 }
 0x4d0   : > { %v1626_v21 = vsel %vm939_vm0, %v8617_v16, -inf }
 0x4d1   : > { %v1589_v17 = vpop.f32.mrf.mxu0 }
 0x4d2   : > { %v1620_v18 = vsel %vm939_vm0, %v1589_v17, -inf }
 0x4d3   : > { %1621 = vmax.xlane.f32.xlu0 %v1620_v18  ;;  %v9781_v19 = vpop.f32.mrf.mxu0 }
 0x4d4   : > { %v1629_v26 = vsel %vm939_vm0, %v9781_v19, -inf }
 0x4d5   : > { %v1592_v20 = vpop.f32.mrf.mxu0 }
 0x4d6   : > { %v1623_v23 = vsel %vm939_vm0, %v1592_v20, -inf }
 0x4d7   : > { %1627 = vmax.xlane.f32.xlu0 %v1626_v21  ;;  %1624 = vmax.xlane.f32.xlu1 %v1623_v23  ;;  %v9785_v28 = vpop.f32.mrf.mxu0 }
 0x4d8   : > { %v1638_v31 = vsel %vm939_vm0, %v9785_v28, -inf }
 0x4d9   : > { %v1605_v30 = vpop.f32.mrf.mxu0 }
 0x4da   : > { %v1632_v32 = vsel %vm939_vm0, %v1605_v30, -inf }
 0x4db   : > { %1630 = vmax.xlane.f32.xlu1 %v1629_v26  ;;  %1633 = vmax.xlane.f32.xlu0 %v1632_v32  ;;  %v9790_v25 = vpop.f32.mrf.mxu0 }
 0x4dc   : > { %v1641_v34 = vsel %vm939_vm0, %v9790_v25, -inf }
 0x4dd   : > { %v1608_v33 = vpop.f32.mrf.mxu0 }
 0x4de   : > { %v1635_v29 = vsel %vm939_vm0, %v1608_v33, -inf }
 0x4df   : > { %1639 = vmax.xlane.f32.xlu0 %v1638_v31  ;;  %1636 = vmax.xlane.f32.xlu1 %v1635_v29 }
 0x4e3   : > { %1642 = vmax.xlane.f32.xlu1 %v1641_v34 }
 0x55c   : > { %v1622_v1 = vpop.xlane.xlu0 %1621 }
 0x55d   : > { %v1644_v3 = vsub.f32 %v1589_v17, %v1622_v1 }
 0x55f   : > { %v1652_v4 = vmul.f32 1.442695, %v1644_v3 }
 0x560   : > { %v1628_v5 = vpop.xlane.xlu0 %1627  ;;  %v1625_v6 = vpop.xlane.xlu1 %1624 }
 0x561   : > { %9240 = vpow2.f32 %v1652_v4  ;;  %v1646_v8 = vsub.f32 %v8617_v16, %v1628_v5  ;;  %v1645_v9 = vsub.f32 %v1592_v20, %v1625_v6 }
 0x563   : > { %v1656_v10 = vmul.f32 1.442695, %v1646_v8  ;;  %v1654_v11 = vmul.f32 1.442695, %v1645_v9 }
 0x564   : > { %v1631_v12 = vpop.xlane.xlu1 %1630  ;;  %v1634_v13 = vpop.xlane.xlu0 %1633 }
 0x565   : > { %9242 = vpow2.f32 %v1656_v10  ;;  %v1647_v14 = vsub.f32 %v9781_v19, %v1631_v12  ;;  %v1648_v15 = vsub.f32 %v1605_v30, %v1634_v13 }
 0x566   : > { %9244 = vpow2.f32 %v1654_v11 }
 0x567   : > { %v1658_v18 = vmul.f32 1.442695, %v1647_v14  ;;  %v1660_v17 = vmul.f32 1.442695, %v1648_v15 }
 0x568   : > { %v1640_v21 = vpop.xlane.xlu0 %1639  ;;  %v1637_v23 = vpop.xlane.xlu1 %1636 }
 0x569   : > { %9246 = vpow2.f32 %v1658_v18  ;;  %v1650_v26 = vsub.f32 %v9785_v28, %v1640_v21  ;;  %v1649_v32 = vsub.f32 %v1608_v33, %v1637_v23  ;;  %v9001_v23 = vld [vmem:[%s11804_s3 + $0x30] sm:$0xff]  }
 0x56a   : > { %9248 = vpow2.f32 %v1660_v17 }
 0x56b   : > { %v1664_v16 = vmul.f32 1.442695, %v1650_v26  ;;  %v1662_v20 = vmul.f32 1.442695, %v1649_v32 }
 0x56c   : > { %v1643_v31 = vpop.xlane.xlu1 %1642 }
 0x56d   : > { %9250 = vpow2.f32 %v1664_v16  ;;  %v1651_v29 = vsub.f32 %v9790_v25, %v1643_v31 }
 0x56e   : > { %v9803_v34 = vpop.eup %9240  ;;  %9252 = vpow2.f32 %v1662_v20 }
 0x56f   : > { %v1666_v19 = vmul.f32 1.442695, %v1651_v29  ;;  %v1668_v30 = vsel %vm939_vm0, %v9803_v34, 0.0 }
 0x570   : > { %1669 = vadd.xlane.f32.xlu0 %v1668_v30 }
 0x571   : > { %9254 = vpow2.f32 %v1666_v19 }
 0x572   : > { %v9807_v35 = vpop.eup %9242 }
 0x573   : > { %v9245_v28 = vpop.eup %9244  ;;  %v1674_v33 = vsel %vm939_vm0, %v9807_v35, 0.0 }
 0x574   : > { %1675 = vadd.xlane.f32.xlu0 %v1674_v33  ;;  %v1671_v36 = vsel %vm939_vm0, %v9245_v28, 0.0  ;;  %v1113_v33 = vpack.c.bf16 %v9738_v44, %v9732_v41  ;;  %v9006_v41 = vld [vmem:[%s11804_s3 + $0x8] sm:$0xff]   ;;  %v9007_v44 = vld [vmem:[%s11804_s3] sm:$0xff]  }
 0x575   : > { %1672 = vadd.xlane.f32.xlu1 %v1671_v36  ;;  %v9004_v36 = vld [vmem:[%s11804_s3 + $0x18] sm:$0xff]  }
 0x576   : > { %v9247_v25 = vpop.eup %9246 }
 0x577   : > { %v9812_v37 = vpop.eup %9248  ;;  %v1677_v38 = vsel %vm939_vm0, %v9247_v25, 0.0 }
 0x578   : > { %v1680_v39 = vsel %vm939_vm0, %v9812_v37, 0.0 }
 0x579   : > { %1681 = vadd.xlane.f32.xlu0 %v1680_v39  ;;  %1678 = vadd.xlane.f32.xlu1 %v1677_v38  ;;  %v9009_v38 = vld [vmem:[%s11802_s1 + $0x1b0] sm:$0xff]   ;;  %v1115_v39 = vpack.c.bf16 %v9748_v49, %v9742_v46  ;;  %v9022_v46 = vld [vmem:[%s11804_s3 + $0x48] sm:$0xff]  }
 0x57a   : > { %v9817_v50 = vpop.eup %9250  ;;  %8651 = vmatprep.subr.bf16.mxu0 %v9022_v46 }
 0x57b   : > { %v9253_v51 = vpop.eup %9252  ;;  %v1686_v52 = vsel %vm939_vm0, %v9817_v50, 0.0  ;;  %8652 = vmatpush3.bf16.msra.mxu0 %v9022_v46 }
 0x57c   : > { %v1683_v53 = vsel %vm939_vm0, %v9253_v51, 0.0  ;;  %8653 = vmatprep.subr.bf16.mxu0 %v9023_v47 }
 0x57d   : > { %1687 = vadd.xlane.f32.xlu0 %v1686_v52  ;;  %1684 = vadd.xlane.f32.xlu1 %v1683_v53 }
 0x57e   : > { %v9822_v54 = vpop.eup %9254 }
 0x57f   : > { %v1689_v55 = vsel %vm939_vm0, %v9822_v54, 0.0  ;;  %8654 = vmatpush3.bf16.msra.mxu0 %v9023_v47 }
 0x581   : > { %1690 = vadd.xlane.f32.xlu1 %v1689_v55 }
 0x5f9   : > { %v1670_v63 = vpop.xlane.xlu0 %1669 }
 0x5fa   : > { %9256 = vrcp.f32 %v1670_v63 }
 0x5fd   : > { %v1676_v0 = vpop.xlane.xlu0 %1675 }
 0x5fe   : > { %v1673_v1 = vpop.xlane.xlu1 %1672 }
 0x5ff   : > { %9258 = vrcp.f32 %v1673_v1  ;;  %v9027_v1 = vld [vmem:[%s11802_s1 + $0xa0] sm:$0xff]  }
 0x600   : > { %9260 = vrcp.f32 %v1676_v0 }
 0x602   : > { %v1682_v2 = vpop.xlane.xlu0 %1681  ;;  %v1679_v3 = vpop.xlane.xlu1 %1678 }
 0x603   : > { %9262 = vrcp.f32 %v1679_v3  ;;  %v9029_v3 = vld [vmem:[%s11802_s1 + $0x90] sm:$0xff]  }
 0x604   : > { %9264 = vrcp.f32 %v1682_v2  ;;  %v9028_v2 = vld [vmem:[%s11802_s1 + $0x98] sm:$0xff]  }
 0x606   : > { %v1688_v4 = vpop.xlane.xlu0 %1687  ;;  %v1685_v5 = vpop.xlane.xlu1 %1684 }
 0x607   : > { %9266 = vrcp.f32 %v1685_v5  ;;  %v9257_v6 = vpop.eup %9256  ;;  %v9031_v5 = vld [vmem:[%s11802_s1 + $0x80] sm:$0xff]  }
 0x608   : > { %9268 = vrcp.f32 %v1688_v4  ;;  %v1700_v10 = vmul.f32 %v9257_v6, %v9803_v34  ;;  %v9002_v34 = vld [vmem:[%s11804_s3 + $0x28] sm:$0xff]  }
 0x609   : > { %v9030_v4 = vld [vmem:[%s11802_s1 + $0x88] sm:$0xff]  }
 0x60a   : > { %v1691_v8 = vpop.xlane.xlu1 %1690 }
 0x60b   : > { %9270 = vrcp.f32 %v1691_v8 }
 0x60c   : > { %v9259_v9 = vpop.eup %9258 }
 0x60d   : > { %v1701_v11 = vmul.f32 %v9259_v9, %v9245_v28  ;;  %v9261_v12 = vpop.eup %9260  ;;  %v9003_v28 = vld [vmem:[%s11804_s3 + $0x20] sm:$0xff]  }
 0x60e   : > { %v1702_v15 = vmul.f32 %v9261_v12, %v9807_v35 }
 0x60f   : > { %v1708_v13 = vpack.c.bf16 %v1701_v11, %v1700_v10 }
 0x610   : > { %v9263_v14 = vpop.eup %9262 }
 0x611   : > { %8631 = vmatprep.mubr.msk.bf16.mxu1 %vm939_vm0, %v1708_v13  ;;  %v1703_v18 = vmul.f32 %v9263_v14, %v9247_v25  ;;  %v9265_v17 = vpop.eup %9264  ;;  %v9005_v25 = vld [vmem:[%s11804_s3 + $0x10] sm:$0xff]  }
 0x612   : > { %v1704_v16 = vmul.f32 %v9265_v17, %v9812_v37  ;;  %v9008_v37 = vld [vmem:[%s11802_s1 + $0x1b8] sm:$0xff]  }
 0x613   : > { %v1709_v21 = vpack.c.bf16 %v1703_v18, %v1702_v15 }
 0x614   : > { %v9267_v26 = vpop.eup %9266 }
 0x615   : > { %v9269_v32 = vpop.eup %9268  ;;  %8632 = vmatmul.mubr.msk.bf16.vlgmr.msra.gmra.mxu1 %vm939_vm0, %v1709_v21  ;;  %v1705_v20 = vmul.f32 %v9267_v26, %v9253_v51  ;;  %v9011_v51 = vld [vmem:[%s11802_s1 + $0x1a0] sm:$0xff]  }
 0x616   : > { %8664 = vmatpush3.bf16.msra.mxu1 %v9000_v56  ;;  %v1706_v19 = vmul.f32 %v9269_v32, %v9817_v50  ;;  %v9010_v50 = vld [vmem:[%s11802_s1 + $0x1a8] sm:$0xff]  }
 0x617   : > { %8665 = vmatprep.subr.bf16.mxu1 %v9001_v23  ;;  %v1710_v29 = vpack.c.bf16 %v1705_v20, %v1704_v16 }
 0x618   : > { %v9271_v31 = vpop.eup %9270 }
 0x619   : > { %v1707_v30 = vmul.f32 %v9271_v31, %v9822_v54  ;;  %8635 = vmatprep.mubr.msk.bf16.mxu1 %vm939_vm0, %v1710_v29 }
 0x61a   : > { %8666 = vmatpush3.bf16.msra.mxu1 %v9001_v23  ;;  %v7420_v23 = vld [vmem:[%s11803_s2 + $0x6] ss:$0 sm:$0xff] }
 0x61b   : > { %v1711_v35 = vpack.c.bf16 %v1707_v30, %v1706_v19  ;;  %8667 = vmatprep.subr.bf16.mxu1 %v9002_v34 }
 0x61d   : > { %8636 = vmatmul.mubr.msk.bf16.gmra.mxu1 %vm939_vm0, %v1711_v35 }
 0x61e   : > { %8668 = vmatpush3.bf16.msra.mxu1 %v9002_v34  ;;  %8679 = vmatprep.mubr.bf16.mxu1 %v1113_v33 }
 0x61f   : > { %8669 = vmatprep.subr.bf16.mxu1 %v9003_v28 }
 0x622   : > { %8670 = vmatpush3.bf16.msra.mxu1 %v9003_v28 }
 0x623   : > { %8671 = vmatprep.subr.bf16.mxu1 %v9004_v36 }
 0x626   : > { %8672 = vmatpush3.bf16.msra.mxu1 %v9004_v36 }
 0x627   : > { %8673 = vmatprep.subr.bf16.mxu1 %v9005_v25 }
 0x62a   : > { %8674 = vmatpush3.bf16.msra.mxu1 %v9005_v25 }
 0x62b   : > { %8675 = vmatprep.subr.bf16.mxu1 %v9006_v41 }
 0x62e   : > { %8676 = vmatpush3.bf16.msra.mxu1 %v9006_v41 }
 0x62f   : > { %8677 = vmatprep.subr.bf16.mxu1 %v9007_v44 }
 0x632   : > { %8678 = vmatpush3.bf16.msra.mxu1 %v9007_v44 }
 0x633   : > { %8711 = vmatprep.subr.bf16.mxu1 %v9008_v37 }
 0x635   : > { %8680 = vmatmul.mubr.bf16.vlgmr.msra.gmra.mxu1 %v1114_v43  ;;  %v9014_v43 = vld [vmem:[%s11802_s1 + $0x188] sm:$0xff]  }
 0x636   : > { %8683 = vmatprep.mubr.bf16.mxu1 %v1115_v39  ;;  %8712 = vmatpush3.bf16.msra.mxu1 %v9008_v37 }
 0x637   : > { %8713 = vmatprep.subr.bf16.mxu1 %v9009_v38 }
 0x63a   : > { %8714 = vmatpush3.bf16.msra.mxu1 %v9009_v38 }
 0x63b   : > { %8715 = vmatprep.subr.bf16.mxu1 %v9010_v50 }
 0x63d   : > { %8684 = vmatmul.mubr.bf16.gmra.mxu1 %v1116_v48  ;;  %v9024_v48 = vld [vmem:[%s11802_s1 + $0xb8] sm:$0xff]  }
 0x63e   : > { %8716 = vmatpush3.bf16.msra.mxu1 %v9010_v50  ;;  %8727 = vmatprep.mubr.bf16.mxu1 %v9490_v7 }
 0x63f   : > { %8717 = vmatprep.subr.bf16.mxu1 %v9011_v51  ;;  %8687 = vmatprep.subr.bf16.mxu0 %v9024_v48 }
 0x642   : > { %8718 = vmatpush3.bf16.msra.mxu1 %v9011_v51 }
 0x643   : > { %8719 = vmatprep.subr.bf16.mxu1 %v9012_v40 }
 0x646   : > { %8720 = vmatpush3.bf16.msra.mxu1 %v9012_v40 }
 0x647   : > { %8721 = vmatprep.subr.bf16.mxu1 %v9013_v42 }
 0x64a   : > { %8722 = vmatpush3.bf16.msra.mxu1 %v9013_v42 }
 0x64b   : > { %8723 = vmatprep.subr.bf16.mxu1 %v9014_v43 }
 0x64e   : > { %8724 = vmatpush3.bf16.msra.mxu1 %v9014_v43 }
 0x64f   : > { %8725 = vmatprep.subr.bf16.mxu1 %v9015_v45 }
 0x652   : > { %8726 = vmatpush3.bf16.msra.mxu1 %v9015_v45 }
 0x655   : > { %8728 = vmatmul.mubr.bf16.vlgmr.msra.gmra.mxu1 %v9528_v22 }
 0x656   : > { %8731 = vmatprep.mubr.bf16.mxu1 %v9533_v24 }
 0x65d   : > { %8732 = vmatmul.mubr.bf16.gmra.mxu1 %v9539_v27 }
 0x6d5   : > { %v8633_v49 = vpop.f32.mrf.mxu1 }
 0x6d7   : > { %v1762_v52 = vpop.f32.mrf.mxu1 }
 0x6d9   : > { %v8634_v53 = vpop.f32.mrf.mxu1 }
 0x6da   : > { %v1794_v56 = vpack.c.bf16 %v8634_v53, %v8633_v49 }
 0x6db   : > { %v1765_v54 = vpop.f32.mrf.mxu1 }
 0x6dc   : > { %v1793_v55 = vpack.c.bf16 %v1765_v54, %v1762_v52 }
 0x6dd   : > { %v8637_v57 = vpop.f32.mrf.mxu1 }
 0x6de   : > { %8655 = vmatprep.mubr.bf16.mxu0 %v1793_v55 }
 0x6df   : > { %v1778_v59 = vpop.f32.mrf.mxu1  ;;  %8656 = vmatmul.mubr.bf16.vlgmr.msra.gmra.mxu0 %v1794_v56 }
 0x6e0   : > { %8688 = vmatpush3.bf16.msra.mxu0 %v9024_v48  ;;  %v7394_v48 = vld [vmem:[%s11803_s2 + $0x2] ss:$0 sm:$0xff] }
 0x6e1   : > { %v8638_v60 = vpop.f32.mrf.mxu1  ;;  %8689 = vmatprep.subr.bf16.mxu0 %v9025_v58 }
 0x6e2   : > { %v1796_v0 = vpack.c.bf16 %v8638_v60, %v8637_v57 }
 0x6e3   : > { %v1781_v62 = vpop.f32.mrf.mxu1 }
 0x6e4   : > { %v1795_v63 = vpack.c.bf16 %v1781_v62, %v1778_v59  ;;  %8690 = vmatpush3.bf16.msra.mxu0 %v9025_v58 }
 0x6e5   : > { %8691 = vmatprep.subr.bf16.mxu0 %v9026_v61 }
 0x6e6   : > { %8659 = vmatprep.mubr.bf16.mxu0 %v1795_v63 }
 0x6e7   : > { %8660 = vmatmul.mubr.bf16.gmra.mxu0 %v1796_v0 }
 0x6e8   : > { %8692 = vmatpush3.bf16.msra.mxu0 %v9026_v61  ;;  %8703 = vmatprep.mubr.bf16.mxu0 %v9490_v7 }
 0x6e9   : > { %8693 = vmatprep.subr.bf16.mxu0 %v9027_v1 }
 0x6ec   : > { %8694 = vmatpush3.bf16.msra.mxu0 %v9027_v1 }
 0x6ed   : > { %8695 = vmatprep.subr.bf16.mxu0 %v9028_v2 }
 0x6f0   : > { %8696 = vmatpush3.bf16.msra.mxu0 %v9028_v2 }
 0x6f1   : > { %8697 = vmatprep.subr.bf16.mxu0 %v9029_v3 }
 0x6f4   : > { %8698 = vmatpush3.bf16.msra.mxu0 %v9029_v3 }
 0x6f5   : > { %8699 = vmatprep.subr.bf16.mxu0 %v9030_v4  ;;  %v9946_v6 = vpop.f32.mrf.mxu1 }
 0x6f7   : > { %v9948_v8 = vpop.f32.mrf.mxu1 }
 0x6f8   : > { %8700 = vmatpush3.bf16.msra.mxu0 %v9030_v4  ;;  %v9032_v4 = vld [vmem:[%s11802_s1 + $0x2b8] sm:$0xff]  }
 0x6f9   : > { %8701 = vmatprep.subr.bf16.mxu0 %v9031_v5  ;;  %v9950_v9 = vpop.f32.mrf.mxu1 }
 0x6fb   : > { %v9954_v10 = vpop.f32.mrf.mxu1 }
 0x6fc   : > { %8702 = vmatpush3.bf16.msra.mxu0 %v9031_v5  ;;  %v9033_v5 = vld [vmem:[%s11802_s1 + $0x2b0] sm:$0xff]  }
 0x6fd   : > { %v9956_v11 = vpop.f32.mrf.mxu1  ;;  %8735 = vmatprep.subr.bf16.mxu0 %v9032_v4 }
 0x6ff   : > { %8704 = vmatmul.mubr.bf16.vlgmr.msra.gmra.mxu0 %v9528_v22  ;;  %v9960_v12 = vpop.f32.mrf.mxu1 }
 0x700   : > { %8707 = vmatprep.mubr.bf16.mxu0 %v9533_v24  ;;  %8736 = vmatpush3.bf16.msra.mxu0 %v9032_v4 }
 0x701   : > { %v9962_v13 = vpop.f32.mrf.mxu1  ;;  %8737 = vmatprep.subr.bf16.mxu0 %v9033_v5 }
 0x703   : > { %v9964_v14 = vpop.f32.mrf.mxu1 }
 0x704   : > { %8738 = vmatpush3.bf16.msra.mxu0 %v9033_v5 }
 0x707   : > { %8708 = vmatmul.mubr.bf16.gmra.mxu0 %v9539_v27 }
 0x708   : > { %8751 = vmatprep.mubr.bf16.mxu0 %v9490_v7 }
 0x715   : > { %v8729_v15 = vpop.f32.mrf.mxu1 }
 0x716   : > { %v2294_v28 = vadd.f32 %v8729_v15, %v7420_v23  ;;  %v9034_v15 = vld [vmem:[%s11802_s1 + $0x2a8] sm:$0xff]  }
 0x717   : > { %v2285_v18 = vpop.f32.mrf.mxu1  ;;  %8739 = vmatprep.subr.bf16.mxu0 %v9034_v15 }
 0x718   : > { %v2286_v25 = vadd.f32 %v7420_v23, %v2285_v18  ;;  %v9035_v18 = vld [vmem:[%s11802_s1 + $0x2a0] sm:$0xff]   ;;  %8740 = vmatpush3.bf16.msra.mxu0 %v9034_v15 }
 0x719   : > { %v8730_v17 = vpop.f32.mrf.mxu1  ;;  %8741 = vmatprep.subr.bf16.mxu0 %v9035_v18 }
 0x71a   : > { %v2297_v33 = vadd.f32 %v8730_v17, %v7420_v23  ;;  %v9036_v17 = vld [vmem:[%s11802_s1 + $0x298] sm:$0xff]  }
 0x71b   : > { %v2288_v21 = vpop.f32.mrf.mxu1 }
 0x71c   : > { %v2459_v36 = vpack.c.bf16 %v2297_v33, %v2294_v28  ;;  %v2289_v41 = vadd.f32 %v7420_v23, %v2288_v21  ;;  %8742 = vmatpush3.bf16.msra.mxu0 %v9035_v18  ;;  %v9037_v21 = vld [vmem:[%s11802_s1 + $0x290] sm:$0xff]  }
 0x71d   : > { %v8733_v26 = vpop.f32.mrf.mxu1  ;;  %8743 = vmatprep.subr.bf16.mxu0 %v9036_v17 }
 0x71e   : > { %v2310_v16 = vadd.f32 %v8733_v26, %v7420_v23  ;;  %v2458_v44 = vpack.c.bf16 %v2289_v41, %v2286_v25  ;;  %v9039_v26 = vld [vmem:[%s11802_s1 + $0x280] sm:$0xff]  }
 0x71f   : > { %v2301_v32 = vpop.f32.mrf.mxu1 }
 0x720   : > { %v2302_v31 = vadd.f32 %v7420_v23, %v2301_v32  ;;  %8744 = vmatpush3.bf16.msra.mxu0 %v9036_v17 }
 0x721   : > { %v8734_v20 = vpop.f32.mrf.mxu1  ;;  %8745 = vmatprep.subr.bf16.mxu0 %v9037_v21 }
 0x722   : > { %v2313_v29 = vadd.f32 %v8734_v20, %v7420_v23 }
 0x723   : > { %v2304_v34 = vpop.f32.mrf.mxu1 }
 0x724   : > { %v2461_v19 = vpack.c.bf16 %v2313_v29, %v2310_v16  ;;  %v2305_v30 = vadd.f32 %v7420_v23, %v2304_v34  ;;  %v9038_v23 = vld [vmem:[%s11802_s1 + $0x288] sm:$0xff]   ;;  %8746 = vmatpush3.bf16.msra.mxu0 %v9037_v21 }
 0x725   : > { %8747 = vmatprep.subr.bf16.mxu0 %v9038_v23 }
 0x726   : > { %8759 = vmatprep.subr.bf16.mxu1 %v2461_v19  ;;  %v2460_v35 = vpack.c.bf16 %v2305_v30, %v2302_v31 }
 0x727   : > { %8760 = vmatpush3.bf16.xpose.msra.mxu1 %v2461_v19 }
 0x728   : > { %8761 = vmatprep.subr.bf16.mxu1 %v2460_v35  ;;  %8748 = vmatpush3.bf16.msra.mxu0 %v9038_v23 }
 0x729   : > { %8749 = vmatprep.subr.bf16.mxu0 %v9039_v26 }
 0x72c   : > { %8750 = vmatpush3.bf16.msra.mxu0 %v9039_v26 }
 0x72f   : > { %8762 = vmatpush3.bf16.xpose.msra.mxu1 %v2460_v35  ;;  %8752 = vmatmul.mubr.bf16.vlgmr.msra.gmra.mxu0 %v9528_v22 }
 0x730   : > { %8763 = vmatprep.subr.bf16.mxu1 %v2459_v36  ;;  %8755 = vmatprep.mubr.bf16.mxu0 %v9533_v24 }
 0x737   : > { %8764 = vmatpush3.bf16.xpose.msra.mxu1 %v2459_v36  ;;  %8756 = vmatmul.mubr.bf16.gmra.mxu0 %v9539_v27 }
 0x738   : > { %8765 = vmatprep.subr.bf16.mxu1 %v2458_v44 }
 0x73f   : > { %8766 = vmatpush3.bf16.xpose.msra.mxu1 %v2458_v44 }
 0x79f   : > { %v9969_v37 = vpop.f32.mrf.mxu0 }
 0x7a1   : > { %v9971_v38 = vpop.f32.mrf.mxu0 }
 0x7a3   : > { %v9973_v39 = vpop.f32.mrf.mxu0 }
 0x7a5   : > { %v9975_v50 = vpop.f32.mrf.mxu0 }
 0x7a7   : > { %v9977_v51 = vpop.f32.mrf.mxu0 }
 0x7a9   : > { %v9979_v40 = vpop.f32.mrf.mxu0 }
 0x7ab   : > { %v9981_v42 = vpop.f32.mrf.mxu0 }
 0x7ad   : > { %v9983_v43 = vpop.f32.mrf.mxu0 }
 0x7bf   : > { %v8705_v45 = vpop.f32.mrf.mxu0 }
 0x7c0   : > { %v2156_v55 = vadd.f32 %v8705_v45, %v7394_v48 }
 0x7c1   : > { %v2147_v46 = vpop.f32.mrf.mxu0 }
 0x7c2   : > { %v2148_v53 = vadd.f32 %v7394_v48, %v2147_v46 }
 0x7c3   : > { %v8706_v47 = vpop.f32.mrf.mxu0 }
 0x7c4   : > { %v2159_v49 = vadd.f32 %v8706_v47, %v7394_v48 }
 0x7c5   : > { %v2150_v52 = vpop.f32.mrf.mxu0 }
 0x7c6   : > { %v2151_v54 = vadd.f32 %v7394_v48, %v2150_v52  ;;  %v2455_v58 = vpack.c.bf16 %v2159_v49, %v2156_v55  ;;  %v7446_v52 = vld [vmem:[%s11803_s2 + $0xa] ss:$0 sm:$0xff] }
 0x7c7   : > { %v8709_v56 = vpop.f32.mrf.mxu0 }
 0x7c8   : > { %v2454_v57 = vpack.c.bf16 %v2151_v54, %v2148_v53  ;;  %v2172_v60 = vadd.f32 %v8709_v56, %v7394_v48 }
 0x7c9   : > { %v2163_v59 = vpop.f32.mrf.mxu0 }
 0x7ca   : > { %8767 = vmatprep.mubr.bf16.mxu1 %v2454_v57  ;;  %v2164_v62 = vadd.f32 %v7394_v48, %v2163_v59 }
 0x7cb   : > { %v8710_v61 = vpop.f32.mrf.mxu0  ;;  %8768 = vmatmul.mubr.bf16.vlgmr.msra.gmra.mxu1 %v2455_v58 }
 0x7cc   : > { %v2175_v63 = vadd.f32 %v8710_v61, %v7394_v48 }
 0x7cd   : > { %v2166_v0 = vpop.f32.mrf.mxu0 }
 0x7ce   : > { %v2167_v1 = vadd.f32 %v7394_v48, %v2166_v0  ;;  %v2457_v2 = vpack.c.bf16 %v2175_v63, %v2172_v60 }
 0x7d0   : > { %v2456_v3 = vpack.c.bf16 %v2167_v1, %v2164_v62 }
 0x7d2   : > { %8771 = vmatprep.mubr.bf16.mxu1 %v2456_v3 }
 0x7d3   : > { %8772 = vmatmul.mubr.bf16.gmra.mxu1 %v2457_v2 }
 0x7ef   : > { %v8753_v46 = vpop.f32.mrf.mxu0 }
 0x7f0   : > { %v2432_v60 = vadd.f32 %v8753_v46, %v7446_v52 }
 0x7f1   : > { %v2423_v47 = vpop.f32.mrf.mxu0 }
 0x7f2   : > { %v2424_v1 = vadd.f32 %v7446_v52, %v2423_v47 }
 0x7f3   : > { %v8754_v48 = vpop.f32.mrf.mxu0 }
 0x7f4   : > { %v2435_v61 = vadd.f32 %v8754_v48, %v7446_v52 }
 0x7f5   : > { %v2426_v49 = vpop.f32.mrf.mxu0 }
 0x7f6   : > { %v2620_v2 = vpack.c.bf16 %v2435_v61, %v2432_v60  ;;  %v2427_v3 = vadd.f32 %v7446_v52, %v2426_v49 }
 0x7f7   : > { %v8757_v53 = vpop.f32.mrf.mxu0 }
 0x7f8   : > { %v2448_v55 = vadd.f32 %v8757_v53, %v7446_v52  ;;  %v2619_v5 = vpack.c.bf16 %v2427_v3, %v2424_v1  ;;  %v9040_v1 = vld [vmem:[%s11804_s3 + $0xb8] sm:$0xff]   ;;  %v9042_v3 = vld [vmem:[%s11804_s3 + $0xa8] sm:$0xff]  }
 0x7f9   : > { %v2439_v54 = vpop.f32.mrf.mxu0  ;;  %8791 = vmatprep.subr.bf16.mxu1 %v9040_v1 }
 0x7fa   : > { %v2440_v57 = vadd.f32 %v7446_v52, %v2439_v54  ;;  %8792 = vmatpush3.bf16.msra.mxu1 %v9040_v1  ;;  %v9063_v1 = vld [vmem:[%s11802_s1 + $0xc0] sm:$0xff]  }
 0x7fb   : > { %v8758_v56 = vpop.f32.mrf.mxu0 }
 0x7fc   : > { %v2451_v58 = vadd.f32 %v8758_v56, %v7446_v52 }
 0x7fd   : > { %v2442_v59 = vpop.f32.mrf.mxu0 }
 0x7fe   : > { %v2622_v62 = vpack.c.bf16 %v2451_v58, %v2448_v55  ;;  %v2443_v63 = vadd.f32 %v7446_v52, %v2442_v59 }
 0x800   : > { %v2621_v0 = vpack.c.bf16 %v2443_v63, %v2440_v57  ;;  %8775 = vmatprep.subr.bf16.mxu0 %v2622_v62 }
 0x801   : > { %8776 = vmatpush3.bf16.msra.mxu0 %v2622_v62 }
 0x802   : > { %8777 = vmatprep.subr.bf16.mxu0 %v2621_v0 }
 0x805   : > { %8778 = vmatpush3.bf16.msra.mxu0 %v2621_v0 }
 0x806   : > { %8779 = vmatprep.subr.bf16.mxu0 %v2620_v2 }
 0x809   : > { %8780 = vmatpush3.bf16.msra.mxu0 %v2620_v2  ;;  %v9041_v2 = vld [vmem:[%s11804_s3 + $0xb0] sm:$0xff]  }
 0x80a   : > { %8781 = vmatprep.subr.bf16.mxu0 %v2619_v5  ;;  %8793 = vmatprep.subr.bf16.mxu1 %v9041_v2 }
 0x80b   : > { %8794 = vmatpush3.bf16.msra.mxu1 %v9041_v2 }
 0x80c   : > { %8795 = vmatprep.subr.bf16.mxu1 %v9042_v3 }
 0x80d   : > { %8782 = vmatpush3.bf16.msra.mxu0 %v2619_v5  ;;  %v9044_v5 = vld [vmem:[%s11804_s3 + $0x98] sm:$0xff]  }
 0x80f   : > { %8796 = vmatpush3.bf16.msra.mxu1 %v9042_v3 }
 0x88b   : > { %v8769_v32 = vpop.f32.mrf.mxu1 }
 0x88c   : > { %v2533_v34 = vsel %vm939_vm0, %v8769_v32, -inf }
 0x88d   : > { %v2496_v16 = vpop.f32.mrf.mxu1 }
 0x88e   : > { %v2527_v20 = vsel %vm939_vm0, %v2496_v16, -inf }
 0x88f   : > { %2528 = vmax.xlane.f32.xlu0 %v2527_v20  ;;  %v10016_v31 = vpop.f32.mrf.mxu1 }
 0x890   : > { %v2536_v28 = vsel %vm939_vm0, %v10016_v31, -inf }
 0x891   : > { %v2499_v29 = vpop.f32.mrf.mxu1 }
 0x892   : > { %v2530_v19 = vsel %vm939_vm0, %v2499_v29, -inf }
 0x893   : > { %2534 = vmax.xlane.f32.xlu0 %v2533_v34  ;;  %2531 = vmax.xlane.f32.xlu1 %v2530_v19  ;;  %v10020_v30 = vpop.f32.mrf.mxu1 }
 0x894   : > { %v2545_v25 = vsel %vm939_vm0, %v10020_v30, -inf }
 0x895   : > { %v2512_v35 = vpop.f32.mrf.mxu1 }
 0x896   : > { %v2539_v33 = vsel %vm939_vm0, %v2512_v35, -inf }
 0x897   : > { %2537 = vmax.xlane.f32.xlu1 %v2536_v28  ;;  %2540 = vmax.xlane.f32.xlu0 %v2539_v33  ;;  %v10025_v36 = vpop.f32.mrf.mxu1 }
 0x898   : > { %v2548_v45 = vsel %vm939_vm0, %v10025_v36, -inf }
 0x899   : > { %v2515_v41 = vpop.f32.mrf.mxu1 }
 0x89a   : > { %v2542_v44 = vsel %vm939_vm0, %v2515_v41, -inf }
 0x89b   : > { %2546 = vmax.xlane.f32.xlu0 %v2545_v25  ;;  %2543 = vmax.xlane.f32.xlu1 %v2542_v44 }
 0x89f   : > { %2549 = vmax.xlane.f32.xlu1 %v2548_v45 }
 0x918   : > { %v2529_v4 = vpop.xlane.xlu0 %2528 }
 0x919   : > { %v2551_v15 = vsub.f32 %v2496_v16, %v2529_v4  ;;  %v9043_v4 = vld [vmem:[%s11804_s3 + $0xa0] sm:$0xff]  }
 0x91a   : > { %8797 = vmatprep.subr.bf16.mxu1 %v9043_v4 }
 0x91b   : > { %v2559_v18 = vmul.f32 1.442695, %v2551_v15  ;;  %8798 = vmatpush3.bf16.msra.mxu1 %v9043_v4  ;;  %v9045_v15 = vld [vmem:[%s11804_s3 + $0x90] sm:$0xff]  }
 0x91c   : > { %v2535_v17 = vpop.xlane.xlu0 %2534  ;;  %v2532_v21 = vpop.xlane.xlu1 %2531  ;;  %8799 = vmatprep.subr.bf16.mxu1 %v9044_v5 }
 0x91d   : > { %9272 = vpow2.f32 %v2559_v18  ;;  %v2553_v23 = vsub.f32 %v8769_v32, %v2535_v17  ;;  %v2552_v26 = vsub.f32 %v2499_v29, %v2532_v21 }
 0x91f   : > { %v2563_v20 = vmul.f32 1.442695, %v2553_v23  ;;  %v2561_v34 = vmul.f32 1.442695, %v2552_v26  ;;  %8800 = vmatpush3.bf16.msra.mxu1 %v9044_v5 }
 0x920   : > { %v2538_v19 = vpop.xlane.xlu1 %2537  ;;  %v2541_v28 = vpop.xlane.xlu0 %2540  ;;  %8801 = vmatprep.subr.bf16.mxu1 %v9045_v15 }
 0x921   : > { %9274 = vpow2.f32 %v2563_v20  ;;  %v2554_v33 = vsub.f32 %v10016_v31, %v2538_v19  ;;  %v2555_v25 = vsub.f32 %v2512_v35, %v2541_v28 }
 0x922   : > { %9276 = vpow2.f32 %v2561_v34 }
 0x923   : > { %v2565_v44 = vmul.f32 1.442695, %v2554_v33  ;;  %v2567_v16 = vmul.f32 1.442695, %v2555_v25  ;;  %8802 = vmatpush3.bf16.msra.mxu1 %v9045_v15 }
 0x924   : > { %v2547_v45 = vpop.xlane.xlu0 %2546  ;;  %v2544_v46 = vpop.xlane.xlu1 %2543 }
 0x925   : > { %9278 = vpow2.f32 %v2565_v44  ;;  %v2557_v47 = vsub.f32 %v10020_v30, %v2547_v45  ;;  %v2556_v48 = vsub.f32 %v2515_v41, %v2544_v46 }
 0x926   : > { %9280 = vpow2.f32 %v2567_v16 }
 0x927   : > { %v2571_v32 = vmul.f32 1.442695, %v2557_v47  ;;  %v2569_v29 = vmul.f32 1.442695, %v2556_v48 }
 0x928   : > { %v2550_v49 = vpop.xlane.xlu1 %2549 }
 0x929   : > { %9282 = vpow2.f32 %v2571_v32  ;;  %v2558_v52 = vsub.f32 %v10025_v36, %v2550_v49 }
 0x92a   : > { %v10038_v53 = vpop.eup %9272  ;;  %9284 = vpow2.f32 %v2569_v29 }
 0x92b   : > { %v2573_v31 = vmul.f32 1.442695, %v2558_v52  ;;  %v2575_v35 = vsel %vm939_vm0, %v10038_v53, 0.0 }
 0x92c   : > { %2576 = vadd.xlane.f32.xlu0 %v2575_v35 }
 0x92d   : > { %9286 = vpow2.f32 %v2573_v31 }
 0x92e   : > { %v10042_v54 = vpop.eup %9274 }
 0x92f   : > { %v9277_v30 = vpop.eup %9276  ;;  %v2581_v41 = vsel %vm939_vm0, %v10042_v54, 0.0 }
 0x930   : > { %2582 = vadd.xlane.f32.xlu0 %v2581_v41  ;;  %v2578_v55 = vsel %vm939_vm0, %v9277_v30, 0.0 }
 0x931   : > { %2579 = vadd.xlane.f32.xlu1 %v2578_v55 }
 0x932   : > { %v9279_v36 = vpop.eup %9278 }
 0x933   : > { %v10047_v56 = vpop.eup %9280  ;;  %v2584_v57 = vsel %vm939_vm0, %v9279_v36, 0.0 }
 0x934   : > { %v2587_v58 = vsel %vm939_vm0, %v10047_v56, 0.0 }
 0x935   : > { %2588 = vadd.xlane.f32.xlu0 %v2587_v58  ;;  %2585 = vadd.xlane.f32.xlu1 %v2584_v57  ;;  %v9056_v58 = vld [vmem:[%s11802_s1 + $0xf8] sm:$0xff]  }
 0x936   : > { %v9283_v59 = vpop.eup %9282  ;;  %8815 = vmatprep.subr.bf16.mxu0 %v9056_v58 }
 0x937   : > { %v9285_v60 = vpop.eup %9284  ;;  %v2593_v61 = vsel %vm939_vm0, %v9283_v59, 0.0 }
 0x938   : > { %v2590_v62 = vsel %vm939_vm0, %v9285_v60, 0.0 }
 0x939   : > { %2594 = vadd.xlane.f32.xlu0 %v2593_v61  ;;  %2591 = vadd.xlane.f32.xlu1 %v2590_v62  ;;  %v9059_v61 = vld [vmem:[%s11802_s1 + $0xe0] sm:$0xff]   ;;  %v9060_v62 = vld [vmem:[%s11802_s1 + $0xd8] sm:$0xff]  }
 0x93a   : > { %v9287_v63 = vpop.eup %9286 }
 0x93b   : > { %v2596_v0 = vsel %vm939_vm0, %v9287_v63, 0.0 }
 0x93d   : > { %2597 = vadd.xlane.f32.xlu1 %v2596_v0  ;;  %v9062_v0 = vld [vmem:[%s11802_s1 + $0xc8] sm:$0xff]  }
 0x9b5   : > { %v2577_v18 = vpop.xlane.xlu0 %2576 }
 0x9b6   : > { %9288 = vrcp.f32 %v2577_v18 }
 0x9b9   : > { %v2583_v17 = vpop.xlane.xlu0 %2582 }
 0x9ba   : > { %v2580_v21 = vpop.xlane.xlu1 %2579 }
 0x9bb   : > { %9290 = vrcp.f32 %v2580_v21  ;;  %v9049_v21 = vld [vmem:[%s11802_s1 + $0x1f0] sm:$0xff]  }
 0x9bc   : > { %9292 = vrcp.f32 %v2583_v17 }
 0x9be   : > { %v2589_v23 = vpop.xlane.xlu0 %2588  ;;  %v2586_v26 = vpop.xlane.xlu1 %2585 }
 0x9bf   : > { %9294 = vrcp.f32 %v2586_v26 }
 0x9c0   : > { %9296 = vrcp.f32 %v2589_v23 }
 0x9c2   : > { %v2595_v20 = vpop.xlane.xlu0 %2594  ;;  %v2592_v34 = vpop.xlane.xlu1 %2591 }
 0x9c3   : > { %9298 = vrcp.f32 %v2592_v34  ;;  %v9289_v19 = vpop.eup %9288 }
 0x9c4   : > { %9300 = vrcp.f32 %v2595_v20  ;;  %v2607_v25 = vmul.f32 %v9289_v19, %v10038_v53  ;;  %v9050_v20 = vld [vmem:[%s11802_s1 + $0x1e8] sm:$0xff]  }
 0x9c6   : > { %v2598_v28 = vpop.xlane.xlu1 %2597 }
 0x9c7   : > { %9302 = vrcp.f32 %v2598_v28 }
 0x9c8   : > { %v9291_v33 = vpop.eup %9290 }
 0x9c9   : > { %v2608_v44 = vmul.f32 %v9291_v33, %v9277_v30  ;;  %v9293_v16 = vpop.eup %9292  ;;  %v9051_v33 = vld [vmem:[%s11802_s1 + $0x1e0] sm:$0xff]  }
 0x9ca   : > { %v2609_v47 = vmul.f32 %v9293_v16, %v10042_v54  ;;  %v9046_v54 = vld [vmem:[%s11804_s3 + $0x88] sm:$0xff]  }
 0x9cb   : > { %v2615_v45 = vpack.c.bf16 %v2608_v44, %v2607_v25  ;;  %8803 = vmatprep.subr.bf16.mxu1 %v9046_v54  ;;  %v9052_v25 = vld [vmem:[%s11802_s1 + $0x1d8] sm:$0xff]   ;;  %v9053_v44 = vld [vmem:[%s11802_s1 + $0x1d0] sm:$0xff]   ;;  %v9054_v16 = vld [vmem:[%s11802_s1 + $0x1c8] sm:$0xff]  }
 0x9cc   : > { %v9295_v46 = vpop.eup %9294  ;;  %8804 = vmatpush3.bf16.msra.mxu1 %v9046_v54 }
 0x9cd   : > { %8783 = vmatprep.mubr.msk.bf16.mxu0 %vm939_vm0, %v2615_v45  ;;  %v2610_v48 = vmul.f32 %v9295_v46, %v9279_v36  ;;  %v9297_v32 = vpop.eup %9296  ;;  %v9047_v36 = vld [vmem:[%s11804_s3 + $0x80] sm:$0xff]  }
 0x9ce   : > { %v2611_v31 = vmul.f32 %v9297_v32, %v10047_v56  ;;  %8805 = vmatprep.subr.bf16.mxu1 %v9047_v36  ;;  %v9048_v56 = vld [vmem:[%s11802_s1 + $0x1f8] sm:$0xff]   ;;  %v10146_v45 = vld [vmem:[%s11803_s2 + $0x3] ss:$0 sm:$0xff] }
 0x9cf   : > { %v2616_v29 = vpack.c.bf16 %v2610_v48, %v2609_v47 }
 0x9d0   : > { %v9299_v49 = vpop.eup %9298  ;;  %8806 = vmatpush3.bf16.msra.mxu1 %v9047_v36  ;;  %v2021_v36 = vadd.f32 %v9950_v9, %v9973_v39  ;;  %v2037_v9 = vadd.f32 %v9962_v13, %v9981_v42 }
 0x9d1   : > { %v9301_v52 = vpop.eup %9300  ;;  %8784 = vmatmul.mubr.msk.bf16.vlgmr.msra.gmra.mxu0 %vm939_vm0, %v2616_v29  ;;  %v2612_v35 = vmul.f32 %v9299_v49, %v9285_v60  ;;  %8839 = vmatprep.subr.bf16.mxu1 %v9048_v56  ;;  %v9058_v60 = vld [vmem:[%s11802_s1 + $0xe8] sm:$0xff]  }
 0x9d2   : > { %v2613_v30 = vmul.f32 %v9301_v52, %v9283_v59  ;;  %8816 = vmatpush3.bf16.msra.mxu0 %v9056_v58  ;;  %v9057_v59 = vld [vmem:[%s11802_s1 + $0xf0] sm:$0xff]  }
 0x9d3   : > { %v2617_v53 = vpack.c.bf16 %v2612_v35, %v2611_v31  ;;  %8817 = vmatprep.subr.bf16.mxu0 %v9057_v59 }
 0x9d4   : > { %v9303_v41 = vpop.eup %9302 }
 0x9d5   : > { %v2614_v55 = vmul.f32 %v9303_v41, %v9287_v63  ;;  %8787 = vmatprep.mubr.msk.bf16.mxu0 %vm939_vm0, %v2617_v53  ;;  %v9061_v63 = vld [vmem:[%s11802_s1 + $0xd0] sm:$0xff]   ;;  %v2018_v53 = vadd.f32 %v9946_v6, %v9969_v37  ;;  %v2034_v6 = vadd.f32 %v9956_v11, %v9977_v51 }
 0x9d6   : > { %8818 = vmatpush3.bf16.msra.mxu0 %v9057_v59 }
 0x9d7   : > { %v2618_v57 = vpack.c.bf16 %v2614_v55, %v2613_v30  ;;  %8819 = vmatprep.subr.bf16.mxu0 %v9058_v60  ;;  %v2010_v55 = vadd.f32 %v9948_v8, %v9971_v38  ;;  %v2026_v8 = vadd.f32 %v9960_v12, %v9979_v40  ;;  %v7526_v12 = vld [vmem:[%s11803_s2 + $0x7] ss:$0 sm:$0xff] }
 0x9d9   : > { %8788 = vmatmul.mubr.msk.bf16.gmra.mxu0 %vm939_vm0, %v2618_v57 }
 0x9da   : > { %8831 = vmatprep.mubr.bf16.mxu0 %v9490_v7  ;;  %8820 = vmatpush3.bf16.msra.mxu0 %v9058_v60 }
 0x9db   : > { %8821 = vmatprep.subr.bf16.mxu0 %v9059_v61 }
 0x9de   : > { %8822 = vmatpush3.bf16.msra.mxu0 %v9059_v61 }
 0x9df   : > { %8823 = vmatprep.subr.bf16.mxu0 %v9060_v62 }
 0x9e2   : > { %8824 = vmatpush3.bf16.msra.mxu0 %v9060_v62 }
 0x9e3   : > { %8825 = vmatprep.subr.bf16.mxu0 %v9061_v63 }
 0x9e6   : > { %8826 = vmatpush3.bf16.msra.mxu0 %v9061_v63 }
 0x9e7   : > { %8827 = vmatprep.subr.bf16.mxu0 %v9062_v0 }
 0x9ea   : > { %8828 = vmatpush3.bf16.msra.mxu0 %v9062_v0 }
 0x9eb   : > { %8829 = vmatprep.subr.bf16.mxu0 %v9063_v1 }
 0x9ee   : > { %8830 = vmatpush3.bf16.msra.mxu0 %v9063_v1 }
 0x9f1   : > { %8832 = vmatmul.mubr.bf16.vlgmr.msra.gmra.mxu0 %v9528_v22 }
 0x9f2   : > { %8835 = vmatprep.mubr.bf16.mxu0 %v9533_v24 }
 0x9f9   : > { %8836 = vmatmul.mubr.bf16.gmra.mxu0 %v9539_v27 }
 0x9fa   : > { %8879 = vmatprep.mubr.bf16.mxu0 %v9490_v7 }
 0xa91   : > { %v8785_v2 = vpop.f32.mrf.mxu0 }
 0xa93   : > { %v2669_v3 = vpop.f32.mrf.mxu0 }
 0xa95   : > { %v8786_v4 = vpop.f32.mrf.mxu0 }
 0xa96   : > { %v2701_v18 = vpack.c.bf16 %v8786_v4, %v8785_v2 }
 0xa97   : > { %v2672_v5 = vpop.f32.mrf.mxu0 }
 0xa98   : > { %v2700_v15 = vpack.c.bf16 %v2672_v5, %v2669_v3 }
 0xa99   : > { %v8789_v17 = vpop.f32.mrf.mxu0 }
 0xa9a   : > { %8807 = vmatprep.mubr.bf16.mxu1 %v2700_v15 }
 0xa9b   : > { %v2685_v23 = vpop.f32.mrf.mxu0  ;;  %8808 = vmatmul.mubr.bf16.vlgmr.msra.gmra.mxu1 %v2701_v18 }
 0xa9c   : > { %8840 = vmatpush3.bf16.msra.mxu1 %v9048_v56 }
 0xa9d   : > { %v8790_v26 = vpop.f32.mrf.mxu0  ;;  %8841 = vmatprep.subr.bf16.mxu1 %v9049_v21 }
 0xa9e   : > { %v2703_v28 = vpack.c.bf16 %v8790_v26, %v8789_v17 }
 0xa9f   : > { %v2688_v34 = vpop.f32.mrf.mxu0 }
 0xaa0   : > { %v2702_v19 = vpack.c.bf16 %v2688_v34, %v2685_v23  ;;  %8842 = vmatpush3.bf16.msra.mxu1 %v9049_v21 }
 0xaa1   : > { %8843 = vmatprep.subr.bf16.mxu1 %v9050_v20 }
 0xaa2   : > { %8811 = vmatprep.mubr.bf16.mxu1 %v2702_v19 }
 0xaa3   : > { %8812 = vmatmul.mubr.bf16.gmra.mxu1 %v2703_v28 }
 0xaa4   : > { %8844 = vmatpush3.bf16.msra.mxu1 %v9050_v20  ;;  %8855 = vmatprep.mubr.bf16.mxu1 %v9490_v7  ;;  %v9055_v7 = vld [vmem:[%s11802_s1 + $0x1c0] sm:$0xff]  }
 0xaa5   : > { %8845 = vmatprep.subr.bf16.mxu1 %v9051_v33 }
 0xaa8   : > { %8846 = vmatpush3.bf16.msra.mxu1 %v9051_v33 }
 0xaa9   : > { %8847 = vmatprep.subr.bf16.mxu1 %v9052_v25 }
 0xaac   : > { %8848 = vmatpush3.bf16.msra.mxu1 %v9052_v25 }
 0xaad   : > { %8849 = vmatprep.subr.bf16.mxu1 %v9053_v44 }
 0xab0   : > { %8850 = vmatpush3.bf16.msra.mxu1 %v9053_v44 }
 0xab1   : > { %8851 = vmatprep.subr.bf16.mxu1 %v9054_v16  ;;  %v8833_v46 = vpop.f32.mrf.mxu0 }
 0xab2   : > { %v10149_v47 = vadd.f32 %v8833_v46, %v10146_v45 }
 0xab3   : > { %v2949_v48 = vpop.f32.mrf.mxu0 }
 0xab4   : > { %8852 = vmatpush3.bf16.msra.mxu1 %v9054_v16  ;;  %v2950_v29 = vadd.f32 %v10146_v45, %v2949_v48 }
 0xab5   : > { %8853 = vmatprep.subr.bf16.mxu1 %v9055_v7  ;;  %v8834_v32 = vpop.f32.mrf.mxu0 }
 0xab6   : > { %v10153_v49 = vadd.f32 %v8834_v32, %v10146_v45 }
 0xab7   : > { %v2952_v52 = vpop.f32.mrf.mxu0 }
 0xab8   : > { %8854 = vmatpush3.bf16.msra.mxu1 %v9055_v7  ;;  %v3257_v31 = vpack.c.bf16 %v10153_v49, %v10149_v47  ;;  %v2953_v35 = vadd.f32 %v10146_v45, %v2952_v52  ;;  %v9064_v49 = vld [vmem:[%s11802_s1 + $0x2f8] sm:$0xff]   ;;  %v9065_v52 = vld [vmem:[%s11802_s1 + $0x2f0] sm:$0xff]  }
 0xab9   : > { %v8837_v34 = vpop.f32.mrf.mxu0  ;;  %8863 = vmatprep.subr.bf16.mxu0 %v9064_v49 }
 0xaba   : > { %v3256_v41 = vpack.c.bf16 %v2953_v35, %v2950_v29  ;;  %v2974_v48 = vadd.f32 %v8837_v34, %v10146_v45  ;;  %8864 = vmatpush3.bf16.msra.mxu0 %v9064_v49  ;;  %v9066_v35 = vld [vmem:[%s11802_s1 + $0x2e8] sm:$0xff]  }
 0xabb   : > { %8856 = vmatmul.mubr.bf16.vlgmr.msra.gmra.mxu1 %v9528_v22  ;;  %v2965_v33 = vpop.f32.mrf.mxu0  ;;  %8865 = vmatprep.subr.bf16.mxu0 %v9065_v52 }
 0xabc   : > { %8859 = vmatprep.mubr.bf16.mxu1 %v9533_v24  ;;  %v2966_v7 = vadd.f32 %v10146_v45, %v2965_v33 }
 0xabd   : > { %v8838_v44 = vpop.f32.mrf.mxu0 }
 0xabe   : > { %v2977_v32 = vadd.f32 %v8838_v44, %v10146_v45  ;;  %8866 = vmatpush3.bf16.msra.mxu0 %v9065_v52 }
 0xabf   : > { %v2968_v16 = vpop.f32.mrf.mxu0  ;;  %8867 = vmatprep.subr.bf16.mxu0 %v9066_v35 }
 0xac0   : > { %v2969_v46 = vadd.f32 %v10146_v45, %v2968_v16  ;;  %v3259_v29 = vpack.c.bf16 %v2977_v32, %v2974_v48  ;;  %v9067_v45 = vld [vmem:[%s11802_s1 + $0x2e0] sm:$0xff]  }
 0xac2   : > { %v3258_v47 = vpack.c.bf16 %v2969_v46, %v2966_v7  ;;  %8868 = vmatpush3.bf16.msra.mxu0 %v9066_v35 }
 0xac3   : > { %8860 = vmatmul.mubr.bf16.gmra.mxu1 %v9539_v27  ;;  %8869 = vmatprep.subr.bf16.mxu0 %v9067_v45 }
 0xac4   : > { %8895 = vmatprep.mubr.bf16.mxu1 %v3256_v41  ;;  %v9069_v41 = vld [vmem:[%s11802_s1 + $0x2d0] sm:$0xff]  }
 0xac6   : > { %8870 = vmatpush3.bf16.msra.mxu0 %v9067_v45 }
 0xb5b   : > { %v8809_v30 = vpop.f32.mrf.mxu1 }
 0xb5c   : > { %v10162_v57 = vadd.f32 %v8809_v30, %v2018_v53  ;;  %v9070_v53 = vld [vmem:[%s11802_s1 + $0x2c8] sm:$0xff]   ;;  %v9071_v30 = vld [vmem:[%s11802_s1 + $0x2c0] sm:$0xff]  }
 0xb5d   : > { %v2803_v54 = vpop.f32.mrf.mxu1 }
 0xb5e   : > { %v10166_v56 = vadd.f32 %v2803_v54, %v2010_v55 }
 0xb5f   : > { %v8810_v58 = vpop.f32.mrf.mxu1 }
 0xb60   : > { %v10168_v59 = vadd.f32 %v8810_v58, %v2021_v36 }
 0xb61   : > { %v10170_v60 = vpop.f32.mrf.mxu1 }
 0xb63   : > { %v8813_v37 = vpop.f32.mrf.mxu1 }
 0xb64   : > { %v10176_v38 = vadd.f32 %v8813_v37, %v2034_v6 }
 0xb65   : > { %v2819_v61 = vpop.f32.mrf.mxu1 }
 0xb66   : > { %v10180_v39 = vadd.f32 %v2819_v61, %v2026_v8 }
 0xb67   : > { %v8814_v62 = vpop.f32.mrf.mxu1 }
 0xb68   : > { %v10182_v63 = vadd.f32 %v8814_v62, %v2037_v9 }
 0xb69   : > { %v10184_v0 = vpop.f32.mrf.mxu1 }
 0xb7b   : > { %v8857_v1 = vpop.f32.mrf.mxu1 }
 0xb7c   : > { %v3096_v26 = vadd.f32 %v8857_v1, %v7526_v12 }
 0xb7d   : > { %v3087_v2 = vpop.f32.mrf.mxu1 }
 0xb7e   : > { %v3088_v28 = vadd.f32 %v7526_v12, %v3087_v2 }
 0xb7f   : > { %v8858_v11 = vpop.f32.mrf.mxu1 }
 0xb80   : > { %v3099_v23 = vadd.f32 %v8858_v11, %v7526_v12 }
 0xb81   : > { %v3090_v51 = vpop.f32.mrf.mxu1 }
 0xb82   : > { %v3261_v20 = vpack.c.bf16 %v3099_v23, %v3096_v26  ;;  %v3091_v19 = vadd.f32 %v7526_v12, %v3090_v51 }
 0xb83   : > { %v8861_v3 = vpop.f32.mrf.mxu1 }
 0xb84   : > { %v3112_v5 = vadd.f32 %v8861_v3, %v7526_v12  ;;  %v3260_v25 = vpack.c.bf16 %v3091_v19, %v3088_v28 }
 0xb85   : > { %v3103_v4 = vpop.f32.mrf.mxu1 }
 0xb86   : > { %v3104_v15 = vadd.f32 %v7526_v12, %v3103_v4 }
 0xb87   : > { %v8862_v40 = vpop.f32.mrf.mxu1 }
 0xb88   : > { %v3115_v13 = vadd.f32 %v8862_v40, %v7526_v12  ;;  %v7552_v40 = vld [vmem:[%s11803_s2 + $0xb] ss:$0 sm:$0xff] }
 0xb89   : > { %v3106_v42 = vpop.f32.mrf.mxu1 }
 0xb8a   : > { %v3263_v18 = vpack.c.bf16 %v3115_v13, %v3112_v5  ;;  %v3107_v17 = vadd.f32 %v7526_v12, %v3106_v42 }
 0xb8c   : > { %v3262_v21 = vpack.c.bf16 %v3107_v17, %v3104_v15  ;;  %8887 = vmatprep.subr.bf16.mxu1 %v3263_v18 }
 0xb8d   : > { %8888 = vmatpush3.bf16.xpose.msra.mxu1 %v3263_v18 }
 0xb8e   : > { %8889 = vmatprep.subr.bf16.mxu1 %v3262_v21 }
 0xb95   : > { %8890 = vmatpush3.bf16.xpose.msra.mxu1 %v3262_v21 }
 0xb96   : > { %8891 = vmatprep.subr.bf16.mxu1 %v3261_v20 }
 0xb9d   : > { %8892 = vmatpush3.bf16.xpose.msra.mxu1 %v3261_v20 }
 0xb9e   : > { %8893 = vmatprep.subr.bf16.mxu1 %v3260_v25 }
 0xba5   : > { %8894 = vmatpush3.bf16.xpose.msra.mxu1 %v3260_v25 }
 0xbac   : > { %8896 = vmatmul.mubr.bf16.vlgmr.msra.gmra.mxu1 %v3257_v31  ;;  %v9068_v31 = vld [vmem:[%s11802_s1 + $0x2d8] sm:$0xff]  }
 0xbad   : > { %8899 = vmatprep.mubr.bf16.mxu1 %v3258_v47  ;;  %8871 = vmatprep.subr.bf16.mxu0 %v9068_v31 }
 0xbae   : > { %8872 = vmatpush3.bf16.msra.mxu0 %v9068_v31 }
 0xbaf   : > { %8873 = vmatprep.subr.bf16.mxu0 %v9069_v41 }
 0xbb2   : > { %8874 = vmatpush3.bf16.msra.mxu0 %v9069_v41 }
 0xbb3   : > { %8875 = vmatprep.subr.bf16.mxu0 %v9070_v53 }
 0xbb4   : > { %8900 = vmatmul.mubr.bf16.gmra.mxu1 %v3259_v29 }
 0xbb6   : > { %8876 = vmatpush3.bf16.msra.mxu0 %v9070_v53 }
 0xbb7   : > { %8877 = vmatprep.subr.bf16.mxu0 %v9071_v30 }
 0xbba   : > { %8878 = vmatpush3.bf16.msra.mxu0 %v9071_v30 }
 0xbbd   : > { %8880 = vmatmul.mubr.bf16.vlgmr.msra.gmra.mxu0 %v9528_v22 }
 0xbbe   : > { %8883 = vmatprep.mubr.bf16.mxu0 %v9533_v24 }
 0xbc5   : > { %8884 = vmatmul.mubr.bf16.gmra.mxu0 %v9539_v27 }
 0xc6c   : > { %v8897_v55 = vpop.f32.mrf.mxu1 }
 0xc6d   : > { %v3335_v37 = vsel %vm939_vm0, %v8897_v55, -inf }
 0xc6e   : > { %v3298_v54 = vpop.f32.mrf.mxu1 }
 0xc6f   : > { %v3329_v36 = vsel %vm939_vm0, %v3298_v54, -inf }
 0xc70   : > { %3330 = vmax.xlane.f32.xlu0 %v3329_v36  ;;  %v10221_v58 = vpop.f32.mrf.mxu1 }
 0xc71   : > { %v3338_v24 = vsel %vm939_vm0, %v10221_v58, -inf }
 0xc72   : > { %v3301_v6 = vpop.f32.mrf.mxu1 }
 0xc73   : > { %v3332_v8 = vsel %vm939_vm0, %v3301_v6, -inf }
 0xc74   : > { %3336 = vmax.xlane.f32.xlu0 %v3335_v37  ;;  %3333 = vmax.xlane.f32.xlu1 %v3332_v8  ;;  %v10225_v61 = vpop.f32.mrf.mxu1 }
 0xc75   : > { %v3347_v1 = vsel %vm939_vm0, %v10225_v61, -inf }
 0xc76   : > { %v3314_v22 = vpop.f32.mrf.mxu1 }
 0xc77   : > { %v3341_v27 = vsel %vm939_vm0, %v3314_v22, -inf }
 0xc78   : > { %3339 = vmax.xlane.f32.xlu1 %v3338_v24  ;;  %3342 = vmax.xlane.f32.xlu0 %v3341_v27  ;;  %v10230_v9 = vpop.f32.mrf.mxu1 }
 0xc79   : > { %v3350_v11 = vsel %vm939_vm0, %v10230_v9, -inf }
 0xc7a   : > { %v3317_v62 = vpop.f32.mrf.mxu1 }
 0xc7b   : > { %v3344_v2 = vsel %vm939_vm0, %v3317_v62, -inf }
 0xc7c   : > { %3348 = vmax.xlane.f32.xlu0 %v3347_v1  ;;  %3345 = vmax.xlane.f32.xlu1 %v3344_v2 }
 0xc7d   : > { %v8881_v51 = vpop.f32.mrf.mxu0 }
 0xc7e   : > { %v3234_v23 = vadd.f32 %v8881_v51, %v7552_v40 }
 0xc7f   : > { %v3225_v3 = vpop.f32.mrf.mxu0 }
 0xc80   : > { %3351 = vmax.xlane.f32.xlu1 %v3350_v11  ;;  %v3226_v28 = vadd.f32 %v7552_v40, %v3225_v3 }
 0xc81   : > { %v8882_v4 = vpop.f32.mrf.mxu0 }
 0xc82   : > { %v3237_v26 = vadd.f32 %v8882_v4, %v7552_v40 }
 0xc83   : > { %v3228_v12 = vpop.f32.mrf.mxu0 }
 0xc84   : > { %v3422_v33 = vpack.c.bf16 %v3237_v26, %v3234_v23  ;;  %v3229_v25 = vadd.f32 %v7552_v40, %v3228_v12 }
 0xc85   : > { %v8885_v5 = vpop.f32.mrf.mxu0 }
 0xc86   : > { %v3250_v42 = vadd.f32 %v8885_v5, %v7552_v40  ;;  %v3421_v16 = vpack.c.bf16 %v3229_v25, %v3226_v28 }
 0xc87   : > { %v3241_v13 = vpop.f32.mrf.mxu0 }
 0xc88   : > { %v3242_v18 = vadd.f32 %v7552_v40, %v3241_v13 }
 0xc89   : > { %v8886_v15 = vpop.f32.mrf.mxu0 }
 0xc8a   : > { %v3253_v17 = vadd.f32 %v8886_v15, %v7552_v40 }
 0xc8b   : > { %v3244_v21 = vpop.f32.mrf.mxu0 }
 0xc8c   : > { %v3424_v20 = vpack.c.bf16 %v3253_v17, %v3250_v42  ;;  %v3245_v34 = vadd.f32 %v7552_v40, %v3244_v21 }
 0xc8e   : > { %v3423_v19 = vpack.c.bf16 %v3245_v34, %v3242_v18  ;;  %8903 = vmatprep.subr.bf16.mxu0 %v3424_v20  ;;  %v9072_v18 = vld [vmem:[%s11804_s3 + $0xf8] sm:$0xff]  }
 0xc8f   : > { %8904 = vmatpush3.bf16.msra.mxu0 %v3424_v20 }
 0xc90   : > { %8905 = vmatprep.subr.bf16.mxu0 %v3423_v19 }
 0xc93   : > { %8906 = vmatpush3.bf16.msra.mxu0 %v3423_v19 }
 0xc94   : > { %8907 = vmatprep.subr.bf16.mxu0 %v3422_v33 }
 0xc97   : > { %8908 = vmatpush3.bf16.msra.mxu0 %v3422_v33 }
 0xc98   : > { %8909 = vmatprep.subr.bf16.mxu0 %v3421_v16 }
 0xc9b   : > { %8910 = vmatpush3.bf16.msra.mxu0 %v3421_v16 }
 0xc9c   : > { %8919 = vmatprep.subr.bf16.mxu0 %v9072_v18 }
 0xcf9   : > { %v3331_v44 = vpop.xlane.xlu0 %3330 }
 0xcfa   : > { %v3353_v7 = vsub.f32 %v3298_v54, %v3331_v44 }
 0xcfc   : > { %v3361_v46 = vmul.f32 1.442695, %v3353_v7 }
 0xcfd   : > { %v3337_v47 = vpop.xlane.xlu0 %3336  ;;  %v3334_v48 = vpop.xlane.xlu1 %3333 }
 0xcfe   : > { %9304 = vpow2.f32 %v3361_v46  ;;  %v3355_v32 = vsub.f32 %v8897_v55, %v3337_v47  ;;  %v3354_v29 = vsub.f32 %v3301_v6, %v3334_v48 }
 0xd00   : > { %v3365_v49 = vmul.f32 1.442695, %v3355_v32  ;;  %v3363_v52 = vmul.f32 1.442695, %v3354_v29 }
 0xd01   : > { %v3340_v35 = vpop.xlane.xlu1 %3339  ;;  %v3343_v45 = vpop.xlane.xlu0 %3342 }
 0xd02   : > { %9306 = vpow2.f32 %v3365_v49  ;;  %v3356_v31 = vsub.f32 %v10221_v58, %v3340_v35  ;;  %v3357_v41 = vsub.f32 %v3314_v22, %v3343_v45 }
 0xd03   : > { %9308 = vpow2.f32 %v3363_v52  ;;  %v9073_v52 = vld [vmem:[%s11804_s3 + $0xf0] sm:$0xff]  }
 0xd04   : > { %v3367_v53 = vmul.f32 1.442695, %v3356_v31  ;;  %v3369_v30 = vmul.f32 1.442695, %v3357_v41 }
 0xd05   : > { %v3349_v54 = vpop.xlane.xlu0 %3348  ;;  %v3346_v36 = vpop.xlane.xlu1 %3345 }
 0xd06   : > { %9310 = vpow2.f32 %v3367_v53  ;;  %v3359_v37 = vsub.f32 %v10225_v61, %v3349_v54  ;;  %v3358_v8 = vsub.f32 %v3317_v62, %v3346_v36  ;;  %v9074_v54 = vld [vmem:[%s11804_s3 + $0xe8] sm:$0xff]  }
 0xd07   : > { %9312 = vpow2.f32 %v3369_v30 }
 0xd08   : > { %v3373_v55 = vmul.f32 1.442695, %v3359_v37  ;;  %v3371_v6 = vmul.f32 1.442695, %v3358_v8 }
 0xd09   : > { %v3352_v24 = vpop.xlane.xlu1 %3351 }
 0xd0a   : > { %9314 = vpow2.f32 %v3373_v55  ;;  %v3360_v27 = vsub.f32 %v10230_v9, %v3352_v24  ;;  %v9075_v55 = vld [vmem:[%s11804_s3 + $0xe0] sm:$0xff]   ;;  %v9077_v24 = vld [vmem:[%s11804_s3 + $0xd0] sm:$0xff]  }
 0xd0b   : > { %v9305_v1 = vpop.eup %9304  ;;  %9316 = vpow2.f32 %v3371_v6  ;;  %v9076_v6 = vld [vmem:[%s11804_s3 + $0xd8] sm:$0xff]  }
 0xd0c   : > { %v3375_v58 = vmul.f32 1.442695, %v3360_v27  ;;  %v3377_v22 = vsel %vm939_vm0, %v9305_v1, 0.0  ;;  %v9078_v27 = vld [vmem:[%s11804_s3 + $0xc8] sm:$0xff]  }
 0xd0d   : > { %3378 = vadd.xlane.f32.xlu0 %v3377_v22 }
 0xd0e   : > { %9318 = vpow2.f32 %v3375_v58 }
 0xd0f   : > { %v9307_v2 = vpop.eup %9306 }
 0xd10   : > { %v9309_v11 = vpop.eup %9308  ;;  %v3383_v51 = vsel %vm939_vm0, %v9307_v2, 0.0 }
 0xd11   : > { %3384 = vadd.xlane.f32.xlu0 %v3383_v51  ;;  %v3380_v61 = vsel %vm939_vm0, %v9309_v11, 0.0 }
 0xd12   : > { %3381 = vadd.xlane.f32.xlu1 %v3380_v61 }
 0xd13   : > { %v9311_v62 = vpop.eup %9310 }
 0xd14   : > { %v9313_v3 = vpop.eup %9312  ;;  %v3386_v4 = vsel %vm939_vm0, %v9311_v62, 0.0 }
 0xd15   : > { %v3389_v9 = vsel %vm939_vm0, %v9313_v3, 0.0 }
 0xd16   : > { %3390 = vadd.xlane.f32.xlu0 %v3389_v9  ;;  %3387 = vadd.xlane.f32.xlu1 %v3386_v4 }
 0xd17   : > { %v9315_v12 = vpop.eup %9314 }
 0xd18   : > { %v9317_v40 = vpop.eup %9316  ;;  %v3395_v5 = vsel %vm939_vm0, %v9315_v12, 0.0 }
 0xd19   : > { %v3392_v13 = vsel %vm939_vm0, %v9317_v40, 0.0 }
 0xd1a   : > { %3396 = vadd.xlane.f32.xlu0 %v3395_v5  ;;  %3393 = vadd.xlane.f32.xlu1 %v3392_v13 }
 0xd1b   : > { %v9319_v42 = vpop.eup %9318 }
 0xd1c   : > { %v3398_v15 = vsel %vm939_vm0, %v9319_v42, 0.0 }
 0xd1e   : > { %3399 = vadd.xlane.f32.xlu1 %v3398_v15 }
 0xd96   : > { %v3379_v17 = vpop.xlane.xlu0 %3378 }
 0xd97   : > { %9320 = vrcp.f32 %v3379_v17 }
 0xd9a   : > { %v3385_v21 = vpop.xlane.xlu0 %3384 }
 0xd9b   : > { %v3382_v23 = vpop.xlane.xlu1 %3381 }
 0xd9c   : > { %9322 = vrcp.f32 %v3382_v23 }
 0xd9d   : > { %9324 = vrcp.f32 %v3385_v21 }
 0xd9f   : > { %v3391_v26 = vpop.xlane.xlu0 %3390  ;;  %v3388_v20 = vpop.xlane.xlu1 %3387 }
 0xda0   : > { %9326 = vrcp.f32 %v3388_v20 }
 0xda1   : > { %9328 = vrcp.f32 %v3391_v26 }
 0xda3   : > { %v3397_v34 = vpop.xlane.xlu0 %3396  ;;  %v3394_v19 = vpop.xlane.xlu1 %3393 }
 0xda4   : > { %9330 = vrcp.f32 %v3394_v19  ;;  %v9321_v28 = vpop.eup %9320  ;;  %v9368_v19 = vld [vmem:[%s9480_s19] sm:$0xff] }
 0xda5   : > { %9332 = vrcp.f32 %v3397_v34  ;;  %v3409_v44 = vmul.f32 %v9321_v28, %v9305_v1  ;;  %v9079_v1 = vld [vmem:[%s11804_s3 + $0xc0] sm:$0xff]  }
 0xda7   : > { %v3400_v33 = vpop.xlane.xlu1 %3399 }
 0xda8   : > { %9334 = vrcp.f32 %v3400_v33 }
 0xda9   : > { %v9323_v25 = vpop.eup %9322 }
 0xdaa   : > { %v3410_v16 = vmul.f32 %v9323_v25, %v9309_v11  ;;  %v9325_v7 = vpop.eup %9324 }
 0xdab   : > { %v3411_v48 = vmul.f32 %v9325_v7, %v9307_v2 }
 0xdac   : > { %v3417_v46 = vpack.c.bf16 %v3410_v16, %v3409_v44  ;;  %v9369_v44 = vld [vmem:[%s9480_s19 + $0x8] sm:$0xff] }
 0xdad   : > { %v9327_v47 = vpop.eup %9326 }
 0xdae   : > { %8911 = vmatprep.mubr.msk.bf16.mxu0 %vm939_vm0, %v3417_v46  ;;  %v3412_v32 = vmul.f32 %v9327_v47, %v9311_v62  ;;  %v9329_v29 = vpop.eup %9328  ;;  %v2029_v46 = vadd.f32 %v9964_v14, %v9983_v43  ;;  %v9371_v43 = vld [vmem:[%s9480_s19 + $0x18] sm:$0xff] }
 0xdaf   : > { %v3413_v31 = vmul.f32 %v9329_v29, %v9313_v3 }
 0xdb0   : > { %v3418_v49 = vpack.c.bf16 %v3412_v32, %v3411_v48  ;;  %v9370_v48 = vld [vmem:[%s9480_s19 + $0x10] sm:$0xff] }
 0xdb1   : > { %v9331_v35 = vpop.eup %9330 }
 0xdb2   : > { %v9333_v45 = vpop.eup %9332  ;;  %8912 = vmatmul.mubr.msk.bf16.vlgmr.msra.gmra.mxu0 %vm939_vm0, %v3418_v49  ;;  %v3414_v41 = vmul.f32 %v9331_v35, %v9317_v40  ;;  %v2839_v49 = vadd.f32 %v10184_v0, %v2029_v46  ;;  %v3917_v0 = vld [vmem:[%s11808_s7 + $0x380] sm:$0xff] }
 0xdb3   : > { %8920 = vmatpush3.bf16.msra.mxu0 %v9072_v18  ;;  %v3415_v36 = vmul.f32 %v9333_v45, %v9315_v12  ;;  %v10285_v18 = vld [vmem:[%s11805_s4] ss:$0 sm:$0xff] }
 0xdb4   : > { %v3419_v30 = vpack.c.bf16 %v3414_v41, %v3413_v31  ;;  %8921 = vmatprep.subr.bf16.mxu0 %v9073_v52  ;;  %v3925_v31 = vld [vmem:[%s11808_s7 + $0x3c0] sm:$0xff] }
 0xdb5   : > { %v9335_v53 = vpop.eup %9334  ;;  %v9372_v41 = vld [vmem:[%s9480_s19 + $0x20] sm:$0xff] }
 0xdb6   : > { %v3416_v37 = vmul.f32 %v9335_v53, %v9319_v42  ;;  %8915 = vmatprep.mubr.msk.bf16.mxu0 %vm939_vm0, %v3419_v30  ;;  %v2013_v42 = vadd.f32 %v9954_v10, %v9975_v50  ;;  %v7704_v30 = vcombine.low %v3917_v0, %v3925_v31  ;;  %v3861_v46 = vld [vmem:[%s11808_s7 + $0x1c0] sm:$0xff] }
 0xdb7   : > { %8922 = vmatpush3.bf16.msra.mxu0 %v9073_v52 }
 0xdb8   : > { %v3420_v8 = vpack.c.bf16 %v3416_v37, %v3415_v36  ;;  %8923 = vmatprep.subr.bf16.mxu0 %v9074_v54  ;;  %v2835_v21 = vadd.f32 %v10170_v60, %v2013_v42  ;;  %v3926_v36 = vld [vmem:[%s11808_s7 + $0x3c8] sm:$0xff] }
 0xdba   : > { %8916 = vmatmul.mubr.msk.bf16.gmra.mxu0 %vm939_vm0, %v3420_v8 }
 0xdbb   : > { %8924 = vmatpush3.bf16.msra.mxu0 %v9074_v54  ;;  %v7705_v54 = vcombine.high %v3917_v0, %v3925_v31  ;;  %v3846_v31 = vld [vmem:[%s11808_s7 + $0x148] sm:$0xff] }
 0xdbc   : > { %8925 = vmatprep.subr.bf16.mxu0 %v9075_v55 }
 0xdbd   : > { %4657 = vmatprep.subr.bf16.mxu1 %v7705_v54 }
 0xdbe   : > { %4658 = vmatpush1.bf16.msra.mxu1 %v7704_v30 }
 0xdbf   : > { %8926 = vmatpush3.bf16.msra.mxu0 %v9075_v55 }
 0xdc0   : > { %8927 = vmatprep.subr.bf16.mxu0 %v9076_v6 }
 0xdc3   : > { %8928 = vmatpush3.bf16.msra.mxu0 %v9076_v6 }
 0xdc4   : > { %8929 = vmatprep.subr.bf16.mxu0 %v9077_v24 }
 0xdc7   : > { %8930 = vmatpush3.bf16.msra.mxu0 %v9077_v24 }
 0xdc8   : > { %8931 = vmatprep.subr.bf16.mxu0 %v9078_v27 }
 0xdcb   : > { %8932 = vmatpush3.bf16.msra.mxu0 %v9078_v27  ;;  %v3901_v27 = vld [vmem:[%s11808_s7 + $0x300] sm:$0xff] }
 0xdcc   : > { %8933 = vmatprep.subr.bf16.mxu0 %v9079_v1 }
 0xdcf   : > { %8934 = vmatpush3.bf16.msra.mxu0 %v9079_v1  ;;  %v3909_v1 = vld [vmem:[%s11808_s7 + $0x340] sm:$0xff] }
 0xe72   : > { %v8913_v58 = vpop.f32.mrf.mxu0 }
 0xe74   : > { %v3471_v22 = vpop.f32.mrf.mxu0 }
 0xe76   : > { %v8914_v2 = vpop.f32.mrf.mxu0 }
 0xe77   : > { %v3503_v61 = vpack.c.bf16 %v8914_v2, %v8913_v58  ;;  %v3902_v58 = vld [vmem:[%s11808_s7 + $0x308] sm:$0xff] }
 0xe78   : > { %v3474_v11 = vpop.f32.mrf.mxu0 }
 0xe79   : > { %v3502_v51 = vpack.c.bf16 %v3474_v11, %v3471_v22  ;;  %v7689_v11 = vcombine.high %v3901_v27, %v3909_v1 }
 0xe7a   : > { %v8917_v62 = vpop.f32.mrf.mxu0 }
 0xe7b   : > { %8935 = vmatprep.mubr.bf16.mxu0 %v3502_v51  ;;  %v3910_v51 = vld [vmem:[%s11808_s7 + $0x348] sm:$0xff]  ;;  %4659 = vmatprep.subr.bf16.mxu1 %v7689_v11 }
 0xe7c   : > { %v3487_v3 = vpop.f32.mrf.mxu0  ;;  %8936 = vmatmul.mubr.bf16.vlgmr.msra.gmra.mxu0 %v3503_v61  ;;  %v9373_v61 = vld [vmem:[%s9480_s19 + $0x28] sm:$0xff] }
 0xe7d   : > { %v3814_v11 = vld [vmem:[%s11808_s7 + $0x48] sm:$0xff] }
 0xe7e   : > { %v8918_v4 = vpop.f32.mrf.mxu0 }
 0xe7f   : > { %v3505_v40 = vpack.c.bf16 %v8918_v4, %v8917_v62  ;;  %v7690_v4 = vcombine.low %v3902_v58, %v3910_v51 }
 0xe80   : > { %v3490_v9 = vpop.f32.mrf.mxu0 }
 0xe81   : > { %v3504_v12 = vpack.c.bf16 %v3490_v9, %v3487_v3  ;;  %v7688_v3 = vcombine.low %v3901_v27, %v3909_v1  ;;  %v7691_v9 = vcombine.high %v3902_v58, %v3910_v51  ;;  %v3805_v1 = vld [vmem:[%s11808_s7] sm:$0xff] }
 0xe82   : > { %v3813_v58 = vld [vmem:[%s11808_s7 + $0x40] sm:$0xff] }
 0xe83   : > { %8939 = vmatprep.mubr.bf16.mxu0 %v3504_v12  ;;  %v3893_v12 = vld [vmem:[%s11808_s7 + $0x2c0] sm:$0xff]  ;;  %4660 = vmatpush1.bf16.msra.mxu1 %v7688_v3  ;;  %v7592_v51 = vcombine.low %v3805_v1, %v3813_v58 }
 0xe84   : > { %8940 = vmatmul.mubr.bf16.gmra.mxu0 %v3505_v40  ;;  %v3886_v40 = vld [vmem:[%s11808_s7 + $0x288] sm:$0xff] }
 0xf3c   : > { %v8937_v5 = vpop.f32.mrf.mxu0 }
 0xf3d   : > { %v3638_v20 = vadd.f32 %v8937_v5, %v10162_v57 }
 0xf3e   : > { %v3605_v13 = vpop.f32.mrf.mxu0 }
 0xf3f   : > { %v3636_v15 = vadd.f32 %v3605_v13, %v10166_v56  ;;  %v3653_v33 = vadd.f32 %v10285_v18, %v3638_v20  ;;  %v9374_v13 = vld [vmem:[%s9480_s19 + $0x30] sm:$0xff] }
 0xf40   : > { %v8938_v17 = vpop.f32.mrf.mxu0 }
 0xf41   : > { %v3651_v23 = vadd.f32 %v10285_v18, %v3636_v15  ;;  %v3639_v60 = vadd.f32 %v8938_v17, %v10168_v59  ;;  %v10308_v59 = vadd.f32 %v9370_v48, %v3653_v33  ;;  %v3894_v17 = vld [vmem:[%s11808_s7 + $0x2c8] sm:$0xff]  ;;  %v9375_v33 = vld [vmem:[%s9480_s19 + $0x38] sm:$0xff] }
 0xf42   : > { %v3608_v26 = vpop.f32.mrf.mxu0  ;;  %v7675_v20 = vcombine.high %v3886_v40, %v3894_v17 }
 0xf43   : > { %v3637_v34 = vadd.f32 %v3608_v26, %v2835_v21  ;;  %v10291_v28 = vadd.f32 %v9368_v19, %v3651_v23  ;;  %v3654_v47 = vadd.f32 %v10285_v18, %v3639_v60  ;;  %v3695_v14 = vmul.f32 %v10308_v59, %v10308_v59  ;;  %v3870_v19 = vld [vmem:[%s11808_s7 + $0x208] sm:$0xff] }
 0xf44   : > { %v8941_v10 = vpop.f32.mrf.mxu0  ;;  %v7674_v26 = vcombine.low %v3886_v40, %v3894_v17  ;;  %v10468_v40 = vld [vmem:[%s11808_s7 + $0x3d8] sm:$0xff] }
 0xf45   : > { %v3652_v50 = vadd.f32 %v10285_v18, %v3637_v34  ;;  %3669 = vadd.xlane.f32.xlu0 %v10291_v28  ;;  %v3693_v25 = vmul.f32 %v10291_v28, %v10291_v28  ;;  %v10318_v35 = vadd.f32 %v9371_v43, %v3654_v47  ;;  %v3642_v45 = vadd.f32 %v8941_v10, %v10176_v38  ;;  %v3918_v38 = vld [vmem:[%s11808_s7 + $0x388] sm:$0xff]  ;;  %v3877_v34 = vld [vmem:[%s11808_s7 + $0x240] sm:$0xff] }
 0xf46   : > { %v3621_v56 = vpop.f32.mrf.mxu0  ;;  %v7706_v55 = vcombine.low %v3918_v38, %v3926_v36  ;;  %v7707_v6 = vcombine.high %v3918_v38, %v3926_v36  ;;  %v3854_v47 = vld [vmem:[%s11808_s7 + $0x188] sm:$0xff]  ;;  %v3845_v43 = vld [vmem:[%s11808_s7 + $0x140] sm:$0xff] }
 0xf47   : > { %v10300_v57 = vadd.f32 %v9369_v44, %v3652_v50  ;;  %v3640_v7 = vadd.f32 %v3621_v56, %v10180_v39  ;;  %v3696_v8 = vmul.f32 %v10318_v35, %v10318_v35  ;;  %v3657_v24 = vadd.f32 %v10285_v18, %v3642_v45  ;;  %v3878_v56 = vld [vmem:[%s11808_s7 + $0x248] sm:$0xff]  ;;  %v3821_v38 = vld [vmem:[%s11808_s7 + $0x80] sm:$0xff] }
 0xf48   : > { %v8942_v16 = vpop.f32.mrf.mxu0  ;;  %4730 = vmatprep.subr.bf16.mxu0 %v7707_v6  ;;  %v7658_v44 = vcombine.low %v3870_v19, %v3878_v56  ;;  %v3838_v45 = vld [vmem:[%s11808_s7 + $0x108] sm:$0xff]  ;;  %v3829_v36 = vld [vmem:[%s11808_s7 + $0xc0] sm:$0xff] }
 0xf49   : > { %3701 = vadd.xlane.f32.xlu0 %v3693_v25  ;;  %3671 = vadd.xlane.f32.xlu1 %v10300_v57  ;;  %v3694_v32 = vmul.f32 %v10300_v57, %v10300_v57  ;;  %v3655_v39 = vadd.f32 %v10285_v18, %v3640_v7  ;;  %v3643_v22 = vadd.f32 %v8942_v16, %v10182_v63  ;;  %v3885_v63 = vld [vmem:[%s11808_s7 + $0x280] sm:$0xff] }
 0xf4a   : > { %v3624_v29 = vpop.f32.mrf.mxu0  ;;  %4731 = vmatpush1.bf16.msra.mxu0 %v7706_v55  ;;  %v10372_v42 = vadd.f32 %v9374_v13, %v3657_v24  ;;  %v7673_v15 = vcombine.high %v3885_v63, %v3893_v12  ;;  %v7672_v23 = vcombine.low %v3885_v63, %v3893_v12  ;;  %v7659_v16 = vcombine.high %v3870_v19, %v3878_v56  ;;  %v3853_v7 = vld [vmem:[%s11808_s7 + $0x180] sm:$0xff]  ;;  %v3830_v55 = vld [vmem:[%s11808_s7 + $0xc8] sm:$0xff]  ;;  %v10461_v63 = vld [vmem:[%s11808_s7 + $0x398] sm:$0xff] }
 0xf4b   : > { %v3641_v52 = vadd.f32 %v3624_v29, %v2839_v49  ;;  %v10329_v53 = vadd.f32 %v9372_v41, %v3655_v39  ;;  %v3658_v5 = vadd.f32 %v10285_v18, %v3643_v22  ;;  %4732 = vmatprep.subr.bf16.mxu0 %v7691_v9  ;;  %v7641_v48 = vcombine.high %v3853_v7, %v3861_v46  ;;  %v3806_v22 = vld [vmem:[%s11808_s7 + $0x8] sm:$0xff]  ;;  %v10456_v9 = vld [vmem:[%s11808_s7 + $0x3d0] sm:$0xff] }
 0xf4c   : > { %4661 = vmatprep.subr.bf16.mxu1 %v7673_v15  ;;  %v3699_v10 = vmul.f32 %v10372_v42, %v10372_v42  ;;  %v7640_v49 = vcombine.low %v3853_v7, %v3861_v46  ;;  %v7626_v30 = vcombine.low %v3838_v45, %v3846_v31  ;;  %v7627_v54 = vcombine.high %v3838_v45, %v3846_v31 }
 0xf4d   : > { %3673 = vadd.xlane.f32.xlu0 %v10308_v59  ;;  %3703 = vadd.xlane.f32.xlu1 %v3694_v32  ;;  %v3656_v37 = vadd.f32 %v10285_v18, %v3641_v52  ;;  %v3697_v2 = vmul.f32 %v10329_v53, %v10329_v53  ;;  %v3869_v18 = vld [vmem:[%s11808_s7 + $0x200] sm:$0xff]  ;;  %v10395_v60 = vadd.f32 %v9375_v33, %v3658_v5  ;;  %v3862_v32 = vld [vmem:[%s11808_s7 + $0x1c8] sm:$0xff]  ;;  %v9384_v5 = vmov 0  }
 0xf4e   : > { %4733 = vmatpush1.bf16.msra.mxu0 %v7690_v4  ;;  %4662 = vmatpush1.bf16.msra.mxu1 %v7672_v23  ;;  %v7657_v50 = vcombine.high %v3869_v18, %v3877_v34  ;;  %v7656_v25 = vcombine.low %v3869_v18, %v3877_v34  ;;  %v7642_v39 = vcombine.low %v3854_v47, %v3862_v32  ;;  %v10451_v4 = vld [vmem:[%s11808_s7 + $0x390] sm:$0xff] }
 0xf4f   : > { %v10358_v62 = vadd.f32 %v9373_v61, %v3656_v37  ;;  %4734 = vmatprep.subr.bf16.mxu0 %v7675_v20  ;;  %v3700_v29 = vmul.f32 %v10395_v60, %v10395_v60  ;;  %v7643_v52 = vcombine.high %v3854_v47, %v3862_v32  ;;  %v3822_v37 = vld [vmem:[%s11808_s7 + $0x88] sm:$0xff]  ;;  %v7608_v6 = vcombine.low %v3821_v38, %v3829_v36 }
 0xf50   : > { %4663 = vmatprep.subr.bf16.mxu1 %v7657_v50  ;;  %v7610_v24 = vcombine.low %v3822_v37, %v3830_v55  ;;  %v7611_v27 = vcombine.high %v3822_v37, %v3830_v55  ;;  %v7594_v61 = vcombine.low %v3806_v22, %v3814_v11  ;;  %v7595_v3 = vcombine.high %v3806_v22, %v3814_v11 }
 0xf51   : > { %3705 = vadd.xlane.f32.xlu0 %v3695_v14  ;;  %3675 = vadd.xlane.f32.xlu1 %v10318_v35  ;;  %v3698_v21 = vmul.f32 %v10358_v62, %v10358_v62  ;;  %v3837_v14 = vld [vmem:[%s11808_s7 + $0x100] sm:$0xff]  ;;  %v7709_v12 = vcombine.high %v10451_v4, %v10456_v9  ;;  %v7708_v13 = vcombine.low %v10451_v4, %v10456_v9  ;;  %v3871_v4 = vld [vmem:[%s11808_s7 + $0x210] sm:$0xff] }
 0xf52   : > { %4735 = vmatpush1.bf16.msra.mxu0 %v7674_v26  ;;  %4664 = vmatpush1.bf16.msra.mxu1 %v7656_v25  ;;  %v7625_v0 = vcombine.high %v3837_v14, %v3845_v43  ;;  %v7624_v41 = vcombine.low %v3837_v14, %v3845_v43  ;;  %v7710_v15 = vcombine.low %v10461_v63, %v10468_v40  ;;  %v3879_v9 = vld [vmem:[%s11808_s7 + $0x250] sm:$0xff] }
 0xf53   : > { %4736 = vmatprep.subr.bf16.mxu0 %v7659_v16  ;;  %4665 = vmatprep.subr.bf16.mxu1 %v7641_v48  ;;  %v7711_v17 = vcombine.high %v10461_v63, %v10468_v40  ;;  %v3880_v40 = vld [vmem:[%s11808_s7 + $0x258] sm:$0xff] }
 0xf54   : > { %4689 = vmatprep.mubr.bf16.mxu1 %v9384_v5  ;;  %4762 = vmatprep.mubr.bf16.mxu0 %v9384_v5 }
 0xf55   : > { %3707 = vadd.xlane.f32.xlu1 %v3696_v8  ;;  %3677 = vadd.xlane.f32.xlu0 %v10329_v53  ;;  %v7609_v8 = vcombine.high %v3821_v38, %v3829_v36 }
 0xf56   : > { %4737 = vmatpush1.bf16.msra.mxu0 %v7658_v44  ;;  %4666 = vmatpush1.bf16.msra.mxu1 %v7640_v49 }
 0xf57   : > { %4738 = vmatprep.subr.bf16.mxu0 %v7643_v52  ;;  %4667 = vmatprep.subr.bf16.mxu1 %v7625_v0 }
 0xf59   : > { %3679 = vadd.xlane.f32.xlu1 %v10358_v62  ;;  %3709 = vadd.xlane.f32.xlu0 %v3697_v2  ;;  %v7593_v2 = vcombine.high %v3805_v1, %v3813_v58  ;;  %v10496_v58 = vld [vmem:[%s11806_s5] ss:$0 sm:$0xff] }
 0xf5a   : > { %4739 = vmatpush1.bf16.msra.mxu0 %v7642_v39  ;;  %4668 = vmatpush1.bf16.msra.mxu1 %v7624_v41 }
 0xf5b   : > { %4740 = vmatprep.subr.bf16.mxu0 %v7627_v54  ;;  %4669 = vmatprep.subr.bf16.mxu1 %v7609_v8 }
 0xf5d   : > { %3711 = vadd.xlane.f32.xlu1 %v3698_v21  ;;  %3681 = vadd.xlane.f32.xlu0 %v10372_v42 }
 0xf5e   : > { %4741 = vmatpush1.bf16.msra.mxu0 %v7626_v30  ;;  %4670 = vmatpush1.bf16.msra.mxu1 %v7608_v6 }
 0xf5f   : > { %4742 = vmatprep.subr.bf16.mxu0 %v7611_v27  ;;  %4671 = vmatprep.subr.bf16.mxu1 %v7593_v2 }
 0xf61   : > { %3683 = vadd.xlane.f32.xlu1 %v10395_v60  ;;  %3713 = vadd.xlane.f32.xlu0 %v3699_v10 }
 0xf62   : > { %4743 = vmatpush1.bf16.msra.mxu0 %v7610_v24  ;;  %4672 = vmatpush1.bf16.msra.mxu1 %v7592_v51 }
 0xf63   : > { %4744 = vmatprep.subr.bf16.mxu0 %v7595_v3  ;;  %4803 = vmatprep.subr.bf16.mxu1 %v7709_v12 }
 0xf65   : > { %3715 = vadd.xlane.f32.xlu1 %v3700_v29 }
 0xf66   : > { %4745 = vmatpush1.bf16.msra.mxu0 %v7594_v61 }
 0xf67   : > { %4876 = vmatprep.subr.bf16.mxu0 %v7711_v17 }
 0xfce   : > { %v3670_v21 = vpop.xlane.xlu0 %3669 }
 0xfcf   : > { %v3685_v23 = vmul.f32 0.03125, %v3670_v21 }
 0xfd1   : > { %v3725_v18 = vmul.f32 %v3685_v23, %v3685_v23  ;;  %v3741_v55 = vsub.f32 %v10291_v28, %v3685_v23 }
 0xfd2   : > { %v3702_v26 = vpop.xlane.xlu0 %3701  ;;  %v3672_v20 = vpop.xlane.xlu1 %3671 }
 0xfd3   : > { %v3717_v34 = vmul.f32 0.03125, %v3702_v26  ;;  %v3686_v19 = vmul.f32 0.03125, %v3672_v20  ;;  %v10507_v26 = vld [vmem:[%s11807_s6] ss:$0 sm:$0xff] }
 0xfd5   : > { %v3733_v10 = vsub.f32 %v3717_v34, %v3725_v18  ;;  %v3726_v25 = vmul.f32 %v3686_v19, %v3686_v19  ;;  %v3742_v28 = vsub.f32 %v10300_v57, %v3686_v19 }
 0xfd6   : > { %v3674_v50 = vpop.xlane.xlu0 %3673  ;;  %v3704_v56 = vpop.xlane.xlu1 %3703 }
 0xfd7   : > { %v3749_v33 = vadd.f32 1e-05, %v3733_v10  ;;  %v10478_v44 = vmul.f32 0.03125, %v3674_v50  ;;  %v3718_v16 = vmul.f32 0.03125, %v3704_v56  ;;  %v3903_v56 = vld [vmem:[%s11808_s7 + $0x310] sm:$0xff] }
 0xfd9   : > { %9336 = vrsqrt.f32 %v3749_v33  ;;  %v3734_v7 = vsub.f32 %v3718_v16, %v3726_v25  ;;  %v3727_v48 = vmul.f32 %v10478_v44, %v10478_v44  ;;  %v3743_v19 = vsub.f32 %v10308_v59, %v10478_v44  ;;  %v3911_v33 = vld [vmem:[%s11808_s7 + $0x350] sm:$0xff]  ;;  %v3904_v59 = vld [vmem:[%s11808_s7 + $0x318] sm:$0xff] }
 0xfda   : > { %v3706_v46 = vpop.xlane.xlu0 %3705  ;;  %v3676_v47 = vpop.xlane.xlu1 %3675  ;;  %v3912_v44 = vld [vmem:[%s11808_s7 + $0x358] sm:$0xff] }
 0xfdb   : > { %v3750_v32 = vadd.f32 1e-05, %v3734_v7  ;;  %v3719_v29 = vmul.f32 0.03125, %v3706_v46  ;;  %v10482_v49 = vmul.f32 0.03125, %v3676_v47 }
 0xfdd   : > { %9338 = vrsqrt.f32 %v3750_v32  ;;  %v3735_v39 = vsub.f32 %v3719_v29, %v3727_v48  ;;  %v3728_v45 = vmul.f32 %v10482_v49, %v10482_v49 }
 0xfde   : > { %v3708_v52 = vpop.xlane.xlu1 %3707  ;;  %v3678_v14 = vpop.xlane.xlu0 %3677 }
 0xfdf   : > { %v3751_v43 = vadd.f32 1e-05, %v3735_v39  ;;  %v3720_v0 = vmul.f32 0.03125, %v3708_v52  ;;  %v10486_v31 = vmul.f32 0.03125, %v3678_v14  ;;  %v7693_v52 = vcombine.high %v3903_v56, %v3911_v33 }
 0xfe1   : > { %9340 = vrsqrt.f32 %v3751_v43  ;;  %v3736_v41 = vsub.f32 %v3720_v0, %v3728_v45  ;;  %v3729_v36 = vmul.f32 %v10486_v31, %v10486_v31  ;;  %v3744_v43 = vsub.f32 %v10318_v35, %v10482_v49  ;;  %v3896_v35 = vld [vmem:[%s11808_s7 + $0x2d8] sm:$0xff] }
 0xfe2   : > { %v3680_v30 = vpop.xlane.xlu1 %3679  ;;  %v3710_v54 = vpop.xlane.xlu0 %3709  ;;  %v7695_v0 = vcombine.high %v3904_v59, %v3912_v44 }
 0xfe3   : > { %v3752_v38 = vadd.f32 1e-05, %v3736_v41  ;;  %v10490_v37 = vmul.f32 0.03125, %v3680_v30  ;;  %v3721_v8 = vmul.f32 0.03125, %v3710_v54  ;;  %v3887_v41 = vld [vmem:[%s11808_s7 + $0x290] sm:$0xff] }
 0xfe4   : > { %v3895_v30 = vld [vmem:[%s11808_s7 + $0x2d0] sm:$0xff] }
 0xfe5   : > { %9342 = vrsqrt.f32 %v3752_v38  ;;  %v3737_v6 = vsub.f32 %v3721_v8, %v3729_v36  ;;  %v3730_v2 = vmul.f32 %v10490_v37, %v10490_v37  ;;  %v3888_v38 = vld [vmem:[%s11808_s7 + $0x298] sm:$0xff] }
 0xfe6   : > { %v9337_v24 = vpop.eup %9336  ;;  %v3712_v27 = vpop.xlane.xlu1 %3711 }
 0xfe7   : > { %v3682_v1 = vpop.xlane.xlu0 %3681  ;;  %v3765_v22 = vmul.f32 %v9337_v24, %v3741_v55  ;;  %v3753_v11 = vadd.f32 1e-05, %v3737_v6  ;;  %v3722_v51 = vmul.f32 0.03125, %v3712_v27  ;;  %v7692_v55 = vcombine.low %v3903_v56, %v3911_v33  ;;  %v3839_v33 = vld [vmem:[%s11808_s7 + $0x110] sm:$0xff] }
 0xfe8   : > { %v10500_v61 = vmul.f32 0.03125, %v3682_v1  ;;  %v7694_v6 = vcombine.low %v3904_v59, %v3912_v44  ;;  %v7677_v24 = vcombine.high %v3887_v41, %v3895_v30  ;;  %v3745_v1 = vsub.f32 %v10329_v53, %v10486_v31  ;;  %v3872_v53 = vld [vmem:[%s11808_s7 + $0x218] sm:$0xff] }
 0xfe9   : > { %9344 = vrsqrt.f32 %v3753_v11  ;;  %v3738_v3 = vsub.f32 %v3722_v51, %v3730_v2  ;;  %v3779_v17 = vmul.f32 %v10496_v58, %v3765_v22  ;;  %v7679_v22 = vcombine.high %v3888_v38, %v3896_v35  ;;  %v3848_v59 = vld [vmem:[%s11808_s7 + $0x158] sm:$0xff] }
 0xfea   : > { %v9339_v12 = vpop.eup %9338  ;;  %v3684_v21 = vpop.xlane.xlu1 %3683  ;;  %v3731_v10 = vmul.f32 %v10500_v61, %v10500_v61  ;;  %v7676_v2 = vcombine.low %v3887_v41, %v3895_v30  ;;  %v7678_v11 = vcombine.low %v3888_v38, %v3896_v35  ;;  %v7661_v51 = vcombine.high %v3871_v4, %v3879_v9  ;;  %v3831_v30 = vld [vmem:[%s11808_s7 + $0xd0] sm:$0xff] }
 0xfeb   : > { %v3714_v23 = vpop.xlane.xlu0 %3713  ;;  %v3766_v20 = vmul.f32 %v9339_v12, %v3742_v28  ;;  %v3754_v18 = vadd.f32 1e-05, %v3738_v3  ;;  %v10509_v34 = vmul.f32 0.03125, %v3684_v21  ;;  %v10523_v16 = vadd.f32 %v10507_v26, %v3779_v17  ;;  %v3855_v17 = vld [vmem:[%s11808_s7 + $0x190] sm:$0xff] }
 0xfec   : > { %v3723_v57 = vmul.f32 0.03125, %v3714_v23  ;;  %v3746_v3 = vsub.f32 %v10358_v62, %v10490_v37  ;;  %v7663_v12 = vcombine.high %v3872_v53, %v3880_v40  ;;  %v3863_v23 = vld [vmem:[%s11808_s7 + $0x1d0] sm:$0xff]  ;;  %v3864_v62 = vld [vmem:[%s11808_s7 + $0x1d8] sm:$0xff] }
 0xfed   : > { %v3780_v50 = vmul.f32 %v10496_v58, %v3766_v20  ;;  %9346 = vrsqrt.f32 %v3754_v18  ;;  %v3732_v32 = vmul.f32 %v10509_v34, %v10509_v34  ;;  %v3856_v20 = vld [vmem:[%s11808_s7 + $0x198] sm:$0xff] }
 0xfee   : > { %v9341_v25 = vpop.eup %9340  ;;  %v3739_v7 = vsub.f32 %v3723_v57, %v3731_v10  ;;  %v3716_v46 = vpop.xlane.xlu1 %3715  ;;  %v7660_v10 = vcombine.low %v3871_v4, %v3879_v9  ;;  %v7662_v57 = vcombine.low %v3872_v53, %v3880_v40  ;;  %v7647_v56 = vcombine.high %v3856_v20, %v3864_v62 }
 0xfef   : > { %v10532_v47 = vadd.f32 %v10507_v26, %v3780_v50  ;;  %v3767_v48 = vmul.f32 %v9341_v25, %v3743_v19  ;;  %v3724_v29 = vmul.f32 0.03125, %v3716_v46  ;;  %v7645_v50 = vcombine.high %v3855_v17, %v3863_v23  ;;  %v3847_v25 = vld [vmem:[%s11808_s7 + $0x150] sm:$0xff]  ;;  %v3840_v46 = vld [vmem:[%s11808_s7 + $0x118] sm:$0xff] }
 0xff0   : > { %v3755_v39 = vadd.f32 1e-05, %v3739_v7  ;;  %v3747_v7 = vsub.f32 %v10372_v42, %v10500_v61  ;;  %v7644_v42 = vcombine.low %v3855_v17, %v3863_v23  ;;  %v7628_v35 = vcombine.low %v3839_v33, %v3847_v25  ;;  %v3913_v23 = vld [vmem:[%s11808_s7 + $0x360] sm:$0xff] }
 0xff1   : > { %v10538_v14 = vpack.c.bf16 %v10532_v47, %v10523_v16  ;;  %v3740_v45 = vsub.f32 %v3724_v29, %v3732_v32  ;;  %v3781_v49 = vmul.f32 %v10496_v58, %v3767_v48  ;;  %v7646_v29 = vcombine.low %v3856_v20, %v3864_v62  ;;  %v3906_v20 = vld [vmem:[%s11808_s7 + $0x328] sm:$0xff] }
 0xff2   : > { %v9343_v54 = vpop.eup %9342  ;;  %9348 = vrsqrt.f32 %v3755_v39  ;;  %v7629_v39 = vcombine.high %v3839_v33, %v3847_v25  ;;  %v3914_v62 = vld [vmem:[%s11808_s7 + $0x368] sm:$0xff] }
 0xff3   : > { %v3768_v36 = vmul.f32 %v9343_v54, %v3744_v43  ;;  %v3756_v8 = vadd.f32 1e-05, %v3740_v45  ;;  %4690 = vmatmul.mubr.bf16.vlgmr.msra.gmra.mxu1 %v10538_v14  ;;  %4763 = vmatmul.mubr.bf16.vlgmr.msra.gmra.mxu0 %v10538_v14  ;;  %v3748_v43 = vsub.f32 %v10395_v60, %v10509_v34  ;;  %v7631_v45 = vcombine.high %v3840_v46, %v3848_v59  ;;  %v3824_v54 = vld [vmem:[%s11808_s7 + $0x98] sm:$0xff]  ;;  %v3898_v33 = vld [vmem:[%s11808_s7 + $0x2e8] sm:$0xff] }
 0xff4   : > { %4804 = vmatpush1.bf16.msra.mxu1 %v7708_v13  ;;  %4877 = vmatpush1.bf16.msra.mxu0 %v7710_v15  ;;  %v10581_v13 = vadd.f32 %v10507_v26, %v3781_v49  ;;  %v3832_v60 = vld [vmem:[%s11808_s7 + $0xd8] sm:$0xff]  ;;  %v7630_v49 = vcombine.low %v3840_v46, %v3848_v59 }
 0xff5   : > { %v3782_v27 = vmul.f32 %v10496_v58, %v3768_v36  ;;  %9350 = vrsqrt.f32 %v3756_v8  ;;  %4805 = vmatprep.subr.bf16.mxu1 %v7693_v52  ;;  %4878 = vmatprep.subr.bf16.mxu0 %v7695_v0  ;;  %v3823_v0 = vld [vmem:[%s11808_s7 + $0x90] sm:$0xff]  ;;  %v7614_v9 = vcombine.low %v3824_v54, %v3832_v60 }
 0xff6   : > { %v9345_v63 = vpop.eup %9344  ;;  %4699 = vmatprep.mubr.bf16.mxu1 %v9384_v5  ;;  %4772 = vmatprep.mubr.bf16.mxu0 %v9384_v5  ;;  %11821 = vst [vmem:[#allocation2_spill] sm:$0xff] %v10581_v13  ;;  %v7613_v8 = vcombine.high %v3823_v0, %v3831_v30  ;;  %v7612_v4 = vcombine.low %v3823_v0, %v3831_v30  ;;  %v3865_v30 = vld [vmem:[%s11808_s7 + $0x1e0] sm:$0xff] }
 0xff7   : > { %v10584_v15 = vadd.f32 %v10507_v26, %v3782_v27  ;;  %v3769_v31 = vmul.f32 %v9345_v63, %v3745_v1  ;;  %v3816_v27 = vld [vmem:[%s11808_s7 + $0x58] sm:$0xff] }
 0xff8   : > { %4806 = vmatpush1.bf16.msra.mxu1 %v7692_v55  ;;  %4879 = vmatpush1.bf16.msra.mxu0 %v7694_v6  ;;  %v7615_v55 = vcombine.high %v3824_v54, %v3832_v60  ;;  %v3807_v6 = vld [vmem:[%s11808_s7 + $0x10] sm:$0xff]  ;;  %v3858_v54 = vld [vmem:[%s11808_s7 + $0x1a8] sm:$0xff] }
 0xff9   : > { %11822 = vst [vmem:[#allocation3_spill] sm:$0xff] %v10584_v15  ;;  %v10588_v28 = vpack.c.bf16 %v10584_v15, %v10581_v13  ;;  %4807 = vmatprep.subr.bf16.mxu1 %v7677_v24  ;;  %4880 = vmatprep.subr.bf16.mxu0 %v7679_v22  ;;  %v3783_v37 = vmul.f32 %v10496_v58, %v3769_v31  ;;  %v3815_v24 = vld [vmem:[%s11808_s7 + $0x50] sm:$0xff]  ;;  %v3921_v31 = vld [vmem:[%s11808_s7 + $0x3a0] sm:$0xff]  ;;  %v3866_v60 = vld [vmem:[%s11808_s7 + $0x1e8] sm:$0xff] }
 0xffa   : > { %v9347_v21 = vpop.eup %9346  ;;  %v7597_v53 = vcombine.high %v3807_v6, %v3815_v24 }
 0xffb   : > { %v3770_v18 = vmul.f32 %v9347_v21, %v3746_v3  ;;  %4700 = vmatmul.mubr.bf16.gmra.mxu1 %v10588_v28  ;;  %4773 = vmatmul.mubr.bf16.gmra.mxu0 %v10588_v28  ;;  %v10625_v48 = vadd.f32 %v10507_v26, %v3783_v37  ;;  %v3905_v21 = vld [vmem:[%s11808_s7 + $0x320] sm:$0xff] }
 0xffc   : > { %4808 = vmatpush1.bf16.msra.mxu1 %v7676_v2  ;;  %4881 = vmatpush1.bf16.msra.mxu0 %v7678_v11  ;;  %v3922_v2 = vld [vmem:[%s11808_s7 + $0x3a8] sm:$0xff]  ;;  %v7696_v25 = vcombine.low %v3905_v21, %v3913_v23 }
 0xffd   : > { %v3784_v19 = vmul.f32 %v10496_v58, %v3770_v18  ;;  %4809 = vmatprep.subr.bf16.mxu1 %v7661_v51  ;;  %4882 = vmatprep.subr.bf16.mxu0 %v7663_v12  ;;  %11823 = vst [vmem:[#allocation4_spill] sm:$0xff] %v10625_v48  ;;  %v3930_v11 = vld [vmem:[%s11808_s7 + $0x3e8] sm:$0xff]  ;;  %v7596_v51 = vcombine.low %v3807_v6, %v3815_v24 }
 0xffe   : > { %4709 = vmatprep.mubr.bf16.mxu1 %v9384_v5  ;;  %4782 = vmatprep.mubr.bf16.mxu0 %v9384_v5  ;;  %v7715_v17 = vcombine.high %v3922_v2, %v3930_v11  ;;  %v7714_v18 = vcombine.low %v3922_v2, %v3930_v11  ;;  %v3850_v6 = vld [vmem:[%s11808_s7 + $0x168] sm:$0xff] }
 0xfff   : > { %v9349_v44 = vpop.eup %9348  ;;  %v10628_v32 = vadd.f32 %v10507_v26, %v3784_v19  ;;  %v3889_v19 = vld [vmem:[%s11808_s7 + $0x2a0] sm:$0xff] }
0x1000   : > { %v3771_v61 = vmul.f32 %v9349_v44, %v3747_v7  ;;  %4810 = vmatpush1.bf16.msra.mxu1 %v7660_v10  ;;  %4883 = vmatpush1.bf16.msra.mxu0 %v7662_v57  ;;  %v7697_v10 = vcombine.high %v3905_v21, %v3913_v23  ;;  %v7699_v57 = vcombine.high %v3906_v20, %v3914_v62  ;;  %v3873_v44 = vld [vmem:[%s11808_s7 + $0x220] sm:$0xff]  ;;  %v3818_v21 = vld [vmem:[%s11808_s7 + $0x68] sm:$0xff] }
0x1001   : > { %11824 = vst [vmem:[#allocation5_spill] sm:$0xff] %v10628_v32  ;;  %v10632_v52 = vpack.c.bf16 %v10628_v32, %v10625_v48  ;;  %4811 = vmatprep.subr.bf16.mxu1 %v7645_v50  ;;  %4884 = vmatprep.subr.bf16.mxu0 %v7647_v56  ;;  %v3897_v50 = vld [vmem:[%s11808_s7 + $0x2e0] sm:$0xff]  ;;  %v3890_v56 = vld [vmem:[%s11808_s7 + $0x2a8] sm:$0xff]  ;;  %v7698_v7 = vcombine.low %v3906_v20, %v3914_v62 }
0x1002   : > { %v9351_v41 = vpop.eup %9350  ;;  %v3785_v34 = vmul.f32 %v10496_v58, %v3771_v61  ;;  %v7681_v46 = vcombine.high %v3889_v19, %v3897_v50  ;;  %v7683_v59 = vcombine.high %v3890_v56, %v3898_v33  ;;  %v3874_v61 = vld [vmem:[%s11808_s7 + $0x228] sm:$0xff] }
0x1003   : > { %v3772_v38 = vmul.f32 %v9351_v41, %v3748_v43  ;;  %4710 = vmatmul.mubr.bf16.gmra.mxu1 %v10632_v52  ;;  %4783 = vmatmul.mubr.bf16.gmra.mxu0 %v10632_v52  ;;  %v7682_v43 = vcombine.low %v3890_v56, %v3898_v33  ;;  %v3857_v41 = vld [vmem:[%s11808_s7 + $0x1a0] sm:$0xff] }
0x1004   : > { %4812 = vmatpush1.bf16.msra.mxu1 %v7644_v42  ;;  %4885 = vmatpush1.bf16.msra.mxu0 %v7646_v29  ;;  %v10667_v1 = vadd.f32 %v10507_v26, %v3785_v34  ;;  %v3881_v42 = vld [vmem:[%s11808_s7 + $0x260] sm:$0xff]  ;;  %v3882_v29 = vld [vmem:[%s11808_s7 + $0x268] sm:$0xff]  ;;  %v7648_v24 = vcombine.low %v3857_v41, %v3865_v30 }
0x1005   : > { %v3786_v36 = vmul.f32 %v10496_v58, %v3772_v38  ;;  %4813 = vmatprep.subr.bf16.mxu1 %v7629_v39  ;;  %4886 = vmatprep.subr.bf16.mxu0 %v7631_v45  ;;  %v3808_v58 = vld [vmem:[%s11808_s7 + $0x18] sm:$0xff]  ;;  %v7680_v39 = vcombine.low %v3889_v19, %v3897_v50  ;;  %v7665_v45 = vcombine.high %v3873_v44, %v3881_v42 }
0x1006   : > { %4719 = vmatprep.mubr.bf16.mxu1 %v9384_v5  ;;  %4792 = vmatprep.mubr.bf16.mxu0 %v9384_v5  ;;  %11825 = vst [vmem:[#allocation6_spill] sm:$0xff] %v10667_v1  ;;  %v7599_v40 = vcombine.high %v3808_v58, %v3816_v27  ;;  %v7598_v3 = vcombine.low %v3808_v58, %v3816_v27  ;;  %v3932_v19 = vld [vmem:[%s11808_s7 + $0x3f8] sm:$0xff] }
0x1007   : > { %v10670_v22 = vadd.f32 %v10507_v26, %v3786_v36  ;;  %v3929_v26 = vld [vmem:[%s11808_s7 + $0x3e0] sm:$0xff]  ;;  %v7667_v0 = vcombine.high %v3874_v61, %v3882_v29  ;;  %v7664_v34 = vcombine.low %v3873_v44, %v3881_v42  ;;  %v7666_v38 = vcombine.low %v3874_v61, %v3882_v29  ;;  %v3916_v44 = vld [vmem:[%s11808_s7 + $0x378] sm:$0xff] }
0x1008   : > { %4814 = vmatpush1.bf16.msra.mxu1 %v7628_v35  ;;  %4887 = vmatpush1.bf16.msra.mxu0 %v7630_v49  ;;  %v7713_v12 = vcombine.high %v3921_v31, %v3929_v26  ;;  %v7712_v37 = vcombine.low %v3921_v31, %v3929_v26  ;;  %v7649_v35 = vcombine.high %v3857_v41, %v3865_v30  ;;  %v3841_v36 = vld [vmem:[%s11808_s7 + $0x120] sm:$0xff]  ;;  %v3834_v31 = vld [vmem:[%s11808_s7 + $0xe8] sm:$0xff]  ;;  %v3900_v41 = vld [vmem:[%s11808_s7 + $0x2f8] sm:$0xff] }
0x1009   : > { %11826 = vst [vmem:[#allocation7_spill] sm:$0xff] %v10670_v22  ;;  %v10674_v63 = vpack.c.bf16 %v10670_v22, %v10667_v1  ;;  %4815 = vmatprep.subr.bf16.mxu1 %v7613_v8  ;;  %4888 = vmatprep.subr.bf16.mxu0 %v7615_v55  ;;  %v7651_v49 = vcombine.high %v3858_v54, %v3866_v60  ;;  %v3849_v8 = vld [vmem:[%s11808_s7 + $0x160] sm:$0xff]  ;;  %v3842_v55 = vld [vmem:[%s11808_s7 + $0x128] sm:$0xff] }
0x100a   : > { %v7650_v58 = vcombine.low %v3858_v54, %v3866_v60  ;;  %v7633_v27 = vcombine.high %v3841_v36, %v3849_v8  ;;  %v7632_v26 = vcombine.low %v3841_v36, %v3849_v8  ;;  %v7634_v2 = vcombine.low %v3842_v55, %v3850_v6  ;;  %v3884_v36 = vld [vmem:[%s11808_s7 + $0x278] sm:$0xff] }
0x100b   : > { %4720 = vmatmul.mubr.bf16.gmra.mxu1 %v10674_v63  ;;  %4793 = vmatmul.mubr.bf16.gmra.mxu0 %v10674_v63 }
0x100c   : > { %4816 = vmatpush1.bf16.msra.mxu1 %v7612_v4  ;;  %4889 = vmatpush1.bf16.msra.mxu0 %v7614_v9  ;;  %v7635_v4 = vcombine.high %v3842_v55, %v3850_v6  ;;  %v3825_v9 = vld [vmem:[%s11808_s7 + $0xa0] sm:$0xff] }
0x100d   : > { %4817 = vmatprep.subr.bf16.mxu1 %v7597_v53  ;;  %4890 = vmatprep.subr.bf16.mxu0 %v7599_v40  ;;  %v3833_v53 = vld [vmem:[%s11808_s7 + $0xe0] sm:$0xff]  ;;  %v3826_v40 = vld [vmem:[%s11808_s7 + $0xa8] sm:$0xff] }
0x100e   : > { %4835 = vmatprep.mubr.bf16.mxu1 %v9384_v5  ;;  %4908 = vmatprep.mubr.bf16.mxu0 %v9384_v5  ;;  %v7617_v11 = vcombine.high %v3825_v9, %v3833_v53  ;;  %v7616_v23 = vcombine.low %v3825_v9, %v3833_v53  ;;  %v7618_v20 = vcombine.low %v3826_v40, %v3834_v31  ;;  %v3868_v9 = vld [vmem:[%s11808_s7 + $0x1f8] sm:$0xff] }
0x1010   : > { %4818 = vmatpush1.bf16.msra.mxu1 %v7596_v51  ;;  %4891 = vmatpush1.bf16.msra.mxu0 %v7598_v3  ;;  %v7619_v51 = vcombine.high %v3826_v40, %v3834_v31  ;;  %v3809_v3 = vld [vmem:[%s11808_s7 + $0x20] sm:$0xff] }
0x1011   : > { %4949 = vmatprep.subr.bf16.mxu1 %v7713_v12  ;;  %5022 = vmatprep.subr.bf16.mxu0 %v7715_v17  ;;  %v3817_v12 = vld [vmem:[%s11808_s7 + $0x60] sm:$0xff]  ;;  %v3810_v17 = vld [vmem:[%s11808_s7 + $0x28] sm:$0xff] }
0x1012   : > { %v7601_v62 = vcombine.high %v3809_v3, %v3817_v12  ;;  %v7600_v50 = vcombine.low %v3809_v3, %v3817_v12  ;;  %v7602_v56 = vcombine.low %v3810_v17, %v3818_v21  ;;  %v3852_v3 = vld [vmem:[%s11808_s7 + $0x178] sm:$0xff] }
0x1013   : > { %4836 = vmatmul.mubr.bf16.vlgmr.msra.gmra.mxu1 %v10538_v14  ;;  %4909 = vmatmul.mubr.bf16.vlgmr.msra.gmra.mxu0 %v10538_v14 }
0x1014   : > { %4950 = vmatpush1.bf16.msra.mxu1 %v7712_v37  ;;  %5023 = vmatpush1.bf16.msra.mxu0 %v7714_v18  ;;  %v7603_v37 = vcombine.high %v3810_v17, %v3818_v21  ;;  %v3923_v18 = vld [vmem:[%s11808_s7 + $0x3b0] sm:$0xff] }
0x1015   : > { %4951 = vmatprep.subr.bf16.mxu1 %v7697_v10  ;;  %5024 = vmatprep.subr.bf16.mxu0 %v7699_v57  ;;  %v3931_v10 = vld [vmem:[%s11808_s7 + $0x3f0] sm:$0xff]  ;;  %v3924_v57 = vld [vmem:[%s11808_s7 + $0x3b8] sm:$0xff] }
0x1016   : > { %4845 = vmatprep.mubr.bf16.mxu1 %v9384_v5  ;;  %4918 = vmatprep.mubr.bf16.mxu0 %v9384_v5  ;;  %v7717_v33 = vcombine.high %v3923_v18, %v3931_v10  ;;  %v7716_v42 = vcombine.low %v3923_v18, %v3931_v10  ;;  %v7718_v61 = vcombine.low %v3924_v57, %v3932_v19  ;;  %v3836_v18 = vld [vmem:[%s11808_s7 + $0xf8] sm:$0xff] }
0x1018   : > { %4952 = vmatpush1.bf16.msra.mxu1 %v7696_v25  ;;  %5025 = vmatpush1.bf16.msra.mxu0 %v7698_v7  ;;  %v7719_v25 = vcombine.high %v3924_v57, %v3932_v19  ;;  %v3907_v7 = vld [vmem:[%s11808_s7 + $0x330] sm:$0xff] }
0x1019   : > { %4953 = vmatprep.subr.bf16.mxu1 %v7681_v46  ;;  %5026 = vmatprep.subr.bf16.mxu0 %v7683_v59  ;;  %v3915_v46 = vld [vmem:[%s11808_s7 + $0x370] sm:$0xff]  ;;  %v3908_v59 = vld [vmem:[%s11808_s7 + $0x338] sm:$0xff] }
0x101a   : > { %v7701_v29 = vcombine.high %v3907_v7, %v3915_v46  ;;  %v7700_v30 = vcombine.low %v3907_v7, %v3915_v46  ;;  %v7702_v54 = vcombine.low %v3908_v59, %v3916_v44  ;;  %v3820_v7 = vld [vmem:[%s11808_s7 + $0x78] sm:$0xff] }
0x101b   : > { %4846 = vmatmul.mubr.bf16.gmra.mxu1 %v10588_v28  ;;  %4919 = vmatmul.mubr.bf16.gmra.mxu0 %v10588_v28 }
0x101c   : > { %4954 = vmatpush1.bf16.msra.mxu1 %v7680_v39  ;;  %5027 = vmatpush1.bf16.msra.mxu0 %v7682_v43  ;;  %v7703_v39 = vcombine.high %v3908_v59, %v3916_v44  ;;  %v3891_v43 = vld [vmem:[%s11808_s7 + $0x2b0] sm:$0xff] }
0x101d   : > { %4955 = vmatprep.subr.bf16.mxu1 %v7665_v45  ;;  %5028 = vmatprep.subr.bf16.mxu0 %v7667_v0  ;;  %v3899_v45 = vld [vmem:[%s11808_s7 + $0x2f0] sm:$0xff]  ;;  %v3892_v0 = vld [vmem:[%s11808_s7 + $0x2b8] sm:$0xff] }
0x101e   : > { %4855 = vmatprep.mubr.bf16.mxu1 %v9384_v5  ;;  %4928 = vmatprep.mubr.bf16.mxu0 %v9384_v5  ;;  %v7685_v60 = vcombine.high %v3891_v43, %v3899_v45  ;;  %v7684_v8 = vcombine.low %v3891_v43, %v3899_v45  ;;  %v7686_v55 = vcombine.low %v3892_v0, %v3900_v41  ;;  %v9082_v43 = vld [vmem:[%s11810_s9 + $0xf8] sm:$0xff]  }
0x101f   : > { %v9081_v45 = vld [vmem:[%s11810_s9 + $0x38] sm:$0xff]  }
0x1020   : > { %4956 = vmatpush1.bf16.msra.mxu1 %v7664_v34  ;;  %5029 = vmatpush1.bf16.msra.mxu0 %v7666_v38  ;;  %v7687_v34 = vcombine.high %v3892_v0, %v3900_v41  ;;  %v3875_v38 = vld [vmem:[%s11808_s7 + $0x230] sm:$0xff]  ;;  %v9083_v0 = vld [vmem:[%s11810_s9 + $0xb8] sm:$0xff]  }
0x1021   : > { %4957 = vmatprep.subr.bf16.mxu1 %v7649_v35  ;;  %5030 = vmatprep.subr.bf16.mxu0 %v7651_v49  ;;  %v3883_v35 = vld [vmem:[%s11808_s7 + $0x270] sm:$0xff]  ;;  %v3876_v49 = vld [vmem:[%s11808_s7 + $0x238] sm:$0xff] }
0x1022   : > { %v7669_v6 = vcombine.high %v3875_v38, %v3883_v35  ;;  %v7668_v53 = vcombine.low %v3875_v38, %v3883_v35  ;;  %v7670_v40 = vcombine.low %v3876_v49, %v3884_v36  ;;  %v9084_v41 = vld [vmem:[%s11810_s9 + $0x70] sm:$0xff]   ;;  %v9089_v38 = vld [vmem:[%s11810_s9 + $0x28] sm:$0xff]  }
0x1023   : > { %4856 = vmatmul.mubr.bf16.gmra.mxu1 %v10632_v52  ;;  %4929 = vmatmul.mubr.bf16.gmra.mxu0 %v10632_v52  ;;  %v9091_v35 = vld [vmem:[%s11810_s9 + $0xa8] sm:$0xff]  }
0x1024   : > { %4958 = vmatpush1.bf16.msra.mxu1 %v7648_v24  ;;  %5031 = vmatpush1.bf16.msra.mxu0 %v7650_v58  ;;  %v7671_v24 = vcombine.high %v3876_v49, %v3884_v36  ;;  %v3859_v58 = vld [vmem:[%s11808_s7 + $0x1b0] sm:$0xff]  ;;  %v9092_v49 = vld [vmem:[%s11810_s9 + $0x60] sm:$0xff]  }
0x1025   : > { %4959 = vmatprep.subr.bf16.mxu1 %v7633_v27  ;;  %5032 = vmatprep.subr.bf16.mxu0 %v7635_v4  ;;  %v3867_v27 = vld [vmem:[%s11808_s7 + $0x1f0] sm:$0xff]  ;;  %v3860_v4 = vld [vmem:[%s11808_s7 + $0x1b8] sm:$0xff]  ;;  %v9094_v36 = vld [vmem:[%s11810_s9 + $0xe0] sm:$0xff]  }
0x1026   : > { %4865 = vmatprep.mubr.bf16.mxu1 %v9384_v5  ;;  %4938 = vmatprep.mubr.bf16.mxu0 %v9384_v5  ;;  %v7653_v31 = vcombine.high %v3859_v58, %v3867_v27  ;;  %v7652_v12 = vcombine.low %v3859_v58, %v3867_v27  ;;  %v7654_v17 = vcombine.low %v3860_v4, %v3868_v9  ;;  %v9099_v58 = vld [vmem:[%s11810_s9 + $0x98] sm:$0xff]   ;;  %v9100_v27 = vld [vmem:[%s11810_s9 + $0x50] sm:$0xff]  }
0x1028   : > { %4960 = vmatpush1.bf16.msra.mxu1 %v7632_v26  ;;  %5033 = vmatpush1.bf16.msra.mxu0 %v7634_v2  ;;  %v7655_v26 = vcombine.high %v3860_v4, %v3868_v9  ;;  %v3843_v2 = vld [vmem:[%s11808_s7 + $0x130] sm:$0xff] }
0x1029   : > { %4961 = vmatprep.subr.bf16.mxu1 %v7617_v11  ;;  %5034 = vmatprep.subr.bf16.mxu0 %v7619_v51  ;;  %v3851_v11 = vld [vmem:[%s11808_s7 + $0x170] sm:$0xff]  ;;  %v3844_v51 = vld [vmem:[%s11808_s7 + $0x138] sm:$0xff] }
0x102a   : > { %v7637_v21 = vcombine.high %v3843_v2, %v3851_v11  ;;  %v7636_v10 = vcombine.low %v3843_v2, %v3851_v11  ;;  %v7638_v57 = vcombine.low %v3844_v51, %v3852_v3  ;;  %v9102_v4 = vld [vmem:[%s11810_s9 + $0xd0] sm:$0xff]   ;;  %v9110_v2 = vld [vmem:[%s11810_s9 + $0xc0] sm:$0xff]  }
0x102b   : > { %4866 = vmatmul.mubr.bf16.gmra.mxu1 %v10674_v63  ;;  %4939 = vmatmul.mubr.bf16.gmra.mxu0 %v10674_v63  ;;  %v9101_v9 = vld [vmem:[%s11810_s9 + $0x10] sm:$0xff]   ;;  %v9109_v11 = vld [vmem:[%s11810_s9] sm:$0xff]  }
0x102c   : > { %4962 = vmatpush1.bf16.msra.mxu1 %v7616_v23  ;;  %5035 = vmatpush1.bf16.msra.mxu0 %v7618_v20  ;;  %v7639_v23 = vcombine.high %v3844_v51, %v3852_v3  ;;  %v3827_v20 = vld [vmem:[%s11808_s7 + $0xb0] sm:$0xff]  ;;  %v9111_v51 = vld [vmem:[%s11810_s9 + $0x80] sm:$0xff]   ;;  %v9112_v3 = vld [vmem:[%s11810_s9 + $0x178] sm:$0xff]  }
0x102d   : > { %4963 = vmatprep.subr.bf16.mxu1 %v7601_v62  ;;  %5036 = vmatprep.subr.bf16.mxu0 %v7603_v37  ;;  %v3835_v62 = vld [vmem:[%s11808_s7 + $0xf0] sm:$0xff]  ;;  %v3828_v37 = vld [vmem:[%s11808_s7 + $0xb8] sm:$0xff] }
0x102e   : > { %4981 = vmatprep.mubr.bf16.mxu1 %v9384_v5  ;;  %5054 = vmatprep.mubr.bf16.mxu0 %v9384_v5  ;;  %v7621_v19 = vcombine.high %v3827_v20, %v3835_v62  ;;  %v7620_v46 = vcombine.low %v3827_v20, %v3835_v62  ;;  %v7622_v59 = vcombine.low %v3828_v37, %v3836_v18 }
0x1030   : > { %4964 = vmatpush1.bf16.msra.mxu1 %v7600_v50  ;;  %5037 = vmatpush1.bf16.msra.mxu0 %v7602_v56  ;;  %v7623_v50 = vcombine.high %v3828_v37, %v3836_v18  ;;  %v3811_v56 = vld [vmem:[%s11808_s7 + $0x30] sm:$0xff]  ;;  %v11029_v37 = vld [vmem:[%s11809_s8] sm:$0xff] }
0x1031   : > { %5095 = vmatprep.subr.bf16.mxu1 %v7717_v33  ;;  %5168 = vmatprep.subr.bf16.mxu0 %v7719_v25  ;;  %v3819_v33 = vld [vmem:[%s11808_s7 + $0x70] sm:$0xff]  ;;  %v3812_v25 = vld [vmem:[%s11808_s7 + $0x38] sm:$0xff] }
0x1032   : > { %v7605_v44 = vcombine.high %v3811_v56, %v3819_v33 }
0x1033   : > { %4982 = vmatmul.mubr.bf16.vlgmr.msra.gmra.mxu1 %v10538_v14  ;;  %5055 = vmatmul.mubr.bf16.vlgmr.msra.gmra.mxu0 %v10538_v14 }
0x1034   : > { %5096 = vmatpush1.bf16.msra.mxu1 %v7716_v42  ;;  %5169 = vmatpush1.bf16.msra.mxu0 %v7718_v61  ;;  %v7607_v42 = vcombine.high %v3812_v25, %v3820_v7  ;;  %v7604_v61 = vcombine.low %v3811_v56, %v3819_v33 }
0x1035   : > { %5097 = vmatprep.subr.bf16.mxu1 %v7701_v29  ;;  %5170 = vmatprep.subr.bf16.mxu0 %v7703_v39  ;;  %v7606_v29 = vcombine.low %v3812_v25, %v3820_v7  ;;  %v9080_v39 = vld [vmem:[%s11810_s9 + $0x78] sm:$0xff]  }
0x1036   : > { %4991 = vmatprep.mubr.bf16.mxu1 %v9384_v5  ;;  %5064 = vmatprep.mubr.bf16.mxu0 %v9384_v5 }
0x1038   : > { %5098 = vmatpush1.bf16.msra.mxu1 %v7700_v30  ;;  %5171 = vmatpush1.bf16.msra.mxu0 %v7702_v54  ;;  %v9086_v30 = vld [vmem:[%s11810_s9 + $0xf0] sm:$0xff]  }
0x1039   : > { %5099 = vmatprep.subr.bf16.mxu1 %v7685_v60  ;;  %5172 = vmatprep.subr.bf16.mxu0 %v7687_v34  ;;  %v9085_v54 = vld [vmem:[%s11810_s9 + $0x30] sm:$0xff]   ;;  %v9090_v34 = vld [vmem:[%s11810_s9 + $0xe8] sm:$0xff]  }
0x103a   : > { %v9087_v60 = vld [vmem:[%s11810_s9 + $0xb0] sm:$0xff]  }
0x103b   : > { %4992 = vmatmul.mubr.bf16.gmra.mxu1 %v10588_v28  ;;  %5065 = vmatmul.mubr.bf16.gmra.mxu0 %v10588_v28 }
0x103c   : > { %5100 = vmatpush1.bf16.msra.mxu1 %v7684_v8  ;;  %5173 = vmatpush1.bf16.msra.mxu0 %v7686_v55  ;;  %v9093_v8 = vld [vmem:[%s11810_s9 + $0x20] sm:$0xff]  }
0x103d   : > { %5101 = vmatprep.subr.bf16.mxu1 %v7669_v6  ;;  %5174 = vmatprep.subr.bf16.mxu0 %v7671_v24  ;;  %v9095_v55 = vld [vmem:[%s11810_s9 + $0xa0] sm:$0xff]   ;;  %v9098_v6 = vld [vmem:[%s11810_s9 + $0xd8] sm:$0xff]  }
0x103e   : > { %5001 = vmatprep.mubr.bf16.mxu1 %v9384_v5  ;;  %5074 = vmatprep.mubr.bf16.mxu0 %v9384_v5  ;;  %v9097_v24 = vld [vmem:[%s11810_s9 + $0x18] sm:$0xff]  }
0x1040   : > { %5102 = vmatpush1.bf16.msra.mxu1 %v7668_v53  ;;  %5175 = vmatpush1.bf16.msra.mxu0 %v7670_v40  ;;  %v9103_v53 = vld [vmem:[%s11810_s9 + $0x90] sm:$0xff]   ;;  %v9105_v40 = vld [vmem:[%s11810_s9 + $0x8] sm:$0xff]  }
0x1041   : > { %5103 = vmatprep.subr.bf16.mxu1 %v7653_v31  ;;  %5176 = vmatprep.subr.bf16.mxu0 %v7655_v26  ;;  %v9107_v31 = vld [vmem:[%s11810_s9 + $0x88] sm:$0xff]   ;;  %v9108_v26 = vld [vmem:[%s11810_s9 + $0x40] sm:$0xff]  }
0x1043   : > { %5002 = vmatmul.mubr.bf16.gmra.mxu1 %v10632_v52  ;;  %5075 = vmatmul.mubr.bf16.gmra.mxu0 %v10632_v52 }
0x1044   : > { %5104 = vmatpush1.bf16.msra.mxu1 %v7652_v12  ;;  %5177 = vmatpush1.bf16.msra.mxu0 %v7654_v17  ;;  %v3937_v12 = vlaneseq }
0x1045   : > { %5105 = vmatprep.subr.bf16.mxu1 %v7637_v21  ;;  %5178 = vmatprep.subr.bf16.mxu0 %v7639_v23 }
0x1046   : > { %5011 = vmatprep.mubr.bf16.mxu1 %v9384_v5  ;;  %5084 = vmatprep.mubr.bf16.mxu0 %v9384_v5  ;;  %v11020_v17 = vshrl.u32 %v3937_v12, 7 }
0x1048   : > { %5106 = vmatpush1.bf16.msra.mxu1 %v7636_v10  ;;  %5179 = vmatpush1.bf16.msra.mxu0 %v7638_v57  ;;  %v3943_v21 = vsub.s32 1, %v11020_v17  ;;  %v3951_v23 = vsub.s32 3, %v11020_v17  ;;  %v3939_v20 = vsub.s32 0, %v11020_v17  ;;  %v3947_v62 = vsub.s32 2, %v11020_v17 }
0x1049   : > { %5107 = vmatprep.subr.bf16.mxu1 %v7621_v19  ;;  %5180 = vmatprep.subr.bf16.mxu0 %v7623_v50 }
0x104a   : > { %v11034_v57 = vrot.slane %v11029_v37, %v3943_v21  ;;  %v11039_v19 = vrot.slane %v11029_v37, %v3951_v23  ;;  %v11044_v50 = vrot.slane %v11029_v37, %v3939_v20  ;;  %v11049_v56 = vrot.slane %v11029_v37, %v3947_v62 }
0x104b   : > { %5012 = vmatmul.mubr.bf16.gmra.mxu1 %v10674_v63  ;;  %5085 = vmatmul.mubr.bf16.gmra.mxu0 %v10674_v63 }
0x104c   : > { %5108 = vmatpush1.bf16.msra.mxu1 %v7620_v46  ;;  %5181 = vmatpush1.bf16.msra.mxu0 %v7622_v59 }
0x104d   : > { %5109 = vmatprep.subr.bf16.mxu1 %v7605_v44  ;;  %5182 = vmatprep.subr.bf16.mxu0 %v7607_v42 }
0x104e   : > { %5127 = vmatprep.mubr.bf16.mxu1 %v9384_v5  ;;  %5200 = vmatprep.mubr.bf16.mxu0 %v9384_v5 }
0x1050   : > { %5110 = vmatpush1.bf16.msra.mxu1 %v7604_v61  ;;  %5183 = vmatpush1.bf16.msra.mxu0 %v7606_v29 }
0x1051   : > { %8111 = vmatprep.subr.bf16.mxu1 %v9080_v39  ;;  %8151 = vmatprep.subr.bf16.mxu0 %v9082_v43 }
0x1053   : > { %5128 = vmatmul.mubr.bf16.vlgmr.msra.gmra.mxu1 %v10538_v14  ;;  %5201 = vmatmul.mubr.bf16.vlgmr.msra.gmra.mxu0 %v10538_v14  ;;  %v9088_v14 = vld [vmem:[%s11810_s9 + $0x68] sm:$0xff]  }
0x1054   : > { %5137 = vmatprep.mubr.bf16.mxu1 %v9384_v5  ;;  %5210 = vmatprep.mubr.bf16.mxu0 %v9384_v5 }
0x1055   : > { %8112 = vmatpush3.bf16.msra.mxu1 %v9081_v45  ;;  %8152 = vmatpush3.bf16.msra.mxu0 %v9083_v0 }
0x1056   : > { %8113 = vmatprep.subr.bf16.mxu1 %v9084_v41  ;;  %8153 = vmatprep.subr.bf16.mxu0 %v9086_v30 }
0x1059   : > { %8114 = vmatpush3.bf16.msra.mxu1 %v9085_v54  ;;  %8154 = vmatpush3.bf16.msra.mxu0 %v9087_v60 }
0x105a   : > { %8115 = vmatprep.subr.bf16.mxu1 %v9088_v14  ;;  %8155 = vmatprep.subr.bf16.mxu0 %v9090_v34 }
0x105b   : > { %5138 = vmatmul.mubr.bf16.gmra.mxu1 %v10588_v28  ;;  %5211 = vmatmul.mubr.bf16.gmra.mxu0 %v10588_v28  ;;  %v9096_v28 = vld [vmem:[%s11810_s9 + $0x58] sm:$0xff]  }
0x105c   : > { %5147 = vmatprep.mubr.bf16.mxu1 %v9384_v5  ;;  %5220 = vmatprep.mubr.bf16.mxu0 %v9384_v5 }
0x105d   : > { %8116 = vmatpush3.bf16.msra.mxu1 %v9089_v38  ;;  %8156 = vmatpush3.bf16.msra.mxu0 %v9091_v35 }
0x105e   : > { %8117 = vmatprep.subr.bf16.mxu1 %v9092_v49  ;;  %8157 = vmatprep.subr.bf16.mxu0 %v9094_v36 }
0x1061   : > { %8118 = vmatpush3.bf16.msra.mxu1 %v9093_v8  ;;  %8158 = vmatpush3.bf16.msra.mxu0 %v9095_v55 }
0x1062   : > { %8119 = vmatprep.subr.bf16.mxu1 %v9096_v28  ;;  %8159 = vmatprep.subr.bf16.mxu0 %v9098_v6 }
0x1063   : > { %5148 = vmatmul.mubr.bf16.gmra.mxu1 %v10632_v52  ;;  %5221 = vmatmul.mubr.bf16.gmra.mxu0 %v10632_v52  ;;  %v9104_v52 = vld [vmem:[%s11810_s9 + $0x48] sm:$0xff]  }
0x1064   : > { %5157 = vmatprep.mubr.bf16.mxu1 %v9384_v5  ;;  %5230 = vmatprep.mubr.bf16.mxu0 %v9384_v5  ;;  %v9106_v5 = vld [vmem:[%s11810_s9 + $0xc8] sm:$0xff]  }
0x1065   : > { %8120 = vmatpush3.bf16.msra.mxu1 %v9097_v24  ;;  %8160 = vmatpush3.bf16.msra.mxu0 %v9099_v58  ;;  %v9113_v58 = vld [vmem:[%s11810_s9 + $0x138] sm:$0xff]  }
0x1066   : > { %8121 = vmatprep.subr.bf16.mxu1 %v9100_v27  ;;  %8161 = vmatprep.subr.bf16.mxu0 %v9102_v4  ;;  %v9115_v27 = vld [vmem:[%s11810_s9 + $0x1b8] sm:$0xff]  }
0x1069   : > { %8122 = vmatpush3.bf16.msra.mxu1 %v9101_v9  ;;  %8162 = vmatpush3.bf16.msra.mxu0 %v9103_v53 }
0x106a   : > { %8123 = vmatprep.subr.bf16.mxu1 %v9104_v52  ;;  %8163 = vmatprep.subr.bf16.mxu0 %v9106_v5  ;;  %v9116_v5 = vld [vmem:[%s11810_s9 + $0x170] sm:$0xff]  }
0x106b   : > { %5158 = vmatmul.mubr.bf16.gmra.mxu1 %v10674_v63  ;;  %5231 = vmatmul.mubr.bf16.gmra.mxu0 %v10674_v63  ;;  %v9114_v63 = vld [vmem:[%s11810_s9 + $0x1f8] sm:$0xff]  }
0x106d   : > { %8124 = vmatpush3.bf16.msra.mxu1 %v9105_v40  ;;  %8164 = vmatpush3.bf16.msra.mxu0 %v9107_v31  ;;  %v9118_v40 = vld [vmem:[%s11810_s9 + $0x1f0] sm:$0xff]  }
0x106e   : > { %8125 = vmatprep.subr.bf16.mxu1 %v9108_v26  ;;  %8165 = vmatprep.subr.bf16.mxu0 %v9110_v2 }
0x1071   : > { %8126 = vmatpush3.bf16.msra.mxu1 %v9109_v11  ;;  %8166 = vmatpush3.bf16.msra.mxu0 %v9111_v51 }
0x1072   : > { %8191 = vmatprep.subr.bf16.mxu1 %v9112_v3  ;;  %8231 = vmatprep.subr.bf16.mxu0 %v9114_v63 }
0x10b3   : > { %v4691_v18 = vpop.f32.mrf.mxu1  ;;  %v4764_v10 = vpop.f32.mrf.mxu0 }
0x10b4   : > { %v4692_v29 = vadd.f32 %v4691_v18, %v11044_v50  ;;  %v4765_v39 = vadd.f32 %v4764_v10, %v11049_v56 }
0x10b5   : > { %v4693_v33 = vpop.f32.mrf.mxu1  ;;  %v4766_v25 = vpop.f32.mrf.mxu0 }
0x10b6   : > { %v4694_v59 = vadd.f32 %v4693_v33, %v11034_v57  ;;  %v4767_v44 = vadd.f32 %v4766_v25, %v11039_v19  ;;  %v5241_v36 = vmax.f32 %v4692_v29, 0.0  ;;  %v5243_v8 = vmax.f32 %v4765_v39, 0.0  ;;  %v9117_v33 = vld [vmem:[%s11810_s9 + $0x130] sm:$0xff]  }
0x10b7   : > { %v4695_v7 = vpop.f32.mrf.mxu1  ;;  %v4768_v46 = vpop.f32.mrf.mxu0  ;;  %v9119_v25 = vld [vmem:[%s11810_s9 + $0x1b0] sm:$0xff]  }
0x10b8   : > { %v4696_v42 = vadd.f32 %v4695_v7, %v11044_v50  ;;  %v4769_v61 = vadd.f32 %v4768_v46, %v11049_v56  ;;  %v5242_v34 = vmax.f32 %v4694_v59, 0.0  ;;  %v5244_v38 = vmax.f32 %v4767_v44, 0.0 }
0x10b9   : > { %v4697_v43 = vpop.f32.mrf.mxu1  ;;  %v4770_v45 = vpop.f32.mrf.mxu0 }
0x10ba   : > { %v4698_v0 = vadd.f32 %v4697_v43, %v11034_v57  ;;  %v4771_v41 = vadd.f32 %v4770_v45, %v11039_v19  ;;  %v5257_v30 = vmax.f32 %v4696_v42, 0.0  ;;  %v5259_v54 = vmax.f32 %v4769_v61, 0.0  ;;  %v9120_v42 = vld [vmem:[%s11810_s9 + $0x168] sm:$0xff]  }
0x10bb   : > { %v4701_v60 = vpop.f32.mrf.mxu1  ;;  %v4774_v14 = vpop.f32.mrf.mxu0  ;;  %v9122_v61 = vld [vmem:[%s11810_s9 + $0x1e8] sm:$0xff]  }
0x10bc   : > { %v5258_v35 = vmax.f32 %v4698_v0, 0.0  ;;  %v5260_v49 = vmax.f32 %v4771_v41, 0.0  ;;  %v5369_v4 = vpack.c.bf16 %v5257_v30, %v5241_v36  ;;  %v5371_v9 = vpack.c.bf16 %v5259_v54, %v5243_v8  ;;  %v9123_v8 = vld [vmem:[%s11810_s9 + $0x1a8] sm:$0xff]  }
0x10bd   : > { %v4703_v55 = vpop.f32.mrf.mxu1  ;;  %v4776_v28 = vpop.f32.mrf.mxu0  ;;  %v4702_v11 = vadd.f32 %v4701_v60, %v11044_v50  ;;  %v4775_v51 = vadd.f32 %v4774_v14, %v11049_v56  ;;  %v9121_v14 = vld [vmem:[%s11810_s9 + $0x128] sm:$0xff]  }
0x10be   : > { %v5370_v6 = vpack.c.bf16 %v5258_v35, %v5242_v34  ;;  %v5372_v24 = vpack.c.bf16 %v5260_v49, %v5244_v38  ;;  %v4704_v31 = vadd.f32 %v4703_v55, %v11034_v57  ;;  %v4777_v3 = vadd.f32 %v4776_v28, %v11039_v19  ;;  %v9124_v55 = vld [vmem:[%s11810_s9 + $0x160] sm:$0xff]  }
0x10bf   : > { %v4705_v53 = vpop.f32.mrf.mxu1  ;;  %v4778_v52 = vpop.f32.mrf.mxu0  ;;  %v5273_v45 = vmax.f32 %v4702_v11, 0.0  ;;  %v5275_v0 = vmax.f32 %v4775_v51, 0.0 }
0x10c0   : > { %v4706_v26 = vadd.f32 %v4705_v53, %v11044_v50  ;;  %v4779_v2 = vadd.f32 %v4778_v52, %v11049_v56  ;;  %6496 = vmatprep.mubr.bf16.mxu1 %v5370_v6  ;;  %6561 = vmatprep.mubr.bf16.mxu0 %v5372_v24  ;;  %v5274_v29 = vmax.f32 %v4704_v31, 0.0  ;;  %v5276_v41 = vmax.f32 %v4777_v3, 0.0  ;;  %v9125_v31 = vld [vmem:[%s11810_s9 + $0x120] sm:$0xff]  }
0x10c1   : > { %v4707_v63 = vpop.f32.mrf.mxu1  ;;  %v4780_v12 = vpop.f32.mrf.mxu0  ;;  %6497 = vmatmul.mubr.bf16.vlgmr.msra.gmra.mxu1 %v5369_v4  ;;  %6562 = vmatmul.mubr.bf16.vlgmr.msra.gmra.mxu0 %v5371_v9  ;;  %v9127_v3 = vld [vmem:[%s11810_s9 + $0x1a0] sm:$0xff]  }
0x10c2   : > { %v4708_v18 = vadd.f32 %v4707_v63, %v11034_v57  ;;  %v4781_v10 = vadd.f32 %v4780_v12, %v11039_v19  ;;  %8192 = vmatpush3.bf16.msra.mxu1 %v9113_v58  ;;  %8232 = vmatpush3.bf16.msra.mxu0 %v9115_v27  ;;  %v5289_v7 = vmax.f32 %v4706_v26, 0.0  ;;  %v5291_v46 = vmax.f32 %v4779_v2, 0.0  ;;  %v9126_v27 = vld [vmem:[%s11810_s9 + $0x1e0] sm:$0xff]   ;;  %v9128_v63 = vld [vmem:[%s11810_s9 + $0x158] sm:$0xff]  }
0x10c3   : > { %v4711_v59 = vpop.f32.mrf.mxu1  ;;  %v4784_v44 = vpop.f32.mrf.mxu0  ;;  %8193 = vmatprep.subr.bf16.mxu1 %v9116_v5  ;;  %8233 = vmatprep.subr.bf16.mxu0 %v9118_v40 }
0x10c4   : > { %v5290_v39 = vmax.f32 %v4708_v18, 0.0  ;;  %v5292_v43 = vmax.f32 %v4781_v10, 0.0  ;;  %v5385_v34 = vpack.c.bf16 %v5289_v7, %v5273_v45  ;;  %v5387_v38 = vpack.c.bf16 %v5291_v46, %v5275_v0 }
0x10c5   : > { %v4713_v30 = vpop.f32.mrf.mxu1  ;;  %v4786_v54 = vpop.f32.mrf.mxu0  ;;  %v4712_v4 = vadd.f32 %v4711_v59, %v11044_v50  ;;  %v4785_v9 = vadd.f32 %v4784_v44, %v11049_v56  ;;  %v9130_v44 = vld [vmem:[%s11810_s9 + $0x1d8] sm:$0xff]  }
0x10c6   : > { %8194 = vmatpush3.bf16.msra.mxu1 %v9117_v33  ;;  %8234 = vmatpush3.bf16.msra.mxu0 %v9119_v25  ;;  %v5386_v60 = vpack.c.bf16 %v5290_v39, %v5274_v29  ;;  %v5388_v36 = vpack.c.bf16 %v5292_v43, %v5276_v41  ;;  %v4714_v28 = vadd.f32 %v4713_v30, %v11034_v57  ;;  %v9129_v29 = vld [vmem:[%s11810_s9 + $0x118] sm:$0xff]   ;;  %v3959_v39 = vsub.s32 5, %v11020_v17 }
0x10c7   : > { %v4715_v35 = vpop.f32.mrf.mxu1  ;;  %v4788_v49 = vpop.f32.mrf.mxu0  ;;  %8195 = vmatprep.subr.bf16.mxu1 %v9120_v42  ;;  %8235 = vmatprep.subr.bf16.mxu0 %v9122_v61  ;;  %v4787_v6 = vadd.f32 %v4786_v54, %v11039_v19  ;;  %v5305_v25 = vmax.f32 %v4712_v4, 0.0  ;;  %v5307_v7 = vmax.f32 %v4785_v9, 0.0  ;;  %v9131_v54 = vld [vmem:[%s11810_s9 + $0x198] sm:$0xff]  }
0x10c8   : > { %v4716_v24 = vadd.f32 %v4715_v35, %v11044_v50  ;;  %v4789_v58 = vadd.f32 %v4788_v49, %v11049_v56  ;;  %6504 = vmatprep.mubr.bf16.mxu1 %v5386_v60  ;;  %6569 = vmatprep.mubr.bf16.mxu0 %v5388_v36  ;;  %v5306_v12 = vmax.f32 %v4714_v28, 0.0  ;;  %v9132_v60 = vld [vmem:[%s11810_s9 + $0x150] sm:$0xff]  }
0x10c9   : > { %v4717_v53 = vpop.f32.mrf.mxu1  ;;  %v4790_v52 = vpop.f32.mrf.mxu0  ;;  %6505 = vmatmul.mubr.bf16.gmra.mxu1 %v5385_v34  ;;  %6570 = vmatmul.mubr.bf16.gmra.mxu0 %v5387_v38  ;;  %v5308_v18 = vmax.f32 %v4787_v6, 0.0  ;;  %v9134_v49 = vld [vmem:[%s11810_s9 + $0x1d0] sm:$0xff]   ;;  %v3955_v6 = vsub.s32 4, %v11020_v17 }
0x10ca   : > { %v4718_v5 = vadd.f32 %v4717_v53, %v11034_v57  ;;  %v4791_v40 = vadd.f32 %v4790_v52, %v11039_v19  ;;  %8196 = vmatpush3.bf16.msra.mxu1 %v9121_v14  ;;  %v5321_v26 = vmax.f32 %v4716_v24, 0.0  ;;  %v5323_v2 = vmax.f32 %v4789_v58, 0.0  ;;  %8236 = vmatpush3.bf16.msra.mxu0 %v9123_v8 }
0x10cb   : > { %v4721_v11 = vpop.f32.mrf.mxu1  ;;  %v4794_v51 = vpop.f32.mrf.mxu0  ;;  %8197 = vmatprep.subr.bf16.mxu1 %v9124_v55  ;;  %8237 = vmatprep.subr.bf16.mxu0 %v9126_v27  ;;  %v3967_v14 = vsub.s32 7, %v11020_v17  ;;  %v3963_v24 = vsub.s32 6, %v11020_v17  ;;  %v11153_v52 = vrot.slane %v11029_v37, %v3959_v39 }
0x10cc   : > { %v5322_v10 = vmax.f32 %v4718_v5, 0.0  ;;  %v5324_v33 = vmax.f32 %v4791_v40, 0.0  ;;  %v5401_v43 = vpack.c.bf16 %v5321_v26, %v5305_v25  ;;  %v5403_v45 = vpack.c.bf16 %v5323_v2, %v5307_v7  ;;  %v9136_v5 = vld [vmem:[%s11810_s9 + $0x148] sm:$0xff]  }
0x10cd   : > { %v4723_v46 = vpop.f32.mrf.mxu1  ;;  %v4796_v59 = vpop.f32.mrf.mxu0  ;;  %v4722_v36 = vadd.f32 %v4721_v11, %v11044_v50  ;;  %v4795_v8 = vadd.f32 %v4794_v51, %v11049_v56  ;;  %v9137_v7 = vld [vmem:[%s11810_s9 + $0x108] sm:$0xff]  }
0x10ce   : > { %8198 = vmatpush3.bf16.msra.mxu1 %v9125_v31  ;;  %v5402_v42 = vpack.c.bf16 %v5322_v10, %v5306_v12  ;;  %v5404_v61 = vpack.c.bf16 %v5324_v33, %v5308_v18  ;;  %v4724_v0 = vadd.f32 %v4723_v46, %v11034_v57  ;;  %8238 = vmatpush3.bf16.msra.mxu0 %v9127_v3  ;;  %v9138_v10 = vld [vmem:[%s11810_s9 + $0x1c8] sm:$0xff]  }
0x10cf   : > { %v4725_v41 = vpop.f32.mrf.mxu1  ;;  %v4798_v30 = vpop.f32.mrf.mxu0  ;;  %8199 = vmatprep.subr.bf16.mxu1 %v9128_v63  ;;  %v4797_v34 = vadd.f32 %v4796_v59, %v11039_v19  ;;  %8239 = vmatprep.subr.bf16.mxu0 %v9130_v44  ;;  %v5337_v11 = vmax.f32 %v4722_v36, 0.0  ;;  %v5339_v51 = vmax.f32 %v4795_v8, 0.0  ;;  %v11169_v3 = vrot.slane %v11029_v37, %v3955_v6 }
0x10d0   : > { %v4726_v38 = vadd.f32 %v4725_v41, %v11044_v50  ;;  %v4799_v35 = vadd.f32 %v4798_v30, %v11049_v56  ;;  %6512 = vmatprep.mubr.bf16.mxu1 %v5402_v42  ;;  %6577 = vmatprep.mubr.bf16.mxu0 %v5404_v61  ;;  %v9133_v50 = vld [vmem:[%s11810_s9 + $0x110] sm:$0xff]   ;;  %v5338_v40 = vmax.f32 %v4724_v0, 0.0  ;;  %v11174_v63 = vrot.slane %v11029_v37, %v3963_v24  ;;  %v9139_v61 = vld [vmem:[%s11810_s9 + $0x188] sm:$0xff]   ;;  %v9142_v41 = vld [vmem:[%s11810_s9 + $0x1c0] sm:$0xff]  }
0x10d1   : > { %v4727_v55 = vpop.f32.mrf.mxu1  ;;  %v4800_v28 = vpop.f32.mrf.mxu0  ;;  %6513 = vmatmul.mubr.bf16.gmra.mxu1 %v5401_v43  ;;  %6578 = vmatmul.mubr.bf16.gmra.mxu0 %v5403_v45  ;;  %v5340_v31 = vmax.f32 %v4797_v34, 0.0 }
0x10d2   : > { %v4728_v58 = vadd.f32 %v4727_v55, %v11034_v57  ;;  %v4801_v27 = vadd.f32 %v4800_v28, %v11039_v19  ;;  %8200 = vmatpush3.bf16.msra.mxu1 %v9129_v29  ;;  %v5353_v4 = vmax.f32 %v4726_v38, 0.0  ;;  %v5355_v56 = vmax.f32 %v4799_v35, 0.0  ;;  %8240 = vmatpush3.bf16.msra.mxu0 %v9131_v54  ;;  %v9135_v19 = vld [vmem:[%s11810_s9 + $0x190] sm:$0xff]   ;;  %v9140_v29 = vld [vmem:[%s11810_s9 + $0x140] sm:$0xff]  }
0x10d3   : > { %v4837_v9 = vpop.f32.mrf.mxu1  ;;  %v4910_v53 = vpop.f32.mrf.mxu0  ;;  %8201 = vmatprep.subr.bf16.mxu1 %v9132_v60  ;;  %v11158_v57 = vrot.slane %v11029_v37, %v3967_v14  ;;  %8241 = vmatprep.subr.bf16.mxu0 %v9134_v49  ;;  %v9141_v49 = vld [vmem:[%s11810_s9 + $0x100] sm:$0xff]  }
0x10d4   : > { %v5354_v26 = vmax.f32 %v4728_v58, 0.0  ;;  %v5356_v2 = vmax.f32 %v4801_v27, 0.0  ;;  %v5417_v46 = vpack.c.bf16 %v5353_v4, %v5337_v11  ;;  %v5419_v59 = vpack.c.bf16 %v5355_v56, %v5339_v51  ;;  %v9143_v58 = vld [vmem:[%s11810_s9 + $0x180] sm:$0xff]   ;;  %v9144_v27 = vld [vmem:[%s11810_s9 + $0x278] sm:$0xff]  }
0x10d5   : > { %v4839_v12 = vpop.f32.mrf.mxu1  ;;  %v4912_v18 = vpop.f32.mrf.mxu0  ;;  %v4838_v30 = vadd.f32 %v4837_v9, %v11169_v3  ;;  %v4911_v54 = vadd.f32 %v4910_v53, %v11174_v63  ;;  %v9145_v11 = vld [vmem:[%s11810_s9 + $0x238] sm:$0xff]  }
0x10d6   : > { %8202 = vmatpush3.bf16.msra.mxu1 %v9133_v50  ;;  %v5418_v33 = vpack.c.bf16 %v5354_v26, %v5338_v40  ;;  %v5420_v25 = vpack.c.bf16 %v5356_v2, %v5340_v31  ;;  %v4840_v44 = vadd.f32 %v4839_v12, %v11153_v52  ;;  %8242 = vmatpush3.bf16.msra.mxu0 %v9135_v19  ;;  %v9146_v31 = vld [vmem:[%s11810_s9 + $0x2f8] sm:$0xff]  }
0x10d7   : > { %v4841_v37 = vpop.f32.mrf.mxu1  ;;  %v4914_v42 = vpop.f32.mrf.mxu0  ;;  %8203 = vmatprep.subr.bf16.mxu1 %v9136_v5  ;;  %v4913_v43 = vadd.f32 %v4912_v18, %v11158_v57  ;;  %8243 = vmatprep.subr.bf16.mxu0 %v9138_v10  ;;  %v5245_v53 = vmax.f32 %v4838_v30, 0.0  ;;  %v5247_v19 = vmax.f32 %v4911_v54, 0.0 }
0x10d8   : > { %v4842_v45 = vadd.f32 %v4841_v37, %v11169_v3  ;;  %v4915_v0 = vadd.f32 %v4914_v42, %v11174_v63  ;;  %6520 = vmatprep.mubr.bf16.mxu1 %v5418_v33  ;;  %6585 = vmatprep.mubr.bf16.mxu0 %v5420_v25  ;;  %v5246_v50 = vmax.f32 %v4840_v44, 0.0  ;;  %v9147_v25 = vld [vmem:[%s11810_s9 + $0x2b8] sm:$0xff]   ;;  %v9150_v37 = vld [vmem:[%s11810_s9 + $0x2f0] sm:$0xff]  }
0x10d9   : > { %v4843_v60 = vpop.f32.mrf.mxu1  ;;  %v4916_v34 = vpop.f32.mrf.mxu0  ;;  %6521 = vmatmul.mubr.bf16.gmra.mxu1 %v5417_v46  ;;  %6586 = vmatmul.mubr.bf16.gmra.mxu0 %v5419_v59  ;;  %v5248_v4 = vmax.f32 %v4913_v43, 0.0 }
0x10da   : > { %v4844_v38 = vadd.f32 %v4843_v60, %v11153_v52  ;;  %v4917_v35 = vadd.f32 %v4916_v34, %v11158_v57  ;;  %8204 = vmatpush3.bf16.msra.mxu1 %v9137_v7  ;;  %v5261_v36 = vmax.f32 %v4842_v45, 0.0  ;;  %v5263_v8 = vmax.f32 %v4915_v0, 0.0  ;;  %8244 = vmatpush3.bf16.msra.mxu0 %v9139_v61  ;;  %v9148_v7 = vld [vmem:[%s11810_s9 + $0x270] sm:$0xff]  }
0x10db   : > { %v4847_v55 = vpop.f32.mrf.mxu1  ;;  %v4920_v28 = vpop.f32.mrf.mxu0  ;;  %8205 = vmatprep.subr.bf16.mxu1 %v9140_v29  ;;  %8245 = vmatprep.subr.bf16.mxu0 %v9142_v41  ;;  %v9149_v41 = vld [vmem:[%s11810_s9 + $0x230] sm:$0xff]  }
0x10dc   : > { %v5262_v56 = vmax.f32 %v4844_v38, 0.0  ;;  %v5264_v9 = vmax.f32 %v4917_v35, 0.0  ;;  %v5373_v51 = vpack.c.bf16 %v5261_v36, %v5245_v53  ;;  %v5375_v12 = vpack.c.bf16 %v5263_v8, %v5247_v19  ;;  %v9151_v38 = vld [vmem:[%s11810_s9 + $0x2b0] sm:$0xff]   ;;  %v9152_v35 = vld [vmem:[%s11810_s9 + $0x268] sm:$0xff]  }
0x10dd   : > { %v4849_v5 = vpop.f32.mrf.mxu1  ;;  %v4922_v40 = vpop.f32.mrf.mxu0  ;;  %v4848_v42 = vadd.f32 %v4847_v55, %v11169_v3  ;;  %v4921_v61 = vadd.f32 %v4920_v28, %v11174_v63  ;;  %v9153_v53 = vld [vmem:[%s11810_s9 + $0x228] sm:$0xff]  }
0x10de   : > { %v5374_v26 = vpack.c.bf16 %v5262_v56, %v5246_v50  ;;  %v5376_v2 = vpack.c.bf16 %v5264_v9, %v5248_v4  ;;  %8206 = vmatpush3.bf16.msra.mxu1 %v9141_v49  ;;  %v4850_v18 = vadd.f32 %v4849_v5, %v11153_v52  ;;  %8246 = vmatpush3.bf16.msra.mxu0 %v9143_v58  ;;  %v9154_v4 = vld [vmem:[%s11810_s9 + $0x2e8] sm:$0xff]  }
0x10df   : > { %v4851_v10 = vpop.f32.mrf.mxu1  ;;  %v4924_v33 = vpop.f32.mrf.mxu0  ;;  %8271 = vmatprep.subr.bf16.mxu1 %v9144_v27  ;;  %v4923_v46 = vadd.f32 %v4922_v40, %v11158_v57  ;;  %8311 = vmatprep.subr.bf16.mxu0 %v9146_v31  ;;  %v5277_v28 = vmax.f32 %v4848_v42, 0.0  ;;  %v5279_v58 = vmax.f32 %v4921_v61, 0.0 }
0x10e0   : > { %v4852_v59 = vadd.f32 %v4851_v10, %v11169_v3  ;;  %v4925_v44 = vadd.f32 %v4924_v33, %v11174_v63  ;;  %6626 = vmatprep.mubr.bf16.mxu1 %v5374_v26  ;;  %6691 = vmatprep.mubr.bf16.mxu0 %v5376_v2  ;;  %v5278_v49 = vmax.f32 %v4850_v18, 0.0  ;;  %v9155_v2 = vld [vmem:[%s11810_s9 + $0x2a8] sm:$0xff]   ;;  %v9158_v10 = vld [vmem:[%s11810_s9 + $0x2e0] sm:$0xff]  }
0x10e1   : > { %v4853_v29 = vpop.f32.mrf.mxu1  ;;  %v4926_v43 = vpop.f32.mrf.mxu0  ;;  %6627 = vmatmul.mubr.bf16.vlgmr.msra.gmra.mxu1 %v5373_v51  ;;  %6692 = vmatmul.mubr.bf16.vlgmr.msra.gmra.mxu0 %v5375_v12  ;;  %v5280_v36 = vmax.f32 %v4923_v46, 0.0 }
0x10e2   : > { %v4854_v45 = vadd.f32 %v4853_v29, %v11153_v52  ;;  %v4927_v0 = vadd.f32 %v4926_v43, %v11158_v57  ;;  %8272 = vmatpush3.bf16.msra.mxu1 %v9145_v11  ;;  %v5293_v30 = vmax.f32 %v4852_v59, 0.0  ;;  %v5295_v54 = vmax.f32 %v4925_v44, 0.0  ;;  %8312 = vmatpush3.bf16.msra.mxu0 %v9147_v25  ;;  %v9156_v11 = vld [vmem:[%s11810_s9 + $0x260] sm:$0xff]  }
0x10e3   : > { %v4857_v60 = vpop.f32.mrf.mxu1  ;;  %v4930_v34 = vpop.f32.mrf.mxu0  ;;  %8273 = vmatprep.subr.bf16.mxu1 %v9148_v7  ;;  %8313 = vmatprep.subr.bf16.mxu0 %v9150_v37  ;;  %v9157_v37 = vld [vmem:[%s11810_s9 + $0x220] sm:$0xff]  }
0x10e4   : > { %v5294_v8 = vmax.f32 %v4854_v45, 0.0  ;;  %v5296_v55 = vmax.f32 %v4927_v0, 0.0  ;;  %v5389_v19 = vpack.c.bf16 %v5293_v30, %v5277_v28  ;;  %v5391_v5 = vpack.c.bf16 %v5295_v54, %v5279_v58  ;;  %v9159_v45 = vld [vmem:[%s11810_s9 + $0x2a0] sm:$0xff]   ;;  %v9160_v0 = vld [vmem:[%s11810_s9 + $0x258] sm:$0xff]  }
0x10e5   : > { %v4859_v27 = vpop.f32.mrf.mxu1  ;;  %v4932_v50 = vpop.f32.mrf.mxu0  ;;  %v4858_v33 = vadd.f32 %v4857_v60, %v11169_v3  ;;  %v4931_v25 = vadd.f32 %v4930_v34, %v11174_v63  ;;  %v9161_v28 = vld [vmem:[%s11810_s9 + $0x218] sm:$0xff]  }
0x10e6   : > { %v5390_v56 = vpack.c.bf16 %v5294_v8, %v5278_v49  ;;  %v5392_v9 = vpack.c.bf16 %v5296_v55, %v5280_v36  ;;  %8274 = vmatpush3.bf16.msra.mxu1 %v9149_v41  ;;  %v4860_v40 = vadd.f32 %v4859_v27, %v11153_v52  ;;  %8314 = vmatpush3.bf16.msra.mxu0 %v9151_v38  ;;  %v9162_v36 = vld [vmem:[%s11810_s9 + $0x2d8] sm:$0xff]  }
0x10e7   : > { %v4861_v31 = vpop.f32.mrf.mxu1  ;;  %v4934_v26 = vpop.f32.mrf.mxu0  ;;  %8275 = vmatprep.subr.bf16.mxu1 %v9152_v35  ;;  %v4933_v51 = vadd.f32 %v4932_v50, %v11158_v57  ;;  %8315 = vmatprep.subr.bf16.mxu0 %v9154_v4  ;;  %v5309_v34 = vmax.f32 %v4858_v33, 0.0  ;;  %v5311_v38 = vmax.f32 %v4931_v25, 0.0 }
0x10e8   : > { %v4862_v12 = vadd.f32 %v4861_v31, %v11169_v3  ;;  %v4935_v18 = vadd.f32 %v4934_v26, %v11174_v63  ;;  %6634 = vmatprep.mubr.bf16.mxu1 %v5390_v56  ;;  %6699 = vmatprep.mubr.bf16.mxu0 %v5392_v9  ;;  %v5310_v41 = vmax.f32 %v4860_v40, 0.0  ;;  %v9163_v9 = vld [vmem:[%s11810_s9 + $0x298] sm:$0xff]   ;;  %v9166_v31 = vld [vmem:[%s11810_s9 + $0x2d0] sm:$0xff]  }
0x10e9   : > { %v4863_v7 = vpop.f32.mrf.mxu1  ;;  %v4936_v46 = vpop.f32.mrf.mxu0  ;;  %6635 = vmatmul.mubr.bf16.gmra.mxu1 %v5389_v19  ;;  %6700 = vmatmul.mubr.bf16.gmra.mxu0 %v5391_v5  ;;  %v5312_v30 = vmax.f32 %v4933_v51, 0.0 }
0x10ea   : > { %v4864_v59 = vadd.f32 %v4863_v7, %v11153_v52  ;;  %v4937_v44 = vadd.f32 %v4936_v46, %v11158_v57  ;;  %8276 = vmatpush3.bf16.msra.mxu1 %v9153_v53  ;;  %v5325_v42 = vmax.f32 %v4862_v12, 0.0  ;;  %v5327_v61 = vmax.f32 %v4935_v18, 0.0  ;;  %8316 = vmatpush3.bf16.msra.mxu0 %v9155_v2  ;;  %v9164_v53 = vld [vmem:[%s11810_s9 + $0x250] sm:$0xff]  }
0x10eb   : > { %v4867_v29 = vpop.f32.mrf.mxu1  ;;  %v4940_v43 = vpop.f32.mrf.mxu0  ;;  %8277 = vmatprep.subr.bf16.mxu1 %v9156_v11  ;;  %8317 = vmatprep.subr.bf16.mxu0 %v9158_v10  ;;  %v11298_v10 = vld [vmem:[%s11809_s8 + $0x8] sm:$0xff]  ;;  %v9167_v46 = vld [vmem:[%s11810_s9 + $0x290] sm:$0xff]  }
0x10ec   : > { %v5326_v54 = vmax.f32 %v4864_v59, 0.0  ;;  %v5328_v60 = vmax.f32 %v4937_v44, 0.0  ;;  %v5405_v58 = vpack.c.bf16 %v5325_v42, %v5309_v34  ;;  %v5407_v27 = vpack.c.bf16 %v5327_v61, %v5311_v38  ;;  %v9168_v59 = vld [vmem:[%s11810_s9 + $0x248] sm:$0xff]  }
0x10ed   : > { %v4869_v35 = vpop.f32.mrf.mxu1  ;;  %v4942_v49 = vpop.f32.mrf.mxu0  ;;  %v4868_v26 = vadd.f32 %v4867_v29, %v11169_v3  ;;  %v4941_v2 = vadd.f32 %v4940_v43, %v11174_v63  ;;  %v11327_v43 = vrot.slane %v11298_v10, %v3947_v62 }
0x10ee   : > { %v5406_v8 = vpack.c.bf16 %v5326_v54, %v5310_v41  ;;  %v5408_v55 = vpack.c.bf16 %v5328_v60, %v5312_v30  ;;  %8278 = vmatpush3.bf16.msra.mxu1 %v9157_v37  ;;  %v4870_v50 = vadd.f32 %v4869_v35, %v11153_v52  ;;  %8318 = vmatpush3.bf16.msra.mxu0 %v9159_v45  ;;  %v9170_v41 = vld [vmem:[%s11810_s9 + $0x2c8] sm:$0xff]  }
0x10ef   : > { %v4871_v4 = vpop.f32.mrf.mxu1  ;;  %v4944_v56 = vpop.f32.mrf.mxu0  ;;  %8279 = vmatprep.subr.bf16.mxu1 %v9160_v0  ;;  %v4943_v19 = vadd.f32 %v4942_v49, %v11158_v57  ;;  %8319 = vmatprep.subr.bf16.mxu0 %v9162_v36  ;;  %v5343_v29 = vmax.f32 %v4941_v2, 0.0  ;;  %v9169_v60 = vld [vmem:[%s11810_s9 + $0x208] sm:$0xff]   ;;  %v9172_v36 = vld [vmem:[%s11810_s9 + $0x240] sm:$0xff]  }
0x10f0   : > { %v4872_v5 = vadd.f32 %v4871_v4, %v11169_v3  ;;  %v4945_v40 = vadd.f32 %v4944_v56, %v11174_v63  ;;  %6642 = vmatprep.mubr.bf16.mxu1 %v5406_v8  ;;  %6707 = vmatprep.mubr.bf16.mxu0 %v5408_v55  ;;  %v9165_v3 = vld [vmem:[%s11810_s9 + $0x210] sm:$0xff]   ;;  %v5342_v44 = vmax.f32 %v4870_v50, 0.0  ;;  %v9171_v49 = vld [vmem:[%s11810_s9 + $0x288] sm:$0xff]   ;;  %v9175_v2 = vld [vmem:[%s11810_s9 + $0x280] sm:$0xff]  }
0x10f1   : > { %v4873_v11 = vpop.f32.mrf.mxu1  ;;  %v4946_v51 = vpop.f32.mrf.mxu0  ;;  %6643 = vmatmul.mubr.bf16.gmra.mxu1 %v5405_v58  ;;  %6708 = vmatmul.mubr.bf16.gmra.mxu0 %v5407_v27  ;;  %v5344_v37 = vmax.f32 %v4943_v19, 0.0  ;;  %v9174_v58 = vld [vmem:[%s11810_s9 + $0x2c0] sm:$0xff]  }
0x10f2   : > { %v4874_v12 = vadd.f32 %v4873_v11, %v11153_v52  ;;  %v4947_v18 = vadd.f32 %v4946_v51, %v11158_v57  ;;  %8280 = vmatpush3.bf16.msra.mxu1 %v9161_v28  ;;  %v5357_v63 = vmax.f32 %v4872_v5, 0.0  ;;  %v5359_v33 = vmax.f32 %v4945_v40, 0.0  ;;  %8320 = vmatpush3.bf16.msra.mxu0 %v9163_v9  ;;  %v9173_v19 = vld [vmem:[%s11810_s9 + $0x200] sm:$0xff]   ;;  %v9176_v11 = vld [vmem:[%s11810_s9 + $0x378] sm:$0xff]  }
0x10f3   : > { %v4983_v25 = vpop.f32.mrf.mxu1  ;;  %v5056_v7 = vpop.f32.mrf.mxu0  ;;  %8281 = vmatprep.subr.bf16.mxu1 %v9164_v53  ;;  %v11306_v52 = vrot.slane %v11298_v10, %v3943_v21  ;;  %v11311_v57 = vrot.slane %v11298_v10, %v3951_v23  ;;  %8321 = vmatprep.subr.bf16.mxu0 %v9166_v31  ;;  %v5341_v21 = vmax.f32 %v4868_v26, 0.0  ;;  %v11322_v23 = vrot.slane %v11298_v10, %v3939_v20 }
0x10f4   : > { %v5358_v42 = vmax.f32 %v4874_v12, 0.0  ;;  %v5360_v61 = vmax.f32 %v4947_v18, 0.0  ;;  %v5423_v34 = vpack.c.bf16 %v5359_v33, %v5343_v29  ;;  %v5057_v50 = vadd.f32 %v5056_v7, %v11327_v43 }
0x10f5   : > { %v4985_v45 = vpop.f32.mrf.mxu1  ;;  %v5058_v0 = vpop.f32.mrf.mxu0  ;;  %v5421_v20 = vpack.c.bf16 %v5357_v63, %v5341_v21  ;;  %v4984_v27 = vadd.f32 %v4983_v25, %v11322_v23 }
0x10f6   : > { %v5422_v30 = vpack.c.bf16 %v5358_v42, %v5342_v44  ;;  %v5424_v54 = vpack.c.bf16 %v5360_v61, %v5344_v37  ;;  %8282 = vmatpush3.bf16.msra.mxu1 %v9165_v3  ;;  %v4986_v38 = vadd.f32 %v4985_v45, %v11306_v52  ;;  %8322 = vmatpush3.bf16.msra.mxu0 %v9167_v46  ;;  %v5251_v33 = vmax.f32 %v5057_v50, 0.0  ;;  %v9178_v46 = vld [vmem:[%s11810_s9 + $0x3f8] sm:$0xff]   ;;  %v9183_v50 = vld [vmem:[%s11810_s9 + $0x3b0] sm:$0xff]  }
0x10f7   : > { %v4987_v62 = vpop.f32.mrf.mxu1  ;;  %v5060_v35 = vpop.f32.mrf.mxu0  ;;  %8283 = vmatprep.subr.bf16.mxu1 %v9168_v59  ;;  %v5059_v8 = vadd.f32 %v5058_v0, %v11311_v57  ;;  %8323 = vmatprep.subr.bf16.mxu0 %v9170_v41  ;;  %v5249_v63 = vmax.f32 %v4984_v27, 0.0  ;;  %v9177_v37 = vld [vmem:[%s11810_s9 + $0x338] sm:$0xff]   ;;  %v9180_v41 = vld [vmem:[%s11810_s9 + $0x370] sm:$0xff]  }
0x10f8   : > { %v4988_v55 = vadd.f32 %v4987_v62, %v11322_v23  ;;  %v5061_v28 = vadd.f32 %v5060_v35, %v11327_v43  ;;  %6650 = vmatprep.mubr.bf16.mxu1 %v5422_v30  ;;  %6715 = vmatprep.mubr.bf16.mxu0 %v5424_v54  ;;  %v5250_v51 = vmax.f32 %v4986_v38, 0.0  ;;  %v9179_v0 = vld [vmem:[%s11810_s9 + $0x3b8] sm:$0xff]  }
0x10f9   : > { %v4989_v4 = vpop.f32.mrf.mxu1  ;;  %v5062_v56 = vpop.f32.mrf.mxu0  ;;  %6651 = vmatmul.mubr.bf16.gmra.mxu1 %v5421_v20  ;;  %6716 = vmatmul.mubr.bf16.gmra.mxu0 %v5423_v34  ;;  %v5252_v12 = vmax.f32 %v5059_v8, 0.0  ;;  %v9182_v20 = vld [vmem:[%s11810_s9 + $0x3f0] sm:$0xff]  }
0x10fa   : > { %v4990_v9 = vadd.f32 %v4989_v4, %v11306_v52  ;;  %v5063_v53 = vadd.f32 %v5062_v56, %v11311_v57  ;;  %8284 = vmatpush3.bf16.msra.mxu1 %v9169_v60  ;;  %v5265_v5 = vmax.f32 %v4988_v55, 0.0  ;;  %v5267_v40 = vmax.f32 %v5061_v28, 0.0  ;;  %8324 = vmatpush3.bf16.msra.mxu0 %v9171_v49  ;;  %v9181_v8 = vld [vmem:[%s11810_s9 + $0x330] sm:$0xff]   ;;  %v9184_v4 = vld [vmem:[%s11810_s9 + $0x368] sm:$0xff]  }
0x10fb   : > { %v4993_v31 = vpop.f32.mrf.mxu1  ;;  %v5066_v26 = vpop.f32.mrf.mxu0  ;;  %8285 = vmatprep.subr.bf16.mxu1 %v9172_v36  ;;  %8325 = vmatprep.subr.bf16.mxu0 %v9174_v58 }
0x10fc   : > { %v5266_v18 = vmax.f32 %v4990_v9, 0.0  ;;  %v5268_v3 = vmax.f32 %v5063_v53, 0.0  ;;  %v5377_v42 = vpack.c.bf16 %v5265_v5, %v5249_v63  ;;  %v5379_v61 = vpack.c.bf16 %v5267_v40, %v5251_v33 }
0x10fd   : > { %v4995_v25 = vpop.f32.mrf.mxu1  ;;  %v5068_v7 = vpop.f32.mrf.mxu0  ;;  %v4994_v34 = vadd.f32 %v4993_v31, %v11322_v23  ;;  %v5067_v38 = vadd.f32 %v5066_v26, %v11327_v43 }
0x10fe   : > { %v5378_v59 = vpack.c.bf16 %v5266_v18, %v5250_v51  ;;  %v5380_v44 = vpack.c.bf16 %v5268_v3, %v5252_v12  ;;  %8286 = vmatpush3.bf16.msra.mxu1 %v9173_v19  ;;  %v4996_v21 = vadd.f32 %v4995_v25, %v11306_v52  ;;  %8326 = vmatpush3.bf16.msra.mxu0 %v9175_v2  ;;  %v9186_v2 = vld [vmem:[%s11810_s9 + $0x3e8] sm:$0xff]  }
0x10ff   : > { %v4997_v29 = vpop.f32.mrf.mxu1  ;;  %v5070_v45 = vpop.f32.mrf.mxu0  ;;  %8351 = vmatprep.subr.bf16.mxu1 %v9176_v11  ;;  %v5069_v30 = vadd.f32 %v5068_v7, %v11311_v57  ;;  %8391 = vmatprep.subr.bf16.mxu0 %v9178_v46  ;;  %v5281_v5 = vmax.f32 %v4994_v34, 0.0  ;;  %v5283_v40 = vmax.f32 %v5067_v38, 0.0  ;;  %v9185_v12 = vld [vmem:[%s11810_s9 + $0x328] sm:$0xff]   ;;  %v9188_v46 = vld [vmem:[%s11810_s9 + $0x360] sm:$0xff]  }
0x1100   : > { %v4998_v54 = vadd.f32 %v4997_v29, %v11322_v23  ;;  %v5071_v60 = vadd.f32 %v5070_v45, %v11327_v43  ;;  %6756 = vmatprep.mubr.bf16.mxu1 %v5378_v59  ;;  %6821 = vmatprep.mubr.bf16.mxu0 %v5380_v44  ;;  %v5282_v56 = vmax.f32 %v4996_v21, 0.0  ;;  %v9187_v7 = vld [vmem:[%s11810_s9 + $0x3a8] sm:$0xff]   ;;  %v9191_v38 = vld [vmem:[%s11810_s9 + $0x3a0] sm:$0xff]  }
0x1101   : > { %v4999_v62 = vpop.f32.mrf.mxu1  ;;  %v5072_v35 = vpop.f32.mrf.mxu0  ;;  %6757 = vmatmul.mubr.bf16.vlgmr.msra.gmra.mxu1 %v5377_v42  ;;  %6822 = vmatmul.mubr.bf16.vlgmr.msra.gmra.mxu0 %v5379_v61  ;;  %v5284_v9 = vmax.f32 %v5069_v30, 0.0  ;;  %v9190_v42 = vld [vmem:[%s11810_s9 + $0x3e0] sm:$0xff]  }
0x1102   : > { %v5000_v49 = vadd.f32 %v4999_v62, %v11306_v52  ;;  %v5073_v36 = vadd.f32 %v5072_v35, %v11311_v57  ;;  %8352 = vmatpush3.bf16.msra.mxu1 %v9177_v37  ;;  %v5297_v55 = vmax.f32 %v4998_v54, 0.0  ;;  %v5299_v28 = vmax.f32 %v5071_v60, 0.0  ;;  %8392 = vmatpush3.bf16.msra.mxu0 %v9179_v0  ;;  %v9189_v30 = vld [vmem:[%s11810_s9 + $0x320] sm:$0xff]   ;;  %v9192_v62 = vld [vmem:[%s11810_s9 + $0x358] sm:$0xff]  }
0x1103   : > { %v5003_v58 = vpop.f32.mrf.mxu1  ;;  %v5076_v27 = vpop.f32.mrf.mxu0  ;;  %8353 = vmatprep.subr.bf16.mxu1 %v9180_v41  ;;  %8393 = vmatprep.subr.bf16.mxu0 %v9182_v20 }
0x1104   : > { %v5298_v53 = vmax.f32 %v5000_v49, 0.0  ;;  %v5300_v19 = vmax.f32 %v5073_v36, 0.0  ;;  %v5393_v18 = vpack.c.bf16 %v5297_v55, %v5281_v5  ;;  %v5395_v3 = vpack.c.bf16 %v5299_v28, %v5283_v40 }
0x1105   : > { %v5005_v31 = vpop.f32.mrf.mxu1  ;;  %v5078_v26 = vpop.f32.mrf.mxu0  ;;  %v5004_v61 = vadd.f32 %v5003_v58, %v11322_v23  ;;  %v5077_v21 = vadd.f32 %v5076_v27, %v11327_v43 }
0x1106   : > { %v5394_v11 = vpack.c.bf16 %v5298_v53, %v5282_v56  ;;  %v5396_v51 = vpack.c.bf16 %v5300_v19, %v5284_v9  ;;  %8354 = vmatpush3.bf16.msra.mxu1 %v9181_v8  ;;  %v5006_v63 = vadd.f32 %v5005_v31, %v11306_v52  ;;  %8394 = vmatpush3.bf16.msra.mxu0 %v9183_v50  ;;  %v9194_v50 = vld [vmem:[%s11810_s9 + $0x3d8] sm:$0xff]  }
0x1107   : > { %v5007_v33 = vpop.f32.mrf.mxu1  ;;  %v5080_v25 = vpop.f32.mrf.mxu0  ;;  %8355 = vmatprep.subr.bf16.mxu1 %v9184_v4  ;;  %v5079_v59 = vadd.f32 %v5078_v26, %v11311_v57  ;;  %8395 = vmatprep.subr.bf16.mxu0 %v9186_v2  ;;  %v5313_v55 = vmax.f32 %v5004_v61, 0.0  ;;  %v5315_v28 = vmax.f32 %v5077_v21, 0.0  ;;  %v9193_v9 = vld [vmem:[%s11810_s9 + $0x318] sm:$0xff]   ;;  %v9196_v2 = vld [vmem:[%s11810_s9 + $0x350] sm:$0xff]   ;;  %v9200_v61 = vld [vmem:[%s11810_s9 + $0x348] sm:$0xff]  }
0x1108   : > { %v5008_v44 = vadd.f32 %v5007_v33, %v11322_v23  ;;  %v5081_v37 = vadd.f32 %v5080_v25, %v11327_v43  ;;  %6764 = vmatprep.mubr.bf16.mxu1 %v5394_v11  ;;  %6829 = vmatprep.mubr.bf16.mxu0 %v5396_v51  ;;  %v5314_v35 = vmax.f32 %v5006_v63, 0.0  ;;  %v9195_v26 = vld [vmem:[%s11810_s9 + $0x398] sm:$0xff]  }
0x1109   : > { %v5009_v29 = vpop.f32.mrf.mxu1  ;;  %v5082_v45 = vpop.f32.mrf.mxu0  ;;  %6765 = vmatmul.mubr.bf16.gmra.mxu1 %v5393_v18  ;;  %6830 = vmatmul.mubr.bf16.gmra.mxu0 %v5395_v3  ;;  %v5316_v49 = vmax.f32 %v5079_v59, 0.0  ;;  %v9198_v18 = vld [vmem:[%s11810_s9 + $0x3d0] sm:$0xff]  }
0x110a   : > { %v5010_v0 = vadd.f32 %v5009_v29, %v11306_v52  ;;  %v5083_v41 = vadd.f32 %v5082_v45, %v11311_v57  ;;  %8356 = vmatpush3.bf16.msra.mxu1 %v9185_v12  ;;  %v5329_v54 = vmax.f32 %v5008_v44, 0.0  ;;  %v5331_v60 = vmax.f32 %v5081_v37, 0.0  ;;  %8396 = vmatpush3.bf16.msra.mxu0 %v9187_v7  ;;  %v9197_v59 = vld [vmem:[%s11810_s9 + $0x310] sm:$0xff]  }
0x110b   : > { %v5013_v20 = vpop.f32.mrf.mxu1  ;;  %v5086_v34 = vpop.f32.mrf.mxu0  ;;  %8357 = vmatprep.subr.bf16.mxu1 %v9188_v46  ;;  %8397 = vmatprep.subr.bf16.mxu0 %v9190_v42 }
0x110c   : > { %v5330_v36 = vmax.f32 %v5010_v0, 0.0  ;;  %v5332_v8 = vmax.f32 %v5083_v41, 0.0  ;;  %v5409_v53 = vpack.c.bf16 %v5329_v54, %v5313_v55  ;;  %v5411_v19 = vpack.c.bf16 %v5331_v60, %v5315_v28 }
0x110d   : > { %v5015_v58 = vpop.f32.mrf.mxu1  ;;  %v5088_v27 = vpop.f32.mrf.mxu0  ;;  %v5014_v3 = vadd.f32 %v5013_v20, %v11322_v23  ;;  %v5087_v63 = vadd.f32 %v5086_v34, %v11327_v43  ;;  %v9202_v20 = vld [vmem:[%s11810_s9 + $0x3c8] sm:$0xff]  }
0x110e   : > { %v5410_v4 = vpack.c.bf16 %v5330_v36, %v5314_v35  ;;  %v5412_v56 = vpack.c.bf16 %v5332_v8, %v5316_v49  ;;  %8358 = vmatpush3.bf16.msra.mxu1 %v9189_v30  ;;  %v5016_v5 = vadd.f32 %v5015_v58, %v11306_v52  ;;  %8398 = vmatpush3.bf16.msra.mxu0 %v9191_v38  ;;  %v9203_v49 = vld [vmem:[%s11810_s9 + $0x388] sm:$0xff]   ;;  %v9204_v36 = vld [vmem:[%s11810_s9 + $0x340] sm:$0xff]  }
0x110f   : > { %v5017_v40 = vpop.f32.mrf.mxu1  ;;  %v5090_v31 = vpop.f32.mrf.mxu0  ;;  %8359 = vmatprep.subr.bf16.mxu1 %v9192_v62  ;;  %v5089_v11 = vadd.f32 %v5088_v27, %v11311_v57  ;;  %8399 = vmatprep.subr.bf16.mxu0 %v9194_v50  ;;  %v5347_v41 = vmax.f32 %v5087_v63, 0.0  ;;  %v11475_v30 = vrot.slane %v11298_v10, %v3963_v24  ;;  %v9201_v62 = vld [vmem:[%s11810_s9 + $0x308] sm:$0xff]   ;;  %v9206_v58 = vld [vmem:[%s11810_s9 + $0x3c0] sm:$0xff]  }
0x1110   : > { %v5018_v51 = vadd.f32 %v5017_v40, %v11322_v23  ;;  %v5091_v12 = vadd.f32 %v5090_v31, %v11327_v43  ;;  %6772 = vmatprep.mubr.bf16.mxu1 %v5410_v4  ;;  %6837 = vmatprep.mubr.bf16.mxu0 %v5412_v56  ;;  %v11454_v43 = vrot.slane %v11298_v10, %v3959_v39  ;;  %v5346_v21 = vmax.f32 %v5016_v5, 0.0 }
0x1111   : > { %v5019_v33 = vpop.f32.mrf.mxu1  ;;  %v5092_v25 = vpop.f32.mrf.mxu0  ;;  %6773 = vmatmul.mubr.bf16.gmra.mxu1 %v5409_v53  ;;  %6838 = vmatmul.mubr.bf16.gmra.mxu0 %v5411_v19  ;;  %v5348_v29 = vmax.f32 %v5089_v11, 0.0  ;;  %v5345_v39 = vmax.f32 %v5014_v3, 0.0  ;;  %v9205_v19 = vld [vmem:[%s11810_s9 + $0x300] sm:$0xff]  }
0x1112   : > { %v5020_v7 = vadd.f32 %v5019_v33, %v11306_v52  ;;  %v5093_v46 = vadd.f32 %v5092_v25, %v11311_v57  ;;  %8360 = vmatpush3.bf16.msra.mxu1 %v9193_v9  ;;  %v5361_v44 = vmax.f32 %v5018_v51, 0.0  ;;  %v5363_v37 = vmax.f32 %v5091_v12, 0.0  ;;  %8400 = vmatpush3.bf16.msra.mxu0 %v9195_v26  ;;  %v9199_v57 = vld [vmem:[%s11810_s9 + $0x390] sm:$0xff]  }
0x1113   : > { %v5129_v23 = vpop.f32.mrf.mxu1  ;;  %v5202_v42 = vpop.f32.mrf.mxu0  ;;  %8361 = vmatprep.subr.bf16.mxu1 %v9196_v2  ;;  %v11459_v52 = vrot.slane %v11298_v10, %v3967_v14  ;;  %8401 = vmatprep.subr.bf16.mxu0 %v9198_v18  ;;  %v11470_v14 = vrot.slane %v11298_v10, %v3955_v6  ;;  %v9207_v2 = vld [vmem:[%s11810_s9 + $0x380] sm:$0xff]  }
0x1114   : > { %v5362_v45 = vmax.f32 %v5020_v7, 0.0  ;;  %v5364_v0 = vmax.f32 %v5093_v46, 0.0  ;;  %v5425_v6 = vpack.c.bf16 %v5361_v44, %v5345_v39  ;;  %v5427_v35 = vpack.c.bf16 %v5363_v37, %v5347_v41 }
0x1115   : > { %v5131_v54 = vpop.f32.mrf.mxu1  ;;  %v5204_v60 = vpop.f32.mrf.mxu0  ;;  %v5130_v27 = vadd.f32 %v5129_v23, %v11470_v14  ;;  %v5203_v50 = vadd.f32 %v5202_v42, %v11475_v30 }
0x1116   : > { %v5426_v34 = vpack.c.bf16 %v5362_v45, %v5346_v21  ;;  %v5428_v38 = vpack.c.bf16 %v5364_v0, %v5348_v29  ;;  %8362 = vmatpush3.bf16.msra.mxu1 %v9197_v59  ;;  %v5132_v17 = vadd.f32 %v5131_v54, %v11454_v43  ;;  %8402 = vmatpush3.bf16.msra.mxu0 %v9199_v57 }
0x1117   : > { %v5133_v24 = vpop.f32.mrf.mxu1  ;;  %v5206_v10 = vpop.f32.mrf.mxu0  ;;  %8363 = vmatprep.subr.bf16.mxu1 %v9200_v61  ;;  %v5205_v8 = vadd.f32 %v5204_v60, %v11459_v52  ;;  %8403 = vmatprep.subr.bf16.mxu0 %v9202_v20  ;;  %v5253_v3 = vmax.f32 %v5130_v27, 0.0  ;;  %v5255_v63 = vmax.f32 %v5203_v50, 0.0 }
0x1118   : > { %v5134_v55 = vadd.f32 %v5133_v24, %v11470_v14  ;;  %v5207_v28 = vadd.f32 %v5206_v10, %v11475_v30  ;;  %6780 = vmatprep.mubr.bf16.mxu1 %v5426_v34  ;;  %6845 = vmatprep.mubr.bf16.mxu0 %v5428_v38  ;;  %v5254_v11 = vmax.f32 %v5132_v17, 0.0 }
0x1119   : > { %v5135_v4 = vpop.f32.mrf.mxu1  ;;  %v5208_v56 = vpop.f32.mrf.mxu0  ;;  %6781 = vmatmul.mubr.bf16.gmra.mxu1 %v5425_v6  ;;  %6846 = vmatmul.mubr.bf16.gmra.mxu0 %v5427_v35  ;;  %v5256_v51 = vmax.f32 %v5205_v8, 0.0 }
0x111a   : > { %v5136_v9 = vadd.f32 %v5135_v4, %v11454_v43  ;;  %v5209_v53 = vadd.f32 %v5208_v56, %v11459_v52  ;;  %8364 = vmatpush3.bf16.msra.mxu1 %v9201_v62  ;;  %v5269_v5 = vmax.f32 %v5134_v55, 0.0  ;;  %v5271_v40 = vmax.f32 %v5207_v28, 0.0  ;;  %8404 = vmatpush3.bf16.msra.mxu0 %v9203_v49 }
0x111b   : > { %v5139_v31 = vpop.f32.mrf.mxu1  ;;  %v5212_v26 = vpop.f32.mrf.mxu0  ;;  %8365 = vmatprep.subr.bf16.mxu1 %v9204_v36  ;;  %8405 = vmatprep.subr.bf16.mxu0 %v9206_v58 }
0x111c   : > { %v5270_v12 = vmax.f32 %v5136_v9, 0.0  ;;  %v5272_v18 = vmax.f32 %v5209_v53, 0.0  ;;  %v5381_v59 = vpack.c.bf16 %v5269_v5, %v5253_v3  ;;  %v5383_v44 = vpack.c.bf16 %v5271_v40, %v5255_v63 }
0x111d   : > { %v5141_v33 = vpop.f32.mrf.mxu1  ;;  %v5214_v25 = vpop.f32.mrf.mxu0  ;;  %v5140_v29 = vadd.f32 %v5139_v31, %v11470_v14  ;;  %v5213_v45 = vadd.f32 %v5212_v26, %v11475_v30 }
0x111e   : > { %v5382_v7 = vpack.c.bf16 %v5270_v12, %v5254_v11  ;;  %v5384_v46 = vpack.c.bf16 %v5272_v18, %v5256_v51  ;;  %8366 = vmatpush3.bf16.msra.mxu1 %v9205_v19  ;;  %v5142_v37 = vadd.f32 %v5141_v33, %v11454_v43  ;;  %8406 = vmatpush3.bf16.msra.mxu0 %v9207_v2 }
0x111f   : > { %v5143_v23 = vpop.f32.mrf.mxu1  ;;  %v5216_v42 = vpop.f32.mrf.mxu0  ;;  %v5215_v57 = vadd.f32 %v5214_v25, %v11459_v52  ;;  %v5285_v24 = vmax.f32 %v5140_v29, 0.0  ;;  %v5287_v10 = vmax.f32 %v5213_v45, 0.0 }
0x1120   : > { %v5144_v61 = vadd.f32 %v5143_v23, %v11470_v14  ;;  %v5217_v21 = vadd.f32 %v5216_v42, %v11475_v30  ;;  %6886 = vmatprep.mubr.bf16.mxu1 %v5382_v7  ;;  %6951 = vmatprep.mubr.bf16.mxu0 %v5384_v46  ;;  %v5286_v62 = vmax.f32 %v5142_v37, 0.0 }
0x1121   : > { %v5145_v0 = vpop.f32.mrf.mxu1  ;;  %v5218_v39 = vpop.f32.mrf.mxu0  ;;  %6887 = vmatmul.mubr.bf16.vlgmr.msra.gmra.mxu1 %v5381_v59  ;;  %6952 = vmatmul.mubr.bf16.vlgmr.msra.gmra.mxu0 %v5383_v44  ;;  %v5288_v6 = vmax.f32 %v5215_v57, 0.0 }
0x1122   : > { %v5146_v41 = vadd.f32 %v5145_v0, %v11454_v43  ;;  %v5219_v54 = vadd.f32 %v5218_v39, %v11459_v52  ;;  %v5301_v60 = vmax.f32 %v5144_v61, 0.0  ;;  %v5303_v20 = vmax.f32 %v5217_v21, 0.0 }
0x1123   : > { %v5149_v34 = vpop.f32.mrf.mxu1  ;;  %v5222_v38 = vpop.f32.mrf.mxu0 }
0x1124   : > { %v5302_v35 = vmax.f32 %v5146_v41, 0.0  ;;  %v5304_v17 = vmax.f32 %v5219_v54, 0.0  ;;  %v5397_v28 = vpack.c.bf16 %v5301_v60, %v5285_v24  ;;  %v5399_v58 = vpack.c.bf16 %v5303_v20, %v5287_v10 }
0x1125   : > { %v5151_v49 = vpop.f32.mrf.mxu1  ;;  %v5224_v36 = vpop.f32.mrf.mxu0  ;;  %v5150_v19 = vadd.f32 %v5149_v34, %v11470_v14  ;;  %v5223_v5 = vadd.f32 %v5222_v38, %v11475_v30 }
0x1126   : > { %v5398_v8 = vpack.c.bf16 %v5302_v35, %v5286_v62  ;;  %v5400_v55 = vpack.c.bf16 %v5304_v17, %v5288_v6  ;;  %v5152_v27 = vadd.f32 %v5151_v49, %v11454_v43  ;;  %v5225_v56 = vadd.f32 %v5224_v36, %v11459_v52 }
0x1127   : > { %v5153_v50 = vpop.f32.mrf.mxu1  ;;  %v5226_v4 = vpop.f32.mrf.mxu0  ;;  %v5317_v7 = vmax.f32 %v5150_v19, 0.0  ;;  %v5319_v46 = vmax.f32 %v5223_v5, 0.0 }
0x1128   : > { %v5154_v9 = vadd.f32 %v5153_v50, %v11470_v14  ;;  %v5227_v53 = vadd.f32 %v5226_v4, %v11475_v30  ;;  %6894 = vmatprep.mubr.bf16.mxu1 %v5398_v8  ;;  %6959 = vmatprep.mubr.bf16.mxu0 %v5400_v55  ;;  %v5318_v3 = vmax.f32 %v5152_v27, 0.0  ;;  %v5320_v63 = vmax.f32 %v5225_v56, 0.0 }
0x1129   : > { %v5155_v40 = vpop.f32.mrf.mxu1  ;;  %v5228_v31 = vpop.f32.mrf.mxu0  ;;  %6895 = vmatmul.mubr.bf16.gmra.mxu1 %v5397_v28  ;;  %6960 = vmatmul.mubr.bf16.gmra.mxu0 %v5399_v58 }
0x112a   : > { %v5156_v26 = vadd.f32 %v5155_v40, %v11454_v43  ;;  %v5229_v2 = vadd.f32 %v5228_v31, %v11459_v52  ;;  %v5333_v11 = vmax.f32 %v5154_v9, 0.0  ;;  %v5335_v51 = vmax.f32 %v5227_v53, 0.0 }
0x112b   : > { %v5159_v12 = vpop.f32.mrf.mxu1  ;;  %v5232_v18 = vpop.f32.mrf.mxu0 }
0x112c   : > { %v5334_v33 = vmax.f32 %v5156_v26, 0.0  ;;  %v5336_v25 = vmax.f32 %v5229_v2, 0.0  ;;  %v5413_v42 = vpack.c.bf16 %v5333_v11, %v5317_v7  ;;  %v5415_v57 = vpack.c.bf16 %v5335_v51, %v5319_v46 }
0x112d   : > { %v5161_v59 = vpop.f32.mrf.mxu1  ;;  %v5234_v44 = vpop.f32.mrf.mxu0  ;;  %v5160_v41 = vadd.f32 %v5159_v12, %v11470_v14  ;;  %v5233_v20 = vadd.f32 %v5232_v18, %v11475_v30 }
0x112e   : > { %v5414_v37 = vpack.c.bf16 %v5334_v33, %v5318_v3  ;;  %v5416_v23 = vpack.c.bf16 %v5336_v25, %v5320_v63  ;;  %v5162_v61 = vadd.f32 %v5161_v59, %v11454_v43  ;;  %v5235_v45 = vadd.f32 %v5234_v44, %v11459_v52 }
0x112f   : > { %v5163_v21 = vpop.f32.mrf.mxu1  ;;  %v5236_v29 = vpop.f32.mrf.mxu0  ;;  %v5349_v49 = vmax.f32 %v5160_v41, 0.0  ;;  %v5351_v36 = vmax.f32 %v5233_v20, 0.0 }
0x1130   : > { %v5164_v0 = vadd.f32 %v5163_v21, %v11470_v14  ;;  %v5237_v39 = vadd.f32 %v5236_v29, %v11475_v30  ;;  %6902 = vmatprep.mubr.bf16.mxu1 %v5414_v37  ;;  %6967 = vmatprep.mubr.bf16.mxu0 %v5416_v23  ;;  %v5350_v62 = vmax.f32 %v5162_v61, 0.0  ;;  %v5352_v35 = vmax.f32 %v5235_v45, 0.0 }
0x1131   : > { %v5165_v54 = vpop.f32.mrf.mxu1  ;;  %v5238_v60 = vpop.f32.mrf.mxu0  ;;  %6903 = vmatmul.mubr.bf16.gmra.mxu1 %v5413_v42  ;;  %6968 = vmatmul.mubr.bf16.gmra.mxu0 %v5415_v57 }
0x1132   : > { %v5166_v34 = vadd.f32 %v5165_v54, %v11454_v43  ;;  %v5239_v38 = vadd.f32 %v5238_v60, %v11459_v52  ;;  %v5365_v6 = vmax.f32 %v5164_v0, 0.0  ;;  %v5367_v17 = vmax.f32 %v5237_v39, 0.0  ;;  %v7720_v52 = vld [vmem:[%s11811_s10] ss:$0 sm:$0xff] }
0x1134   : > { %v5366_v24 = vmax.f32 %v5166_v34, 0.0  ;;  %v5368_v10 = vmax.f32 %v5239_v38, 0.0  ;;  %v5429_v55 = vpack.c.bf16 %v5365_v6, %v5349_v49  ;;  %v5431_v28 = vpack.c.bf16 %v5367_v17, %v5351_v36 }
0x1136   : > { %v5430_v8 = vpack.c.bf16 %v5366_v24, %v5350_v62  ;;  %v5432_v14 = vpack.c.bf16 %v5368_v10, %v5352_v35 }
0x1138   : > { %6910 = vmatprep.mubr.bf16.mxu1 %v5430_v8  ;;  %6975 = vmatprep.mubr.bf16.mxu0 %v5432_v14 }
0x1139   : > { %6911 = vmatmul.mubr.bf16.gmra.mxu1 %v5429_v55  ;;  %6976 = vmatmul.mubr.bf16.gmra.mxu0 %v5431_v28 }
0x1181   : > { %v8127_v43 = vpop.f32.mrf.mxu1  ;;  %v8167_v30 = vpop.f32.mrf.mxu0 }
0x1183   : > { %v8128_v58 = vpop.f32.mrf.mxu1  ;;  %v8168_v27 = vpop.f32.mrf.mxu0 }
0x1184   : > { %v8129_v50 = vadd.f32 %v8128_v58, %v8127_v43  ;;  %v8169_v4 = vadd.f32 %v8168_v27, %v8167_v30 }
0x1185   : > { %v8130_v56 = vpop.f32.mrf.mxu1  ;;  %v8170_v9 = vpop.f32.mrf.mxu0 }
0x1186   : > { %v6499_v53 = vadd.f32 %v8129_v50, %v7720_v52 }
0x1187   : > { %v8131_v19 = vpop.f32.mrf.mxu1  ;;  %v8171_v5 = vpop.f32.mrf.mxu0 }
0x1188   : > { %v11533_v40 = vadd.f32 %v8169_v4, %v6499_v53  ;;  %v8132_v31 = vadd.f32 %v8131_v19, %v8130_v56  ;;  %v8172_v26 = vadd.f32 %v8171_v5, %v8170_v9 }
0x1189   : > { %v8133_v2 = vpop.f32.mrf.mxu1  ;;  %v8173_v51 = vpop.f32.mrf.mxu0 }
0x118a   : > { %v6502_v11 = vadd.f32 %v8132_v31, %v7720_v52 }
0x118b   : > { %v8134_v12 = vpop.f32.mrf.mxu1  ;;  %v8174_v63 = vpop.f32.mrf.mxu0 }
0x118c   : > { %v11535_v18 = vadd.f32 %v8172_v26, %v6502_v11  ;;  %v8135_v3 = vadd.f32 %v8134_v12, %v8133_v2  ;;  %v8175_v33 = vadd.f32 %v8174_v63, %v8173_v51 }
0x118d   : > { %v8136_v25 = vpop.f32.mrf.mxu1  ;;  %v8176_v46 = vpop.f32.mrf.mxu0 }
0x118e   : > { %v6507_v7 = vadd.f32 %v8135_v3, %v7720_v52 }
0x118f   : > { %v8137_v59 = vpop.f32.mrf.mxu1  ;;  %v8177_v23 = vpop.f32.mrf.mxu0 }
0x1190   : > { %v11537_v44 = vadd.f32 %v8175_v33, %v6507_v7  ;;  %v8138_v37 = vadd.f32 %v8137_v59, %v8136_v25  ;;  %v8178_v42 = vadd.f32 %v8177_v23, %v8176_v46 }
0x1191   : > { %v8139_v57 = vpop.f32.mrf.mxu1  ;;  %v8179_v21 = vpop.f32.mrf.mxu0 }
0x1192   : > { %v6510_v61 = vadd.f32 %v8138_v37, %v7720_v52 }
0x1193   : > { %v8140_v29 = vpop.f32.mrf.mxu1  ;;  %v8180_v39 = vpop.f32.mrf.mxu0 }
0x1194   : > { %v11539_v45 = vadd.f32 %v8178_v42, %v6510_v61  ;;  %v8141_v0 = vadd.f32 %v8140_v29, %v8139_v57  ;;  %v8181_v41 = vadd.f32 %v8180_v39, %v8179_v21 }
0x1195   : > { %v8142_v54 = vpop.f32.mrf.mxu1  ;;  %v8182_v20 = vpop.f32.mrf.mxu0 }
0x1196   : > { %v6515_v60 = vadd.f32 %v8141_v0, %v7720_v52 }
0x1197   : > { %v8143_v34 = vpop.f32.mrf.mxu1  ;;  %v8183_v6 = vpop.f32.mrf.mxu0 }
0x1198   : > { %v11541_v38 = vadd.f32 %v8181_v41, %v6515_v60  ;;  %v8144_v62 = vadd.f32 %v8143_v34, %v8142_v54  ;;  %v8184_v35 = vadd.f32 %v8183_v6, %v8182_v20 }
0x1199   : > { %v8145_v17 = vpop.f32.mrf.mxu1  ;;  %v8185_v10 = vpop.f32.mrf.mxu0 }
0x119a   : > { %v6518_v24 = vadd.f32 %v8144_v62, %v7720_v52 }
0x119b   : > { %v8146_v49 = vpop.f32.mrf.mxu1  ;;  %v8186_v14 = vpop.f32.mrf.mxu0 }
0x119c   : > { %v11543_v36 = vadd.f32 %v8184_v35, %v6518_v24  ;;  %v8147_v8 = vadd.f32 %v8146_v49, %v8145_v17  ;;  %v8187_v55 = vadd.f32 %v8186_v14, %v8185_v10 }
0x119d   : > { %v8148_v28 = vpop.f32.mrf.mxu1  ;;  %v8188_v30 = vpop.f32.mrf.mxu0 }
0x119e   : > { %v6523_v43 = vadd.f32 %v8147_v8, %v7720_v52 }
0x119f   : > { %v8149_v58 = vpop.f32.mrf.mxu1  ;;  %v8189_v4 = vpop.f32.mrf.mxu0 }
0x11a0   : > { %v11545_v27 = vadd.f32 %v8187_v55, %v6523_v43  ;;  %v8150_v50 = vadd.f32 %v8149_v58, %v8148_v28  ;;  %v8190_v56 = vadd.f32 %v8189_v4, %v8188_v30 }
0x11a1   : > { %v8207_v9 = vpop.f32.mrf.mxu1  ;;  %v8247_v19 = vpop.f32.mrf.mxu0 }
0x11a2   : > { %11827 = vst [vmem:[#allocation8_spill] sm:$0xff] %v11545_v27  ;;  %v6526_v53 = vadd.f32 %v8150_v50, %v7720_v52 }
0x11a3   : > { %v8208_v5 = vpop.f32.mrf.mxu1  ;;  %v8248_v26 = vpop.f32.mrf.mxu0 }
0x11a4   : > { %v11547_v31 = vadd.f32 %v8190_v56, %v6526_v53  ;;  %v8249_v27 = vadd.f32 %v8248_v26, %v8247_v19 }
0x11a5   : > { %v8210_v2 = vpop.f32.mrf.mxu1  ;;  %v11549_v11 = vpop.f32.mrf.mxu0 }
0x11a6   : > { %11828 = vst [vmem:[#allocation9_spill] sm:$0xff] %v11547_v31 }
0x11a7   : > { %v8211_v51 = vpop.f32.mrf.mxu1  ;;  %v11551_v12 = vpop.f32.mrf.mxu0 }
0x11a9   : > { %v8213_v3 = vpop.f32.mrf.mxu1  ;;  %v11553_v63 = vpop.f32.mrf.mxu0 }
0x11ab   : > { %v8214_v33 = vpop.f32.mrf.mxu1  ;;  %v11555_v25 = vpop.f32.mrf.mxu0 }
0x11ad   : > { %v11557_v7 = vpop.f32.mrf.mxu1  ;;  %v11559_v52 = vpop.f32.mrf.mxu0 }
0x11af   : > { %v8217_v46 = vpop.f32.mrf.mxu1  ;;  %v11561_v59 = vpop.f32.mrf.mxu0 }
0x11b0   : > { %v8218_v19 = vadd.f32 %v8217_v46, %v11557_v7 }
0x11b1   : > { %v11563_v37 = vpop.f32.mrf.mxu1  ;;  %v11565_v23 = vpop.f32.mrf.mxu0 }
0x11b3   : > { %v11567_v42 = vpop.f32.mrf.mxu1  ;;  %v11569_v57 = vpop.f32.mrf.mxu0 }
0x11b4   : > { %v8221_v7 = vadd.f32 %v11567_v42, %v11563_v37 }
0x11b5   : > { %v11571_v61 = vpop.f32.mrf.mxu1  ;;  %v11573_v21 = vpop.f32.mrf.mxu0 }
0x11b7   : > { %v11575_v29 = vpop.f32.mrf.mxu1  ;;  %v11577_v0 = vpop.f32.mrf.mxu0 }
0x11b8   : > { %11829 = vst [vmem:[#allocation10_spill] sm:$0xff] %v11577_v0  ;;  %v8224_v37 = vadd.f32 %v11575_v29, %v11571_v61 }
0x11b9   : > { %v11579_v39 = vpop.f32.mrf.mxu1  ;;  %v11581_v41 = vpop.f32.mrf.mxu0 }
0x11ba   : > { %11830 = vst [vmem:[#allocation11_spill] sm:$0xff] %v11581_v41 }
0x11bb   : > { %v11583_v54 = vpop.f32.mrf.mxu1  ;;  %v11585_v60 = vpop.f32.mrf.mxu0 }
0x11bc   : > { %11831 = vst [vmem:[#allocation12_spill] sm:$0xff] %v11585_v60 }
0x11bd   : > { %v11587_v20 = vpop.f32.mrf.mxu1  ;;  %v11589_v34 = vpop.f32.mrf.mxu0 }
0x11be   : > { %11832 = vst [vmem:[#allocation13_spill] sm:$0xff] %v11587_v20  ;;  %11833 = vst [vmem:[#allocation14_spill] sm:$0xff] %v11589_v34  ;;  %v8209_v34 = vadd.f32 %v8208_v5, %v8207_v9 }
0x11bf   : > { %v11591_v62 = vpop.f32.mrf.mxu1  ;;  %v11593_v6 = vpop.f32.mrf.mxu0 }
0x11c0   : > { %11834 = vst [vmem:[#allocation15_spill] sm:$0xff] %v11591_v62  ;;  %11835 = vst [vmem:[#allocation16_spill] sm:$0xff] %v11593_v6  ;;  %v6629_v13 = vadd.f32 %v8209_v34, %v11533_v40  ;;  %v8212_v62 = vadd.f32 %v8211_v51, %v8210_v2  ;;  %v8252_v40 = vadd.f32 %v11551_v12, %v11549_v11 }
0x11c1   : > { %v8287_v35 = vpop.f32.mrf.mxu1  ;;  %v8327_v17 = vpop.f32.mrf.mxu0  ;;  %v6640_v12 = vadd.f32 %v8218_v19, %v11539_v45 }
0x11c2   : > { %v6694_v5 = vadd.f32 %v8249_v27, %v6629_v13 }
0x11c3   : > { %v8288_v24 = vpop.f32.mrf.mxu1  ;;  %v8328_v10 = vpop.f32.mrf.mxu0 }
0x11c4   : > { %v8329_v27 = vadd.f32 %v8328_v10, %v8327_v17 }
0x11c5   : > { %v8290_v49 = vpop.f32.mrf.mxu1  ;;  %v8330_v8 = vpop.f32.mrf.mxu0 }
0x11c7   : > { %v8291_v14 = vpop.f32.mrf.mxu1  ;;  %v8331_v55 = vpop.f32.mrf.mxu0 }
0x11c8   : > { %v8292_v51 = vadd.f32 %v8291_v14, %v8290_v49  ;;  %v8332_v49 = vadd.f32 %v8331_v55, %v8330_v8 }
0x11c9   : > { %v8293_v28 = vpop.f32.mrf.mxu1  ;;  %v11595_v43 = vpop.f32.mrf.mxu0 }
0x11cb   : > { %v8294_v30 = vpop.f32.mrf.mxu1  ;;  %v11597_v58 = vpop.f32.mrf.mxu0 }
0x11cc   : > { %v8335_v8 = vadd.f32 %v11597_v58, %v11595_v43  ;;  %v6648_v58 = vadd.f32 %v8224_v37, %v11543_v36 }
0x11cd   : > { %v8296_v50 = vpop.f32.mrf.mxu1  ;;  %v11599_v4 = vpop.f32.mrf.mxu0 }
0x11cf   : > { %v8297_v56 = vpop.f32.mrf.mxu1  ;;  %v11601_v53 = vpop.f32.mrf.mxu0 }
0x11d1   : > { %v11603_v22 = vpop.f32.mrf.mxu1  ;;  %v11605_v1 = vpop.f32.mrf.mxu0 }
0x11d2   : > { %11836 = vst [vmem:[#allocation17_spill] sm:$0xff] %v11605_v1 }
0x11d3   : > { %v11607_v32 = vpop.f32.mrf.mxu1  ;;  %v11609_v48 = vpop.f32.mrf.mxu0 }
0x11d4   : > { %11837 = vst [vmem:[#allocation18_spill] sm:$0xff] %v11609_v48  ;;  %v8289_v48 = vadd.f32 %v8288_v24, %v8287_v35 }
0x11d5   : > { %v11611_v6 = vpop.f32.mrf.mxu1  ;;  %v11613_v15 = vpop.f32.mrf.mxu0 }
0x11d6   : > { %11838 = vst [vmem:[#allocation19_spill] sm:$0xff] %v11613_v15  ;;  %v6632_v15 = vadd.f32 %v8212_v62, %v11535_v18  ;;  %v6759_v2 = vadd.f32 %v8289_v48, %v6694_v5 }
0x11d7   : > { %v11615_v31 = vpop.f32.mrf.mxu1  ;;  %v11617_v60 = vpop.f32.mrf.mxu0 }
0x11d8   : > { %11839 = vst [vmem:[#allocation20_spill] sm:$0xff] %v11615_v31  ;;  %11840 = vst [vmem:[#allocation21_spill] sm:$0xff] %v11617_v60  ;;  %v8215_v31 = vadd.f32 %v8214_v33, %v8213_v3  ;;  %v6697_v35 = vadd.f32 %v8252_v40, %v6632_v15  ;;  %v8255_v3 = vadd.f32 %v11555_v25, %v11553_v63 }
0x11d9   : > { %v11619_v41 = vpop.f32.mrf.mxu1  ;;  %v11622_v20 = vpop.f32.mrf.mxu0  ;;  %v6824_v62 = vadd.f32 %v8329_v27, %v6759_v2  ;;  %v8258_v63 = vadd.f32 %v11561_v59, %v11559_v52  ;;  %v8298_v25 = vadd.f32 %v8297_v56, %v8296_v50  ;;  %v6645_v2 = vadd.f32 %v8221_v7, %v11541_v38  ;;  %v11847_v7 = vld [vmem:[#allocation15_spill] sm:$0xff] }
0x11da   : > { %11841 = vst [vmem:[#allocation22_spill] sm:$0xff] %v11619_v41  ;;  %v6637_v13 = vadd.f32 %v8215_v31, %v11537_v44  ;;  %v6762_v24 = vadd.f32 %v8292_v51, %v6697_v35  ;;  %v8301_v38 = vadd.f32 %v11607_v32, %v11603_v22 }
0x11db   : > { %v11624_v1 = vpop.f32.mrf.mxu1  ;;  %v11626_v0 = vpop.f32.mrf.mxu0  ;;  %v6705_v45 = vadd.f32 %v8258_v63, %v6640_v12  ;;  %v11846_v12 = vld [vmem:[#allocation13_spill] sm:$0xff] }
0x11dc   : > { %v6702_v15 = vadd.f32 %v8255_v3, %v6637_v13  ;;  %v6827_v14 = vadd.f32 %v8332_v49, %v6762_v24 }
0x11dd   : > { %v11628_v9 = vpop.f32.mrf.mxu1  ;;  %v11631_v60 = vpop.f32.mrf.mxu0  ;;  %v6770_v50 = vadd.f32 %v8298_v25, %v6705_v45  ;;  %v11850_v25 = vld [vmem:[#allocation2_spill] sm:$0xff] }
0x11de   : > { %11842 = vst [vmem:[#allocation23_spill] sm:$0xff] %v11631_v60  ;;  %v8295_v60 = vadd.f32 %v8294_v30, %v8293_v28 }
0x11df   : > { %v11633_v41 = vpop.f32.mrf.mxu1  ;;  %v11637_v34 = vpop.f32.mrf.mxu0 }
0x11e0   : > { %v6767_v28 = vadd.f32 %v8295_v60, %v6702_v15  ;;  %v8261_v60 = vadd.f32 %v11569_v57, %v11565_v23  ;;  %v8338_v23 = vadd.f32 %v11601_v53, %v11599_v4  ;;  %v11848_v15 = vld [vmem:[#allocation17_spill] sm:$0xff] }
0x11e1   : > { %v8367_v26 = vpop.f32.mrf.mxu1  ;;  %v8407_v18 = vpop.f32.mrf.mxu0 }
0x11e2   : > { %v6832_v19 = vadd.f32 %v8335_v8, %v6767_v28  ;;  %v6710_v43 = vadd.f32 %v8261_v60, %v6645_v2  ;;  %v6835_v36 = vadd.f32 %v8338_v23, %v6770_v50  ;;  %v11852_v28 = vld [vmem:[#allocation12_spill] sm:$0xff]  ;;  %v11855_v50 = vld [vmem:[#allocation19_spill] sm:$0xff] }
0x11e3   : > { %v8368_v33 = vpop.f32.mrf.mxu1  ;;  %v8408_v48 = vpop.f32.mrf.mxu0  ;;  %v11859_v23 = vld [vmem:[#allocation16_spill] sm:$0xff] }
0x11e4   : > { %v8369_v11 = vadd.f32 %v8368_v33, %v8367_v26  ;;  %v8409_v31 = vadd.f32 %v8408_v48, %v8407_v18  ;;  %v11843_v18 = vld [vmem:[#allocation10_spill] sm:$0xff]  ;;  %v11844_v33 = vld [vmem:[#allocation20_spill] sm:$0xff] }
0x11e5   : > { %v8370_v46 = vpop.f32.mrf.mxu1  ;;  %v8410_v17 = vpop.f32.mrf.mxu0  ;;  %v8264_v3 = vadd.f32 %v11843_v18, %v11573_v21  ;;  %v11849_v21 = vld [vmem:[#allocation18_spill] sm:$0xff] }
0x11e6   : > { %v6889_v44 = vadd.f32 %v8369_v11, %v6824_v62  ;;  %v6775_v62 = vadd.f32 %v8301_v38, %v6710_v43  ;;  %v11845_v11 = vld [vmem:[#allocation8_spill] sm:$0xff]  ;;  %v8341_v49 = vadd.f32 %v11849_v21, %v11848_v15  ;;  %v11857_v43 = vld [vmem:[#allocation3_spill] sm:$0xff] }
0x11e7   : > { %v8371_v10 = vpop.f32.mrf.mxu1  ;;  %v8411_v40 = vpop.f32.mrf.mxu0 }
0x11e8   : > { %v6954_v30 = vadd.f32 %v8409_v31, %v6889_v44  ;;  %v8372_v5 = vadd.f32 %v8371_v10, %v8370_v46  ;;  %v8412_v51 = vadd.f32 %v8411_v40, %v8410_v17  ;;  %v8230_v46 = vadd.f32 %v11847_v7, %v11846_v12  ;;  %v11853_v40 = vld [vmem:[#allocation22_spill] sm:$0xff] }
0x11e9   : > { %v8373_v42 = vpop.f32.mrf.mxu1  ;;  %v8413_v52 = vpop.f32.mrf.mxu0  ;;  %v8307_v45 = vadd.f32 %v11624_v1, %v11853_v40  ;;  %v6840_v37 = vadd.f32 %v8341_v49, %v6775_v62 }
0x11ea   : > { %v6892_v55 = vadd.f32 %v8372_v5, %v6827_v14  ;;  %v11654_v59 = vadd.f32 %v6954_v30, %v10523_v16  ;;  %v8227_v16 = vadd.f32 %v11583_v54, %v11579_v39  ;;  %v8304_v39 = vadd.f32 %v11844_v33, %v11611_v6  ;;  %v11851_v14 = vld [vmem:[#allocation11_spill] sm:$0xff] }
0x11eb   : > { %v8374_v56 = vpop.f32.mrf.mxu1  ;;  %v8414_v26 = vpop.f32.mrf.mxu0  ;;  %v8267_v30 = vadd.f32 %v11852_v28, %v11851_v14 }
0x11ec   : > { %v6957_v61 = vadd.f32 %v8412_v51, %v6892_v55  ;;  %v8375_v29 = vadd.f32 %v8374_v56, %v8373_v42  ;;  %6994 = vadd.xlane.f32.xlu0 %v11654_v59  ;;  %v8415_v13 = vadd.f32 %v8414_v26, %v8413_v52  ;;  %v7018_v22 = vmul.f32 %v11654_v59, %v11654_v59  ;;  %v11854_v52 = vld [vmem:[#allocation9_spill] sm:$0xff] }
0x11ed   : > { %v8376_v57 = vpop.f32.mrf.mxu1  ;;  %v8416_v27 = vpop.f32.mrf.mxu0  ;;  %v6653_v48 = vadd.f32 %v8227_v16, %v11845_v11  ;;  %v6656_v60 = vadd.f32 %v8230_v46, %v11854_v52  ;;  %v11856_v56 = vld [vmem:[#allocation21_spill] sm:$0xff]  ;;  %v11858_v16 = vld [vmem:[#allocation14_spill] sm:$0xff] }
0x11ee   : > { %v6897_v35 = vadd.f32 %v8375_v29, %v6832_v19  ;;  %v11667_v32 = vadd.f32 %v6957_v61, %v10532_v47  ;;  %v6713_v47 = vadd.f32 %v8264_v3, %v6648_v58  ;;  %v8344_v19 = vadd.f32 %v11856_v56, %v11855_v50 }
0x11ef   : > { %v8377_v54 = vpop.f32.mrf.mxu1  ;;  %v8417_v24 = vpop.f32.mrf.mxu0  ;;  %v6718_v51 = vadd.f32 %v8267_v30, %v6653_v48 }
0x11f0   : > { %v6962_v4 = vadd.f32 %v8415_v13, %v6897_v35  ;;  %v8378_v53 = vadd.f32 %v8377_v54, %v8376_v57  ;;  %6996 = vadd.xlane.f32.xlu1 %v11667_v32  ;;  %7026 = vadd.xlane.f32.xlu0 %v7018_v22  ;;  %v8418_v6 = vadd.f32 %v8417_v24, %v8416_v27 }
0x11f1   : > { %v8379_v44 = vpop.f32.mrf.mxu1  ;;  %v8419_v17 = vpop.f32.mrf.mxu0  ;;  %v7019_v63 = vmul.f32 %v11667_v32, %v11667_v32  ;;  %v6778_v5 = vadd.f32 %v8304_v39, %v6713_v47  ;;  %v8270_v57 = vadd.f32 %v11859_v23, %v11858_v16  ;;  %v6783_v13 = vadd.f32 %v8307_v45, %v6718_v51  ;;  %v11860_v47 = vld [vmem:[#allocation4_spill] sm:$0xff]  ;;  %v11863_v45 = vld [vmem:[#allocation6_spill] sm:$0xff] }
0x11f2   : > { %v6900_v31 = vadd.f32 %v8378_v53, %v6835_v36  ;;  %v11684_v10 = vadd.f32 %v6962_v4, %v11850_v25  ;;  %v8310_v22 = vadd.f32 %v11633_v41, %v11628_v9  ;;  %v8347_v39 = vadd.f32 %v11626_v0, %v11622_v20  ;;  %v11861_v0 = vld [vmem:[#allocation23_spill] sm:$0xff] }
0x11f3   : > { %v8380_v2 = vpop.f32.mrf.mxu1  ;;  %v8420_v55 = vpop.f32.mrf.mxu0  ;;  %v6843_v35 = vadd.f32 %v8344_v19, %v6778_v5  ;;  %v6721_v33 = vadd.f32 %v8270_v57, %v6656_v60  ;;  %v8350_v20 = vadd.f32 %v11637_v34, %v11861_v0 }
0x11f4   : > { %v6965_v42 = vadd.f32 %v8418_v6, %v6900_v31  ;;  %v8381_v8 = vadd.f32 %v8380_v2, %v8379_v44  ;;  %7028 = vadd.xlane.f32.xlu1 %v7019_v63  ;;  %6998 = vadd.xlane.f32.xlu0 %v11684_v10  ;;  %v8421_v29 = vadd.f32 %v8420_v55, %v8419_v17  ;;  %v11862_v31 = vld [vmem:[#allocation5_spill] sm:$0xff] }
0x11f5   : > { %v8382_v38 = vpop.f32.mrf.mxu1  ;;  %v8422_v26 = vpop.f32.mrf.mxu0  ;;  %v7020_v58 = vmul.f32 %v11684_v10, %v11684_v10  ;;  %v6848_v41 = vadd.f32 %v8347_v39, %v6783_v13  ;;  %v6786_v48 = vadd.f32 %v8310_v22, %v6721_v33 }
0x11f6   : > { %v6905_v61 = vadd.f32 %v8381_v8, %v6840_v37  ;;  %v11695_v1 = vadd.f32 %v6965_v42, %v11857_v43  ;;  %v11864_v42 = vld [vmem:[#allocation7_spill] sm:$0xff] }
0x11f7   : > { %v8383_v27 = vpop.f32.mrf.mxu1  ;;  %v8423_v36 = vpop.f32.mrf.mxu0  ;;  %v6851_v25 = vadd.f32 %v8350_v20, %v6786_v48 }
0x11f8   : > { %v6970_v18 = vadd.f32 %v8421_v29, %v6905_v61  ;;  %v8384_v3 = vadd.f32 %v8383_v27, %v8382_v38  ;;  %7000 = vadd.xlane.f32.xlu1 %v11695_v1  ;;  %7030 = vadd.xlane.f32.xlu0 %v7020_v58  ;;  %v8424_v4 = vadd.f32 %v8423_v36, %v8422_v26 }
0x11f9   : > { %v8385_v54 = vpop.f32.mrf.mxu1  ;;  %v8425_v53 = vpop.f32.mrf.mxu0  ;;  %v7021_v24 = vmul.f32 %v11695_v1, %v11695_v1 }
0x11fa   : > { %v6908_v62 = vadd.f32 %v8384_v3, %v6843_v35  ;;  %v11709_v11 = vadd.f32 %v6970_v18, %v11860_v47 }
0x11fb   : > { %v8386_v9 = vpop.f32.mrf.mxu1  ;;  %v8426_v46 = vpop.f32.mrf.mxu0 }
0x11fc   : > { %v6973_v12 = vadd.f32 %v8424_v4, %v6908_v62  ;;  %v8387_v7 = vadd.f32 %v8386_v9, %v8385_v54  ;;  %7032 = vadd.xlane.f32.xlu1 %v7021_v24  ;;  %7002 = vadd.xlane.f32.xlu0 %v11709_v11  ;;  %v8427_v49 = vadd.f32 %v8426_v46, %v8425_v53 }
0x11fd   : > { %v8388_v15 = vpop.f32.mrf.mxu1  ;;  %v8428_v44 = vpop.f32.mrf.mxu0  ;;  %v7022_v17 = vmul.f32 %v11709_v11, %v11709_v11 }
0x11fe   : > { %v6913_v21 = vadd.f32 %v8387_v7, %v6848_v41  ;;  %v11715_v6 = vadd.f32 %v6973_v12, %v11862_v31 }
0x11ff   : > { %v8389_v63 = vpop.f32.mrf.mxu1  ;;  %v8429_v30 = vpop.f32.mrf.mxu0 }
0x1200   : > { %v6978_v14 = vadd.f32 %v8427_v49, %v6913_v21  ;;  %v8390_v28 = vadd.f32 %v8389_v63, %v8388_v15  ;;  %7004 = vadd.xlane.f32.xlu1 %v11715_v6  ;;  %7034 = vadd.xlane.f32.xlu0 %v7022_v17  ;;  %v8430_v34 = vadd.f32 %v8429_v30, %v8428_v44  ;;  %v11748_v21 = vld [vmem:[%s11812_s11] ss:$0 sm:$0xff] }
0x1201   : > { %v7023_v40 = vmul.f32 %v11715_v6, %v11715_v6 }
0x1202   : > { %v6916_v5 = vadd.f32 %v8390_v28, %v6851_v25  ;;  %v11723_v2 = vadd.f32 %v6978_v14, %v11863_v45 }
0x1204   : > { %v6981_v37 = vadd.f32 %v8430_v34, %v6916_v5  ;;  %7036 = vadd.xlane.f32.xlu1 %v7023_v40  ;;  %7006 = vadd.xlane.f32.xlu0 %v11723_v2  ;;  %v7024_v55 = vmul.f32 %v11723_v2, %v11723_v2 }
0x1206   : > { %v11727_v8 = vadd.f32 %v6981_v37, %v11864_v42 }
0x1208   : > { %7008 = vadd.xlane.f32.xlu1 %v11727_v8  ;;  %7038 = vadd.xlane.f32.xlu0 %v7024_v55  ;;  %v7025_v51 = vmul.f32 %v11727_v8, %v11727_v8 }
0x120c   : > { %7040 = vadd.xlane.f32.xlu1 %v7025_v51 }
0x1275   : > { %v6995_v52 = vpop.xlane.xlu0 %6994 }
0x1276   : > { %v7010_v60 = vmul.f32 0.03125, %v6995_v52 }
0x1278   : > { %v7050_v19 = vmul.f32 %v7010_v60, %v7010_v60  ;;  %v7066_v0 = vsub.f32 %v11654_v59, %v7010_v60  ;;  %v11755_v59 = vld [vmem:[%s11813_s12] ss:$0 sm:$0xff] }
0x1279   : > { %v6997_v50 = vpop.xlane.xlu1 %6996  ;;  %v7027_v56 = vpop.xlane.xlu0 %7026 }
0x127a   : > { %v7011_v38 = vmul.f32 0.03125, %v6997_v50  ;;  %v7042_v61 = vmul.f32 0.03125, %v7027_v56 }
0x127c   : > { %v7058_v29 = vsub.f32 %v7042_v61, %v7050_v19  ;;  %v7051_v58 = vmul.f32 %v7011_v38, %v7011_v38  ;;  %v7067_v28 = vsub.f32 %v11667_v32, %v7011_v38 }
0x127d   : > { %v7029_v26 = vpop.xlane.xlu1 %7028  ;;  %v6999_v43 = vpop.xlane.xlu0 %6998 }
0x127e   : > { %v7074_v16 = vadd.f32 1e-05, %v7058_v29  ;;  %v7043_v23 = vmul.f32 0.03125, %v7029_v26  ;;  %v7012_v57 = vmul.f32 0.03125, %v6999_v43 }
0x1280   : > { %9352 = vrsqrt.f32 %v7074_v16  ;;  %v7059_v35 = vsub.f32 %v7043_v23, %v7051_v58  ;;  %v7052_v18 = vmul.f32 %v7012_v57, %v7012_v57  ;;  %v7068_v50 = vsub.f32 %v11684_v10, %v7012_v57 }
0x1281   : > { %v7001_v13 = vpop.xlane.xlu1 %7000  ;;  %v7031_v27 = vpop.xlane.xlu0 %7030 }
0x1282   : > { %v7075_v22 = vadd.f32 1e-05, %v7059_v35  ;;  %v11734_v3 = vmul.f32 0.03125, %v7001_v13  ;;  %v7044_v36 = vmul.f32 0.03125, %v7031_v27 }
0x1284   : > { %9354 = vrsqrt.f32 %v7075_v22  ;;  %v7060_v33 = vsub.f32 %v7044_v36, %v7052_v18  ;;  %v7053_v62 = vmul.f32 %v11734_v3, %v11734_v3  ;;  %v7069_v16 = vsub.f32 %v11695_v1, %v11734_v3 }
0x1285   : > { %v7033_v39 = vpop.xlane.xlu1 %7032  ;;  %v7003_v54 = vpop.xlane.xlu0 %7002 }
0x1286   : > { %v7076_v4 = vadd.f32 1e-05, %v7060_v33  ;;  %v7045_v53 = vmul.f32 0.03125, %v7033_v39  ;;  %v11738_v24 = vmul.f32 0.03125, %v7003_v54 }
0x1288   : > { %9356 = vrsqrt.f32 %v7076_v4  ;;  %v7061_v47 = vsub.f32 %v7045_v53, %v7053_v62  ;;  %v7054_v12 = vmul.f32 %v11738_v24, %v11738_v24  ;;  %v7070_v18 = vsub.f32 %v11709_v11, %v11738_v24 }
0x1289   : > { %v7005_v41 = vpop.xlane.xlu1 %7004  ;;  %v7035_v9 = vpop.xlane.xlu0 %7034 }
0x128a   : > { %v7077_v48 = vadd.f32 1e-05, %v7061_v47  ;;  %v11742_v7 = vmul.f32 0.03125, %v7005_v41  ;;  %v7046_v46 = vmul.f32 0.03125, %v7035_v9 }
0x128c   : > { %9358 = vrsqrt.f32 %v7077_v48  ;;  %v7062_v20 = vsub.f32 %v7046_v46, %v7054_v12  ;;  %v7055_v17 = vmul.f32 %v11742_v7, %v11742_v7  ;;  %v7071_v33 = vsub.f32 %v11715_v6, %v11742_v7 }
0x128d   : > { %v9353_v15 = vpop.eup %9352  ;;  %v7037_v49 = vpop.xlane.xlu1 %7036 }
0x128e   : > { %v7007_v44 = vpop.xlane.xlu0 %7006  ;;  %v7090_v31 = vmul.f32 %v9353_v15, %v7066_v0  ;;  %v7078_v63 = vadd.f32 1e-05, %v7062_v20  ;;  %v7047_v25 = vmul.f32 0.03125, %v7037_v49 }
0x128f   : > { %v7016_v14 = vmul.f32 0.03125, %v7007_v44 }
0x1290   : > { %v7104_v30 = vmul.f32 %v11748_v21, %v7090_v31  ;;  %9360 = vrsqrt.f32 %v7078_v63  ;;  %v7063_v5 = vsub.f32 %v7047_v25, %v7055_v17 }
0x1291   : > { %v9355_v34 = vpop.eup %9354  ;;  %v7009_v40 = vpop.xlane.xlu1 %7008  ;;  %v7056_v51 = vmul.f32 %v7016_v14, %v7016_v14  ;;  %v7072_v53 = vsub.f32 %v11723_v2, %v7016_v14 }
0x1292   : > { %v7039_v45 = vpop.xlane.xlu0 %7038  ;;  %v7118_v37 = vadd.f32 %v11755_v59, %v7104_v30  ;;  %v7091_v42 = vmul.f32 %v9355_v34, %v7067_v28  ;;  %v7079_v55 = vadd.f32 1e-05, %v7063_v5  ;;  %v7017_v32 = vmul.f32 0.03125, %v7009_v40 }
0x1293   : > { %v7048_v52 = vmul.f32 0.03125, %v7039_v45 }
0x1294   : > { %7126 = vst [vmem:[%s11764_s21] sm:$0xff] %v7118_v37  ;;  %v7105_v60 = vmul.f32 %v11748_v21, %v7091_v42  ;;  %9362 = vrsqrt.f32 %v7079_v55  ;;  %v7057_v26 = vmul.f32 %v7017_v32, %v7017_v32  ;;  %v7073_v6 = vsub.f32 %v11727_v8, %v7017_v32 }
0x1295   : > { %v9357_v56 = vpop.eup %9356  ;;  %v7064_v19 = vsub.f32 %v7048_v52, %v7056_v51  ;;  %v7041_v38 = vpop.xlane.xlu1 %7040 }
0x1296   : > { %v7119_v61 = vadd.f32 %v11755_v59, %v7105_v60  ;;  %v7092_v29 = vmul.f32 %v9357_v56, %v7068_v50  ;;  %v7049_v43 = vmul.f32 0.03125, %v7041_v38 }
0x1297   : > { %v7080_v58 = vadd.f32 1e-05, %v7064_v19 }
0x1298   : > { %7127 = vst [vmem:[%s11764_s21 + $0x8] sm:$0xff] %v7119_v61  ;;  %v7106_v23 = vmul.f32 %v11748_v21, %v7092_v29  ;;  %v7065_v35 = vsub.f32 %v7049_v43, %v7057_v26 }
0x1299   : > { %v9359_v10 = vpop.eup %9358  ;;  %9364 = vrsqrt.f32 %v7080_v58 }
0x129a   : > { %v7120_v57 = vadd.f32 %v11755_v59, %v7106_v23  ;;  %v7093_v13 = vmul.f32 %v9359_v10, %v7069_v16  ;;  %v7081_v27 = vadd.f32 1e-05, %v7065_v35 }
0x129c   : > { %7128 = vst [vmem:[%s11764_s21 + $0x10] sm:$0xff] %v7120_v57  ;;  %v7107_v22 = vmul.f32 %v11748_v21, %v7093_v13  ;;  %9366 = vrsqrt.f32 %v7081_v27 }
0x129d   : > { %v9361_v36 = vpop.eup %9360 }
0x129e   : > { %v7121_v1 = vadd.f32 %v11755_v59, %v7107_v22  ;;  %v7094_v3 = vmul.f32 %v9361_v36, %v7070_v18 }
0x12a0   : > { %7129 = vst [vmem:[%s11764_s21 + $0x18] sm:$0xff] %v7121_v1  ;;  %v7108_v39 = vmul.f32 %v11748_v21, %v7094_v3 }
0x12a1   : > { %v9363_v54 = vpop.eup %9362 }
0x12a2   : > { %v7122_v62 = vadd.f32 %v11755_v59, %v7108_v39  ;;  %v7095_v4 = vmul.f32 %v9363_v54, %v7071_v33 }
0x12a4   : > { %7130 = vst [vmem:[%s11764_s21 + $0x20] sm:$0xff] %v7122_v62  ;;  %v7109_v11 = vmul.f32 %v11748_v21, %v7095_v4 }
0x12a6   : > { %v9365_v24 = vpop.eup %9364  ;;  %v7123_v47 = vadd.f32 %v11755_v59, %v7109_v11 }
0x12a7   : > { %v7096_v41 = vmul.f32 %v9365_v24, %v7072_v53 }
0x12a8   : > { %7131 = vst [vmem:[%s11764_s21 + $0x28] sm:$0xff] %v7123_v47 }
0x12a9   : > { %v9367_v9 = vpop.eup %9366  ;;  %v7110_v48 = vmul.f32 %v11748_v21, %v7096_v41 }
0x12aa   : > { %v7097_v12 = vmul.f32 %v9367_v9, %v7073_v6 }
0x12ab   : > { %v7124_v7 = vadd.f32 %v11755_v59, %v7110_v48 }
0x12ac   : > { %v7111_v46 = vmul.f32 %v11748_v21, %v7097_v12 }
0x12ad   : > { %7132 = vst [vmem:[%s11764_s21 + $0x30] sm:$0xff] %v7124_v7 }
0x12ae   : > { %v7125_v0 = vadd.f32 %v11755_v59, %v7111_v46 }
0x12b0   : > { %7133 = vst [vmem:[%s11764_s21 + $0x38] sm:$0xff] %v7125_v0 }
0x12b1 PF: > { %s23_s25 = sadd.s32 1, %s9382_s25  }
0x12b2   : > { %p20_p4 = scmp.ge.s32.totalorder %s23_s25, 4  }
0x12b4   :  { %22 = sbr.rel (!%p20_p4) target bundleno = 1 (0x1), region = 127 }

</bundles_post_ra>
